<compile_context>
chip_gen: v7x
topology: tpu7x:2x2x1
jax: 0.10.0
libtpu: 0.0.40
codegen_flags: <defaults>
</compile_context>

<pallas_src>
import functools

import numpy as np

import jax
import jax.numpy as jnp
from jax import lax
from jax.experimental import pallas as pl
from jax.experimental.pallas import tpu as pltpu


def _round_up(x, m):
    return (x + m - 1) // m * m


def _lstm_kernel(zx_ref, len_ref, wh_ref, h0_ref, c0_ref, hc_ref, h_scr, c_scr,
                 *, t_blk, d_hidden_p, n_sub, unroll, precision):
    """One grid step = one (batch-block, time-block) tile.

    zx_ref : (T_BLK, B_BLK, 4*H)   precomputed x@W_x + b, gate order [f|i|o|c_hat]
    len_ref: (B_BLK, 1) int32      per-row sequence length (padding mask)
    wh_ref : (H, 4*H)              recurrent weight (resident, constant index map)
    h0/c0  : (B_BLK, H)            initial recurrent state
    hc_ref : (T_BLK, B_BLK, 2*H)   packed [h | c] output (stream dtype)
    h_scr, c_scr : (B_BLK, H) f32  recurrent state carried across time blocks
    """
    H = d_hidden_p
    b_blk = h_scr.shape[0]
    sub = b_blk // n_sub
    t_outer = pl.program_id(1)

    # Start of the sequence for this batch block: load the initial state.
    @pl.when(t_outer == 0)
    def _():
        h_scr[...] = h0_ref[...]
        c_scr[...] = c0_ref[...]

    lens = len_ref[...]          # (B_BLK, 1) int32, resident across the loop
    wh = wh_ref[...]             # resident recurrent weight

    def step(tt, carry):
        t_idx = t_outer * t_blk + tt
        # Padding mask rebuilt in-kernel from sequence lengths (no HBM stream).
        m_full = (lens > t_idx).astype(jnp.float32)      # (B_BLK, 1)
        new_carry = []
        # n_sub independent batch sub-tiles -> independent MXU / VPU / EUP
        # chains in the same loop body; the scheduler interleaves them, hiding
        # the matmul -> gates -> matmul latency of a single recurrent chain.
        for s in range(n_sub):
            rows = slice(s * sub, (s + 1) * sub)
            h_prev, c_prev = carry[s]
            # Recurrent projection only; input projection + bias precomputed.
            z = zx_ref[tt, rows, :].astype(jnp.float32) + jnp.dot(
                h_prev.astype(wh.dtype), wh,
                preferred_element_type=jnp.float32, precision=precision)
            f = jax.nn.sigmoid(z[:, 0 * H:1 * H])
            i = jax.nn.sigmoid(z[:, 1 * H:2 * H])
            o = jax.nn.sigmoid(z[:, 2 * H:3 * H])
            c_hat = jnp.tanh(z[:, 3 * H:4 * H])
            new_c = f * c_prev + i * c_hat
            new_h = o * jnp.tanh(new_c)
            m_t = m_full[rows]
            new_h = new_h * m_t
            new_c = new_c * m_t
            # Two lane-aligned sub-stores (H is a multiple of 128): no concat
            # temporary, both halves of the packed [h | c] slab stored unmasked.
            hc_ref[tt, rows, 0:H] = new_h.astype(hc_ref.dtype)
            hc_ref[tt, rows, H:2 * H] = new_c.astype(hc_ref.dtype)
            new_carry.append((new_h, new_c))
        return tuple(new_carry)

    init = tuple((h_scr[s * sub:(s + 1) * sub, :],
                  c_scr[s * sub:(s + 1) * sub, :]) for s in range(n_sub))
    final = lax.fori_loop(0, t_blk, step, init, unroll=unroll)
    for s in range(n_sub):
        h_scr[s * sub:(s + 1) * sub, :] = final[s][0]
        c_scr[s * sub:(s + 1) * sub, :] = final[s][1]


def lstm_rnn_forward(x, W, b, mask=None, init_hidden=None, *,
                     t_blk=8, b_blk=None, num_cores=1, interleave=2,
                     matmul_dtype=jnp.float32, stream_dtype=jnp.bfloat16,
                     wh_single_buffer=False):
    """Forward pass matching LSTMRNN.forward.

    x    : [bsz, L, d_embed]
    W    : [d_embed + d_hidden, 4*d_hidden]  fused [Wf|Wi|Wo|U] weight
           (input rows first, then recurrent rows)
    b    : [4*d_hidden] (or [1, 4*d_hidden])  fused bias
    mask : [bsz, L] padding mask, 1s for tokens then 0s for padding (optional)
    init_hidden : optional (h0, c0), each [bsz, d_hidden]

    matmul_dtype : dtype of the MXU matmuls (pass jnp.bfloat16 on v6e/v7x
                   hardware for the native MXU path; f32 accumulation either way).
    stream_dtype : storage dtype of the zx / packed [h|c] HBM streams (bf16
                   default halves HBM traffic + VMEM; state math stays f32).
    num_cores    : guarantee >= num_cores batch blocks ("parallel" axis) so a
                   megacore chip (v7x) can shard the batch across TensorCores.
    Returns (h, c), each [bsz, L, d_hidden] float32.
    """
    bsz, L, d_embed = x.shape
    d_in, four_h = W.shape
    d_hidden = four_h // 4
    assert d_in == d_embed + d_hidden

    f32 = jnp.float32
    matmul_is_f32 = (np.dtype(matmul_dtype) == np.dtype(jnp.float32))

    if mask is None:
        mask = jnp.ones((bsz, L), dtype=f32)
    mask = mask.astype(f32)
    # The module defines `mask` as a padding mask (1s then trailing 0s), so it
    # is fully described by per-row lengths; this removes the (t, b) mask
    # stream (and its 128x lane-padded VMEM buffers) from the kernel.
    lengths = jnp.sum(mask, axis=1).astype(jnp.int32)           # (bsz,)

    b = jnp.reshape(b, (four_h,)).astype(f32)

    if init_hidden is None:
        h0 = jnp.zeros((bsz, d_hidden), f32)
        c0 = jnp.zeros((bsz, d_hidden), f32)
    else:
        h0, c0 = init_hidden
        h0 = h0.astype(f32)
        c0 = c0.astype(f32)

    # ---- lane/sublane-aligned padded sizes --------------------------------
    H_p = _round_up(d_hidden, 128)          # hidden -> multiple of 128 lanes
    B_p = _round_up(bsz, 8)                 # batch  -> multiple of 8 sublanes
    t_blk = max(1, min(t_blk, L))
    L_p = _round_up(L, t_blk)
    if b_blk is None:
        # Ensure at least `num_cores` batch blocks for megacore sharding.
        b_blk = _round_up(-(-B_p // max(1, int(num_cores))), 8)
        b_blk = min(b_blk, 128)
    b_blk = max(8, _round_up(min(int(b_blk), B_p), 8))
    B_p = _round_up(B_p, b_blk)

    # Independent batch sub-tiles interleaved inside the kernel (keep 8-aligned).
    n_sub = max(1, int(interleave))
    while n_sub > 1 and (b_blk % (8 * n_sub) != 0):
        n_sub -= 1

    # ---- split fused weight into input / recurrent parts, pad per gate ----
    def _pad_gate_cols(w2d, n_rows_p):
        rows = w2d.shape[0]
        out = jnp.zeros((n_rows_p, 4 * H_p), f32)
        for g in range(4):
            out = out.at[:rows, g * H_p:g * H_p + d_hidden].set(
                w2d[:, g * d_hidden:(g + 1) * d_hidden].astype(f32))
        return out

    W_x = _pad_gate_cols(W[:d_embed], d_embed)     # (d_embed, 4*H_p)
    W_h = _pad_gate_cols(W[d_embed:], H_p)         # (H_p,    4*H_p)
    b_p = jnp.zeros((4 * H_p,), f32)
    for g in range(4):
        b_p = b_p.at[g * H_p:g * H_p + d_hidden].set(
            b[g * d_hidden:(g + 1) * d_hidden])

    # ---- pad batch/time; hoist the input projection into ONE big matmul ---
    x_p = jnp.zeros((B_p, L_p, d_embed), f32).at[:bsz, :L].set(x.astype(f32))
    h0_p = jnp.zeros((B_p, H_p), f32).at[:bsz, :d_hidden].set(h0)
    c0_p = jnp.zeros((B_p, H_p), f32).at[:bsz, :d_hidden].set(c0)
    len_p = jnp.zeros((B_p, 1), jnp.int32).at[:bsz, 0].set(lengths)

    # Precision follows matmul_dtype: HIGHEST (multi-pass) only for strict f32.
    mm_precision = (lax.Precision.HIGHEST if matmul_is_f32
                    else lax.Precision.DEFAULT)

    # z_x[t, b, :] = x[b, t] @ W_x + bias   (time-major for the kernel)
    zx = jnp.einsum("bld,dg->lbg",
                    x_p.astype(matmul_dtype), W_x.astype(matmul_dtype),
                    preferred_element_type=f32, precision=mm_precision) + b_p
    zx = zx.astype(stream_dtype)                     # (L_p, B_p, 4*H_p) stream
    W_h = W_h.astype(matmul_dtype)

    n_b = B_p // b_blk
    n_t = L_p // t_blk
    unroll = int(min(t_blk, max(1, 8 // n_sub)))     # partial unroll for big t_blk

    # ---- explicit VMEM budget (default scoped VMEM is only 16-32 MiB) -----
    def _nbytes(*shape, dtype):
        n = 1
        for s in shape:
            n *= s
        return n * np.dtype(dtype).itemsize

    zx_blk = _nbytes(t_blk, b_blk, 4 * H_p, dtype=stream_dtype)
    hc_blk = _nbytes(t_blk, b_blk, 2 * H_p, dtype=stream_dtype)
    wh_buf = _nbytes(H_p, 4 * H_p, dtype=matmul_dtype)
    st_buf = _nbytes(b_blk, H_p, dtype=f32)
    len_buf = _nbytes(b_blk, 128, dtype=jnp.int32)        # lane-padded
    tmp_buf = 4 * _nbytes(b_blk, 4 * H_p, dtype=f32)      # in-kernel z/gate temps
    vmem_bytes = (2 * zx_blk + 2 * hc_blk
                  + (1 if wh_single_buffer else 2) * wh_buf
                  + 2 * 2 * st_buf + 2 * len_buf          # h0/c0 + lengths buffers
                  + 2 * st_buf                            # h/c state scratch
                  + tmp_buf)
    vmem_limit = int(min(max(int(vmem_bytes * 1.25) + (4 << 20), 16 << 20),
                         100 << 20))

    # W_h never changes (constant index map); optionally single-buffer it.
    wh_kwargs = {}
    if wh_single_buffer:
        wh_kwargs["pipeline_mode"] = pl.Buffered(1)
    wh_spec = pl.BlockSpec((H_p, 4 * H_p), lambda bb, tt: (0, 0), **wh_kwargs)

    kernel = functools.partial(_lstm_kernel, t_blk=t_blk, d_hidden_p=H_p,
                               n_sub=n_sub, unroll=unroll,
                               precision=mm_precision)

    hc_tm = pl.pallas_call(
        kernel,
        out_shape=jax.ShapeDtypeStruct((L_p, B_p, 2 * H_p), stream_dtype),
        grid_spec=pltpu.PrefetchScalarGridSpec(
            num_scalar_prefetch=0,
            grid=(n_b, n_t),
            in_specs=[
                # precomputed input projection, blocked over (time, batch)
                pl.BlockSpec((t_blk, b_blk, 4 * H_p), lambda bb, tt: (tt, bb, 0)),
                # per-row sequence lengths (tiny, resident per batch block)
                pl.BlockSpec((b_blk, 1), lambda bb, tt: (bb, 0)),
                # recurrent weight: constant index map -> DMA'd once, resident
                wh_spec,
                # initial state (per batch block, constant over time)
                pl.BlockSpec((b_blk, H_p), lambda bb, tt: (bb, 0)),
                pl.BlockSpec((b_blk, H_p), lambda bb, tt: (bb, 0)),
            ],
            out_specs=pl.BlockSpec((t_blk, b_blk, 2 * H_p),
                                   lambda bb, tt: (tt, bb, 0)),
            scratch_shapes=[
                pltpu.VMEM((b_blk, H_p), jnp.float32),   # recurrent h (f32 state)
                pltpu.VMEM((b_blk, H_p), jnp.float32),   # recurrent c (f32 state)
            ],
        ),
        compiler_params=pltpu.CompilerParams(
            # batch blocks are independent (megacore); time is sequential
            dimension_semantics=("parallel", "arbitrary"),
            vmem_limit_bytes=vmem_limit,
        ),
    )(zx, len_p, W_h, h0_p, c0_p)

    # One transpose of the packed [h|c] slab, then split + unpad (+ f32 cast).
    hc = jnp.transpose(hc_tm[:L, :bsz, :], (1, 0, 2)).astype(f32)
    h = hc[:, :, :d_hidden]
    c = hc[:, :, H_p:H_p + d_hidden]
    return h, c


def _reference_forward(x, W, b, mask, init_hidden=None):
    """Pure-JAX reference replicating the PyTorch loop."""
    bsz, L, _ = x.shape
    d_hidden = W.shape[1] // 4
    b = jnp.reshape(b, (-1,))
    if init_hidden is None:
        h_prev = jnp.zeros((bsz, d_hidden), jnp.float32)
        c_prev = jnp.zeros((bsz, d_hidden), jnp.float32)
    else:
        h_prev, c_prev = init_hidden
    hs, cs = [], []
    for t in range(L):
        xh = jnp.concatenate([x[:, t, :], h_prev], axis=-1)
        z = jnp.dot(xh, W, precision=jax.lax.Precision.HIGHEST) + b
        f = jax.nn.sigmoid(z[:, 0 * d_hidden:1 * d_hidden])
        i = jax.nn.sigmoid(z[:, 1 * d_hidden:2 * d_hidden])
        o = jax.nn.sigmoid(z[:, 2 * d_hidden:3 * d_hidden])
        c_hat = jnp.tanh(z[:, 3 * d_hidden:4 * d_hidden])
        new_c = f * c_prev + i * c_hat
        new_h = o * jnp.tanh(new_c)
        m_t = mask[:, t][:, None]
        new_h = new_h * m_t
        new_c = new_c * m_t
        hs.append(new_h)
        cs.append(new_c)
        h_prev, c_prev = new_h, new_c
    return jnp.stack(hs, axis=1), jnp.stack(cs, axis=1)


if __name__ == "__main__":
    bsz, L, d_embed, d_hidden = 2, 8, 16, 32
    d_in = d_embed + d_hidden

    key = jax.random.PRNGKey(0)
    kx, kw, kb, kh, kc, kx2 = jax.random.split(key, 6)

    # Deterministic nn.Linear-style init, fused gate order [f, i, o, U].
    bound = 1.0 / (d_in ** 0.5)
    W = jax.random.uniform(kw, (d_in, 4 * d_hidden), jnp.float32, -bound, bound)
    b = jax.random.uniform(kb, (4 * d_hidden,), jnp.float32, -bound, bound)

    x = jax.random.normal(kx, (bsz, L, d_embed), jnp.float32)
    lengths = jnp.array([L, L - 3])
    mask = (jnp.arange(L)[None, :] < lengths[:, None]).astype(jnp.float32)

    h_ref, c_ref = _reference_forward(x, W, b, mask)

    # 1) f32 streams + f32 matmuls — tight tolerance.
    h, c = lstm_rnn_forward(x, W, b, mask,
                            matmul_dtype=jnp.float32, stream_dtype=jnp.float32)
    h = jax.block_until_ready(h)
    c = jax.block_until_ready(c)
    assert h.shape == (bsz, L, d_hidden) and c.shape == (bsz, L, d_hidden)
    assert jnp.allclose(h, h_ref, atol=1e-4, rtol=1e-4)
    assert jnp.allclose(c, c_ref, atol=1e-4, rtol=1e-4)

    # 2) default perf config: bf16 zx / [h|c] streams (f32 matmuls & f32 state).
    h16, c16 = lstm_rnn_forward(x, W, b, mask)
    h16 = jax.block_until_ready(h16)
    c16 = jax.block_until_ready(c16)
    assert jnp.allclose(h16, h_ref, atol=3e-2, rtol=3e-2)
    assert jnp.allclose(c16, c_ref, atol=3e-2, rtol=3e-2)

    # 3) explicit init_hidden path (f32).
    h0 = 0.1 * jax.random.normal(kh, (bsz, d_hidden), jnp.float32)
    c0 = 0.1 * jax.random.normal(kc, (bsz, d_hidden), jnp.float32)
    h_i, c_i = lstm_rnn_forward(x, W, b, mask, init_hidden=(h0, c0),
                                matmul_dtype=jnp.float32,
                                stream_dtype=jnp.float32)
    h_i = jax.block_until_ready(h_i)
    c_i = jax.block_until_ready(c_i)
    hr_i, cr_i = _reference_forward(x, W, b, mask, init_hidden=(h0, c0))
    assert jnp.allclose(h_i, hr_i, atol=1e-4, rtol=1e-4)
    assert jnp.allclose(c_i, cr_i, atol=1e-4, rtol=1e-4)

    # 4) larger batch: 2 batch blocks ("parallel" axis / megacore), interleaved
    #    batch sub-tiles, padded batch & time, multiple time blocks (state carry).
    bsz2, L2 = 30, 11
    x2 = jax.random.normal(kx2, (bsz2, L2, d_embed), jnp.float32)
    lengths2 = (jnp.arange(bsz2) % L2) + 1
    mask2 = (jnp.arange(L2)[None, :] < lengths2[:, None]).astype(jnp.float32)
    h_ref2, c_ref2 = _reference_forward(x2, W, b, mask2)
    h2, c2 = lstm_rnn_forward(x2, W, b, mask2, t_blk=4, num_cores=2,
                              matmul_dtype=jnp.float32,
                              stream_dtype=jnp.float32)
    h2 = jax.block_until_ready(h2)
    c2 = jax.block_until_ready(c2)
    assert h2.shape == (bsz2, L2, d_hidden) and c2.shape == (bsz2, L2, d_hidden)
    assert jnp.allclose(h2, h_ref2, atol=1e-4, rtol=1e-4)
    assert jnp.allclose(c2, c_ref2, atol=1e-4, rtol=1e-4)

    print("KERNEL_OK")
</pallas_src>

<mosaic_0001>
module attributes {stable_mosaic.version = 11 : i64} {
  func.func @_lstm_kernel(%arg0: i32, %arg1: i32, %arg2: memref<8x8x512xf32, #tpu.memory_space<vmem>>, %arg3: memref<8x1xi32, #tpu.memory_space<vmem>>, %arg4: memref<128x512xf32, #tpu.memory_space<vmem>>, %arg5: memref<8x128xf32, #tpu.memory_space<vmem>>, %arg6: memref<8x128xf32, #tpu.memory_space<vmem>>, %arg7: memref<8x8x256xf32, #tpu.memory_space<vmem>>, %arg8: memref<8x128xf32, #tpu.memory_space<vmem>>, %arg9: memref<8x128xf32, #tpu.memory_space<vmem>>) attributes {dimension_semantics = [#tpu.dimension_semantics<parallel>, #tpu.dimension_semantics<arbitrary>], iteration_bounds = array<i64: 1, 1>, scalar_prefetch = 0 : i64, scratch_operands = 2 : i64, tpu.core_type = #tpu.core_type<tc>, window_params = [{transform_indices = @transform_0, window_bounds = array<i64: 8, 8, 512>}, {transform_indices = @transform_1, window_bounds = array<i64: 8, 1>}, {pipeline_mode = #tpu.pipeline_mode<synchronous>, transform_indices = @transform_2, window_bounds = array<i64: 128, 512>}, {transform_indices = @transform_3, window_bounds = array<i64: 8, 128>}, {transform_indices = @transform_4, window_bounds = array<i64: 8, 128>}, {transform_indices = @transform_5, window_bounds = array<i64: 8, 8, 256>}]} {
    %c0_i32 = arith.constant 0 : i32
    %0 = arith.cmpi eq, %arg1, %c0_i32 : i32
    %1 = arith.extui %0 : i1 to i32
    %c0_i32_0 = arith.constant 0 : i32
    %2 = arith.cmpi ne, %1, %c0_i32_0 : i32
    scf.if %2 {
      %c0_99 = arith.constant 0 : index
      %c0_100 = arith.constant 0 : index
      %393 = vector.load %arg5[%c0_99, %c0_100] : memref<8x128xf32, #tpu.memory_space<vmem>>, vector<8x128xf32>
      %c0_101 = arith.constant 0 : index
      %c0_102 = arith.constant 0 : index
      %394 = vector.load %arg8[%c0_101, %c0_102] : memref<8x128xf32, #tpu.memory_space<vmem>>, vector<8x128xf32>
      tpu.vector_store %arg8[%c0_101, %c0_102], %393 {strides = array<i32>} : memref<8x128xf32, #tpu.memory_space<vmem>>, vector<8x128xf32>,
      %c0_103 = arith.constant 0 : index
      %c0_104 = arith.constant 0 : index
      %395 = vector.load %arg6[%c0_103, %c0_104] : memref<8x128xf32, #tpu.memory_space<vmem>>, vector<8x128xf32>
      %c0_105 = arith.constant 0 : index
      %c0_106 = arith.constant 0 : index
      %396 = vector.load %arg9[%c0_105, %c0_106] : memref<8x128xf32, #tpu.memory_space<vmem>>, vector<8x128xf32>
      tpu.vector_store %arg9[%c0_105, %c0_106], %395 {strides = array<i32>} : memref<8x128xf32, #tpu.memory_space<vmem>>, vector<8x128xf32>,
    } else {
    }
    %c0 = arith.constant 0 : index
    %c0_1 = arith.constant 0 : index
    %3 = vector.load %arg3[%c0, %c0_1] : memref<8x1xi32, #tpu.memory_space<vmem>>, vector<8x1xi32>
    %c0_2 = arith.constant 0 : index
    %c0_3 = arith.constant 0 : index
    %4 = vector.load %arg4[%c0_2, %c0_3] : memref<128x512xf32, #tpu.memory_space<vmem>>, vector<128x512xf32>
    %c0_4 = arith.constant 0 : index
    %c0_5 = arith.constant 0 : index
    %5 = vector.load %arg8[%c0_4, %c0_5] : memref<8x128xf32, #tpu.memory_space<vmem>>, vector<8x128xf32>
    %c0_6 = arith.constant 0 : index
    %c0_7 = arith.constant 0 : index
    %6 = vector.load %arg9[%c0_6, %c0_7] : memref<8x128xf32, #tpu.memory_space<vmem>>, vector<8x128xf32>
    %c0_i32_8 = arith.constant 0 : i32
    %c8_i32 = arith.constant 8 : i32
    %7 = arith.muli %arg1, %c8_i32 : i32
    %8 = arith.addi %7, %c0_i32_8 : i32
    %9 = vector.broadcast %8 : i32 to vector<8x1xi32>
    %10 = arith.cmpi sgt, %3, %9 : vector<8x1xi32>
    %11 = arith.extui %10 : vector<8x1xi1> to vector<8x1xi32>
    %12 = arith.sitofp %11 : vector<8x1xi32> to vector<8x1xf32>
    %13 = arith.index_cast %c0_i32_8 : i32 to index
    %c0_9 = arith.constant 0 : index
    %c0_10 = arith.constant 0 : index
    %14 = vector.load %arg2[%13, %c0_9, %c0_10] : memref<8x8x512xf32, #tpu.memory_space<vmem>>, vector<1x8x512xf32>
    %15 = vector.shape_cast %14 : vector<1x8x512xf32> to vector<8x512xf32>
    %cst = arith.constant dense<0.000000e+00> : vector<8x512xf32>
    %16 = tpu.matmul %5, %4, %cst {dimension_numbers = #tpu.dot_dimension_numbers<[1], [0], [0], [1], [0, 0, 1, 1], [], []>, precision = #tpu.contract_precision<fp32>} : vector<8x128xf32>, vector<128x512xf32>, vector<8x512xf32> -> vector<8x512xf32>
    %17 = arith.addf %15, %16 : vector<8x512xf32>
    %18 = vector.extract_strided_slice %17 {offsets = [0, 0], sizes = [8, 128], strides = [1, 1]} : vector<8x512xf32> to vector<8x128xf32>
    %19 = arith.negf %18 : vector<8x128xf32>
    %20 = math.exp %19 : vector<8x128xf32>
    %cst_11 = arith.constant 1.000000e+00 : f32
    %21 = vector.broadcast %cst_11 : f32 to vector<8x128xf32>
    %22 = arith.addf %21, %20 : vector<8x128xf32>
    %23 = arith.divf %21, %22 : vector<8x128xf32>
    %24 = vector.extract_strided_slice %17 {offsets = [0, 128], sizes = [8, 128], strides = [1, 1]} : vector<8x512xf32> to vector<8x128xf32>
    %25 = arith.negf %24 : vector<8x128xf32>
    %26 = math.exp %25 : vector<8x128xf32>
    %cst_12 = arith.constant 1.000000e+00 : f32
    %27 = vector.broadcast %cst_12 : f32 to vector<8x128xf32>
    %28 = arith.addf %27, %26 : vector<8x128xf32>
    %29 = arith.divf %27, %28 : vector<8x128xf32>
    %30 = vector.extract_strided_slice %17 {offsets = [0, 256], sizes = [8, 128], strides = [1, 1]} : vector<8x512xf32> to vector<8x128xf32>
    %31 = arith.negf %30 : vector<8x128xf32>
    %32 = math.exp %31 : vector<8x128xf32>
    %cst_13 = arith.constant 1.000000e+00 : f32
    %33 = vector.broadcast %cst_13 : f32 to vector<8x128xf32>
    %34 = arith.addf %33, %32 : vector<8x128xf32>
    %35 = arith.divf %33, %34 : vector<8x128xf32>
    %36 = vector.extract_strided_slice %17 {offsets = [0, 384], sizes = [8, 128], strides = [1, 1]} : vector<8x512xf32> to vector<8x128xf32>
    %37 = math.tanh %36 : vector<8x128xf32>
    %38 = arith.mulf %23, %6 : vector<8x128xf32>
    %39 = arith.mulf %29, %37 : vector<8x128xf32>
    %40 = arith.addf %38, %39 : vector<8x128xf32>
    %41 = math.tanh %40 : vector<8x128xf32>
    %42 = arith.mulf %35, %41 : vector<8x128xf32>
    %43 = vector.broadcast %12 : vector<8x1xf32> to vector<8x128xf32>
    %44 = arith.mulf %42, %43 : vector<8x128xf32>
    %45 = vector.broadcast %12 : vector<8x1xf32> to vector<8x128xf32>
    %46 = arith.mulf %40, %45 : vector<8x128xf32>
    %47 = arith.index_cast %c0_i32_8 : i32 to index
    %c0_14 = arith.constant 0 : index
    %c0_15 = arith.constant 0 : index
    %48 = vector.load %arg7[%47, %c0_14, %c0_15] : memref<8x8x256xf32, #tpu.memory_space<vmem>>, vector<1x8x128xf32>
    %49 = vector.shape_cast %48 : vector<1x8x128xf32> to vector<8x128xf32>
    %50 = vector.shape_cast %44 : vector<8x128xf32> to vector<1x8x128xf32>
    tpu.vector_store %arg7[%47, %c0_14, %c0_15], %50 {strides = array<i32>} : memref<8x8x256xf32, #tpu.memory_space<vmem>>, vector<1x8x128xf32>,
    %51 = arith.index_cast %c0_i32_8 : i32 to index
    %c0_16 = arith.constant 0 : index
    %c128 = arith.constant 128 : index
    %52 = vector.load %arg7[%51, %c0_16, %c128] : memref<8x8x256xf32, #tpu.memory_space<vmem>>, vector<1x8x128xf32>
    %53 = vector.shape_cast %52 : vector<1x8x128xf32> to vector<8x128xf32>
    %54 = vector.shape_cast %46 : vector<8x128xf32> to vector<1x8x128xf32>
    tpu.vector_store %arg7[%51, %c0_16, %c128], %54 {strides = array<i32>} : memref<8x8x256xf32, #tpu.memory_space<vmem>>, vector<1x8x128xf32>,
    %c1_i32 = arith.constant 1 : i32
    %c8_i32_17 = arith.constant 8 : i32
    %55 = arith.muli %arg1, %c8_i32_17 : i32
    %56 = arith.addi %55, %c1_i32 : i32
    %57 = vector.broadcast %56 : i32 to vector<8x1xi32>
    %58 = arith.cmpi sgt, %3, %57 : vector<8x1xi32>
    %59 = arith.extui %58 : vector<8x1xi1> to vector<8x1xi32>
    %60 = arith.sitofp %59 : vector<8x1xi32> to vector<8x1xf32>
    %61 = arith.index_cast %c1_i32 : i32 to index
    %c0_18 = arith.constant 0 : index
    %c0_19 = arith.constant 0 : index
    %62 = vector.load %arg2[%61, %c0_18, %c0_19] : memref<8x8x512xf32, #tpu.memory_space<vmem>>, vector<1x8x512xf32>
    %63 = vector.shape_cast %62 : vector<1x8x512xf32> to vector<8x512xf32>
    %cst_20 = arith.constant dense<0.000000e+00> : vector<8x512xf32>
    %64 = tpu.matmul %44, %4, %cst_20 {dimension_numbers = #tpu.dot_dimension_numbers<[1], [0], [0], [1], [0, 0, 1, 1], [], []>, precision = #tpu.contract_precision<fp32>} : vector<8x128xf32>, vector<128x512xf32>, vector<8x512xf32> -> vector<8x512xf32>
    %65 = arith.addf %63, %64 : vector<8x512xf32>
    %66 = vector.extract_strided_slice %65 {offsets = [0, 0], sizes = [8, 128], strides = [1, 1]} : vector<8x512xf32> to vector<8x128xf32>
    %67 = arith.negf %66 : vector<8x128xf32>
    %68 = math.exp %67 : vector<8x128xf32>
    %cst_21 = arith.constant 1.000000e+00 : f32
    %69 = vector.broadcast %cst_21 : f32 to vector<8x128xf32>
    %70 = arith.addf %69, %68 : vector<8x128xf32>
    %71 = arith.divf %69, %70 : vector<8x128xf32>
    %72 = vector.extract_strided_slice %65 {offsets = [0, 128], sizes = [8, 128], strides = [1, 1]} : vector<8x512xf32> to vector<8x128xf32>
    %73 = arith.negf %72 : vector<8x128xf32>
    %74 = math.exp %73 : vector<8x128xf32>
    %cst_22 = arith.constant 1.000000e+00 : f32
    %75 = vector.broadcast %cst_22 : f32 to vector<8x128xf32>
    %76 = arith.addf %75, %74 : vector<8x128xf32>
    %77 = arith.divf %75, %76 : vector<8x128xf32>
    %78 = vector.extract_strided_slice %65 {offsets = [0, 256], sizes = [8, 128], strides = [1, 1]} : vector<8x512xf32> to vector<8x128xf32>
    %79 = arith.negf %78 : vector<8x128xf32>
    %80 = math.exp %79 : vector<8x128xf32>
    %cst_23 = arith.constant 1.000000e+00 : f32
    %81 = vector.broadcast %cst_23 : f32 to vector<8x128xf32>
    %82 = arith.addf %81, %80 : vector<8x128xf32>
    %83 = arith.divf %81, %82 : vector<8x128xf32>
    %84 = vector.extract_strided_slice %65 {offsets = [0, 384], sizes = [8, 128], strides = [1, 1]} : vector<8x512xf32> to vector<8x128xf32>
    %85 = math.tanh %84 : vector<8x128xf32>
    %86 = arith.mulf %71, %46 : vector<8x128xf32>
    %87 = arith.mulf %77, %85 : vector<8x128xf32>
    %88 = arith.addf %86, %87 : vector<8x128xf32>
    %89 = math.tanh %88 : vector<8x128xf32>
    %90 = arith.mulf %83, %89 : vector<8x128xf32>
    %91 = vector.broadcast %60 : vector<8x1xf32> to vector<8x128xf32>
    %92 = arith.mulf %90, %91 : vector<8x128xf32>
    %93 = vector.broadcast %60 : vector<8x1xf32> to vector<8x128xf32>
    %94 = arith.mulf %88, %93 : vector<8x128xf32>
    %95 = arith.index_cast %c1_i32 : i32 to index
    %c0_24 = arith.constant 0 : index
    %c0_25 = arith.constant 0 : index
    %96 = vector.load %arg7[%95, %c0_24, %c0_25] : memref<8x8x256xf32, #tpu.memory_space<vmem>>, vector<1x8x128xf32>
    %97 = vector.shape_cast %96 : vector<1x8x128xf32> to vector<8x128xf32>
    %98 = vector.shape_cast %92 : vector<8x128xf32> to vector<1x8x128xf32>
    tpu.vector_store %arg7[%95, %c0_24, %c0_25], %98 {strides = array<i32>} : memref<8x8x256xf32, #tpu.memory_space<vmem>>, vector<1x8x128xf32>,
    %99 = arith.index_cast %c1_i32 : i32 to index
    %c0_26 = arith.constant 0 : index
    %c128_27 = arith.constant 128 : index
    %100 = vector.load %arg7[%99, %c0_26, %c128_27] : memref<8x8x256xf32, #tpu.memory_space<vmem>>, vector<1x8x128xf32>
    %101 = vector.shape_cast %100 : vector<1x8x128xf32> to vector<8x128xf32>
    %102 = vector.shape_cast %94 : vector<8x128xf32> to vector<1x8x128xf32>
    tpu.vector_store %arg7[%99, %c0_26, %c128_27], %102 {strides = array<i32>} : memref<8x8x256xf32, #tpu.memory_space<vmem>>, vector<1x8x128xf32>,
    %c2_i32 = arith.constant 2 : i32
    %c8_i32_28 = arith.constant 8 : i32
    %103 = arith.muli %arg1, %c8_i32_28 : i32
    %104 = arith.addi %103, %c2_i32 : i32
    %105 = vector.broadcast %104 : i32 to vector<8x1xi32>
    %106 = arith.cmpi sgt, %3, %105 : vector<8x1xi32>
    %107 = arith.extui %106 : vector<8x1xi1> to vector<8x1xi32>
    %108 = arith.sitofp %107 : vector<8x1xi32> to vector<8x1xf32>
    %109 = arith.index_cast %c2_i32 : i32 to index
    %c0_29 = arith.constant 0 : index
    %c0_30 = arith.constant 0 : index
    %110 = vector.load %arg2[%109, %c0_29, %c0_30] : memref<8x8x512xf32, #tpu.memory_space<vmem>>, vector<1x8x512xf32>
    %111 = vector.shape_cast %110 : vector<1x8x512xf32> to vector<8x512xf32>
    %cst_31 = arith.constant dense<0.000000e+00> : vector<8x512xf32>
    %112 = tpu.matmul %92, %4, %cst_31 {dimension_numbers = #tpu.dot_dimension_numbers<[1], [0], [0], [1], [0, 0, 1, 1], [], []>, precision = #tpu.contract_precision<fp32>} : vector<8x128xf32>, vector<128x512xf32>, vector<8x512xf32> -> vector<8x512xf32>
    %113 = arith.addf %111, %112 : vector<8x512xf32>
    %114 = vector.extract_strided_slice %113 {offsets = [0, 0], sizes = [8, 128], strides = [1, 1]} : vector<8x512xf32> to vector<8x128xf32>
    %115 = arith.negf %114 : vector<8x128xf32>
    %116 = math.exp %115 : vector<8x128xf32>
    %cst_32 = arith.constant 1.000000e+00 : f32
    %117 = vector.broadcast %cst_32 : f32 to vector<8x128xf32>
    %118 = arith.addf %117, %116 : vector<8x128xf32>
    %119 = arith.divf %117, %118 : vector<8x128xf32>
    %120 = vector.extract_strided_slice %113 {offsets = [0, 128], sizes = [8, 128], strides = [1, 1]} : vector<8x512xf32> to vector<8x128xf32>
    %121 = arith.negf %120 : vector<8x128xf32>
    %122 = math.exp %121 : vector<8x128xf32>
    %cst_33 = arith.constant 1.000000e+00 : f32
    %123 = vector.broadcast %cst_33 : f32 to vector<8x128xf32>
    %124 = arith.addf %123, %122 : vector<8x128xf32>
    %125 = arith.divf %123, %124 : vector<8x128xf32>
    %126 = vector.extract_strided_slice %113 {offsets = [0, 256], sizes = [8, 128], strides = [1, 1]} : vector<8x512xf32> to vector<8x128xf32>
    %127 = arith.negf %126 : vector<8x128xf32>
    %128 = math.exp %127 : vector<8x128xf32>
    %cst_34 = arith.constant 1.000000e+00 : f32
    %129 = vector.broadcast %cst_34 : f32 to vector<8x128xf32>
    %130 = arith.addf %129, %128 : vector<8x128xf32>
    %131 = arith.divf %129, %130 : vector<8x128xf32>
    %132 = vector.extract_strided_slice %113 {offsets = [0, 384], sizes = [8, 128], strides = [1, 1]} : vector<8x512xf32> to vector<8x128xf32>
    %133 = math.tanh %132 : vector<8x128xf32>
    %134 = arith.mulf %119, %94 : vector<8x128xf32>
    %135 = arith.mulf %125, %133 : vector<8x128xf32>
    %136 = arith.addf %134, %135 : vector<8x128xf32>
    %137 = math.tanh %136 : vector<8x128xf32>
    %138 = arith.mulf %131, %137 : vector<8x128xf32>
    %139 = vector.broadcast %108 : vector<8x1xf32> to vector<8x128xf32>
    %140 = arith.mulf %138, %139 : vector<8x128xf32>
    %141 = vector.broadcast %108 : vector<8x1xf32> to vector<8x128xf32>
    %142 = arith.mulf %136, %141 : vector<8x128xf32>
    %143 = arith.index_cast %c2_i32 : i32 to index
    %c0_35 = arith.constant 0 : index
    %c0_36 = arith.constant 0 : index
    %144 = vector.load %arg7[%143, %c0_35, %c0_36] : memref<8x8x256xf32, #tpu.memory_space<vmem>>, vector<1x8x128xf32>
    %145 = vector.shape_cast %144 : vector<1x8x128xf32> to vector<8x128xf32>
    %146 = vector.shape_cast %140 : vector<8x128xf32> to vector<1x8x128xf32>
    tpu.vector_store %arg7[%143, %c0_35, %c0_36], %146 {strides = array<i32>} : memref<8x8x256xf32, #tpu.memory_space<vmem>>, vector<1x8x128xf32>,
    %147 = arith.index_cast %c2_i32 : i32 to index
    %c0_37 = arith.constant 0 : index
    %c128_38 = arith.constant 128 : index
    %148 = vector.load %arg7[%147, %c0_37, %c128_38] : memref<8x8x256xf32, #tpu.memory_space<vmem>>, vector<1x8x128xf32>
    %149 = vector.shape_cast %148 : vector<1x8x128xf32> to vector<8x128xf32>
    %150 = vector.shape_cast %142 : vector<8x128xf32> to vector<1x8x128xf32>
    tpu.vector_store %arg7[%147, %c0_37, %c128_38], %150 {strides = array<i32>} : memref<8x8x256xf32, #tpu.memory_space<vmem>>, vector<1x8x128xf32>,
    %c3_i32 = arith.constant 3 : i32
    %c8_i32_39 = arith.constant 8 : i32
    %151 = arith.muli %arg1, %c8_i32_39 : i32
    %152 = arith.addi %151, %c3_i32 : i32
    %153 = vector.broadcast %152 : i32 to vector<8x1xi32>
    %154 = arith.cmpi sgt, %3, %153 : vector<8x1xi32>
    %155 = arith.extui %154 : vector<8x1xi1> to vector<8x1xi32>
    %156 = arith.sitofp %155 : vector<8x1xi32> to vector<8x1xf32>
    %157 = arith.index_cast %c3_i32 : i32 to index
    %c0_40 = arith.constant 0 : index
    %c0_41 = arith.constant 0 : index
    %158 = vector.load %arg2[%157, %c0_40, %c0_41] : memref<8x8x512xf32, #tpu.memory_space<vmem>>, vector<1x8x512xf32>
    %159 = vector.shape_cast %158 : vector<1x8x512xf32> to vector<8x512xf32>
    %cst_42 = arith.constant dense<0.000000e+00> : vector<8x512xf32>
    %160 = tpu.matmul %140, %4, %cst_42 {dimension_numbers = #tpu.dot_dimension_numbers<[1], [0], [0], [1], [0, 0, 1, 1], [], []>, precision = #tpu.contract_precision<fp32>} : vector<8x128xf32>, vector<128x512xf32>, vector<8x512xf32> -> vector<8x512xf32>
    %161 = arith.addf %159, %160 : vector<8x512xf32>
    %162 = vector.extract_strided_slice %161 {offsets = [0, 0], sizes = [8, 128], strides = [1, 1]} : vector<8x512xf32> to vector<8x128xf32>
    %163 = arith.negf %162 : vector<8x128xf32>
    %164 = math.exp %163 : vector<8x128xf32>
    %cst_43 = arith.constant 1.000000e+00 : f32
    %165 = vector.broadcast %cst_43 : f32 to vector<8x128xf32>
    %166 = arith.addf %165, %164 : vector<8x128xf32>
    %167 = arith.divf %165, %166 : vector<8x128xf32>
    %168 = vector.extract_strided_slice %161 {offsets = [0, 128], sizes = [8, 128], strides = [1, 1]} : vector<8x512xf32> to vector<8x128xf32>
    %169 = arith.negf %168 : vector<8x128xf32>
    %170 = math.exp %169 : vector<8x128xf32>
    %cst_44 = arith.constant 1.000000e+00 : f32
    %171 = vector.broadcast %cst_44 : f32 to vector<8x128xf32>
    %172 = arith.addf %171, %170 : vector<8x128xf32>
    %173 = arith.divf %171, %172 : vector<8x128xf32>
    %174 = vector.extract_strided_slice %161 {offsets = [0, 256], sizes = [8, 128], strides = [1, 1]} : vector<8x512xf32> to vector<8x128xf32>
    %175 = arith.negf %174 : vector<8x128xf32>
    %176 = math.exp %175 : vector<8x128xf32>
    %cst_45 = arith.constant 1.000000e+00 : f32
    %177 = vector.broadcast %cst_45 : f32 to vector<8x128xf32>
    %178 = arith.addf %177, %176 : vector<8x128xf32>
    %179 = arith.divf %177, %178 : vector<8x128xf32>
    %180 = vector.extract_strided_slice %161 {offsets = [0, 384], sizes = [8, 128], strides = [1, 1]} : vector<8x512xf32> to vector<8x128xf32>
    %181 = math.tanh %180 : vector<8x128xf32>
    %182 = arith.mulf %167, %142 : vector<8x128xf32>
    %183 = arith.mulf %173, %181 : vector<8x128xf32>
    %184 = arith.addf %182, %183 : vector<8x128xf32>
    %185 = math.tanh %184 : vector<8x128xf32>
    %186 = arith.mulf %179, %185 : vector<8x128xf32>
    %187 = vector.broadcast %156 : vector<8x1xf32> to vector<8x128xf32>
    %188 = arith.mulf %186, %187 : vector<8x128xf32>
    %189 = vector.broadcast %156 : vector<8x1xf32> to vector<8x128xf32>
    %190 = arith.mulf %184, %189 : vector<8x128xf32>
    %191 = arith.index_cast %c3_i32 : i32 to index
    %c0_46 = arith.constant 0 : index
    %c0_47 = arith.constant 0 : index
    %192 = vector.load %arg7[%191, %c0_46, %c0_47] : memref<8x8x256xf32, #tpu.memory_space<vmem>>, vector<1x8x128xf32>
    %193 = vector.shape_cast %192 : vector<1x8x128xf32> to vector<8x128xf32>
    %194 = vector.shape_cast %188 : vector<8x128xf32> to vector<1x8x128xf32>
    tpu.vector_store %arg7[%191, %c0_46, %c0_47], %194 {strides = array<i32>} : memref<8x8x256xf32, #tpu.memory_space<vmem>>, vector<1x8x128xf32>,
    %195 = arith.index_cast %c3_i32 : i32 to index
    %c0_48 = arith.constant 0 : index
    %c128_49 = arith.constant 128 : index
    %196 = vector.load %arg7[%195, %c0_48, %c128_49] : memref<8x8x256xf32, #tpu.memory_space<vmem>>, vector<1x8x128xf32>
    %197 = vector.shape_cast %196 : vector<1x8x128xf32> to vector<8x128xf32>
    %198 = vector.shape_cast %190 : vector<8x128xf32> to vector<1x8x128xf32>
    tpu.vector_store %arg7[%195, %c0_48, %c128_49], %198 {strides = array<i32>} : memref<8x8x256xf32, #tpu.memory_space<vmem>>, vector<1x8x128xf32>,
    %c4_i32 = arith.constant 4 : i32
    %c8_i32_50 = arith.constant 8 : i32
    %199 = arith.muli %arg1, %c8_i32_50 : i32
    %200 = arith.addi %199, %c4_i32 : i32
    %201 = vector.broadcast %200 : i32 to vector<8x1xi32>
    %202 = arith.cmpi sgt, %3, %201 : vector<8x1xi32>
    %203 = arith.extui %202 : vector<8x1xi1> to vector<8x1xi32>
    %204 = arith.sitofp %203 : vector<8x1xi32> to vector<8x1xf32>
    %205 = arith.index_cast %c4_i32 : i32 to index
    %c0_51 = arith.constant 0 : index
    %c0_52 = arith.constant 0 : index
    %206 = vector.load %arg2[%205, %c0_51, %c0_52] : memref<8x8x512xf32, #tpu.memory_space<vmem>>, vector<1x8x512xf32>
    %207 = vector.shape_cast %206 : vector<1x8x512xf32> to vector<8x512xf32>
    %cst_53 = arith.constant dense<0.000000e+00> : vector<8x512xf32>
    %208 = tpu.matmul %188, %4, %cst_53 {dimension_numbers = #tpu.dot_dimension_numbers<[1], [0], [0], [1], [0, 0, 1, 1], [], []>, precision = #tpu.contract_precision<fp32>} : vector<8x128xf32>, vector<128x512xf32>, vector<8x512xf32> -> vector<8x512xf32>
    %209 = arith.addf %207, %208 : vector<8x512xf32>
    %210 = vector.extract_strided_slice %209 {offsets = [0, 0], sizes = [8, 128], strides = [1, 1]} : vector<8x512xf32> to vector<8x128xf32>
    %211 = arith.negf %210 : vector<8x128xf32>
    %212 = math.exp %211 : vector<8x128xf32>
    %cst_54 = arith.constant 1.000000e+00 : f32
    %213 = vector.broadcast %cst_54 : f32 to vector<8x128xf32>
    %214 = arith.addf %213, %212 : vector<8x128xf32>
    %215 = arith.divf %213, %214 : vector<8x128xf32>
    %216 = vector.extract_strided_slice %209 {offsets = [0, 128], sizes = [8, 128], strides = [1, 1]} : vector<8x512xf32> to vector<8x128xf32>
    %217 = arith.negf %216 : vector<8x128xf32>
    %218 = math.exp %217 : vector<8x128xf32>
    %cst_55 = arith.constant 1.000000e+00 : f32
    %219 = vector.broadcast %cst_55 : f32 to vector<8x128xf32>
    %220 = arith.addf %219, %218 : vector<8x128xf32>
    %221 = arith.divf %219, %220 : vector<8x128xf32>
    %222 = vector.extract_strided_slice %209 {offsets = [0, 256], sizes = [8, 128], strides = [1, 1]} : vector<8x512xf32> to vector<8x128xf32>
    %223 = arith.negf %222 : vector<8x128xf32>
    %224 = math.exp %223 : vector<8x128xf32>
    %cst_56 = arith.constant 1.000000e+00 : f32
    %225 = vector.broadcast %cst_56 : f32 to vector<8x128xf32>
    %226 = arith.addf %225, %224 : vector<8x128xf32>
    %227 = arith.divf %225, %226 : vector<8x128xf32>
    %228 = vector.extract_strided_slice %209 {offsets = [0, 384], sizes = [8, 128], strides = [1, 1]} : vector<8x512xf32> to vector<8x128xf32>
    %229 = math.tanh %228 : vector<8x128xf32>
    %230 = arith.mulf %215, %190 : vector<8x128xf32>
    %231 = arith.mulf %221, %229 : vector<8x128xf32>
    %232 = arith.addf %230, %231 : vector<8x128xf32>
    %233 = math.tanh %232 : vector<8x128xf32>
    %234 = arith.mulf %227, %233 : vector<8x128xf32>
    %235 = vector.broadcast %204 : vector<8x1xf32> to vector<8x128xf32>
    %236 = arith.mulf %234, %235 : vector<8x128xf32>
    %237 = vector.broadcast %204 : vector<8x1xf32> to vector<8x128xf32>
    %238 = arith.mulf %232, %237 : vector<8x128xf32>
    %239 = arith.index_cast %c4_i32 : i32 to index
    %c0_57 = arith.constant 0 : index
    %c0_58 = arith.constant 0 : index
    %240 = vector.load %arg7[%239, %c0_57, %c0_58] : memref<8x8x256xf32, #tpu.memory_space<vmem>>, vector<1x8x128xf32>
    %241 = vector.shape_cast %240 : vector<1x8x128xf32> to vector<8x128xf32>
    %242 = vector.shape_cast %236 : vector<8x128xf32> to vector<1x8x128xf32>
    tpu.vector_store %arg7[%239, %c0_57, %c0_58], %242 {strides = array<i32>} : memref<8x8x256xf32, #tpu.memory_space<vmem>>, vector<1x8x128xf32>,
    %243 = arith.index_cast %c4_i32 : i32 to index
    %c0_59 = arith.constant 0 : index
    %c128_60 = arith.constant 128 : index
    %244 = vector.load %arg7[%243, %c0_59, %c128_60] : memref<8x8x256xf32, #tpu.memory_space<vmem>>, vector<1x8x128xf32>
    %245 = vector.shape_cast %244 : vector<1x8x128xf32> to vector<8x128xf32>
    %246 = vector.shape_cast %238 : vector<8x128xf32> to vector<1x8x128xf32>
    tpu.vector_store %arg7[%243, %c0_59, %c128_60], %246 {strides = array<i32>} : memref<8x8x256xf32, #tpu.memory_space<vmem>>, vector<1x8x128xf32>,
    %c5_i32 = arith.constant 5 : i32
    %c8_i32_61 = arith.constant 8 : i32
    %247 = arith.muli %arg1, %c8_i32_61 : i32
    %248 = arith.addi %247, %c5_i32 : i32
    %249 = vector.broadcast %248 : i32 to vector<8x1xi32>
    %250 = arith.cmpi sgt, %3, %249 : vector<8x1xi32>
    %251 = arith.extui %250 : vector<8x1xi1> to vector<8x1xi32>
    %252 = arith.sitofp %251 : vector<8x1xi32> to vector<8x1xf32>
    %253 = arith.index_cast %c5_i32 : i32 to index
    %c0_62 = arith.constant 0 : index
    %c0_63 = arith.constant 0 : index
    %254 = vector.load %arg2[%253, %c0_62, %c0_63] : memref<8x8x512xf32, #tpu.memory_space<vmem>>, vector<1x8x512xf32>
    %255 = vector.shape_cast %254 : vector<1x8x512xf32> to vector<8x512xf32>
    %cst_64 = arith.constant dense<0.000000e+00> : vector<8x512xf32>
    %256 = tpu.matmul %236, %4, %cst_64 {dimension_numbers = #tpu.dot_dimension_numbers<[1], [0], [0], [1], [0, 0, 1, 1], [], []>, precision = #tpu.contract_precision<fp32>} : vector<8x128xf32>, vector<128x512xf32>, vector<8x512xf32> -> vector<8x512xf32>
    %257 = arith.addf %255, %256 : vector<8x512xf32>
    %258 = vector.extract_strided_slice %257 {offsets = [0, 0], sizes = [8, 128], strides = [1, 1]} : vector<8x512xf32> to vector<8x128xf32>
    %259 = arith.negf %258 : vector<8x128xf32>
    %260 = math.exp %259 : vector<8x128xf32>
    %cst_65 = arith.constant 1.000000e+00 : f32
    %261 = vector.broadcast %cst_65 : f32 to vector<8x128xf32>
    %262 = arith.addf %261, %260 : vector<8x128xf32>
    %263 = arith.divf %261, %262 : vector<8x128xf32>
    %264 = vector.extract_strided_slice %257 {offsets = [0, 128], sizes = [8, 128], strides = [1, 1]} : vector<8x512xf32> to vector<8x128xf32>
    %265 = arith.negf %264 : vector<8x128xf32>
    %266 = math.exp %265 : vector<8x128xf32>
    %cst_66 = arith.constant 1.000000e+00 : f32
    %267 = vector.broadcast %cst_66 : f32 to vector<8x128xf32>
    %268 = arith.addf %267, %266 : vector<8x128xf32>
    %269 = arith.divf %267, %268 : vector<8x128xf32>
    %270 = vector.extract_strided_slice %257 {offsets = [0, 256], sizes = [8, 128], strides = [1, 1]} : vector<8x512xf32> to vector<8x128xf32>
    %271 = arith.negf %270 : vector<8x128xf32>
    %272 = math.exp %271 : vector<8x128xf32>
    %cst_67 = arith.constant 1.000000e+00 : f32
    %273 = vector.broadcast %cst_67 : f32 to vector<8x128xf32>
    %274 = arith.addf %273, %272 : vector<8x128xf32>
    %275 = arith.divf %273, %274 : vector<8x128xf32>
    %276 = vector.extract_strided_slice %257 {offsets = [0, 384], sizes = [8, 128], strides = [1, 1]} : vector<8x512xf32> to vector<8x128xf32>
    %277 = math.tanh %276 : vector<8x128xf32>
    %278 = arith.mulf %263, %238 : vector<8x128xf32>
    %279 = arith.mulf %269, %277 : vector<8x128xf32>
    %280 = arith.addf %278, %279 : vector<8x128xf32>
    %281 = math.tanh %280 : vector<8x128xf32>
    %282 = arith.mulf %275, %281 : vector<8x128xf32>
    %283 = vector.broadcast %252 : vector<8x1xf32> to vector<8x128xf32>
    %284 = arith.mulf %282, %283 : vector<8x128xf32>
    %285 = vector.broadcast %252 : vector<8x1xf32> to vector<8x128xf32>
    %286 = arith.mulf %280, %285 : vector<8x128xf32>
    %287 = arith.index_cast %c5_i32 : i32 to index
    %c0_68 = arith.constant 0 : index
    %c0_69 = arith.constant 0 : index
    %288 = vector.load %arg7[%287, %c0_68, %c0_69] : memref<8x8x256xf32, #tpu.memory_space<vmem>>, vector<1x8x128xf32>
    %289 = vector.shape_cast %288 : vector<1x8x128xf32> to vector<8x128xf32>
    %290 = vector.shape_cast %284 : vector<8x128xf32> to vector<1x8x128xf32>
    tpu.vector_store %arg7[%287, %c0_68, %c0_69], %290 {strides = array<i32>} : memref<8x8x256xf32, #tpu.memory_space<vmem>>, vector<1x8x128xf32>,
    %291 = arith.index_cast %c5_i32 : i32 to index
    %c0_70 = arith.constant 0 : index
    %c128_71 = arith.constant 128 : index
    %292 = vector.load %arg7[%291, %c0_70, %c128_71] : memref<8x8x256xf32, #tpu.memory_space<vmem>>, vector<1x8x128xf32>
    %293 = vector.shape_cast %292 : vector<1x8x128xf32> to vector<8x128xf32>
    %294 = vector.shape_cast %286 : vector<8x128xf32> to vector<1x8x128xf32>
    tpu.vector_store %arg7[%291, %c0_70, %c128_71], %294 {strides = array<i32>} : memref<8x8x256xf32, #tpu.memory_space<vmem>>, vector<1x8x128xf32>,
    %c6_i32 = arith.constant 6 : i32
    %c8_i32_72 = arith.constant 8 : i32
    %295 = arith.muli %arg1, %c8_i32_72 : i32
    %296 = arith.addi %295, %c6_i32 : i32
    %297 = vector.broadcast %296 : i32 to vector<8x1xi32>
    %298 = arith.cmpi sgt, %3, %297 : vector<8x1xi32>
    %299 = arith.extui %298 : vector<8x1xi1> to vector<8x1xi32>
    %300 = arith.sitofp %299 : vector<8x1xi32> to vector<8x1xf32>
    %301 = arith.index_cast %c6_i32 : i32 to index
    %c0_73 = arith.constant 0 : index
    %c0_74 = arith.constant 0 : index
    %302 = vector.load %arg2[%301, %c0_73, %c0_74] : memref<8x8x512xf32, #tpu.memory_space<vmem>>, vector<1x8x512xf32>
    %303 = vector.shape_cast %302 : vector<1x8x512xf32> to vector<8x512xf32>
    %cst_75 = arith.constant dense<0.000000e+00> : vector<8x512xf32>
    %304 = tpu.matmul %284, %4, %cst_75 {dimension_numbers = #tpu.dot_dimension_numbers<[1], [0], [0], [1], [0, 0, 1, 1], [], []>, precision = #tpu.contract_precision<fp32>} : vector<8x128xf32>, vector<128x512xf32>, vector<8x512xf32> -> vector<8x512xf32>
    %305 = arith.addf %303, %304 : vector<8x512xf32>
    %306 = vector.extract_strided_slice %305 {offsets = [0, 0], sizes = [8, 128], strides = [1, 1]} : vector<8x512xf32> to vector<8x128xf32>
    %307 = arith.negf %306 : vector<8x128xf32>
    %308 = math.exp %307 : vector<8x128xf32>
    %cst_76 = arith.constant 1.000000e+00 : f32
    %309 = vector.broadcast %cst_76 : f32 to vector<8x128xf32>
    %310 = arith.addf %309, %308 : vector<8x128xf32>
    %311 = arith.divf %309, %310 : vector<8x128xf32>
    %312 = vector.extract_strided_slice %305 {offsets = [0, 128], sizes = [8, 128], strides = [1, 1]} : vector<8x512xf32> to vector<8x128xf32>
    %313 = arith.negf %312 : vector<8x128xf32>
    %314 = math.exp %313 : vector<8x128xf32>
    %cst_77 = arith.constant 1.000000e+00 : f32
    %315 = vector.broadcast %cst_77 : f32 to vector<8x128xf32>
    %316 = arith.addf %315, %314 : vector<8x128xf32>
    %317 = arith.divf %315, %316 : vector<8x128xf32>
    %318 = vector.extract_strided_slice %305 {offsets = [0, 256], sizes = [8, 128], strides = [1, 1]} : vector<8x512xf32> to vector<8x128xf32>
    %319 = arith.negf %318 : vector<8x128xf32>
    %320 = math.exp %319 : vector<8x128xf32>
    %cst_78 = arith.constant 1.000000e+00 : f32
    %321 = vector.broadcast %cst_78 : f32 to vector<8x128xf32>
    %322 = arith.addf %321, %320 : vector<8x128xf32>
    %323 = arith.divf %321, %322 : vector<8x128xf32>
    %324 = vector.extract_strided_slice %305 {offsets = [0, 384], sizes = [8, 128], strides = [1, 1]} : vector<8x512xf32> to vector<8x128xf32>
    %325 = math.tanh %324 : vector<8x128xf32>
    %326 = arith.mulf %311, %286 : vector<8x128xf32>
    %327 = arith.mulf %317, %325 : vector<8x128xf32>
    %328 = arith.addf %326, %327 : vector<8x128xf32>
    %329 = math.tanh %328 : vector<8x128xf32>
    %330 = arith.mulf %323, %329 : vector<8x128xf32>
    %331 = vector.broadcast %300 : vector<8x1xf32> to vector<8x128xf32>
    %332 = arith.mulf %330, %331 : vector<8x128xf32>
    %333 = vector.broadcast %300 : vector<8x1xf32> to vector<8x128xf32>
    %334 = arith.mulf %328, %333 : vector<8x128xf32>
    %335 = arith.index_cast %c6_i32 : i32 to index
    %c0_79 = arith.constant 0 : index
    %c0_80 = arith.constant 0 : index
    %336 = vector.load %arg7[%335, %c0_79, %c0_80] : memref<8x8x256xf32, #tpu.memory_space<vmem>>, vector<1x8x128xf32>
    %337 = vector.shape_cast %336 : vector<1x8x128xf32> to vector<8x128xf32>
    %338 = vector.shape_cast %332 : vector<8x128xf32> to vector<1x8x128xf32>
    tpu.vector_store %arg7[%335, %c0_79, %c0_80], %338 {strides = array<i32>} : memref<8x8x256xf32, #tpu.memory_space<vmem>>, vector<1x8x128xf32>,
    %339 = arith.index_cast %c6_i32 : i32 to index
    %c0_81 = arith.constant 0 : index
    %c128_82 = arith.constant 128 : index
    %340 = vector.load %arg7[%339, %c0_81, %c128_82] : memref<8x8x256xf32, #tpu.memory_space<vmem>>, vector<1x8x128xf32>
    %341 = vector.shape_cast %340 : vector<1x8x128xf32> to vector<8x128xf32>
    %342 = vector.shape_cast %334 : vector<8x128xf32> to vector<1x8x128xf32>
    tpu.vector_store %arg7[%339, %c0_81, %c128_82], %342 {strides = array<i32>} : memref<8x8x256xf32, #tpu.memory_space<vmem>>, vector<1x8x128xf32>,
    %c7_i32 = arith.constant 7 : i32
    %c8_i32_83 = arith.constant 8 : i32
    %343 = arith.muli %arg1, %c8_i32_83 : i32
    %344 = arith.addi %343, %c7_i32 : i32
    %345 = vector.broadcast %344 : i32 to vector<8x1xi32>
    %346 = arith.cmpi sgt, %3, %345 : vector<8x1xi32>
    %347 = arith.extui %346 : vector<8x1xi1> to vector<8x1xi32>
    %348 = arith.sitofp %347 : vector<8x1xi32> to vector<8x1xf32>
    %349 = arith.index_cast %c7_i32 : i32 to index
    %c0_84 = arith.constant 0 : index
    %c0_85 = arith.constant 0 : index
    %350 = vector.load %arg2[%349, %c0_84, %c0_85] : memref<8x8x512xf32, #tpu.memory_space<vmem>>, vector<1x8x512xf32>
    %351 = vector.shape_cast %350 : vector<1x8x512xf32> to vector<8x512xf32>
    %cst_86 = arith.constant dense<0.000000e+00> : vector<8x512xf32>
    %352 = tpu.matmul %332, %4, %cst_86 {dimension_numbers = #tpu.dot_dimension_numbers<[1], [0], [0], [1], [0, 0, 1, 1], [], []>, precision = #tpu.contract_precision<fp32>} : vector<8x128xf32>, vector<128x512xf32>, vector<8x512xf32> -> vector<8x512xf32>
    %353 = arith.addf %351, %352 : vector<8x512xf32>
    %354 = vector.extract_strided_slice %353 {offsets = [0, 0], sizes = [8, 128], strides = [1, 1]} : vector<8x512xf32> to vector<8x128xf32>
    %355 = arith.negf %354 : vector<8x128xf32>
    %356 = math.exp %355 : vector<8x128xf32>
    %cst_87 = arith.constant 1.000000e+00 : f32
    %357 = vector.broadcast %cst_87 : f32 to vector<8x128xf32>
    %358 = arith.addf %357, %356 : vector<8x128xf32>
    %359 = arith.divf %357, %358 : vector<8x128xf32>
    %360 = vector.extract_strided_slice %353 {offsets = [0, 128], sizes = [8, 128], strides = [1, 1]} : vector<8x512xf32> to vector<8x128xf32>
    %361 = arith.negf %360 : vector<8x128xf32>
    %362 = math.exp %361 : vector<8x128xf32>
    %cst_88 = arith.constant 1.000000e+00 : f32
    %363 = vector.broadcast %cst_88 : f32 to vector<8x128xf32>
    %364 = arith.addf %363, %362 : vector<8x128xf32>
    %365 = arith.divf %363, %364 : vector<8x128xf32>
    %366 = vector.extract_strided_slice %353 {offsets = [0, 256], sizes = [8, 128], strides = [1, 1]} : vector<8x512xf32> to vector<8x128xf32>
    %367 = arith.negf %366 : vector<8x128xf32>
    %368 = math.exp %367 : vector<8x128xf32>
    %cst_89 = arith.constant 1.000000e+00 : f32
    %369 = vector.broadcast %cst_89 : f32 to vector<8x128xf32>
    %370 = arith.addf %369, %368 : vector<8x128xf32>
    %371 = arith.divf %369, %370 : vector<8x128xf32>
    %372 = vector.extract_strided_slice %353 {offsets = [0, 384], sizes = [8, 128], strides = [1, 1]} : vector<8x512xf32> to vector<8x128xf32>
    %373 = math.tanh %372 : vector<8x128xf32>
    %374 = arith.mulf %359, %334 : vector<8x128xf32>
    %375 = arith.mulf %365, %373 : vector<8x128xf32>
    %376 = arith.addf %374, %375 : vector<8x128xf32>
    %377 = math.tanh %376 : vector<8x128xf32>
    %378 = arith.mulf %371, %377 : vector<8x128xf32>
    %379 = vector.broadcast %348 : vector<8x1xf32> to vector<8x128xf32>
    %380 = arith.mulf %378, %379 : vector<8x128xf32>
    %381 = vector.broadcast %348 : vector<8x1xf32> to vector<8x128xf32>
    %382 = arith.mulf %376, %381 : vector<8x128xf32>
    %383 = arith.index_cast %c7_i32 : i32 to index
    %c0_90 = arith.constant 0 : index
    %c0_91 = arith.constant 0 : index
    %384 = vector.load %arg7[%383, %c0_90, %c0_91] : memref<8x8x256xf32, #tpu.memory_space<vmem>>, vector<1x8x128xf32>
    %385 = vector.shape_cast %384 : vector<1x8x128xf32> to vector<8x128xf32>
    %386 = vector.shape_cast %380 : vector<8x128xf32> to vector<1x8x128xf32>
    tpu.vector_store %arg7[%383, %c0_90, %c0_91], %386 {strides = array<i32>} : memref<8x8x256xf32, #tpu.memory_space<vmem>>, vector<1x8x128xf32>,
    %387 = arith.index_cast %c7_i32 : i32 to index
    %c0_92 = arith.constant 0 : index
    %c128_93 = arith.constant 128 : index
    %388 = vector.load %arg7[%387, %c0_92, %c128_93] : memref<8x8x256xf32, #tpu.memory_space<vmem>>, vector<1x8x128xf32>
    %389 = vector.shape_cast %388 : vector<1x8x128xf32> to vector<8x128xf32>
    %390 = vector.shape_cast %382 : vector<8x128xf32> to vector<1x8x128xf32>
    tpu.vector_store %arg7[%387, %c0_92, %c128_93], %390 {strides = array<i32>} : memref<8x8x256xf32, #tpu.memory_space<vmem>>, vector<1x8x128xf32>,
    %c8_i32_94 = arith.constant 8 : i32
    %c0_95 = arith.constant 0 : index
    %c0_96 = arith.constant 0 : index
    %391 = vector.load %arg8[%c0_95, %c0_96] : memref<8x128xf32, #tpu.memory_space<vmem>>, vector<8x128xf32>
    tpu.vector_store %arg8[%c0_95, %c0_96], %380 {strides = array<i32>} : memref<8x128xf32, #tpu.memory_space<vmem>>, vector<8x128xf32>,
    %c0_97 = arith.constant 0 : index
    %c0_98 = arith.constant 0 : index
    %392 = vector.load %arg9[%c0_97, %c0_98] : memref<8x128xf32, #tpu.memory_space<vmem>>, vector<8x128xf32>
    tpu.vector_store %arg9[%c0_97, %c0_98], %382 {strides = array<i32>} : memref<8x128xf32, #tpu.memory_space<vmem>>, vector<8x128xf32>,
    return
  }
  func.func @transform_0(%arg0: i32, %arg1: i32) -> (i32, i32, i32) {
    %c0_i32 = arith.constant 0 : i32
    %c0_i32_0 = arith.constant 0 : i32
    return %arg1, %arg0, %c0_i32 : i32, i32, i32
  }
  func.func @transform_1(%arg0: i32, %arg1: i32) -> (i32, i32) {
    %c0_i32 = arith.constant 0 : i32
    %c0_i32_0 = arith.constant 0 : i32
    return %arg0, %c0_i32 : i32, i32
  }
  func.func @transform_2(%arg0: i32, %arg1: i32) -> (i32, i32) {
    %c0_i32 = arith.constant 0 : i32
    %c0_i32_0 = arith.constant 0 : i32
    %c0_i32_1 = arith.constant 0 : i32
    return %c0_i32, %c0_i32_0 : i32, i32
  }
  func.func @transform_3(%arg0: i32, %arg1: i32) -> (i32, i32) {
    %c0_i32 = arith.constant 0 : i32
    %c0_i32_0 = arith.constant 0 : i32
    return %arg0, %c0_i32 : i32, i32
  }
  func.func @transform_4(%arg0: i32, %arg1: i32) -> (i32, i32) {
    %c0_i32 = arith.constant 0 : i32
    %c0_i32_0 = arith.constant 0 : i32
    return %arg0, %c0_i32 : i32, i32
  }
  func.func @transform_5(%arg0: i32, %arg1: i32) -> (i32, i32, i32) {
    %c0_i32 = arith.constant 0 : i32
    %c0_i32_0 = arith.constant 0 : i32
    return %arg1, %arg0, %c0_i32 : i32, i32, i32
  }
}

</mosaic_0001>

<bundles_post_ra>
// kernel: tpu_custom_call.1
= control target key start
LH: loop header
LB: loop body
LE: loop exit
PB: predicated region body
PF: predicated region fallthrough
CT: control target
= control target key end

     0   :  { %10 = vsyncpa [#allocation5], 0  ;;  %s20949_s0 = inlined_call_operand.hbm [shape: f32[8,8,512], index: 0, kind: input, shape index: {}]   ;;  %s20950_s1 = inlined_call_operand.vmem [shape: s32[8,1], index: 1, kind: input, shape index: {}]   ;;  %s20951_s2 = inlined_call_operand.hbm [shape: f32[128,512], index: 2, kind: input, shape index: {}]   ;;  %s20952_s3 = inlined_call_operand.vmem [shape: f32[8,128], index: 3, kind: input, shape index: {}]   ;;  %s20953_s4 = inlined_call_operand.vmem [shape: f32[8,128], index: 4, kind: input, shape index: {}]   ;;  %s20954_s5 = inlined_call_operand.hbm [shape: f32[8,8,256], index: 5, kind: output, shape index: {}]  }
   0x1   :  { %11 = vsyncpa [#allocation8], 0 }
   0x2   :  { %12 = vsyncpa [#allocation6], 0  ;;  %s17682_s18 = smov [#allocation4]   ;;  %s17610_s22 = scalar_lea.hbm %s20949_s0, 4096 }
   0x3   :  { %s18_s19 = sshll.u32 %s17682_s18, 4  ;;  %p17611_p0 = scmp.ne.s32.totalorder %s20949_s0, %s17610_s22  ;;  %s19_s19 = int_to_ptr.vmem [resolvable:$true] %s18_s19 }
   0x4   :  { %p17614_p1 = scmp.lt.u32.totalorder %s17610_s22, %s20949_s0 }
   0x6   :  { %p17616_p2 = pnand %p17614_p1, %p17611_p0 }
   0x8   :  { %17619 = shalt.err (!%p17616_p2)
}
   0x9   :  { %s17620_s27 = scalar_lea.vmem %s19_s19, 4096  ;;  %p17625_p4 = scmp.lt.s32.totalorder %s19_s19, %s19_s19 }
   0xa   :  { %p17621_p3 = scmp.ne.s32.totalorder %s19_s19, %s17620_s27  ;;  %p17626_p5 = scmp.lt.s32.totalorder %s17620_s27, %s17620_s27 }
   0xc   :  { %p17627_p6 = por %p17626_p5, %p17625_p4 }
   0xe   :  { %p17628_p7 = pnand %p17627_p6, %p17621_p3 }
  0x10   :  { %17631 = shalt.err (!%p17628_p7)
}
  0x11   :  { %s17683_s28 = smov 512   ;;  %s17684_s29 = smov 32  }
  0x12   :  { %24 = dma.hbm_to_vmem [thread:$0]  %s20949_s0, 4096, %s19_s19, [#allocation5], %s17683_s28, %s17683_s28, %s17684_s29  }
  0x13   :  { %s17685_s7 = smov [#allocation7]   ;;  %s17632_s11 = scalar_lea.hbm %s20951_s2, 8192 }
  0x14   :  { %s32_s8 = sshll.u32 %s17685_s7, 4  ;;  %p17633_p8 = scmp.ne.s32.totalorder %s20951_s2, %s17632_s11  ;;  %s33_s8 = int_to_ptr.vmem [resolvable:$true] %s32_s8 }
  0x15   :  { %p17636_p9 = scmp.lt.u32.totalorder %s17632_s11, %s20951_s2 }
  0x17   :  { %p17638_p10 = pnand %p17636_p9, %p17633_p8 }
  0x19   :  { %17641 = shalt.err (!%p17638_p10)
}
  0x1a   :  { %s17642_s16 = scalar_lea.vmem %s33_s8, 8192  ;;  %p17647_p12 = scmp.lt.s32.totalorder %s33_s8, %s33_s8 }
  0x1b   :  { %p17643_p11 = scmp.ne.s32.totalorder %s33_s8, %s17642_s16  ;;  %p17648_p13 = scmp.lt.s32.totalorder %s17642_s16, %s17642_s16 }
  0x1d   :  { %p17649_p0 = por %p17648_p13, %p17647_p12 }
  0x1f   :  { %p17650_p1 = pnand %p17649_p0, %p17643_p11 }
  0x21   :  { %17653 = shalt.err (!%p17650_p1)
}
  0x22   :  { %38 = dma.hbm_to_vmem [thread:$0]  %s20951_s2, 8192, %s33_s8, [#allocation8], %s17683_s28, %s17683_s28, %s17684_s29  }
  0x23   :  { %17676 = dma.done.wait [#allocation5], 4096  }
  0x24   :  { %17677 = vsyncadd [#allocation5], 4294963200 }
  0x25   :  { %17678 = dma.done.wait [#allocation8], 8192  }
  0x26   :  { %17679 = vsyncadd [#allocation8], 4294959104  ;;  %v20958_v0 = vmov 0.0   ;;  %v17747_v1 = vld [vmem:[#allocation7 + $0x8] sm:$0xff]  ;;  %v17751_v3 = vld [vmem:[#allocation7 + $0x18] sm:$0xff] }
  0x27   :  { %229 = vmatprep.mubr.f32.mxu0 %v20958_v0  ;;  %1084 = vmatprep.mubr.f32.mxu1 %v20958_v0  ;;  %v17749_v2 = vld [vmem:[#allocation7 + $0x28] sm:$0xff]  ;;  %v20982_v4 = vand.u32 4294901760, %v17747_v1  ;;  %v17755_v6 = vld [vmem:[#allocation7 + $0x38] sm:$0xff]  ;;  %v20978_v7 = vand.u32 4294901760, %v17751_v3  ;;  %v17758_v8 = vld [vmem:[#allocation7] sm:$0xff] }
  0x28   :  { %v20981_v5 = vand.u32 4294901760, %v17749_v2  ;;  %v17760_v9 = vld [vmem:[#allocation7 + $0x20] sm:$0xff]  ;;  %v20977_v10 = vand.u32 4294901760, %v17755_v6  ;;  %v20976_v11 = vand.u32 4294901760, %v17758_v8  ;;  %v17765_v13 = vld [vmem:[#allocation7 + $0x10] sm:$0xff]  ;;  %v17769_v15 = vld [vmem:[#allocation7 + $0x48] sm:$0xff] }
  0x29   :  { %v20975_v12 = vand.u32 4294901760, %v17760_v9  ;;  %v17767_v14 = vld [vmem:[#allocation7 + $0x30] sm:$0xff]  ;;  %v20974_v17 = vand.u32 4294901760, %v17765_v13  ;;  %v17779_v19 = vld [vmem:[#allocation7 + $0x68] sm:$0xff]  ;;  %v20970_v20 = vand.u32 4294901760, %v17769_v15  ;;  %v17782_v21 = vld [vmem:[#allocation7 + $0x58] sm:$0xff] }
  0x2a   :  { %v17775_v16 = vpack.c.bf16 %v20981_v5, %v20982_v4  ;;  %v20973_v18 = vand.u32 4294901760, %v17767_v14  ;;  %v17784_v22 = vld [vmem:[#allocation7 + $0x78] sm:$0xff]  ;;  %v17790_v23 = vpack.c.bf16 %v20977_v10, %v20978_v7  ;;  %v20969_v25 = vand.u32 4294901760, %v17779_v19  ;;  %v17800_v27 = vld [vmem:[#allocation7 + $0x40] sm:$0xff]  ;;  %v17804_v29 = vld [vmem:[#allocation7 + $0x50] sm:$0xff] }
  0x2b   :  { %v17796_v24 = vpack.c.bf16 %v20975_v12, %v20976_v11  ;;  %v20968_v26 = vand.u32 4294901760, %v17782_v21  ;;  %v17802_v28 = vld [vmem:[#allocation7 + $0x60] sm:$0xff]  ;;  %v20963_v31 = vand.u32 4294901760, %v17784_v22  ;;  %v20962_v32 = vand.u32 4294901760, %v17800_v27  ;;  %v17816_v34 = vld [vmem:[#allocation7 + $0x70] sm:$0xff]  ;;  %v17818_v35 = vld [vmem:[#allocation7 + $0x88] sm:$0xff] }
  0x2c   :  { %21421 = vst [vmem:[#allocation13_spill] sm:$0xff] %v17775_v16  ;;  %21422 = vst [vmem:[#allocation14_spill] sm:$0xff] %v17790_v23  ;;  %14239 = vmatprep.subr.bf16.mxu0 %v17775_v16  ;;  %v17811_v30 = vpack.c.bf16 %v20973_v18, %v20974_v17  ;;  %v20961_v33 = vand.u32 4294901760, %v17802_v28  ;;  %v17820_v36 = vld [vmem:[#allocation7 + $0xa8] sm:$0xff]  ;;  %14431 = vmatprep.subr.bf16.mxu1 %v17790_v23  ;;  %v17828_v37 = vpack.c.bf16 %v20969_v25, %v20970_v20  ;;  %v17833_v41 = vld [vmem:[#allocation7 + $0x98] sm:$0xff] }
  0x2d   :  { %21423 = vst [vmem:[#allocation15_spill] sm:$0xff] %v17796_v24  ;;  %14241 = vmatpush1.bf16.msra.mxu0 %v17796_v24  ;;  %v20960_v38 = vand.u32 4294901760, %v17804_v29  ;;  %v20955_v39 = vand.u32 4294901760, %v17816_v34  ;;  %v20957_v40 = vand.u32 4294901760, %v17818_v35  ;;  %v17835_v42 = vld [vmem:[#allocation7 + $0xb8] sm:$0xff]  ;;  %v17837_v43 = vld [vmem:[#allocation7 + $0x80] sm:$0xff]  ;;  %v17844_v44 = vpack.c.bf16 %v20963_v31, %v20968_v26 }
  0x2e   :  { %21424 = vst [vmem:[#allocation16_spill] sm:$0xff] %v17811_v30  ;;  %21425 = vst [vmem:[#allocation17_spill] sm:$0xff] %v17828_v37  ;;  %14433 = vmatpush1.bf16.msra.mxu1 %v17811_v30  ;;  %v17850_v45 = vpack.c.bf16 %v20961_v33, %v20962_v32  ;;  %v20956_v46 = vand.u32 4294901760, %v17820_v36  ;;  %v20967_v47 = vand.u32 4294901760, %v17833_v41  ;;  %v17854_v48 = vld [vmem:[#allocation7 + $0xa0] sm:$0xff]  ;;  %v17856_v49 = vld [vmem:[#allocation7 + $0x90] sm:$0xff]  ;;  %14243 = vmatprep.subr.bf16.mxu0 %v17828_v37 }
  0x2f   :  { %21426 = vst [vmem:[#allocation18_spill] sm:$0xff] %v17844_v44  ;;  %v17858_v50 = vld [vmem:[#allocation7 + $0xb0] sm:$0xff]  ;;  %v17865_v51 = vpack.c.bf16 %v20955_v39, %v20960_v38  ;;  %v20966_v52 = vand.u32 4294901760, %v17835_v42  ;;  %v20965_v53 = vand.u32 4294901760, %v17837_v43  ;;  %v20964_v54 = vand.u32 4294901760, %v17854_v48  ;;  %v17870_v55 = vld [vmem:[#allocation7 + $0xc8] sm:$0xff]  ;;  %14435 = vmatprep.subr.bf16.mxu1 %v17844_v44 }
  0x30   :  { %21427 = vst [vmem:[#allocation19_spill] sm:$0xff] %v17850_v45  ;;  %v17872_v56 = vld [vmem:[#allocation7 + $0xe8] sm:$0xff]  ;;  %v17874_v57 = vld [vmem:[#allocation7 + $0xd8] sm:$0xff]  ;;  %v17881_v58 = vpack.c.bf16 %v20956_v46, %v20957_v40  ;;  %v20972_v59 = vand.u32 4294901760, %v17856_v49  ;;  %v20971_v60 = vand.u32 4294901760, %v17858_v50  ;;  %v20980_v61 = vand.u32 4294901760, %v17870_v55 }
  0x31   :  { %21428 = vst [vmem:[#allocation20_spill] sm:$0xff] %v17865_v51  ;;  %v17886_v62 = vld [vmem:[#allocation7 + $0xf8] sm:$0xff]  ;;  %v17888_v63 = vld [vmem:[#allocation7 + $0xc0] sm:$0xff]  ;;  %14245 = vmatpush1.bf16.msra.mxu0 %v17850_v45  ;;  %v17897_v46 = vpack.c.bf16 %v20966_v52, %v20967_v47  ;;  %v17903_v40 = vpack.c.bf16 %v20964_v54, %v20965_v53  ;;  %v20979_v0 = vand.u32 4294901760, %v17872_v56  ;;  %v20984_v38 = vand.u32 4294901760, %v17874_v57  ;;  %v17907_v33 = vld [vmem:[#allocation7 + $0xd0] sm:$0xff] }
  0x32   :  { %21429 = vst [vmem:[#allocation21_spill] sm:$0xff] %v17881_v58  ;;  %v17890_v39 = vld [vmem:[#allocation7 + $0xe0] sm:$0xff]  ;;  %v17909_v32 = vld [vmem:[#allocation7 + $0xf0] sm:$0xff]  ;;  %v17911_v31 = vld [vmem:[#allocation7 + $0x108] sm:$0xff]  ;;  %14437 = vmatpush1.bf16.msra.mxu1 %v17865_v51  ;;  %14247 = vmatprep.subr.bf16.mxu0 %v17881_v58  ;;  %v17919_v54 = vpack.c.bf16 %v20971_v60, %v20972_v59  ;;  %v20983_v53 = vand.u32 4294901760, %v17886_v62  ;;  %v20986_v52 = vand.u32 4294901760, %v17888_v63 }
  0x33   :  { %21430 = vst [vmem:[#allocation22_spill] sm:$0xff] %v17897_v46  ;;  %21431 = vst [vmem:[#allocation23_spill] sm:$0xff] %v17903_v40  ;;  %v20985_v47 = vand.u32 4294901760, %v17890_v39  ;;  %v17924_v26 = vld [vmem:[#allocation7 + $0x128] sm:$0xff]  ;;  %v17926_v25 = vld [vmem:[#allocation7 + $0x118] sm:$0xff]  ;;  %14439 = vmatprep.subr.bf16.mxu1 %v17897_v46  ;;  %v17935_v60 = vpack.c.bf16 %v20979_v0, %v20980_v61  ;;  %v20993_v59 = vand.u32 4294901760, %v17907_v33 }
  0x34   :  { %21432 = vst [vmem:[#allocation24_spill] sm:$0xff] %v17919_v54  ;;  %21433 = vst [vmem:[#allocation25_spill] sm:$0xff] %v17926_v25  ;;  %v17928_v20 = vld [vmem:[#allocation7 + $0x138] sm:$0xff]  ;;  %v17940_v12 = vld [vmem:[#allocation7 + $0x100] sm:$0xff]  ;;  %v17950_v7 = vpack.c.bf16 %v20983_v53, %v20984_v38  ;;  %v21444_v53 = vand.u32 4294901760, %v17909_v32 }
  0x35   :  { %21434 = vst [vmem:[#allocation26_spill] sm:$0xff] %v17928_v20  ;;  %21435 = vst [vmem:[#allocation27_spill] sm:$0xff] %v17935_v60  ;;  %v17942_v11 = vld [vmem:[#allocation7 + $0x120] sm:$0xff]  ;;  %v17944_v10 = vld [vmem:[#allocation7 + $0x110] sm:$0xff]  ;;  %v17956_v0 = vpack.c.bf16 %v20985_v47, %v20986_v52  ;;  %14249 = vmatpush1.bf16.msra.mxu0 %v17903_v40  ;;  %v21449_v40 = vand.u32 4294901760, %v17911_v31 }
  0x36   :  { %21436 = vst [vmem:[#allocation28_spill] sm:$0xff] %v17940_v12  ;;  %21437 = vst [vmem:[#allocation29_spill] sm:$0xff] %v17942_v11  ;;  %v17960_v4 = vld [vmem:[#allocation7 + $0x130] sm:$0xff]  ;;  %v17962_v17 = vld [vmem:[#allocation7 + $0x148] sm:$0xff]  ;;  %v17971_v38 = vpack.c.bf16 %v21444_v53, %v20993_v59  ;;  %14441 = vmatpush1.bf16.msra.mxu1 %v17919_v54  ;;  %14251 = vmatprep.subr.bf16.mxu0 %v17935_v60  ;;  %v21450_v53 = vand.u32 4294901760, %v17924_v26  ;;  %v21455_v54 = vand.u32 4294901760, %v17926_v25 }
  0x37   :  { %21438 = vst [vmem:[#allocation30_spill] sm:$0xff] %v17944_v10  ;;  %21439 = vst [vmem:[#allocation31_spill] sm:$0xff] %v17950_v7  ;;  %v17964_v18 = vld [vmem:[#allocation7 + $0x168] sm:$0xff]  ;;  %v17976_v61 = vld [vmem:[#allocation7 + $0x158] sm:$0xff]  ;;  %14443 = vmatprep.subr.bf16.mxu1 %v17950_v7  ;;  %v21456_v60 = vand.u32 4294901760, %v17928_v20  ;;  %v21459_v5 = vand.u32 4294901760, %v17942_v11 }
  0x38   :  { %21440 = vst [vmem:[#allocation32_spill] sm:$0xff] %v17956_v0  ;;  %21441 = vst [vmem:[#allocation33_spill] sm:$0xff] %v17960_v4  ;;  %v17978_v46 = vld [vmem:[#allocation7 + $0x178] sm:$0xff]  ;;  %v17980_v51 = vld [vmem:[#allocation7 + $0x140] sm:$0xff]  ;;  %v17988_v59 = vpack.c.bf16 %v21450_v53, %v21449_v40  ;;  %v21458_v53 = vand.u32 4294901760, %v17940_v12  ;;  %v21462_v24 = vand.u32 4294901760, %v17944_v10 }
  0x39   :  { %21442 = vst [vmem:[#allocation34_spill] sm:$0xff] %v17962_v17  ;;  %21443 = vst [vmem:[#allocation35_spill] sm:$0xff] %v17964_v18  ;;  %v17993_v58 = vld [vmem:[#allocation7 + $0x160] sm:$0xff]  ;;  %v17995_v44 = vld [vmem:[#allocation7 + $0x150] sm:$0xff]  ;;  %v18004_v40 = vpack.c.bf16 %v21456_v60, %v21455_v54  ;;  %v21463_v54 = vand.u32 4294901760, %v17960_v4  ;;  %14253 = vmatpush1.bf16.msra.mxu0 %v17956_v0  ;;  %v21467_v10 = vand.u32 4294901760, %v17962_v17 }
  0x3a   :  { %21445 = vst [vmem:[#allocation36_spill] sm:$0xff] %v17971_v38  ;;  %21446 = vst [vmem:[#allocation37_spill] sm:$0xff] %v17976_v61  ;;  %v17997_v45 = vld [vmem:[#allocation7 + $0x170] sm:$0xff]  ;;  %v18010_v52 = vpack.c.bf16 %v21459_v5, %v21458_v53  ;;  %v18014_v37 = vld [vmem:[#allocation7 + $0x188] sm:$0xff]  ;;  %v21468_v4 = vand.u32 4294901760, %v17964_v18  ;;  %14445 = vmatpush1.bf16.msra.mxu1 %v17971_v38  ;;  %14255 = vmatprep.subr.bf16.mxu0 %v17988_v59  ;;  %v21471_v0 = vand.u32 4294901760, %v17976_v61 }
  0x3b   :  { %21447 = vst [vmem:[#allocation38_spill] sm:$0xff] %v17978_v46  ;;  %21448 = vst [vmem:[#allocation39_spill] sm:$0xff] %v17980_v51  ;;  %v18016_v23 = vld [vmem:[#allocation7 + $0x1a8] sm:$0xff]  ;;  %v18018_v7 = vld [vmem:[#allocation7 + $0x198] sm:$0xff]  ;;  %v18024_v60 = vpack.c.bf16 %v21463_v54, %v21462_v24  ;;  %v21474_v5 = vand.u32 4294901760, %v17980_v51  ;;  %v21475_v53 = vand.u32 4294901760, %v17993_v58  ;;  %14447 = vmatprep.subr.bf16.mxu1 %v18004_v40 }
  0x3c   :  { %21451 = vst [vmem:[#allocation40_spill] sm:$0xff] %v17988_v59  ;;  %21452 = vst [vmem:[#allocation41_spill] sm:$0xff] %v17993_v58  ;;  %v18029_v47 = vld [vmem:[#allocation7 + $0x1b8] sm:$0xff]  ;;  %v18031_v30 = vld [vmem:[#allocation7 + $0x180] sm:$0xff]  ;;  %v18040_v24 = vpack.c.bf16 %v21468_v4, %v21467_v10  ;;  %v21472_v4 = vand.u32 4294901760, %v17978_v46  ;;  %v21477_v59 = vand.u32 4294901760, %v17995_v44 }
  0x3d   :  { %21453 = vst [vmem:[#allocation42_spill] sm:$0xff] %v17995_v44  ;;  %21454 = vst [vmem:[#allocation43_spill] sm:$0xff] %v17997_v45  ;;  %v18033_v11 = vld [vmem:[#allocation7 + $0x1a0] sm:$0xff]  ;;  %v18045_v16 = vld [vmem:[#allocation7 + $0x190] sm:$0xff]  ;;  %v18063_v54 = vpack.c.bf16 %v21475_v53, %v21474_v5  ;;  %v21482_v44 = vand.u32 4294901760, %v18016_v23  ;;  %14257 = vmatpush1.bf16.msra.mxu0 %v18010_v52 }
  0x3e   :  { %21457 = vst [vmem:[#allocation44_spill] sm:$0xff] %v18004_v40  ;;  %21460 = vst [vmem:[#allocation45_spill] sm:$0xff] %v18010_v52  ;;  %v18047_v12 = vld [vmem:[#allocation7 + $0x1b0] sm:$0xff]  ;;  %v18049_v20 = vld [vmem:[#allocation7 + $0x1c8] sm:$0xff]  ;;  %v18057_v10 = vpack.c.bf16 %v21472_v4, %v21471_v0  ;;  %v21478_v0 = vand.u32 4294901760, %v17997_v45  ;;  %v21481_v40 = vand.u32 4294901760, %v18014_v37  ;;  %14449 = vmatpush1.bf16.msra.mxu1 %v18024_v60  ;;  %14259 = vmatprep.subr.bf16.mxu0 %v18040_v24 }
  0x3f   :  { %21461 = vst [vmem:[#allocation46_spill] sm:$0xff] %v18014_v37  ;;  %21464 = vst [vmem:[#allocation47_spill] sm:$0xff] %v18024_v60  ;;  %v18067_v25 = vld [vmem:[#allocation7 + $0x1e8] sm:$0xff]  ;;  %v18069_v38 = vld [vmem:[#allocation7 + $0x1d8] sm:$0xff]  ;;  %v21484_v45 = vand.u32 4294901760, %v18018_v7  ;;  %v21485_v37 = vand.u32 4294901760, %v18029_v47 }
  0x40   :  { %21465 = vst [vmem:[#allocation48_spill] sm:$0xff] %v18029_v47  ;;  %21466 = vst [vmem:[#allocation49_spill] sm:$0xff] %v18033_v11  ;;  %v18076_v4 = vpack.c.bf16 %v21478_v0, %v21477_v59  ;;  %v18081_v18 = vld [vmem:[#allocation7 + $0x1f8] sm:$0xff]  ;;  %v18083_v17 = vld [vmem:[#allocation7 + $0x1c0] sm:$0xff]  ;;  %v18091_v46 = vpack.c.bf16 %v21482_v44, %v21481_v40  ;;  %v21487_v44 = vand.u32 4294901760, %v18031_v30  ;;  %v21488_v40 = vand.u32 4294901760, %v18033_v11  ;;  %14451 = vmatprep.subr.bf16.mxu1 %v18057_v10 }
  0x41   :  { %21469 = vst [vmem:[#allocation50_spill] sm:$0xff] %v18040_v24  ;;  %21470 = vst [vmem:[#allocation51_spill] sm:$0xff] %v18049_v20  ;;  %v18085_v51 = vld [vmem:[#allocation7 + $0x1e0] sm:$0xff]  ;;  %v18096_v58 = vld [vmem:[#allocation7 + $0x1d0] sm:$0xff]  ;;  %v18105_v61 = vpack.c.bf16 %v21485_v37, %v21484_v45  ;;  %v21068_v5 = vand.u32 4294901760, %v18067_v25  ;;  %v21490_v52 = vand.u32 4294901760, %v18045_v16  ;;  %14261 = vmatpush1.bf16.msra.mxu0 %v18063_v54 }
  0x42   :  { %21473 = vst [vmem:[#allocation52_spill] sm:$0xff] %v18057_v10  ;;  %21476 = vst [vmem:[#allocation53_spill] sm:$0xff] %v18063_v54  ;;  %v18098_v53 = vld [vmem:[#allocation7 + $0x1f0] sm:$0xff]  ;;  %v18111_v59 = vpack.c.bf16 %v21488_v40, %v21487_v44  ;;  %v21491_v47 = vand.u32 4294901760, %v18047_v12  ;;  %v53_v40 = vld [vmem:[%s20952_s3] sm:$0xff]  ;;  %v21493_v0 = vand.u32 4294901760, %v18049_v20  ;;  %14453 = vmatpush1.bf16.msra.mxu1 %v18076_v4  ;;  %14263 = vmatprep.subr.bf16.mxu0 %v18091_v46 }
  0x43   :  { %21479 = vst [vmem:[#allocation54_spill] sm:$0xff] %v18076_v4  ;;  %21480 = vst [vmem:[#allocation55_spill] sm:$0xff] %v18083_v17  ;;  %v21495_v11 = vand.u32 4294901760, %v17747_v1  ;;  %v21496_v45 = vand.u32 4294901760, %v18069_v38  ;;  %v21497_v24 = vand.u32 4294901760, %v18081_v18  ;;  %v21499_v20 = vand.u32 4294901760, %v18083_v17  ;;  %14455 = vmatprep.subr.bf16.mxu1 %v18105_v61 }
  0x44   :  { %21483 = vst [vmem:[#allocation56_spill] sm:$0xff] %v18091_v46  ;;  %21486 = vst [vmem:[#allocation57_spill] sm:$0xff] %v18105_v61  ;;  %v18121_v37 = vpack.c.bf16 %v21491_v47, %v21490_v52  ;;  %v18134_v60 = vpack.c.bf16 %v21068_v5, %v21493_v0  ;;  %v21500_v0 = vand.u32 4294901760, %v18085_v51  ;;  %v21502_v47 = vand.u32 4294901760, %v17749_v2 }
  0x45   :  { %21489 = vst [vmem:[#allocation58_spill] sm:$0xff] %v18111_v59  ;;  %v18141_v44 = vsub.f32 %v17747_v1, %v21495_v11  ;;  %v18147_v10 = vpack.c.bf16 %v21497_v24, %v21496_v45  ;;  %v21503_v1 = vand.u32 4294901760, %v17751_v3  ;;  %v21505_v24 = vand.u32 4294901760, %v18096_v58  ;;  %14265 = vmatpush1.bf16.msra.mxu0 %v18111_v59 }
  0x46   :  { %21492 = vst [vmem:[#allocation59_spill] sm:$0xff] %v18121_v37  ;;  %21494 = vst [vmem:[#allocation60_spill] sm:$0xff] %v18134_v60  ;;  %v18153_v5 = vpack.c.bf16 %v21500_v0, %v21499_v20  ;;  %v18158_v52 = vsub.f32 %v17749_v2, %v21502_v47  ;;  %v21506_v45 = vand.u32 4294901760, %v18098_v53  ;;  %v21508_v0 = vand.u32 4294901760, %v17755_v6  ;;  %14457 = vmatpush1.bf16.msra.mxu1 %v18121_v37 }
  0x47   :  { %21498 = vst [vmem:[#allocation61_spill] sm:$0xff] %v18147_v10  ;;  %v18163_v11 = vsub.f32 %v17751_v3, %v21503_v1  ;;  %v18178_v47 = vand.u32 4294901760, %v53_v40  ;;  %v21512_v20 = vand.u32 4294901760, %v17760_v9  ;;  %v21515_v46 = vand.u32 4294901760, %v17765_v13  ;;  %14267 = vmatprep.subr.bf16.mxu0 %v18134_v60  ;;  %14459 = vmatprep.subr.bf16.mxu1 %v18147_v10 }
  0x48   :  { %21501 = vst [vmem:[#allocation62_spill] sm:$0xff] %v18153_v5  ;;  %v18170_v17 = vpack.c.bf16 %v21506_v45, %v21505_v24  ;;  %v18176_v2 = vsub.f32 %v17755_v6, %v21508_v0  ;;  %v21511_v24 = vand.u32 4294901760, %v17758_v8  ;;  %v21513_v0 = vand.u32 4294901760, %v18141_v44 }
  0x49   :  { %21504 = vst [vmem:[#allocation63_spill] sm:$0xff] %v18163_v11  ;;  %21510 = vst [vmem:[#allocation66_spill] sm:$0xff] %v18178_v47  ;;  %v18192_v6 = vsub.f32 %v17760_v9, %v21512_v20  ;;  %v18200_v1 = vsub.f32 %v53_v40, %v18178_v47  ;;  %v21517_v20 = vand.u32 4294901760, %v18163_v11  ;;  %14269 = vmatpush1.bf16.msra.mxu0 %v18153_v5 }
  0x4a   :  { %21507 = vst [vmem:[#allocation64_spill] sm:$0xff] %v18170_v17  ;;  %21509 = vst [vmem:[#allocation65_spill] sm:$0xff] %v18176_v2  ;;  %v18187_v45 = vsub.f32 %v17758_v8, %v21511_v24  ;;  %v244_v4 = vsub.f32 %v18141_v44, %v21513_v0  ;;  %v18205_v8 = vsub.f32 %v17765_v13, %v21515_v46  ;;  %v21516_v24 = vand.u32 4294901760, %v18158_v52 }
  0x4b   :  { %21514 = vst [vmem:[#allocation67_spill] sm:$0xff] %v18200_v1  ;;  %v1099_v61 = vsub.f32 %v18163_v11, %v21517_v20  ;;  %v21518_v54 = vand.u32 4294901760, %v18176_v2  ;;  %v18220_v46 = vand.u32 4294901760, %v18200_v1  ;;  %14461 = vmatpush1.bf16.msra.mxu1 %v18170_v17  ;;  %v21545_v17 = vand.u32 4294901760, %v17820_v36 }
  0x4c   :  { %v256_v9 = vsub.f32 %v18158_v52, %v21516_v24  ;;  %v245_v40 = vand.u32 4294901760, %v244_v4  ;;  %v21520_v3 = vand.u32 4294901760, %v18187_v45  ;;  %v21521_v4 = vand.u32 4294901760, %v18192_v6 }
  0x4d   :  { %v1111_v13 = vsub.f32 %v18176_v2, %v21518_v54  ;;  %21519 = vst [vmem:[#allocation68_spill] sm:$0xff] %v18220_v46  ;;  %v1100_v0 = vand.u32 4294901760, %v1099_v61  ;;  %v233_v24 = vsub.f32 %v18200_v1, %v18220_v46  ;;  %v21522_v37 = vand.u32 4294901760, %v18205_v8 }
  0x4e   :  { %v257_v20 = vand.u32 4294901760, %v256_v9  ;;  %v250_v59 = vsub.f32 %v18187_v45, %v21520_v3  ;;  %v262_v47 = vsub.f32 %v18192_v6, %v21521_v4  ;;  %v21523_v61 = vand.u32 4294901760, %v17767_v14 }
  0x4f   :  { %v1112_v54 = vand.u32 4294901760, %v1111_v13  ;;  %v1105_v60 = vsub.f32 %v18205_v8, %v21522_v37  ;;  %v21525_v4 = vand.u32 4294901760, %v17769_v15  ;;  %v234_v10 = vand.u32 4294901760, %v233_v24 }
  0x50   :  { %v18240_v9 = vsub.f32 %v17767_v14, %v21523_v61  ;;  %v18242_v3 = vpack.c.bf16 %v257_v20, %v245_v40  ;;  %v251_v2 = vand.u32 4294901760, %v250_v59  ;;  %v263_v11 = vand.u32 4294901760, %v262_v47 }
  0x51   :  { %v18247_v13 = vsub.f32 %v17769_v15, %v21525_v4  ;;  %v18250_v46 = vpack.c.bf16 %v1112_v54, %v1100_v0  ;;  %v1106_v37 = vand.u32 4294901760, %v1105_v60  ;;  %v21528_v47 = vand.u32 4294901760, %v17779_v19  ;;  %235 = vmatmul.mubr.f32.vlgmr.msra.gmra.mrb[0].mxu0 %v234_v10  ;;  %1090 = vmatmul.mubr.f32.vlgmr.msra.gmra.mrb[0].mxu1 %v234_v10 }
  0x52   :  { %21524 = vst [vmem:[#allocation69_spill] sm:$0xff] %v18242_v3  ;;  %v21097_v1 = vand.u32 4294901760, %v18240_v9  ;;  %14271 = vmatprep.subr.bf16.mxu0 %v18242_v3  ;;  %v18255_v14 = vpack.c.bf16 %v263_v11, %v251_v2  ;;  %v21529_v0 = vand.u32 4294901760, %v17782_v21  ;;  %v21531_v11 = vand.u32 4294901760, %v17784_v22 }
  0x53   :  { %21526 = vst [vmem:[#allocation70_spill] sm:$0xff] %v18250_v46  ;;  %v21100_v59 = vand.u32 4294901760, %v18247_v13  ;;  %v18261_v15 = vsub.f32 %v17779_v19, %v21528_v47  ;;  %14463 = vmatprep.subr.bf16.mxu1 %v18250_v46  ;;  %v21533_v24 = vand.u32 4294901760, %v17800_v27  ;;  %v21535_v20 = vand.u32 4294901760, %v17802_v28 }
  0x54   :  { %21527 = vst [vmem:[#allocation71_spill] sm:$0xff] %v18255_v14  ;;  %v18266_v40 = vsub.f32 %v17782_v21, %v21529_v0  ;;  %v1117_v60 = vsub.f32 %v18240_v9, %v21097_v1  ;;  %v18275_v2 = vsub.f32 %v17784_v22, %v21531_v11  ;;  %v21537_v4 = vand.u32 4294901760, %v17804_v29  ;;  %14273 = vmatpush1.bf16.msra.mxu0 %v18255_v14 }
  0x55   :  { %v18280_v19 = vsub.f32 %v17800_v27, %v21533_v24  ;;  %v18285_v21 = vsub.f32 %v17802_v28, %v21535_v20  ;;  %v268_v54 = vsub.f32 %v18247_v13, %v21100_v59  ;;  %v21099_v61 = vand.u32 4294901760, %v18261_v15 }
  0x56   :  { %21530 = vst [vmem:[#allocation72_spill] sm:$0xff] %v18266_v40  ;;  %21532 = vst [vmem:[#allocation73_spill] sm:$0xff] %v18275_v2  ;;  %v21098_v22 = vand.u32 4294901760, %v18266_v40  ;;  %v18295_v47 = vsub.f32 %v17804_v29, %v21537_v4  ;;  %v1118_v27 = vand.u32 4294901760, %v1117_v60  ;;  %v21103_v28 = vand.u32 4294901760, %v18275_v2 }
  0x57   :  { %21534 = vst [vmem:[#allocation74_spill] sm:$0xff] %v18280_v19  ;;  %21536 = vst [vmem:[#allocation75_spill] sm:$0xff] %v18285_v21  ;;  %v21106_v0 = vand.u32 4294901760, %v18280_v19  ;;  %v21109_v11 = vand.u32 4294901760, %v18285_v21  ;;  %v269_v24 = vand.u32 4294901760, %v268_v54  ;;  %v280_v20 = vsub.f32 %v18261_v15, %v21099_v61 }
  0x58   :  { %21538 = vst [vmem:[#allocation76_spill] sm:$0xff] %v18295_v47  ;;  %v1123_v29 = vsub.f32 %v18266_v40, %v21098_v22  ;;  %v21110_v4 = vand.u32 4294901760, %v18295_v47  ;;  %v21539_v1 = vmov 0.0   ;;  %v18310_v10 = vpack.c.bf16 %v1118_v27, %v1106_v37 }
  0x59   :  { %465 = vmatprep.mubr.f32.mxu0 %v21539_v1  ;;  %1320 = vmatprep.mubr.f32.mxu1 %v21539_v1  ;;  %v1135_v60 = vsub.f32 %v18275_v2, %v21103_v28  ;;  %v274_v54 = vsub.f32 %v18280_v19, %v21106_v0  ;;  %v286_v22 = vsub.f32 %v18285_v21, %v21109_v11  ;;  %v281_v61 = vand.u32 4294901760, %v280_v20 }
  0x5a   :  { %21540 = vst [vmem:[#allocation77_spill] sm:$0xff] %v18310_v10  ;;  %v1124_v59 = vand.u32 4294901760, %v1123_v29  ;;  %v1129_v14 = vsub.f32 %v18295_v47, %v21110_v4  ;;  %v21541_v37 = vand.u32 4294901760, %v17816_v34  ;;  %14465 = vmatpush1.bf16.msra.mxu1 %v18310_v10  ;;  %v21543_v3 = vand.u32 4294901760, %v17818_v35 }
  0x5b   :  { %v1136_v28 = vand.u32 4294901760, %v1135_v60  ;;  %v275_v46 = vand.u32 4294901760, %v274_v54  ;;  %v287_v0 = vand.u32 4294901760, %v286_v22  ;;  %v18335_v20 = vpack.c.bf16 %v281_v61, %v269_v24 }
  0x5c   :  { %v18327_v27 = vsub.f32 %v17816_v34, %v21541_v37  ;;  %v18333_v11 = vsub.f32 %v17818_v35, %v21543_v3  ;;  %v1130_v29 = vand.u32 4294901760, %v1129_v14  ;;  %v18341_v34 = vsub.f32 %v17820_v36, %v21545_v17 }
  0x5d   :  { %21544 = vst [vmem:[#allocation79_spill] sm:$0xff] %v18335_v20  ;;  %v18343_v37 = vpack.c.bf16 %v1136_v28, %v1124_v59  ;;  %v18345_v60 = vpack.c.bf16 %v287_v0, %v275_v46  ;;  %v21548_v54 = vand.u32 4294901760, %v17833_v41  ;;  %14275 = vmatprep.subr.bf16.mxu0 %v18335_v20  ;;  %v21549_v36 = vand.u32 4294901760, %v17835_v42 }
  0x5e   :  { %21542 = vst [vmem:[#allocation78_spill] sm:$0xff] %v18327_v27  ;;  %v21113_v4 = vand.u32 4294901760, %v18327_v27  ;;  %v21114_v22 = vand.u32 4294901760, %v18333_v11  ;;  %v21115_v17 = vand.u32 4294901760, %v18341_v34  ;;  %v21550_v14 = vand.u32 4294901760, %v17837_v43 }
  0x5f   :  { %21546 = vst [vmem:[#allocation80_spill] sm:$0xff] %v18343_v37  ;;  %21547 = vst [vmem:[#allocation81_spill] sm:$0xff] %v18345_v60  ;;  %v18351_v35 = vsub.f32 %v17833_v41, %v21548_v54  ;;  %v18361_v46 = vsub.f32 %v17835_v42, %v21549_v36  ;;  %14467 = vmatprep.subr.bf16.mxu1 %v18343_v37  ;;  %14277 = vmatpush1.bf16.msra.mxu0 %v18345_v60  ;;  %v21551_v28 = vand.u32 4294901760, %v17854_v48 }
  0x60   :  { %v1141_v3 = vsub.f32 %v18327_v27, %v21113_v4  ;;  %v18366_v59 = vsub.f32 %v17837_v43, %v21550_v14  ;;  %v292_v41 = vsub.f32 %v18333_v11, %v21114_v22  ;;  %v21552_v0 = vand.u32 4294901760, %v17856_v49 }
  0x61   :  { %v21116_v61 = vand.u32 4294901760, %v18351_v35  ;;  %v18377_v42 = vsub.f32 %v17854_v48, %v21551_v28  ;;  %v304_v54 = vsub.f32 %v18341_v34, %v21115_v17  ;;  %v21119_v36 = vand.u32 4294901760, %v18361_v46 }
  0x62   :  { %v18382_v43 = vsub.f32 %v17856_v49, %v21552_v0  ;;  %v1142_v24 = vand.u32 4294901760, %v1141_v3  ;;  %v21120_v14 = vand.u32 4294901760, %v18366_v59  ;;  %v293_v4 = vand.u32 4294901760, %v292_v41 }
  0x63   :  { %v1147_v48 = vsub.f32 %v18351_v35, %v21116_v61  ;;  %v21123_v28 = vand.u32 4294901760, %v18377_v42  ;;  %v305_v3 = vand.u32 4294901760, %v304_v54  ;;  %v1159_v0 = vsub.f32 %v18361_v46, %v21119_v36 }
  0x64   :  { %v21126_v22 = vand.u32 4294901760, %v18382_v43  ;;  %v18394_v49 = vpack.c.bf16 %v1142_v24, %v1130_v29  ;;  %v298_v17 = vsub.f32 %v18366_v59, %v21120_v14  ;;  %v21554_v29 = vand.u32 4294901760, %v17858_v50 }
  0x65   :  { %v1148_v41 = vand.u32 4294901760, %v1147_v48  ;;  %v310_v61 = vsub.f32 %v18377_v42, %v21123_v28  ;;  %v18414_v54 = vpack.c.bf16 %v305_v3, %v293_v4  ;;  %v1160_v36 = vand.u32 4294901760, %v1159_v0 }
  0x66   :  { %21553 = vst [vmem:[#allocation82_spill] sm:$0xff] %v18394_v49  ;;  %v1153_v60 = vsub.f32 %v18382_v43, %v21126_v22  ;;  %v18411_v24 = vsub.f32 %v17858_v50, %v21554_v29  ;;  %14469 = vmatpush1.bf16.msra.mxu1 %v18394_v49  ;;  %v299_v14 = vand.u32 4294901760, %v298_v17  ;;  %v21556_v48 = vand.u32 4294901760, %v17870_v55 }
  0x67   :  { %21555 = vst [vmem:[#allocation83_spill] sm:$0xff] %v18414_v54  ;;  %v311_v28 = vand.u32 4294901760, %v310_v61  ;;  %v21557_v10 = vand.u32 4294901760, %v17872_v56  ;;  %14279 = vmatprep.subr.bf16.mxu0 %v18414_v54  ;;  %v18428_v4 = vpack.c.bf16 %v1160_v36, %v1148_v41  ;;  %v21559_v3 = vand.u32 4294901760, %v17874_v57  ;;  %v21587_v54 = vld [vmem:[#allocation30_spill] sm:$0xff] }
  0x68   :  { %v18419_v37 = vsub.f32 %v17870_v55, %v21556_v48  ;;  %v1154_v20 = vand.u32 4294901760, %v1153_v60  ;;  %v21130_v22 = vand.u32 4294901760, %v18411_v24  ;;  %v21560_v60 = vand.u32 4294901760, %v17886_v62 }
  0x69   :  { %v18425_v50 = vsub.f32 %v17872_v56, %v21557_v10  ;;  %21558 = vst [vmem:[#allocation84_spill] sm:$0xff] %v18428_v4  ;;  %v18434_v55 = vsub.f32 %v17874_v57, %v21559_v3  ;;  %v18441_v0 = vpack.c.bf16 %v311_v28, %v299_v14  ;;  %v21562_v36 = vand.u32 4294901760, %v17888_v63  ;;  %14471 = vmatprep.subr.bf16.mxu1 %v18428_v4 }
  0x6a   :  { %v21129_v17 = vand.u32 4294901760, %v18419_v37  ;;  %v18439_v61 = vsub.f32 %v17886_v62, %v21560_v60  ;;  %v1165_v56 = vsub.f32 %v18411_v24, %v21130_v22  ;;  %v21563_v28 = vand.u32 4294901760, %v17890_v39 }
  0x6b   :  { %21561 = vst [vmem:[#allocation85_spill] sm:$0xff] %v18441_v0  ;;  %v21131_v10 = vand.u32 4294901760, %v18425_v50  ;;  %v18450_v41 = vsub.f32 %v17888_v63, %v21562_v36  ;;  %v21134_v62 = vand.u32 4294901760, %v18434_v55  ;;  %14281 = vmatpush1.bf16.msra.mxu0 %v18441_v0  ;;  %v21564_v60 = vand.u32 4294901760, %v17907_v33 }
  0x6c   :  { %v316_v57 = vsub.f32 %v18419_v37, %v21129_v17  ;;  %v21137_v14 = vand.u32 4294901760, %v18439_v61  ;;  %v18461_v29 = vsub.f32 %v17890_v39, %v21563_v28  ;;  %v1166_v48 = vand.u32 4294901760, %v1165_v56 }
  0x6d   :  { %v328_v63 = vsub.f32 %v18425_v50, %v21131_v10  ;;  %v21139_v3 = vand.u32 4294901760, %v18450_v41  ;;  %v18471_v36 = vsub.f32 %v17907_v33, %v21564_v60  ;;  %v1171_v39 = vsub.f32 %v18434_v55, %v21134_v62 }
  0x6e   :  { %v317_v17 = vand.u32 4294901760, %v316_v57  ;;  %v1183_v56 = vsub.f32 %v18439_v61, %v21137_v14  ;;  %v21138_v28 = vand.u32 4294901760, %v18461_v29  ;;  %v18480_v22 = vpack.c.bf16 %v1166_v48, %v1154_v20 }
  0x6f   :  { %21565 = vst [vmem:[#allocation86_spill] sm:$0xff] %v18471_v36  ;;  %v329_v10 = vand.u32 4294901760, %v328_v63  ;;  %v322_v0 = vsub.f32 %v18450_v41, %v21139_v3  ;;  %v21140_v33 = vand.u32 4294901760, %v18471_v36  ;;  %v1172_v57 = vand.u32 4294901760, %v1171_v39 }
  0x70   :  { %21566 = vst [vmem:[#allocation87_spill] sm:$0xff] %v18480_v22  ;;  %v1184_v60 = vand.u32 4294901760, %v1183_v56  ;;  %v334_v62 = vsub.f32 %v18461_v29, %v21138_v28  ;;  %v21567_v4 = vand.u32 4294901760, %v17909_v32  ;;  %14473 = vmatpush1.bf16.msra.mxu1 %v18480_v22  ;;  %v21570_v39 = vand.u32 4294901760, %v17911_v31 }
  0x71   :  { %v18495_v20 = vpack.c.bf16 %v329_v10, %v317_v17  ;;  %v323_v48 = vand.u32 4294901760, %v322_v0  ;;  %v1177_v63 = vsub.f32 %v18471_v36, %v21140_v33  ;;  %v21573_v33 = vld [vmem:[#allocation25_spill] sm:$0xff] }
  0x72   :  { %v18492_v14 = vsub.f32 %v17909_v32, %v21567_v4  ;;  %v18503_v56 = vsub.f32 %v17911_v31, %v21570_v39  ;;  %v18505_v28 = vpack.c.bf16 %v1184_v60, %v1172_v57  ;;  %v335_v3 = vand.u32 4294901760, %v334_v62  ;;  %v21576_v57 = vld [vmem:[#allocation26_spill] sm:$0xff] }
  0x73   :  { %21569 = vst [vmem:[#allocation89_spill] sm:$0xff] %v18495_v20  ;;  %v21572_v4 = vand.u32 4294901760, %v17924_v26  ;;  %14283 = vmatprep.subr.bf16.mxu0 %v18495_v20  ;;  %v1178_v0 = vand.u32 4294901760, %v1177_v63  ;;  %v21574_v22 = vand.u32 4294901760, %v21573_v33  ;;  %v21577_v60 = vand.u32 4294901760, %v21576_v57 }
  0x74   :  { %21568 = vst [vmem:[#allocation88_spill] sm:$0xff] %v18492_v14  ;;  %21571 = vst [vmem:[#allocation90_spill] sm:$0xff] %v18505_v28  ;;  %v21147_v32 = vand.u32 4294901760, %v18492_v14  ;;  %14475 = vmatprep.subr.bf16.mxu1 %v18505_v28  ;;  %v18526_v39 = vpack.c.bf16 %v335_v3, %v323_v48  ;;  %v21584_v48 = vld [vmem:[#allocation29_spill] sm:$0xff] }
  0x75   :  { %v18511_v17 = vsub.f32 %v17924_v26, %v21572_v4  ;;  %v18518_v31 = vsub.f32 %v21573_v33, %v21574_v22  ;;  %v18523_v62 = vsub.f32 %v21576_v57, %v21577_v60  ;;  %v21580_v4 = vld [vmem:[#allocation28_spill] sm:$0xff]  ;;  %v21583_v33 = vand.u32 4294901760, %v18503_v56 }
  0x76   :  { %21579 = vst [vmem:[#allocation91_spill] sm:$0xff] %v18526_v39  ;;  %v1189_v26 = vsub.f32 %v18492_v14, %v21147_v32  ;;  %v21581_v10 = vand.u32 4294901760, %v21580_v4  ;;  %v21585_v28 = vand.u32 4294901760, %v21584_v48  ;;  %14285 = vmatpush1.bf16.msra.mxu0 %v18526_v39 }
  0x77   :  { %21575 = vst [vmem:[#allocation25_spill] sm:$0xff] %v18518_v31  ;;  %21578 = vst [vmem:[#allocation26_spill] sm:$0xff] %v18523_v62  ;;  %v21156_v63 = vand.u32 4294901760, %v18511_v17  ;;  %v340_v57 = vsub.f32 %v18503_v56, %v21583_v33  ;;  %v21588_v33 = vand.u32 4294901760, %v21587_v54  ;;  %v21590_v49 = vand.u32 4294901760, %v18518_v31 }
  0x78   :  { %v18535_v22 = vsub.f32 %v21580_v4, %v21581_v10  ;;  %v18545_v20 = vsub.f32 %v21584_v48, %v21585_v28  ;;  %v1190_v32 = vand.u32 4294901760, %v1189_v26  ;;  %v21591_v48 = vand.u32 4294901760, %v18523_v62 }
  0x79   :  { %v352_v10 = vsub.f32 %v18511_v17, %v21156_v63  ;;  %v18555_v60 = vsub.f32 %v21587_v54, %v21588_v33  ;;  %v341_v3 = vand.u32 4294901760, %v340_v57  ;;  %v1195_v28 = vsub.f32 %v18518_v31, %v21590_v49  ;;  %v21593_v31 = vld [vmem:[#allocation33_spill] sm:$0xff] }
  0x7a   :  { %21582 = vst [vmem:[#allocation28_spill] sm:$0xff] %v18535_v22  ;;  %21586 = vst [vmem:[#allocation29_spill] sm:$0xff] %v18545_v20  ;;  %v21163_v4 = vand.u32 4294901760, %v18535_v22  ;;  %v1207_v26 = vsub.f32 %v18523_v62, %v21591_v48  ;;  %v21164_v39 = vand.u32 4294901760, %v18545_v20  ;;  %v18564_v5 = vpack.c.bf16 %v1190_v32, %v1178_v0 }
  0x7b   :  { %21589 = vst [vmem:[#allocation30_spill] sm:$0xff] %v18555_v60  ;;  %v353_v63 = vand.u32 4294901760, %v352_v10  ;;  %v21169_v54 = vand.u32 4294901760, %v18555_v60  ;;  %v1196_v57 = vand.u32 4294901760, %v1195_v28  ;;  %v21594_v36 = vand.u32 4294901760, %v21593_v31  ;;  %v21597_v28 = vld [vmem:[#allocation34_spill] sm:$0xff] }
  0x7c   :  { %21592 = vst [vmem:[#allocation92_spill] sm:$0xff] %v18564_v5  ;;  %v346_v14 = vsub.f32 %v18535_v22, %v21163_v4  ;;  %v1208_v33 = vand.u32 4294901760, %v1207_v26  ;;  %v358_v49 = vsub.f32 %v18545_v20, %v21164_v39  ;;  %14477 = vmatpush1.bf16.msra.mxu1 %v18564_v5  ;;  %v21598_v26 = vand.u32 4294901760, %v21597_v28 }
  0x7d   :  { %v18576_v48 = vsub.f32 %v21593_v31, %v21594_v36  ;;  %v18579_v32 = vpack.c.bf16 %v353_v63, %v341_v3  ;;  %v1201_v10 = vsub.f32 %v18555_v60, %v21169_v54  ;;  %v21601_v31 = vld [vmem:[#allocation35_spill] sm:$0xff]  ;;  %v21604_v54 = vld [vmem:[#allocation37_spill] sm:$0xff] }
  0x7e   :  { %v347_v0 = vand.u32 4294901760, %v346_v14  ;;  %v18587_v4 = vsub.f32 %v21597_v28, %v21598_v26  ;;  %v18589_v39 = vpack.c.bf16 %v1208_v33, %v1196_v57  ;;  %v359_v20 = vand.u32 4294901760, %v358_v49  ;;  %v21607_v57 = vld [vmem:[#allocation38_spill] sm:$0xff] }
  0x7f   :  { %21595 = vst [vmem:[#allocation33_spill] sm:$0xff] %v18576_v48  ;;  %21596 = vst [vmem:[#allocation93_spill] sm:$0xff] %v18579_v32  ;;  %v21176_v36 = vand.u32 4294901760, %v18576_v48  ;;  %v21602_v22 = vand.u32 4294901760, %v21601_v31  ;;  %14287 = vmatprep.subr.bf16.mxu0 %v18579_v32  ;;  %v1202_v14 = vand.u32 4294901760, %v1201_v10  ;;  %v21605_v5 = vand.u32 4294901760, %v21604_v54 }
  0x80   :  { %21599 = vst [vmem:[#allocation34_spill] sm:$0xff] %v18587_v4  ;;  %21600 = vst [vmem:[#allocation94_spill] sm:$0xff] %v18589_v39  ;;  %v21608_v33 = vand.u32 4294901760, %v21607_v57  ;;  %14479 = vmatprep.subr.bf16.mxu1 %v18589_v39  ;;  %v18610_v26 = vpack.c.bf16 %v359_v20, %v347_v0  ;;  %v21613_v0 = vld [vmem:[#allocation41_spill] sm:$0xff] }
  0x81   :  { %v18595_v63 = vsub.f32 %v21601_v31, %v21602_v22  ;;  %v18602_v28 = vsub.f32 %v21604_v54, %v21605_v5  ;;  %v1213_v22 = vsub.f32 %v18576_v48, %v21176_v36  ;;  %v21610_v31 = vld [vmem:[#allocation39_spill] sm:$0xff]  ;;  %v21612_v54 = vand.u32 4294901760, %v18587_v4  ;;  %v21616_v48 = vld [vmem:[#allocation42_spill] sm:$0xff] }
  0x82   :  { %v18607_v49 = vsub.f32 %v21607_v57, %v21608_v33  ;;  %21609 = vst [vmem:[#allocation38_spill] sm:$0xff] %v18610_v26  ;;  %v21611_v3 = vand.u32 4294901760, %v21610_v31  ;;  %v21614_v39 = vand.u32 4294901760, %v21613_v0  ;;  %14289 = vmatpush1.bf16.msra.mxu0 %v18610_v26 }
  0x83   :  { %21603 = vst [vmem:[#allocation35_spill] sm:$0xff] %v18595_v63  ;;  %21606 = vst [vmem:[#allocation37_spill] sm:$0xff] %v18602_v28  ;;  %v21185_v10 = vand.u32 4294901760, %v18595_v63  ;;  %v364_v57 = vsub.f32 %v18587_v4, %v21612_v54  ;;  %v1214_v36 = vand.u32 4294901760, %v1213_v22  ;;  %v21617_v54 = vand.u32 4294901760, %v21616_v48 }
  0x84   :  { %v18619_v5 = vsub.f32 %v21610_v31, %v21611_v3  ;;  %v18629_v32 = vsub.f32 %v21613_v0, %v21614_v39  ;;  %v21618_v4 = vand.u32 4294901760, %v18602_v28  ;;  %v21619_v0 = vand.u32 4294901760, %v18607_v49 }
  0x85   :  { %v376_v3 = vsub.f32 %v18595_v63, %v21185_v10  ;;  %v18639_v33 = vsub.f32 %v21616_v48, %v21617_v54  ;;  %v365_v20 = vand.u32 4294901760, %v364_v57  ;;  %v18648_v60 = vpack.c.bf16 %v1214_v36, %v1202_v14 }
  0x86   :  { %21615 = vst [vmem:[#allocation39_spill] sm:$0xff] %v18629_v32  ;;  %v21192_v31 = vand.u32 4294901760, %v18619_v5  ;;  %v1219_v39 = vsub.f32 %v18602_v28, %v21618_v4  ;;  %v1231_v22 = vsub.f32 %v18607_v49, %v21619_v0  ;;  %v21193_v26 = vand.u32 4294901760, %v18629_v32  ;;  %v21621_v28 = vld [vmem:[#allocation43_spill] sm:$0xff] }
  0x87   :  { %21620 = vst [vmem:[#allocation41_spill] sm:$0xff] %v18648_v60  ;;  %v377_v10 = vand.u32 4294901760, %v376_v3  ;;  %v21196_v48 = vand.u32 4294901760, %v18639_v33  ;;  %v21622_v62 = vand.u32 4294901760, %v21621_v28  ;;  %14481 = vmatpush1.bf16.msra.mxu1 %v18648_v60 }
  0x88   :  { %v370_v63 = vsub.f32 %v18619_v5, %v21192_v31  ;;  %v1220_v57 = vand.u32 4294901760, %v1219_v39  ;;  %v1232_v54 = vand.u32 4294901760, %v1231_v22  ;;  %v382_v4 = vsub.f32 %v18629_v32, %v21193_v26  ;;  %v21624_v39 = vld [vmem:[#allocation46_spill] sm:$0xff] }
  0x89   :  { %v18660_v0 = vsub.f32 %v21621_v28, %v21622_v62  ;;  %v18663_v36 = vpack.c.bf16 %v377_v10, %v365_v20  ;;  %v1225_v3 = vsub.f32 %v18639_v33, %v21196_v48  ;;  %v21625_v22 = vand.u32 4294901760, %v21624_v39 }
  0x8a   :  { %v371_v14 = vand.u32 4294901760, %v370_v63  ;;  %v18673_v26 = vpack.c.bf16 %v1232_v54, %v1220_v57  ;;  %v383_v32 = vand.u32 4294901760, %v382_v4  ;;  %v21627_v28 = vand.u32 4294901760, %v18016_v23  ;;  %v21631_v57 = vld [vmem:[#allocation48_spill] sm:$0xff] }
  0x8b   :  { %21623 = vst [vmem:[#allocation42_spill] sm:$0xff] %v18663_v36  ;;  %v18671_v31 = vsub.f32 %v21624_v39, %v21625_v22  ;;  %v21199_v62 = vand.u32 4294901760, %v18660_v0  ;;  %14291 = vmatprep.subr.bf16.mxu0 %v18663_v36  ;;  %v1226_v63 = vand.u32 4294901760, %v1225_v3  ;;  %v21629_v48 = vand.u32 4294901760, %v18018_v7 }
  0x8c   :  { %21626 = vst [vmem:[#allocation43_spill] sm:$0xff] %v18673_v26  ;;  %v18679_v10 = vsub.f32 %v18016_v23, %v21627_v28  ;;  %v21632_v54 = vand.u32 4294901760, %v21631_v57  ;;  %14483 = vmatprep.subr.bf16.mxu1 %v18673_v26  ;;  %v18694_v22 = vpack.c.bf16 %v383_v32, %v371_v14  ;;  %v21634_v28 = vand.u32 4294901760, %v18031_v30  ;;  %v21635_v14 = vld [vmem:[#allocation49_spill] sm:$0xff] }
  0x8d   :  { %v21200_v20 = vand.u32 4294901760, %v18671_v31  ;;  %v18686_v39 = vsub.f32 %v18018_v7, %v21629_v48  ;;  %v1237_v23 = vsub.f32 %v18660_v0, %v21199_v62 }
  0x8e   :  { %21628 = vst [vmem:[#allocation46_spill] sm:$0xff] %v18679_v10  ;;  %v18691_v4 = vsub.f32 %v21631_v57, %v21632_v54  ;;  %21633 = vst [vmem:[#allocation48_spill] sm:$0xff] %v18694_v22  ;;  %v21207_v3 = vand.u32 4294901760, %v18679_v10  ;;  %v18703_v7 = vsub.f32 %v18031_v30, %v21634_v28  ;;  %v21636_v54 = vand.u32 4294901760, %v21635_v14  ;;  %14293 = vmatpush1.bf16.msra.mxu0 %v18694_v22 }
  0x8f   :  { %21630 = vst [vmem:[#allocation95_spill] sm:$0xff] %v18686_v39  ;;  %v388_v48 = vsub.f32 %v18671_v31, %v21200_v20  ;;  %v1238_v62 = vand.u32 4294901760, %v1237_v23  ;;  %v21638_v20 = vand.u32 4294901760, %v18045_v16  ;;  %v21639_v36 = vand.u32 4294901760, %v18686_v39 }
  0x90   :  { %v18713_v26 = vsub.f32 %v21635_v14, %v21636_v54  ;;  %v400_v30 = vsub.f32 %v18679_v10, %v21207_v3  ;;  %v21212_v28 = vand.u32 4294901760, %v18703_v7  ;;  %v21640_v54 = vand.u32 4294901760, %v18691_v4 }
  0x91   :  { %v18723_v57 = vsub.f32 %v18045_v16, %v21638_v20  ;;  %v389_v32 = vand.u32 4294901760, %v388_v48  ;;  %v1243_v14 = vsub.f32 %v18686_v39, %v21639_v36  ;;  %v18732_v60 = vpack.c.bf16 %v1238_v62, %v1226_v63 }
  0x92   :  { %21637 = vst [vmem:[#allocation49_spill] sm:$0xff] %v18713_v26  ;;  %v1255_v23 = vsub.f32 %v18691_v4, %v21640_v54  ;;  %v21213_v22 = vand.u32 4294901760, %v18713_v26  ;;  %v401_v3 = vand.u32 4294901760, %v400_v30  ;;  %v394_v10 = vsub.f32 %v18703_v7, %v21212_v28 }
  0x93   :  { %21641 = vst [vmem:[#allocation96_spill] sm:$0xff] %v18732_v60  ;;  %v21216_v16 = vand.u32 4294901760, %v18723_v57  ;;  %v1244_v20 = vand.u32 4294901760, %v1243_v14  ;;  %v21642_v39 = vand.u32 4294901760, %v18047_v12  ;;  %14485 = vmatpush1.bf16.msra.mxu1 %v18732_v60  ;;  %v21644_v14 = vld [vmem:[#allocation51_spill] sm:$0xff] }
  0x94   :  { %v1256_v48 = vand.u32 4294901760, %v1255_v23  ;;  %v406_v36 = vsub.f32 %v18713_v26, %v21213_v22  ;;  %v18747_v62 = vpack.c.bf16 %v401_v3, %v389_v32  ;;  %v395_v63 = vand.u32 4294901760, %v394_v10 }
  0x95   :  { %v18744_v54 = vsub.f32 %v18047_v12, %v21642_v39  ;;  %v1249_v30 = vsub.f32 %v18723_v57, %v21216_v16  ;;  %v21645_v23 = vand.u32 4294901760, %v21644_v14  ;;  %v21647_v39 = vand.u32 4294901760, %v18067_v25 }
  0x96   :  { %21643 = vst [vmem:[#allocation97_spill] sm:$0xff] %v18747_v62  ;;  %v18757_v22 = vpack.c.bf16 %v1256_v48, %v1244_v20  ;;  %v407_v26 = vand.u32 4294901760, %v406_v36  ;;  %14295 = vmatprep.subr.bf16.mxu0 %v18747_v62  ;;  %v21648_v16 = vand.u32 4294901760, %v18069_v38  ;;  %v21650_v20 = vand.u32 4294901760, %v18081_v18 }
  0x97   :  { %v18755_v28 = vsub.f32 %v21644_v14, %v21645_v23  ;;  %v21217_v12 = vand.u32 4294901760, %v18744_v54  ;;  %v18763_v3 = vsub.f32 %v18067_v25, %v21647_v39  ;;  %v1250_v10 = vand.u32 4294901760, %v1249_v30  ;;  %v21652_v23 = vld [vmem:[#allocation55_spill] sm:$0xff] }
  0x98   :  { %21646 = vst [vmem:[#allocation51_spill] sm:$0xff] %v18757_v22  ;;  %v18770_v14 = vsub.f32 %v18069_v38, %v21648_v16  ;;  %v18775_v48 = vsub.f32 %v18081_v18, %v21650_v20  ;;  %14487 = vmatprep.subr.bf16.mxu1 %v18757_v22  ;;  %v18778_v36 = vpack.c.bf16 %v407_v26, %v395_v63  ;;  %v21653_v39 = vand.u32 4294901760, %v21652_v23 }
  0x99   :  { %v21218_v32 = vand.u32 4294901760, %v18755_v28  ;;  %v1261_v25 = vsub.f32 %v18744_v54, %v21217_v12  ;;  %v21225_v30 = vand.u32 4294901760, %v18763_v3  ;;  %v21654_v63 = vand.u32 4294901760, %v18085_v51 }
  0x9a   :  { %21649 = vst [vmem:[#allocation98_spill] sm:$0xff] %v18770_v14  ;;  %21651 = vst [vmem:[#allocation99_spill] sm:$0xff] %v18778_v36  ;;  %v18787_v38 = vsub.f32 %v21652_v23, %v21653_v39  ;;  %14297 = vmatpush1.bf16.msra.mxu0 %v18778_v36  ;;  %v21656_v22 = vand.u32 4294901760, %v18770_v14 }
  0x9b   :  { %v412_v18 = vsub.f32 %v18755_v28, %v21218_v32  ;;  %v18797_v20 = vsub.f32 %v18085_v51, %v21654_v63  ;;  %v1262_v12 = vand.u32 4294901760, %v1261_v25  ;;  %v424_v23 = vsub.f32 %v18763_v3, %v21225_v30 }
  0x9c   :  { %v21230_v39 = vand.u32 4294901760, %v18787_v38  ;;  %v21655_v32 = vand.u32 4294901760, %v18096_v58  ;;  %v1267_v51 = vsub.f32 %v18770_v14, %v21656_v22  ;;  %v21657_v63 = vand.u32 4294901760, %v18775_v48 }
  0x9d   :  { %v413_v26 = vand.u32 4294901760, %v412_v18  ;;  %v21231_v36 = vand.u32 4294901760, %v18797_v20  ;;  %v18816_v62 = vpack.c.bf16 %v1262_v12, %v1250_v10  ;;  %v425_v30 = vand.u32 4294901760, %v424_v23 }
  0x9e   :  { %v18807_v16 = vsub.f32 %v18096_v58, %v21655_v32  ;;  %v1279_v25 = vsub.f32 %v18775_v48, %v21657_v63  ;;  %v418_v60 = vsub.f32 %v18787_v38, %v21230_v39  ;;  %v1268_v32 = vand.u32 4294901760, %v1267_v51 }
  0x9f   :  { %21658 = vst [vmem:[#allocation55_spill] sm:$0xff] %v18816_v62  ;;  %v430_v22 = vsub.f32 %v18797_v20, %v21231_v36  ;;  %v21659_v14 = vand.u32 4294901760, %v18098_v53  ;;  %14489 = vmatpush1.bf16.msra.mxu1 %v18816_v62  ;;  %v18831_v12 = vpack.c.bf16 %v425_v30, %v413_v26  ;;  %v18856_v26 = vpack.c.bf16 %v18275_v2, %v18266_v40 }
  0xa0   :  { %v21233_v58 = vand.u32 4294901760, %v18807_v16  ;;  %v1280_v18 = vand.u32 4294901760, %v1279_v25  ;;  %v419_v10 = vand.u32 4294901760, %v418_v60  ;;  %v21687_v2 = vand.u32 4294901760, %v18351_v35 }
  0xa1   :  { %v18828_v63 = vsub.f32 %v18098_v53, %v21659_v14  ;;  %21660 = vst [vmem:[#allocation100_spill] sm:$0xff] %v18831_v12  ;;  %v431_v25 = vand.u32 4294901760, %v430_v22  ;;  %14299 = vmatprep.subr.bf16.mxu0 %v18831_v12  ;;  %v18842_v53 = vpack.c.bf16 %v18158_v52, %v18141_v44  ;;  %v18846_v14 = vpack.c.bf16 %v18261_v15, %v18247_v13  ;;  %v21674_v12 = vld [vmem:[#allocation65_spill] sm:$0xff] }
  0xa2   :  { %v1273_v23 = vsub.f32 %v18807_v16, %v21233_v58  ;;  %v18836_v51 = vpack.c.bf16 %v1280_v18, %v1268_v32  ;;  %21665 = vst [vmem:[#allocation105_spill] sm:$0xff] %v18856_v26  ;;  %v18860_v32 = vpack.c.bf16 %v18285_v21, %v18280_v19  ;;  %v18864_v18 = vpack.c.bf16 %v18327_v27, %v18295_v47  ;;  %v21677_v47 = vld [vmem:[#allocation66_spill] sm:$0xff] }
  0xa3   :  { %v21232_v39 = vand.u32 4294901760, %v18828_v63  ;;  %21662 = vst [vmem:[#allocation102_spill] sm:$0xff] %v18842_v53  ;;  %21663 = vst [vmem:[#allocation103_spill] sm:$0xff] %v18846_v14  ;;  %v18849_v60 = vpack.c.bf16 %v431_v25, %v419_v10  ;;  %v18868_v22 = vpack.c.bf16 %v18341_v34, %v18333_v11  ;;  %v18872_v10 = vpack.c.bf16 %v18361_v46, %v18351_v35 }
  0xa4   :  { %21661 = vst [vmem:[#allocation101_spill] sm:$0xff] %v18836_v51  ;;  %v1274_v36 = vand.u32 4294901760, %v1273_v23  ;;  %14491 = vmatprep.subr.bf16.mxu1 %v18836_v51  ;;  %21666 = vst [vmem:[#allocation106_spill] sm:$0xff] %v18860_v32  ;;  %v18876_v23 = vpack.c.bf16 %v18377_v42, %v18366_v59  ;;  %v18885_v58 = vpack.c.bf16 %v18411_v24, %v18382_v43  ;;  %v21673_v51 = vld [vmem:[#allocation63_spill] sm:$0xff]  ;;  %v21688_v40 = vand.u32 4294901760, %v18361_v46 }
  0xa5   :  { %21664 = vst [vmem:[#allocation104_spill] sm:$0xff] %v18849_v60  ;;  %v1285_v30 = vsub.f32 %v18828_v63, %v21232_v39  ;;  %21667 = vst [vmem:[#allocation107_spill] sm:$0xff] %v18864_v18  ;;  %14301 = vmatpush1.bf16.msra.mxu0 %v18849_v60  ;;  %v18881_v39 = vpack.c.bf16 %v18192_v6, %v18187_v45  ;;  %v18890_v62 = vpack.c.bf16 %v21674_v12, %v21673_v51 }
  0xa6   :  { %21668 = vst [vmem:[#allocation108_spill] sm:$0xff] %v18868_v22  ;;  %21669 = vst [vmem:[#allocation109_spill] sm:$0xff] %v18872_v10  ;;  %14303 = vmatprep.subr.bf16.mxu0 %v18842_v53  ;;  %v18905_v53 = vpack.c.bf16 %v18828_v63, %v18807_v16  ;;  %v21685_v60 = vand.u32 4294901760, %v18341_v34  ;;  %v18942_v21 = vpack.c.bf16 %v21688_v40, %v21687_v2  ;;  %v21696_v35 = vand.u32 4294901760, %v18419_v37 }
  0xa7   :  { %21670 = vst [vmem:[#allocation110_spill] sm:$0xff] %v18876_v23  ;;  %v1286_v25 = vand.u32 4294901760, %v1285_v30  ;;  %21671 = vst [vmem:[#allocation111_spill] sm:$0xff] %v18881_v39  ;;  %v18899_v30 = vpack.c.bf16 %v18240_v9, %v18205_v8  ;;  %v21697_v40 = vand.u32 4294901760, %v18425_v50  ;;  %v21699_v46 = vand.u32 4294901760, %v18434_v55 }
  0xa8   :  { %21672 = vst [vmem:[#allocation112_spill] sm:$0xff] %v18885_v58  ;;  %21675 = vst [vmem:[#allocation63_spill] sm:$0xff] %v18890_v62  ;;  %467 = vmatmul.mubr.f32.vlgmr.msra.gmra.mrb[0].mxu0 %v21677_v47 }
  0xa9   :  { %v18892_v27 = vpack.c.bf16 %v1286_v25, %v1274_v36  ;;  %14305 = vmatpush1.bf16.msra.mxu0 %v18881_v39  ;;  %21678 = vst [vmem:[#allocation113_spill] sm:$0xff] %v18899_v30  ;;  %21679 = vst [vmem:[#allocation114_spill] sm:$0xff] %v18905_v53  ;;  %601 = vmatprep.mubr.f32.mxu0 %v21539_v1  ;;  %v18911_v36 = vpack.c.bf16 %v18425_v50, %v18419_v37  ;;  %v21705_v37 = vld [vmem:[#allocation86_spill] sm:$0xff] }
  0xaa   :  { %14307 = vmatprep.subr.bf16.mxu0 %v18846_v14  ;;  %v18915_v25 = vpack.c.bf16 %v18439_v61, %v18434_v55  ;;  %v18919_v39 = vpack.c.bf16 %v18461_v29, %v18450_v41  ;;  %v18924_v14 = vld [vmem:[%s20950_s1] sm:$0xff]  ;;  %21689 = vst [vmem:[#allocation120_spill] sm:$0xff] %v18942_v21  ;;  %v18962_v2 = vpack.c.bf16 %v21697_v40, %v21696_v35  ;;  %v21706_v50 = vand.u32 4294901760, %v21705_v37 }
  0xab   :  { %21676 = vst [vmem:[#allocation65_spill] sm:$0xff] %v18892_v27  ;;  %14493 = vmatpush1.bf16.msra.mxu1 %v18892_v27  ;;  %21680 = vst [vmem:[#allocation115_spill] sm:$0xff] %v18911_v36  ;;  %v21684_v27 = vand.u32 4294901760, %v18333_v11  ;;  %v21693_v11 = vand.u32 4294901760, %v18382_v43  ;;  %vm126_vm0 = vcmp.gt.s32.totalorder %v18924_v14, 0  ;;  %v21702_v43 = vand.u32 4294901760, %v18450_v41 }
  0xac   :  { %14495 = vmatprep.subr.bf16.mxu1 %v18890_v62  ;;  %21681 = vst [vmem:[#allocation116_spill] sm:$0xff] %v18915_v25  ;;  %21682 = vst [vmem:[#allocation117_spill] sm:$0xff] %v18919_v39  ;;  %v18930_v62 = vpack.c.bf16 %v18511_v17, %v18503_v56  ;;  %v21711_v55 = vand.u32 4294901760, %v18511_v17  ;;  %v21728_v17 = vld [vmem:[#allocation34_spill] sm:$0xff]  ;;  %vm1882_vm1 = vcmp.gt.s32.totalorder %v18924_v14, 1  ;;  %v21764_v21 = vand.u32 4294901760, %v18775_v48 }
  0xad   :  { %14309 = vmatpush1.bf16.msra.mxu0 %v18860_v32  ;;  %v21690_v32 = vand.u32 4294901760, %v18366_v59  ;;  %21698 = vst [vmem:[#allocation123_spill] sm:$0xff] %v18962_v2  ;;  %v21700_v59 = vand.u32 4294901760, %v18439_v61  ;;  %v21713_v61 = vld [vmem:[#allocation25_spill] sm:$0xff]  ;;  %vm7156_vm2 = vcmp.gt.s32.totalorder %v18924_v14, 4  ;;  %vm10672_vm3 = vcmp.gt.s32.totalorder %v18924_v14, 6 }
  0xae   :  { %1322 = vmatmul.mubr.f32.vlgmr.msra.gmra.mrb[0].mxu1 %v21677_v47  ;;  %21683 = vst [vmem:[#allocation118_spill] sm:$0xff] %v18930_v62  ;;  %v18936_v47 = vpack.c.bf16 %v21685_v60, %v21684_v27  ;;  %14311 = vmatprep.subr.bf16.mxu0 %v18868_v22  ;;  %v21694_v27 = vand.u32 4294901760, %v18411_v24  ;;  %v21703_v24 = vand.u32 4294901760, %v18461_v29  ;;  %v21714_v40 = vand.u32 4294901760, %v21713_v61  ;;  %v21718_v29 = vld [vmem:[#allocation28_spill] sm:$0xff] }
  0xaf   :  { %14497 = vmatpush1.bf16.msra.mxu1 %v18899_v30  ;;  %v21691_v30 = vand.u32 4294901760, %v18377_v42  ;;  %1456 = vmatprep.mubr.f32.mxu1 %v21539_v1  ;;  %v18970_v42 = vpack.c.bf16 %v21700_v59, %v21699_v46  ;;  %v21715_v46 = vld [vmem:[#allocation26_spill] sm:$0xff] }
  0xb0   :  { %21686 = vst [vmem:[#allocation119_spill] sm:$0xff] %v18936_v47  ;;  %14499 = vmatprep.subr.bf16.mxu1 %v18856_v26  ;;  %v18956_v34 = vpack.c.bf16 %v21694_v27, %v21693_v11  ;;  %v18976_v60 = vpack.c.bf16 %v21703_v24, %v21702_v43  ;;  %v21710_v27 = vand.u32 4294901760, %v18503_v56  ;;  %v21716_v41 = vand.u32 4294901760, %v21715_v46  ;;  %v21720_v24 = vld [vmem:[#allocation29_spill] sm:$0xff] }
  0xb1   :  { %v18950_v19 = vpack.c.bf16 %v21691_v30, %v21690_v32  ;;  %21701 = vst [vmem:[#allocation124_spill] sm:$0xff] %v18970_v42  ;;  %v21707_v32 = vld [vmem:[#allocation88_spill] sm:$0xff]  ;;  %v21719_v43 = vand.u32 4294901760, %v21718_v29  ;;  %v21721_v22 = vand.u32 4294901760, %v21720_v24  ;;  %14313 = vmatpush1.bf16.msra.mxu0 %v18876_v23  ;;  %v14206_v23 = vsel %vm126_vm0, 1.0, %v21539_v1 }
  0xb2   :  { %21695 = vst [vmem:[#allocation122_spill] sm:$0xff] %v18956_v34  ;;  %21704 = vst [vmem:[#allocation125_spill] sm:$0xff] %v18976_v60  ;;  %v21708_v30 = vand.u32 4294901760, %v21707_v32  ;;  %v18988_v35 = vpack.c.bf16 %v21711_v55, %v21710_v27  ;;  %v18994_v59 = vpack.c.bf16 %v21716_v41, %v21714_v40  ;;  %v21729_v27 = vand.u32 4294901760, %v21728_v17  ;;  %v21730_v55 = vld [vmem:[#allocation35_spill] sm:$0xff]  ;;  %14315 = vmatprep.subr.bf16.mxu0 %v18911_v36 }
  0xb3   :  { %21692 = vst [vmem:[#allocation121_spill] sm:$0xff] %v18950_v19  ;;  %v19000_v26 = vpack.c.bf16 %v21721_v22, %v21719_v43  ;;  %v17687_v40 = vmov 0   ;;  %14501 = vmatpush1.bf16.msra.mxu1 %v18864_v18  ;;  %v21733_v22 = vld [vmem:[#allocation37_spill] sm:$0xff]  ;;  %v21735_v43 = vand.u32 4294901760, %v18607_v49  ;;  %v21756_v36 = vand.u32 4294901760, %v18723_v57 }
  0xb4   :  { %v18982_v11 = vpack.c.bf16 %v21708_v30, %v21706_v50  ;;  %21712 = vst [vmem:[#allocation88_spill] sm:$0xff] %v18988_v35  ;;  %21717 = vst [vmem:[#allocation25_spill] sm:$0xff] %v18994_v59  ;;  %v21723_v50 = vld [vmem:[#allocation30_spill] sm:$0xff]  ;;  %v21731_v35 = vand.u32 4294901760, %v21730_v55  ;;  %17479 = vset.pattern.permute.xlu0 %v17687_v40  ;;  %v21734_v41 = vand.u32 4294901760, %v21733_v22  ;;  %14503 = vmatprep.subr.bf16.mxu1 %v18872_v10  ;;  %v21757_v10 = vand.u32 4294901760, %v18744_v54 }
  0xb5   :  { %21722 = vst [vmem:[#allocation26_spill] sm:$0xff] %v19000_v26  ;;  %v21724_v30 = vand.u32 4294901760, %v21723_v50  ;;  %1873 = vperm.xlu0 %17479, %v14206_v23   ;;  %17480 = vset.pattern.permute.xlu1 %v17687_v40  ;;  %v19097_v23 = vpack.c.bf16 %v21720_v24, %v21718_v29  ;;  %v21796_v29 = vld [vmem:[#allocation20_spill] sm:$0xff]  ;;  %v21797_v24 = vld [vmem:[#allocation23_spill] sm:$0xff] }
  0xb6   :  { %21709 = vst [vmem:[#allocation86_spill] sm:$0xff] %v18982_v11  ;;  %v21725_v11 = vld [vmem:[#allocation33_spill] sm:$0xff]  ;;  %v19012_v60 = vpack.c.bf16 %v21731_v35, %v21729_v27  ;;  %v19020_v59 = vpack.c.bf16 %v21735_v43, %v21734_v41  ;;  %v21741_v35 = vand.u32 4294901760, %v18639_v33  ;;  %v21742_v27 = vand.u32 4294901760, %v18660_v0  ;;  %v21745_v43 = vld [vmem:[#allocation46_spill] sm:$0xff]  ;;  %14317 = vmatpush1.bf16.msra.mxu0 %v18919_v39  ;;  %v21801_v40 = vld [vmem:[#allocation32_spill] sm:$0xff] }
  0xb7   :  { %v21726_v56 = vand.u32 4294901760, %v21725_v11  ;;  %v21744_v41 = vand.u32 4294901760, %v18671_v31  ;;  %v21746_v18 = vand.u32 4294901760, %v21745_v43  ;;  %14505 = vmatpush1.bf16.msra.mxu1 %v18885_v58  ;;  %21773 = vst [vmem:[#allocation128_spill] sm:$0xff] %v19097_v23  ;;  %14319 = vmatprep.subr.bf16.mxu0 %v18930_v62 }
  0xb8   :  { %21732 = vst [vmem:[#allocation29_spill] sm:$0xff] %v19012_v60  ;;  %21736 = vst [vmem:[#allocation30_spill] sm:$0xff] %v19020_v59  ;;  %v19032_v60 = vpack.c.bf16 %v21742_v27, %v21741_v35  ;;  %v21752_v27 = vand.u32 4294901760, %v18703_v7  ;;  %14507 = vmatprep.subr.bf16.mxu1 %v18915_v25 }
  0xb9   :  { %v19006_v42 = vpack.c.bf16 %v21726_v56, %v21724_v30  ;;  %v21737_v30 = vand.u32 4294901760, %v18619_v5  ;;  %v21738_v56 = vld [vmem:[#allocation39_spill] sm:$0xff] }
  0xba   :  { %21743 = vst [vmem:[#allocation34_spill] sm:$0xff] %v19032_v60  ;;  %v21753_v60 = vld [vmem:[#allocation49_spill] sm:$0xff]  ;;  %14321 = vmatpush1.bf16.msra.mxu0 %v19097_v23 }
  0xbb   :  { %21727 = vst [vmem:[#allocation28_spill] sm:$0xff] %v19006_v42  ;;  %v21739_v42 = vand.u32 4294901760, %v21738_v56  ;;  %v21754_v34 = vand.u32 4294901760, %v21753_v60  ;;  %v19141_v14 = vpack.c.bf16 %v21753_v60, %v18703_v7  ;;  %v21787_v7 = vld [vmem:[#allocation13_spill] sm:$0xff] }
  0xbc   :  { %v21795_v60 = vld [vmem:[#allocation21_spill] sm:$0xff] }
  0xbd   :  { %v19026_v26 = vpack.c.bf16 %v21739_v42, %v21737_v30  ;;  %v19043_v42 = vpack.c.bf16 %v21746_v18, %v21744_v41  ;;  %v21748_v30 = vld [vmem:[#allocation95_spill] sm:$0xff]  ;;  %v19055_v2 = vpack.c.bf16 %v21754_v34, %v21752_v27  ;;  %v19062_v18 = vpack.c.bf16 %v21757_v10, %v21756_v36  ;;  %21781 = vst [vmem:[#allocation136_spill] sm:$0xff] %v19141_v14 }
  0xbe   :  { %v21749_v59 = vand.u32 4294901760, %v21748_v30  ;;  %v21759_v41 = vand.u32 4294901760, %v18755_v28  ;;  %v21766_v27 = vand.u32 4294901760, %v18787_v38  ;;  %v21769_v10 = vand.u32 4294901760, %v18807_v16 }
  0xbf   :  { %21740 = vst [vmem:[#allocation33_spill] sm:$0xff] %v19026_v26  ;;  %21747 = vst [vmem:[#allocation35_spill] sm:$0xff] %v19043_v42  ;;  %v21750_v26 = vand.u32 4294901760, %v18691_v4  ;;  %v21760_v42 = vand.u32 4294901760, %v18763_v3  ;;  %v21770_v36 = vand.u32 4294901760, %v18828_v63  ;;  %v19104_v16 = vpack.c.bf16 %v21715_v46, %v21713_v61 }
  0xc0   :  { %21755 = vst [vmem:[#allocation39_spill] sm:$0xff] %v19055_v2  ;;  %21758 = vst [vmem:[#allocation46_spill] sm:$0xff] %v19062_v18  ;;  %v21767_v2 = vand.u32 4294901760, %v18797_v20  ;;  %v19108_v63 = vpack.c.bf16 %v21730_v55, %v21728_v17  ;;  %v19126_v61 = vpack.c.bf16 %v18607_v49, %v21733_v22  ;;  %v19130_v46 = vpack.c.bf16 %v21745_v43, %v18671_v31  ;;  %v21799_v17 = vld [vmem:[#allocation27_spill] sm:$0xff]  ;;  %v21800_v55 = vld [vmem:[#allocation24_spill] sm:$0xff] }
  0xc1   :  { %v19049_v35 = vpack.c.bf16 %v21750_v26, %v21749_v59  ;;  %v19068_v26 = vpack.c.bf16 %v21760_v42, %v21759_v41  ;;  %v21762_v59 = vld [vmem:[#allocation98_spill] sm:$0xff]  ;;  %v19086_v18 = vpack.c.bf16 %v21770_v36, %v21769_v10  ;;  %v14210_v42 = vsel %vm1882_vm1, 1.0, %v21539_v1  ;;  %21774 = vst [vmem:[#allocation129_spill] sm:$0xff] %v19104_v16  ;;  %v21802_v22 = vld [vmem:[#allocation31_spill] sm:$0xff]  ;;  %v21804_v43 = vld [vmem:[#allocation36_spill] sm:$0xff] }
  0xc2   :  { %v19080_v19 = vpack.c.bf16 %v21767_v2, %v21766_v27  ;;  %21775 = vst [vmem:[#allocation130_spill] sm:$0xff] %v19108_v63  ;;  %3630 = vperm.xlu0 %17479, %v14210_v42   ;;  %v14222_v2 = vsel %vm7156_vm2, 1.0, %v21539_v1  ;;  %14323 = vmatprep.subr.bf16.mxu0 %v19108_v63  ;;  %21778 = vst [vmem:[#allocation133_spill] sm:$0xff] %v19126_v61  ;;  %v19147_v49 = vpack.c.bf16 %v18691_v4, %v21748_v30  ;;  %v21805_v30 = vld [vmem:[#allocation45_spill] sm:$0xff]  ;;  %v21807_v41 = vld [vmem:[#allocation50_spill] sm:$0xff] }
  0xc3   :  { %21751 = vst [vmem:[#allocation37_spill] sm:$0xff] %v19049_v35  ;;  %21761 = vst [vmem:[#allocation95_spill] sm:$0xff] %v19068_v26  ;;  %v21763_v35 = vand.u32 4294901760, %v21762_v59  ;;  %v19151_v31 = vpack.c.bf16 %v18763_v3, %v18755_v28  ;;  %v19167_v4 = vpack.c.bf16 %v18775_v48, %v21762_v59  ;;  %v21789_v28 = vld [vmem:[#allocation15_spill] sm:$0xff]  ;;  %v21791_v3 = vld [vmem:[#allocation17_spill] sm:$0xff] }
  0xc4   :  { %21768 = vst [vmem:[#allocation98_spill] sm:$0xff] %v19080_v19  ;;  %21771 = vst [vmem:[#allocation126_spill] sm:$0xff] %v19086_v18  ;;  %v21792_v48 = vld [vmem:[#allocation16_spill] sm:$0xff]  ;;  %v21808_v59 = vld [vmem:[#allocation47_spill] sm:$0xff] }
  0xc5   :  { %v19074_v34 = vpack.c.bf16 %v21764_v21, %v21763_v35  ;;  %v19093_v21 = vpack.c.bf16 %v21707_v32, %v21705_v37  ;;  %v19115_v37 = vpack.c.bf16 %v21725_v11, %v21723_v50  ;;  %v19119_v32 = vpack.c.bf16 %v21738_v56, %v18619_v5  ;;  %21779 = vst [vmem:[#allocation134_spill] sm:$0xff] %v19130_v46  ;;  %v21798_v50 = vld [vmem:[#allocation22_spill] sm:$0xff]  ;;  %v21803_v56 = vld [vmem:[#allocation40_spill] sm:$0xff]  ;;  %v21809_v27 = vld [vmem:[#allocation53_spill] sm:$0xff] }
  0xc6   :  { %8904 = vperm.xlu0 %17479, %v14222_v2   ;;  %v14230_v11 = vsel %vm10672_vm3, 1.0, %v21539_v1  ;;  %v19137_v5 = vpack.c.bf16 %v18660_v0, %v18639_v33  ;;  %21782 = vst [vmem:[#allocation137_spill] sm:$0xff] %v19147_v49  ;;  %21783 = vst [vmem:[#allocation138_spill] sm:$0xff] %v19151_v31  ;;  %v19157_v33 = vpack.c.bf16 %v18744_v54, %v18723_v57  ;;  %v21788_v57 = vld [vmem:[#allocation67_spill] sm:$0xff]  ;;  %v21790_v54 = vld [vmem:[#allocation14_spill] sm:$0xff] }
  0xc7   :  { %21765 = vst [vmem:[#allocation49_spill] sm:$0xff] %v19074_v34  ;;  %21772 = vst [vmem:[#allocation127_spill] sm:$0xff] %v19093_v21  ;;  %14509 = vmatpush1.bf16.msra.mxu1 %v19093_v21  ;;  %14325 = vmatpush1.bf16.msra.mxu0 %v19119_v32  ;;  %v19161_v0 = vpack.c.bf16 %v18797_v20, %v18787_v38  ;;  %v21793_v38 = vld [vmem:[#allocation19_spill] sm:$0xff]  ;;  %v21794_v20 = vld [vmem:[#allocation18_spill] sm:$0xff] }
  0xc8   :  { %21776 = vst [vmem:[#allocation131_spill] sm:$0xff] %v19115_v37  ;;  %21777 = vst [vmem:[#allocation132_spill] sm:$0xff] %v19119_v32  ;;  %14511 = vmatprep.subr.bf16.mxu1 %v19104_v16  ;;  %14327 = vmatprep.subr.bf16.mxu0 %v19130_v46  ;;  %v21806_v35 = vld [vmem:[#allocation44_spill] sm:$0xff]  ;;  %v21812_v42 = vld [vmem:[#allocation54_spill] sm:$0xff]  ;;  %v21829_v32 = vand.u32 4294901760, %v18261_v15 }
  0xc9   :  { %21780 = vst [vmem:[#allocation135_spill] sm:$0xff] %v19137_v5  ;;  %21784 = vst [vmem:[#allocation139_spill] sm:$0xff] %v19157_v33  ;;  %v21810_v10 = vld [vmem:[#allocation52_spill] sm:$0xff]  ;;  %v21813_v2 = vld [vmem:[#allocation58_spill] sm:$0xff] }
  0xca   :  { %12420 = vperm.xlu0 %17479, %v14230_v11   ;;  %21785 = vst [vmem:[#allocation140_spill] sm:$0xff] %v19161_v0  ;;  %21786 = vst [vmem:[#allocation141_spill] sm:$0xff] %v19167_v4  ;;  %v21811_v36 = vld [vmem:[#allocation56_spill] sm:$0xff]  ;;  %v21814_v11 = vld [vmem:[#allocation57_spill] sm:$0xff] }
  0xcb   :  { %14513 = vmatpush1.bf16.msra.mxu1 %v19115_v37  ;;  %14329 = vmatpush1.bf16.msra.mxu0 %v19141_v14  ;;  %v21821_v14 = vand.u32 4294901760, %v18187_v45  ;;  %v21831_v45 = vld [vmem:[#allocation68_spill] sm:$0xff] }
  0xcc   :  { %14515 = vmatprep.subr.bf16.mxu1 %v19126_v61  ;;  %14331 = vmatprep.subr.bf16.mxu0 %v19151_v31  ;;  %v21819_v31 = vld [vmem:[#allocation59_spill] sm:$0xff]  ;;  %v21841_v15 = vld [vmem:[#allocation72_spill] sm:$0xff] }
  0xcf   :  { %14517 = vmatpush1.bf16.msra.mxu1 %v19137_v5  ;;  %14333 = vmatpush1.bf16.msra.mxu0 %v19161_v0  ;;  %v21817_v0 = vand.u32 4294901760, %v18158_v52  ;;  %v21824_v5 = vld [vmem:[#allocation61_spill] sm:$0xff]  ;;  %v21826_v52 = vand.u32 4294901760, %v21674_v12  ;;  %v21836_v12 = vld [vmem:[#allocation74_spill] sm:$0xff] }
  0xd0   :  { %14519 = vmatprep.subr.bf16.mxu1 %v19147_v49  ;;  %14335 = vmatprep.subr.bf16.mxu0 %v21787_v7  ;;  %v21822_v49 = vand.u32 4294901760, %v18192_v6  ;;  %v21832_v6 = vld [vmem:[#allocation64_spill] sm:$0xff] }
  0xd2   :  { %604 = vmatmul.mubr.f32.vlgmr.msra.gmra.mrb[0].mxu0 %v21788_v57  ;;  %v19217_v46 = vpack.c.bf16 %v21822_v49, %v21821_v14  ;;  %v21833_v14 = vand.u32 4294901760, %v18205_v8  ;;  %v21846_v8 = vld [vmem:[#allocation76_spill] sm:$0xff] }
  0xd3   :  { %14521 = vmatpush1.bf16.msra.mxu1 %v19157_v33  ;;  %14337 = vmatpush1.bf16.msra.mxu0 %v21789_v28  ;;  %v21820_v33 = vld [vmem:[#allocation62_spill] sm:$0xff] }
  0xd4   :  { %14523 = vmatprep.subr.bf16.mxu1 %v19167_v4  ;;  %14339 = vmatprep.subr.bf16.mxu0 %v21791_v3  ;;  %21823 = vst [vmem:[#allocation67_spill] sm:$0xff] %v19217_v46 }
  0xd5   :  { %706 = vmatprep.mubr.f32.mxu0 %v21539_v1 }
  0xd7   :  { %14525 = vmatpush1.bf16.msra.mxu1 %v18905_v53  ;;  %14341 = vmatpush1.bf16.msra.mxu0 %v21793_v38  ;;  %v21816_v53 = vand.u32 4294901760, %v18141_v44  ;;  %v21825_v44 = vand.u32 4294901760, %v21673_v51  ;;  %v21834_v51 = vand.u32 4294901760, %v18240_v9  ;;  %v21847_v9 = vand.u32 4294901760, %v21846_v8  ;;  %v21859_v8 = vld [vmem:[#allocation26_spill] sm:$0xff] }
  0xd8   :  { %14527 = vmatprep.subr.bf16.mxu1 %v21790_v54  ;;  %14343 = vmatprep.subr.bf16.mxu0 %v21795_v60 }
  0xd9   :  { %v19209_v4 = vpack.c.bf16 %v21817_v0, %v21816_v53  ;;  %v19225_v53 = vpack.c.bf16 %v21826_v52, %v21825_v44  ;;  %v21828_v0 = vand.u32 4294901760, %v18247_v13  ;;  %v19240_v49 = vpack.c.bf16 %v21834_v51, %v21833_v14  ;;  %v21838_v52 = vld [vmem:[#allocation75_spill] sm:$0xff]  ;;  %v21848_v14 = vld [vmem:[#allocation78_spill] sm:$0xff] }
  0xda   :  { %1459 = vmatmul.mubr.f32.vlgmr.msra.gmra.mrb[0].mxu1 %v21788_v57  ;;  %v21815_v57 = vld [vmem:[#allocation60_spill] sm:$0xff]  ;;  %v21837_v44 = vand.u32 4294901760, %v21836_v12  ;;  %v21839_v13 = vand.u32 4294901760, %v21838_v52  ;;  %v21849_v51 = vand.u32 4294901760, %v21848_v14  ;;  %v21854_v52 = vld [vmem:[#allocation122_spill] sm:$0xff]  ;;  %v21861_v14 = vld [vmem:[#allocation29_spill] sm:$0xff] }
  0xdb   :  { %14529 = vmatpush1.bf16.msra.mxu1 %v21792_v48  ;;  %1561 = vmatprep.mubr.f32.mxu1 %v21539_v1  ;;  %21818 = vst [vmem:[#allocation13_spill] sm:$0xff] %v19209_v4  ;;  %21827 = vst [vmem:[#allocation15_spill] sm:$0xff] %v19225_v53  ;;  %v19231_v61 = vpack.c.bf16 %v21829_v32, %v21828_v0  ;;  %v21842_v32 = vand.u32 4294901760, %v21841_v15  ;;  %v21843_v0 = vld [vmem:[#allocation73_spill] sm:$0xff]  ;;  %v21856_v15 = vld [vmem:[#allocation124_spill] sm:$0xff] }
  0xdc   :  { %14531 = vmatprep.subr.bf16.mxu1 %v21794_v20  ;;  %14345 = vmatpush1.bf16.msra.mxu0 %v21797_v24  ;;  %21835 = vst [vmem:[#allocation17_spill] sm:$0xff] %v19240_v49  ;;  %v19264_v12 = vpack.c.bf16 %v21849_v51, %v21847_v9  ;;  %v21860_v9 = vld [vmem:[#allocation25_spill] sm:$0xff]  ;;  %v21862_v51 = vld [vmem:[#allocation28_spill] sm:$0xff] }
  0xdd   :  { %14347 = vmatprep.subr.bf16.mxu0 %v21799_v17  ;;  %21830 = vst [vmem:[#allocation14_spill] sm:$0xff] %v19231_v61 }
  0xde   :  { %21850 = vst [vmem:[#allocation18_spill] sm:$0xff] %v19264_v12 }
  0xdf   :  { %14533 = vmatpush1.bf16.msra.mxu1 %v21796_v29 }
  0xe0   :  { %14535 = vmatprep.subr.bf16.mxu1 %v21798_v50  ;;  %14349 = vmatpush1.bf16.msra.mxu0 %v21801_v40 }
  0xe1   :  { %14351 = vmatprep.subr.bf16.mxu0 %v21803_v56 }
  0xe3   :  { %14537 = vmatpush1.bf16.msra.mxu1 %v21800_v55 }
  0xe4   :  { %14539 = vmatprep.subr.bf16.mxu1 %v21802_v22  ;;  %14353 = vmatpush1.bf16.msra.mxu0 %v21805_v30 }
  0xe5   :  { %14355 = vmatprep.subr.bf16.mxu0 %v21807_v41 }
  0xe7   :  { %14541 = vmatpush1.bf16.msra.mxu1 %v21804_v43 }
  0xe8   :  { %14543 = vmatprep.subr.bf16.mxu1 %v21806_v35  ;;  %14357 = vmatpush1.bf16.msra.mxu0 %v21809_v27 }
  0xe9   :  { %14359 = vmatprep.subr.bf16.mxu0 %v21811_v36 }
  0xeb   :  { %14545 = vmatpush1.bf16.msra.mxu1 %v21808_v59 }
  0xec   :  { %14547 = vmatprep.subr.bf16.mxu1 %v21810_v10  ;;  %14361 = vmatpush1.bf16.msra.mxu0 %v21813_v2 }
  0xed   :  { %14363 = vmatprep.subr.bf16.mxu0 %v21815_v57 }
  0xef   :  { %14549 = vmatpush1.bf16.msra.mxu1 %v21812_v42 }
  0xf0   :  { %14551 = vmatprep.subr.bf16.mxu1 %v21814_v11  ;;  %14365 = vmatpush1.bf16.msra.mxu0 %v21820_v33 }
  0xf1   :  { %14367 = vmatprep.subr.bf16.mxu0 %v19209_v4  ;;  %v19246_v4 = vpack.c.bf16 %v21839_v13, %v21837_v44  ;;  %v21853_v44 = vld [vmem:[#allocation123_spill] sm:$0xff]  ;;  %v21855_v13 = vld [vmem:[#allocation125_spill] sm:$0xff] }
  0xf3   :  { %14553 = vmatpush1.bf16.msra.mxu1 %v21819_v31  ;;  %710 = vmatmul.mubr.f32.vlgmr.msra.gmra.mrb[0].mxu0 %v21831_v45  ;;  %21840 = vst [vmem:[#allocation16_spill] sm:$0xff] %v19246_v4 }
  0xf4   :  { %14555 = vmatprep.subr.bf16.mxu1 %v21824_v5  ;;  %14369 = vmatpush1.bf16.msra.mxu0 %v19217_v46  ;;  %v21844_v46 = vand.u32 4294901760, %v21843_v0  ;;  %v21858_v0 = vld [vmem:[#allocation86_spill] sm:$0xff] }
  0xf5   :  { %14371 = vmatprep.subr.bf16.mxu0 %v19231_v61  ;;  %876 = vmatprep.mubr.f32.mxu0 %v21539_v1 }
  0xf6   :  { %v19254_v63 = vpack.c.bf16 %v21844_v46, %v21842_v32  ;;  %v21851_v46 = vld [vmem:[#allocation121_spill] sm:$0xff]  ;;  %v21857_v32 = vld [vmem:[#allocation88_spill] sm:$0xff] }
  0xf7   :  { %14557 = vmatpush1.bf16.msra.mxu1 %v21832_v6 }
  0xf8   :  { %14559 = vmatprep.subr.bf16.mxu1 %v19225_v53  ;;  %21845 = vst [vmem:[#allocation19_spill] sm:$0xff] %v19254_v63  ;;  %14373 = vmatpush1.bf16.msra.mxu0 %v19246_v4 }
  0xf9   :  { %14375 = vmatprep.subr.bf16.mxu0 %v18936_v47 }
  0xfa   :  { %1565 = vmatmul.mubr.f32.vlgmr.msra.gmra.mrb[0].mxu1 %v21831_v45  ;;  %v21852_v45 = vld [vmem:[#allocation120_spill] sm:$0xff] }
  0xfb   :  { %14561 = vmatpush1.bf16.msra.mxu1 %v19240_v49  ;;  %1731 = vmatprep.mubr.f32.mxu1 %v21539_v1 }
  0xfc   :  { %14563 = vmatprep.subr.bf16.mxu1 %v19254_v63  ;;  %14377 = vmatpush1.bf16.msra.mxu0 %v21851_v46  ;;  %v21863_v46 = vld [vmem:[#allocation33_spill] sm:$0xff] }
  0xfd   :  { %14379 = vmatprep.subr.bf16.mxu0 %v21853_v44  ;;  %v21864_v44 = vld [vmem:[#allocation30_spill] sm:$0xff] }
  0xff   :  { %14565 = vmatpush1.bf16.msra.mxu1 %v19264_v12 }
 0x100   :  { %14567 = vmatprep.subr.bf16.mxu1 %v21852_v45  ;;  %14381 = vmatpush1.bf16.msra.mxu0 %v21855_v13  ;;  %v21866_v13 = vld [vmem:[#allocation34_spill] sm:$0xff] }
 0x101   :  { %14383 = vmatprep.subr.bf16.mxu0 %v21857_v32  ;;  %v21868_v32 = vld [vmem:[#allocation37_spill] sm:$0xff] }
 0x103   :  { %14569 = vmatpush1.bf16.msra.mxu1 %v21854_v52  ;;  %v21865_v52 = vld [vmem:[#allocation35_spill] sm:$0xff] }
 0x104   :  { %14571 = vmatprep.subr.bf16.mxu1 %v21856_v15  ;;  %14385 = vmatpush1.bf16.msra.mxu0 %v21859_v8  ;;  %v21867_v15 = vld [vmem:[#allocation39_spill] sm:$0xff]  ;;  %v21869_v8 = vld [vmem:[#allocation46_spill] sm:$0xff] }
 0x105   :  { %14387 = vmatprep.subr.bf16.mxu0 %v21861_v14  ;;  %v131_v14 = vld [vmem:[#allocation4 + $0x10] sm:$0xff] }
 0x107   :  { %14573 = vmatpush1.bf16.msra.mxu1 %v21858_v0  ;;  %v132_v0 = vld [vmem:[#allocation4 + $0x18] sm:$0xff] }
 0x108   :  { %14575 = vmatprep.subr.bf16.mxu1 %v21860_v9  ;;  %14389 = vmatpush1.bf16.msra.mxu0 %v21863_v46  ;;  %v21870_v46 = vld [vmem:[#allocation66_spill] sm:$0xff] }
 0x109   :  { %14391 = vmatprep.subr.bf16.mxu0 %v21865_v52 }
 0x10b   :  { %14577 = vmatpush1.bf16.msra.mxu1 %v21862_v51 }
 0x10c   :  { %14579 = vmatprep.subr.bf16.mxu1 %v21864_v44  ;;  %14393 = vmatpush1.bf16.msra.mxu0 %v21867_v15 }
 0x10d   :  { %14395 = vmatprep.subr.bf16.mxu0 %v19068_v26 }
 0x10f   :  { %14581 = vmatpush1.bf16.msra.mxu1 %v21866_v13 }
 0x110   :  { %14583 = vmatprep.subr.bf16.mxu1 %v21868_v32  ;;  %14397 = vmatpush1.bf16.msra.mxu0 %v19080_v19  ;;  %v129_v19 = vld [vmem:[#allocation4] sm:$0xff] }
 0x111   :  { %14399 = vmatprep.subr.bf16.mxu0 %v21787_v7 }
 0x113   :  { %14585 = vmatpush1.bf16.msra.mxu1 %v21869_v8  ;;  %878 = vmatmul.mubr.f32.vlgmr.msra.gmra.mrb[0].mxu0 %v21870_v46 }
 0x114   :  { %14587 = vmatprep.subr.bf16.mxu1 %v19074_v34  ;;  %14401 = vmatpush1.bf16.msra.mxu0 %v21789_v28  ;;  %v130_v34 = vld [vmem:[#allocation4 + $0x8] sm:$0xff] }
 0x115   :  { %14403 = vmatprep.subr.bf16.mxu0 %v21791_v3  ;;  %980 = vmatprep.mubr.f32.mxu0 %v21539_v1 }
 0x117   :  { %14589 = vmatpush1.bf16.msra.mxu1 %v19086_v18  ;;  %v21872_v18 = vld [vmem:[#allocation70_spill] sm:$0xff] }
 0x118   :  { %14591 = vmatprep.subr.bf16.mxu1 %v21790_v54  ;;  %14405 = vmatpush1.bf16.msra.mxu0 %v21793_v38 }
 0x119   :  { %14407 = vmatprep.subr.bf16.mxu0 %v21795_v60 }
 0x11a   :  { %1733 = vmatmul.mubr.f32.vlgmr.msra.gmra.mrb[0].mxu1 %v21870_v46 }
 0x11b   :  { %14593 = vmatpush1.bf16.msra.mxu1 %v21792_v48  ;;  %1835 = vmatprep.mubr.f32.mxu1 %v21539_v1 }
 0x11c   :  { %14595 = vmatprep.subr.bf16.mxu1 %v21794_v20  ;;  %14409 = vmatpush1.bf16.msra.mxu0 %v21797_v24 }
 0x11d   :  { %14411 = vmatprep.subr.bf16.mxu0 %v21799_v17 }
 0x11f   :  { %14597 = vmatpush1.bf16.msra.mxu1 %v21796_v29 }
 0x120   :  { %14599 = vmatprep.subr.bf16.mxu1 %v21798_v50  ;;  %14413 = vmatpush1.bf16.msra.mxu0 %v21801_v40 }
 0x121   :  { %14415 = vmatprep.subr.bf16.mxu0 %v21803_v56 }
 0x123   :  { %14601 = vmatpush1.bf16.msra.mxu1 %v21800_v55 }
 0x124   :  { %14603 = vmatprep.subr.bf16.mxu1 %v21802_v22  ;;  %14417 = vmatpush1.bf16.msra.mxu0 %v21805_v30 }
 0x125   :  { %14419 = vmatprep.subr.bf16.mxu0 %v21807_v41 }
 0x127   :  { %14605 = vmatpush1.bf16.msra.mxu1 %v21804_v43 }
 0x128   :  { %14607 = vmatprep.subr.bf16.mxu1 %v21806_v35  ;;  %14421 = vmatpush1.bf16.msra.mxu0 %v21809_v27 }
 0x129   :  { %14423 = vmatprep.subr.bf16.mxu0 %v21811_v36 }
 0x12b   :  { %14609 = vmatpush1.bf16.msra.mxu1 %v21808_v59 }
 0x12c   :  { %14611 = vmatprep.subr.bf16.mxu1 %v21810_v10  ;;  %14425 = vmatpush1.bf16.msra.mxu0 %v21813_v2 }
 0x12d   :  { %14427 = vmatprep.subr.bf16.mxu0 %v21815_v57 }
 0x12f   :  { %14613 = vmatpush1.bf16.msra.mxu1 %v21812_v42 }
 0x130   :  { %14615 = vmatprep.subr.bf16.mxu1 %v21814_v11  ;;  %14429 = vmatpush1.bf16.msra.mxu0 %v21820_v33 }
 0x131   :  { %14623 = vmatprep.subr.bf16.mxu0 %v21787_v7 }
 0x133   :  { %14617 = vmatpush1.bf16.msra.mxu1 %v21819_v31  ;;  %982 = vmatmul.mubr.f32.vlgmr.msra.gmra.mrb[0].mxu0 %v21870_v46 }
 0x134   :  { %14619 = vmatprep.subr.bf16.mxu1 %v21824_v5  ;;  %14625 = vmatpush1.bf16.msra.mxu0 %v21789_v28 }
 0x135   :  { %14627 = vmatprep.subr.bf16.mxu0 %v21791_v3  ;;  %1986 = vmatprep.mubr.f32.mxu0 %v21539_v1 }
 0x137   :  { %14621 = vmatpush1.bf16.msra.mxu1 %v21832_v6 }
 0x138   :  { %14815 = vmatprep.subr.bf16.mxu1 %v21790_v54  ;;  %14629 = vmatpush1.bf16.msra.mxu0 %v21793_v38 }
 0x139   :  { %14631 = vmatprep.subr.bf16.mxu0 %v21795_v60 }
 0x13a   :  { %1837 = vmatmul.mubr.f32.vlgmr.msra.gmra.mrb[0].mxu1 %v21870_v46  ;;  %v21871_v46 = vld [vmem:[#allocation69_spill] sm:$0xff] }
 0x13b   :  { %14817 = vmatpush1.bf16.msra.mxu1 %v21792_v48  ;;  %2841 = vmatprep.mubr.f32.mxu1 %v21539_v1 }
 0x13c   :  { %14819 = vmatprep.subr.bf16.mxu1 %v21794_v20  ;;  %14633 = vmatpush1.bf16.msra.mxu0 %v21797_v24 }
 0x13d   :  { %14635 = vmatprep.subr.bf16.mxu0 %v21799_v17 }
 0x13f   :  { %14821 = vmatpush1.bf16.msra.mxu1 %v21796_v29 }
 0x140   :  { %14823 = vmatprep.subr.bf16.mxu1 %v21798_v50  ;;  %14637 = vmatpush1.bf16.msra.mxu0 %v21801_v40 }
 0x141   :  { %14639 = vmatprep.subr.bf16.mxu0 %v21803_v56 }
 0x143   :  { %14825 = vmatpush1.bf16.msra.mxu1 %v21800_v55 }
 0x144   :  { %14827 = vmatprep.subr.bf16.mxu1 %v21802_v22  ;;  %14641 = vmatpush1.bf16.msra.mxu0 %v21805_v30 }
 0x145   :  { %14643 = vmatprep.subr.bf16.mxu0 %v21807_v41 }
 0x147   :  { %14829 = vmatpush1.bf16.msra.mxu1 %v21804_v43 }
 0x148   :  { %14831 = vmatprep.subr.bf16.mxu1 %v21806_v35  ;;  %14645 = vmatpush1.bf16.msra.mxu0 %v21809_v27 }
 0x149   :  { %14647 = vmatprep.subr.bf16.mxu0 %v21811_v36 }
 0x14b   :  { %14833 = vmatpush1.bf16.msra.mxu1 %v21808_v59 }
 0x14c   :  { %14835 = vmatprep.subr.bf16.mxu1 %v21810_v10  ;;  %14649 = vmatpush1.bf16.msra.mxu0 %v21813_v2 }
 0x14d   :  { %14651 = vmatprep.subr.bf16.mxu0 %v21815_v57 }
 0x14f   :  { %14837 = vmatpush1.bf16.msra.mxu1 %v21812_v42 }
 0x150   :  { %14839 = vmatprep.subr.bf16.mxu1 %v21814_v11  ;;  %14653 = vmatpush1.bf16.msra.mxu0 %v21820_v33 }
 0x151   :  { %14655 = vmatprep.subr.bf16.mxu0 %v21871_v46 }
 0x153   :  { %14841 = vmatpush1.bf16.msra.mxu1 %v21819_v31 }
 0x154   :  { %14843 = vmatprep.subr.bf16.mxu1 %v21824_v5 }
 0x157   :  { %14845 = vmatpush1.bf16.msra.mxu1 %v21832_v6 }
 0x158   :  { %14847 = vmatprep.subr.bf16.mxu1 %v21872_v18 }
 0x206   :  { %v983_v26 = vpop.f32.mrb[0].mxu0 }
 0x207   :  { %v1843_v8 = vadd.f32 %v983_v26, %v129_v19  ;;  %v985_v15 = vpop.f32.mrb[1].mxu0  ;;  %v55_v26 = vld [vmem:[%s20953_s4] sm:$0xff] }
 0x208   :  { %v1844_v32 = vadd.f32 %v985_v15, %v130_v34 }
 0x209   :  { %v14207_v52 = vmul.f32 -1.442695, %v1843_v8 }
 0x20a   :  { %v14208_v44 = vmul.f32 -1.442695, %v1844_v32 }
 0x20b   :  { %17481 = vpow2.f32 %v14207_v52 }
 0x20c   :  { %17483 = vpow2.f32 %v14208_v44 }
 0x20d   :  { %v1838_v13 = vpop.f32.mrb[0].mxu1 }
 0x20e   :  { %v1840_v51 = vpop.f32.mrb[1].mxu1  ;;  %v1845_v9 = vadd.f32 %v1838_v13, %v131_v14 }
 0x20f   :  { %v1846_v45 = vadd.f32 %v1840_v51, %v132_v0  ;;  %v1874_v0 = vpop.permute.xlu0 %1873 }
 0x210   :  { %v14209_v46 = vmul.f32 -1.442695, %v1845_v9 }
 0x212   :  { %17485 = vpow2.f32 %v14209_v46 }
 0x213   :  { %17487 = vtanh.f32 %v1846_v45 }
 0x215   :  { %v17482_v47 = vpop.eup %17481 }
 0x216   :  { %v17484_v12 = vpop.eup %17483  ;;  %v1850_v18 = vadd.f32 1.0, %v17482_v47 }
 0x217   :  { %v1856_v4 = vadd.f32 1.0, %v17484_v12 }
 0x218   :  { %17489 = vrcp.f32 %v1850_v18 }
 0x219   :  { %17491 = vrcp.f32 %v1856_v4 }
 0x21c   :  { %v17486_v19 = vpop.eup %17485 }
 0x21d   :  { %v17488_v34 = vpop.eup %17487  ;;  %v1862_v13 = vadd.f32 1.0, %v17486_v19 }
 0x21f   :  { %17493 = vrcp.f32 %v1862_v13  ;;  %v21877_v13 = vld [vmem:[#allocation81_spill] sm:$0xff] }
 0x222   :  { %v17490_v52 = vpop.eup %17489 }
 0x223   :  { %v17492_v44 = vpop.eup %17491  ;;  %v1866_v15 = vmul.f32 %v17490_v52, %v55_v26  ;;  %v21873_v26 = vld [vmem:[#allocation71_spill] sm:$0xff] }
 0x224   :  { %v1867_v32 = vmul.f32 %v17492_v44, %v17488_v34  ;;  %v21874_v34 = vld [vmem:[#allocation77_spill] sm:$0xff]  ;;  %v21875_v52 = vld [vmem:[#allocation79_spill] sm:$0xff]  ;;  %v21876_v44 = vld [vmem:[#allocation80_spill] sm:$0xff] }
 0x226   :  { %v1868_v8 = vadd.f32 %v1867_v32, %v1866_v15  ;;  %v21878_v15 = vld [vmem:[#allocation82_spill] sm:$0xff]  ;;  %v21879_v32 = vld [vmem:[#allocation83_spill] sm:$0xff] }
 0x228   :  { %17495 = vtanh.f32 %v1868_v8  ;;  %v19370_v47 = vmul.f32 %v1874_v0, %v1868_v8  ;;  %v21881_v8 = vld [vmem:[#allocation85_spill] sm:$0xff] }
 0x229   :  { %v17494_v18 = vpop.eup %17493 }
 0x22a   :  { %1879 = vst [vmem:[#allocation9 + $0x8] sm:$0xff] %v19370_v47 }
 0x232   :  { %v17496_v4 = vpop.eup %17495 }
 0x233   :  { %v1870_v12 = vmul.f32 %v17496_v4, %v17494_v18  ;;  %v21882_v18 = vld [vmem:[#allocation87_spill] sm:$0xff]  ;;  %v21883_v4 = vld [vmem:[#allocation89_spill] sm:$0xff] }
 0x235   :  { %v1876_v45 = vmul.f32 %v1874_v0, %v1870_v12  ;;  %v21880_v0 = vld [vmem:[#allocation84_spill] sm:$0xff]  ;;  %v21884_v12 = vld [vmem:[#allocation90_spill] sm:$0xff] }
 0x237   :  { %1878 = vst [vmem:[#allocation9] sm:$0xff] %v1876_v45  ;;  %v19373_v9 = vand.u32 4294901760, %v1876_v45 }
 0x239   :  { %v19376_v14 = vsub.f32 %v1876_v45, %v19373_v9  ;;  %v21885_v45 = vld [vmem:[#allocation91_spill] sm:$0xff] }
 0x23b   :  { %v19379_v51 = vand.u32 4294901760, %v19376_v14 }
 0x23d   :  { %v1990_v46 = vsub.f32 %v19376_v14, %v19379_v51 }
 0x23f   :  { %v1991_v19 = vand.u32 4294901760, %v1990_v46  ;;  %v21886_v46 = vld [vmem:[#allocation92_spill] sm:$0xff] }
 0x241   :  { %1992 = vmatmul.mubr.f32.vlgmr.msra.gmra.mrb[2].mxu0 %v1991_v19  ;;  %2847 = vmatmul.mubr.f32.vlgmr.msra.gmra.mrb[2].mxu1 %v1991_v19  ;;  %v21887_v19 = vld [vmem:[#allocation93_spill] sm:$0xff] }
 0x242   :  { %14657 = vmatpush1.bf16.msra.mxu0 %v21873_v26  ;;  %14849 = vmatpush1.bf16.msra.mxu1 %v21874_v34 }
 0x243   :  { %14659 = vmatprep.subr.bf16.mxu0 %v21875_v52  ;;  %14851 = vmatprep.subr.bf16.mxu1 %v21876_v44 }
 0x244   :  { %2222 = vmatprep.mubr.f32.mxu0 %v21539_v1  ;;  %3077 = vmatprep.mubr.f32.mxu1 %v21539_v1 }
 0x246   :  { %14661 = vmatpush1.bf16.msra.mxu0 %v21877_v13  ;;  %14853 = vmatpush1.bf16.msra.mxu1 %v21878_v15  ;;  %v21888_v13 = vld [vmem:[#allocation94_spill] sm:$0xff] }
 0x247   :  { %14663 = vmatprep.subr.bf16.mxu0 %v21879_v32  ;;  %14855 = vmatprep.subr.bf16.mxu1 %v21880_v0  ;;  %v21889_v15 = vld [vmem:[#allocation38_spill] sm:$0xff]  ;;  %v21890_v32 = vld [vmem:[#allocation41_spill] sm:$0xff] }
 0x248   :  { %v21891_v0 = vld [vmem:[#allocation42_spill] sm:$0xff] }
 0x24a   :  { %14665 = vmatpush1.bf16.msra.mxu0 %v21881_v8  ;;  %14857 = vmatpush1.bf16.msra.mxu1 %v21882_v18  ;;  %v21892_v8 = vld [vmem:[#allocation43_spill] sm:$0xff]  ;;  %v21893_v18 = vld [vmem:[#allocation48_spill] sm:$0xff] }
 0x24b   :  { %14667 = vmatprep.subr.bf16.mxu0 %v21883_v4  ;;  %14859 = vmatprep.subr.bf16.mxu1 %v21884_v12  ;;  %v21894_v4 = vld [vmem:[#allocation96_spill] sm:$0xff]  ;;  %v21895_v12 = vld [vmem:[#allocation97_spill] sm:$0xff] }
 0x24e   :  { %14669 = vmatpush1.bf16.msra.mxu0 %v21885_v45  ;;  %14861 = vmatpush1.bf16.msra.mxu1 %v21886_v46  ;;  %v21896_v45 = vld [vmem:[#allocation51_spill] sm:$0xff] }
 0x24f   :  { %14671 = vmatprep.subr.bf16.mxu0 %v21887_v19  ;;  %14863 = vmatprep.subr.bf16.mxu1 %v21888_v13  ;;  %v21897_v46 = vld [vmem:[#allocation99_spill] sm:$0xff]  ;;  %v21899_v13 = vld [vmem:[#allocation100_spill] sm:$0xff] }
 0x250   :  { %v21898_v19 = vld [vmem:[#allocation55_spill] sm:$0xff] }
 0x252   :  { %14673 = vmatpush1.bf16.msra.mxu0 %v21889_v15  ;;  %14865 = vmatpush1.bf16.msra.mxu1 %v21890_v32  ;;  %v21900_v15 = vld [vmem:[#allocation101_spill] sm:$0xff]  ;;  %v21901_v32 = vld [vmem:[#allocation104_spill] sm:$0xff] }
 0x253   :  { %14675 = vmatprep.subr.bf16.mxu0 %v21891_v0  ;;  %14867 = vmatprep.subr.bf16.mxu1 %v21892_v8  ;;  %v21902_v0 = vld [vmem:[#allocation65_spill] sm:$0xff]  ;;  %v21903_v8 = vld [vmem:[#allocation102_spill] sm:$0xff] }
 0x256   :  { %14677 = vmatpush1.bf16.msra.mxu0 %v21893_v18  ;;  %14869 = vmatpush1.bf16.msra.mxu1 %v21894_v4  ;;  %v21904_v18 = vld [vmem:[#allocation63_spill] sm:$0xff] }
 0x257   :  { %14679 = vmatprep.subr.bf16.mxu0 %v21895_v12  ;;  %14871 = vmatprep.subr.bf16.mxu1 %v21896_v45  ;;  %v21905_v45 = vld [vmem:[#allocation111_spill] sm:$0xff] }
 0x25a   :  { %14681 = vmatpush1.bf16.msra.mxu0 %v21897_v46  ;;  %14873 = vmatpush1.bf16.msra.mxu1 %v21898_v19  ;;  %v21906_v46 = vld [vmem:[#allocation113_spill] sm:$0xff]  ;;  %v21907_v19 = vld [vmem:[#allocation103_spill] sm:$0xff] }
 0x25b   :  { %14683 = vmatprep.subr.bf16.mxu0 %v21899_v13  ;;  %14875 = vmatprep.subr.bf16.mxu1 %v21900_v15  ;;  %v21908_v13 = vld [vmem:[#allocation105_spill] sm:$0xff]  ;;  %v21913_v15 = vld [vmem:[#allocation110_spill] sm:$0xff] }
 0x25e   :  { %14685 = vmatpush1.bf16.msra.mxu0 %v21901_v32  ;;  %14877 = vmatpush1.bf16.msra.mxu1 %v21902_v0  ;;  %v21909_v0 = vld [vmem:[#allocation106_spill] sm:$0xff]  ;;  %v21912_v32 = vld [vmem:[#allocation109_spill] sm:$0xff] }
 0x25f   :  { %14687 = vmatprep.subr.bf16.mxu0 %v21903_v8  ;;  %14879 = vmatprep.subr.bf16.mxu1 %v21904_v18  ;;  %v21910_v8 = vld [vmem:[#allocation107_spill] sm:$0xff]  ;;  %v21911_v18 = vld [vmem:[#allocation108_spill] sm:$0xff] }
 0x261   :  { %2224 = vmatmul.mubr.f32.vlgmr.msra.gmra.mrb[2].mxu0 %v19373_v9  ;;  %3079 = vmatmul.mubr.f32.vlgmr.msra.gmra.mrb[2].mxu1 %v19373_v9 }
 0x262   :  { %14689 = vmatpush1.bf16.msra.mxu0 %v21905_v45  ;;  %14881 = vmatpush1.bf16.msra.mxu1 %v21906_v46  ;;  %v21914_v46 = vld [vmem:[#allocation115_spill] sm:$0xff] }
 0x263   :  { %14691 = vmatprep.subr.bf16.mxu0 %v21907_v19  ;;  %14883 = vmatprep.subr.bf16.mxu1 %v21908_v13 }
 0x264   :  { %2358 = vmatprep.mubr.f32.mxu0 %v21539_v1  ;;  %3213 = vmatprep.mubr.f32.mxu1 %v21539_v1 }
 0x266   :  { %14693 = vmatpush1.bf16.msra.mxu0 %v21909_v0  ;;  %14885 = vmatpush1.bf16.msra.mxu1 %v21910_v8 }
 0x267   :  { %14695 = vmatprep.subr.bf16.mxu0 %v21911_v18  ;;  %14887 = vmatprep.subr.bf16.mxu1 %v21912_v32  ;;  %v21915_v32 = vld [vmem:[#allocation130_spill] sm:$0xff] }
 0x26a   :  { %14697 = vmatpush1.bf16.msra.mxu0 %v21913_v15  ;;  %14889 = vmatpush1.bf16.msra.mxu1 %v18885_v58  ;;  %v21916_v15 = vld [vmem:[#allocation133_spill] sm:$0xff]  ;;  %v21917_v58 = vld [vmem:[#allocation132_spill] sm:$0xff] }
 0x26b   :  { %14699 = vmatprep.subr.bf16.mxu0 %v21914_v46  ;;  %14891 = vmatprep.subr.bf16.mxu1 %v18915_v25  ;;  %v21918_v46 = vld [vmem:[#allocation135_spill] sm:$0xff]  ;;  %v21919_v25 = vld [vmem:[#allocation134_spill] sm:$0xff] }
 0x26e   :  { %14701 = vmatpush1.bf16.msra.mxu0 %v18919_v39  ;;  %14893 = vmatpush1.bf16.msra.mxu1 %v19093_v21  ;;  %v21920_v39 = vld [vmem:[#allocation137_spill] sm:$0xff]  ;;  %v21921_v21 = vld [vmem:[#allocation136_spill] sm:$0xff] }
 0x26f   :  { %14703 = vmatprep.subr.bf16.mxu0 %v18930_v62  ;;  %14895 = vmatprep.subr.bf16.mxu1 %v19104_v16  ;;  %v21922_v62 = vld [vmem:[#allocation139_spill] sm:$0xff]  ;;  %v21923_v16 = vld [vmem:[#allocation138_spill] sm:$0xff] }
 0x272   :  { %14705 = vmatpush1.bf16.msra.mxu0 %v19097_v23  ;;  %14897 = vmatpush1.bf16.msra.mxu1 %v19115_v37  ;;  %v21924_v23 = vld [vmem:[#allocation141_spill] sm:$0xff]  ;;  %v21925_v37 = vld [vmem:[#allocation140_spill] sm:$0xff] }
 0x273   :  { %14707 = vmatprep.subr.bf16.mxu0 %v21915_v32  ;;  %14899 = vmatprep.subr.bf16.mxu1 %v21916_v15  ;;  %v21926_v32 = vld [vmem:[#allocation114_spill] sm:$0xff] }
 0x276   :  { %14709 = vmatpush1.bf16.msra.mxu0 %v21917_v58  ;;  %14901 = vmatpush1.bf16.msra.mxu1 %v21918_v46 }
 0x277   :  { %14711 = vmatprep.subr.bf16.mxu0 %v21919_v25  ;;  %14903 = vmatprep.subr.bf16.mxu1 %v21920_v39 }
 0x27a   :  { %14713 = vmatpush1.bf16.msra.mxu0 %v21921_v21  ;;  %14905 = vmatpush1.bf16.msra.mxu1 %v21922_v62  ;;  %v21939_v62 = vld [vmem:[#allocation88_spill] sm:$0xff] }
 0x27b   :  { %14715 = vmatprep.subr.bf16.mxu0 %v21923_v16  ;;  %14907 = vmatprep.subr.bf16.mxu1 %v21924_v23  ;;  %v21932_v23 = vld [vmem:[#allocation120_spill] sm:$0xff]  ;;  %v21938_v16 = vld [vmem:[#allocation86_spill] sm:$0xff] }
 0x27e   :  { %14717 = vmatpush1.bf16.msra.mxu0 %v21925_v37  ;;  %14909 = vmatpush1.bf16.msra.mxu1 %v21926_v32  ;;  %v21928_v32 = vld [vmem:[#allocation67_spill] sm:$0xff]  ;;  %v21929_v37 = vld [vmem:[#allocation16_spill] sm:$0xff] }
 0x27f   :  { %14719 = vmatprep.subr.bf16.mxu0 %v21787_v7  ;;  %14911 = vmatprep.subr.bf16.mxu1 %v21790_v54 }
 0x281   :  { %2361 = vmatmul.mubr.f32.vlgmr.msra.gmra.mrb[2].mxu0 %v19376_v14  ;;  %3216 = vmatmul.mubr.f32.vlgmr.msra.gmra.mrb[2].mxu1 %v19376_v14  ;;  %v21927_v14 = vld [vmem:[#allocation13_spill] sm:$0xff] }
 0x282   :  { %14721 = vmatpush1.bf16.msra.mxu0 %v21789_v28  ;;  %14913 = vmatpush1.bf16.msra.mxu1 %v21792_v48 }
 0x283   :  { %14723 = vmatprep.subr.bf16.mxu0 %v21791_v3  ;;  %14915 = vmatprep.subr.bf16.mxu1 %v21794_v20 }
 0x284   :  { %2463 = vmatprep.mubr.f32.mxu0 %v21539_v1  ;;  %3318 = vmatprep.mubr.f32.mxu1 %v21539_v1 }
 0x286   :  { %14725 = vmatpush1.bf16.msra.mxu0 %v21793_v38  ;;  %14917 = vmatpush1.bf16.msra.mxu1 %v21796_v29 }
 0x287   :  { %14727 = vmatprep.subr.bf16.mxu0 %v21795_v60  ;;  %14919 = vmatprep.subr.bf16.mxu1 %v21798_v50 }
 0x28a   :  { %14729 = vmatpush1.bf16.msra.mxu0 %v21797_v24  ;;  %14921 = vmatpush1.bf16.msra.mxu1 %v21800_v55 }
 0x28b   :  { %14731 = vmatprep.subr.bf16.mxu0 %v21799_v17  ;;  %14923 = vmatprep.subr.bf16.mxu1 %v21802_v22 }
 0x28e   :  { %14733 = vmatpush1.bf16.msra.mxu0 %v21801_v40  ;;  %14925 = vmatpush1.bf16.msra.mxu1 %v21804_v43 }
 0x28f   :  { %14735 = vmatprep.subr.bf16.mxu0 %v21803_v56  ;;  %14927 = vmatprep.subr.bf16.mxu1 %v21806_v35 }
 0x292   :  { %14737 = vmatpush1.bf16.msra.mxu0 %v21805_v30  ;;  %14929 = vmatpush1.bf16.msra.mxu1 %v21808_v59 }
 0x293   :  { %14739 = vmatprep.subr.bf16.mxu0 %v21807_v41  ;;  %14931 = vmatprep.subr.bf16.mxu1 %v21810_v10 }
 0x296   :  { %14741 = vmatpush1.bf16.msra.mxu0 %v21809_v27  ;;  %14933 = vmatpush1.bf16.msra.mxu1 %v21812_v42 }
 0x297   :  { %14743 = vmatprep.subr.bf16.mxu0 %v21811_v36  ;;  %14935 = vmatprep.subr.bf16.mxu1 %v21814_v11 }
 0x29a   :  { %14745 = vmatpush1.bf16.msra.mxu0 %v21813_v2  ;;  %14937 = vmatpush1.bf16.msra.mxu1 %v21819_v31 }
 0x29b   :  { %14747 = vmatprep.subr.bf16.mxu0 %v21815_v57  ;;  %14939 = vmatprep.subr.bf16.mxu1 %v21824_v5 }
 0x29e   :  { %14749 = vmatpush1.bf16.msra.mxu0 %v21820_v33  ;;  %14941 = vmatpush1.bf16.msra.mxu1 %v21832_v6 }
 0x29f   :  { %14751 = vmatprep.subr.bf16.mxu0 %v21927_v14  ;;  %14943 = vmatprep.subr.bf16.mxu1 %v19225_v53  ;;  %v21930_v14 = vld [vmem:[#allocation18_spill] sm:$0xff]  ;;  %v21931_v53 = vld [vmem:[#allocation119_spill] sm:$0xff] }
 0x2a1   :  { %2467 = vmatmul.mubr.f32.vlgmr.msra.gmra.mrb[2].mxu0 %v19379_v51  ;;  %3322 = vmatmul.mubr.f32.vlgmr.msra.gmra.mrb[2].mxu1 %v19379_v51  ;;  %v21933_v51 = vld [vmem:[#allocation121_spill] sm:$0xff] }
 0x2a2   :  { %14753 = vmatpush1.bf16.msra.mxu0 %v21928_v32  ;;  %14945 = vmatpush1.bf16.msra.mxu1 %v19240_v49  ;;  %v21934_v32 = vld [vmem:[#allocation122_spill] sm:$0xff]  ;;  %v21935_v49 = vld [vmem:[#allocation123_spill] sm:$0xff] }
 0x2a3   :  { %14755 = vmatprep.subr.bf16.mxu0 %v19231_v61  ;;  %14947 = vmatprep.subr.bf16.mxu1 %v19254_v63  ;;  %v21936_v61 = vld [vmem:[#allocation124_spill] sm:$0xff]  ;;  %v21937_v63 = vld [vmem:[#allocation125_spill] sm:$0xff] }
 0x2a4   :  { %2633 = vmatprep.mubr.f32.mxu0 %v21539_v1  ;;  %3488 = vmatprep.mubr.f32.mxu1 %v21539_v1 }
 0x2a6   :  { %14757 = vmatpush1.bf16.msra.mxu0 %v21929_v37  ;;  %14949 = vmatpush1.bf16.msra.mxu1 %v21930_v14  ;;  %v21940_v37 = vld [vmem:[#allocation25_spill] sm:$0xff]  ;;  %v21941_v14 = vld [vmem:[#allocation26_spill] sm:$0xff] }
 0x2a7   :  { %14759 = vmatprep.subr.bf16.mxu0 %v21931_v53  ;;  %14951 = vmatprep.subr.bf16.mxu1 %v21932_v23  ;;  %v21942_v53 = vld [vmem:[#allocation28_spill] sm:$0xff]  ;;  %v21943_v23 = vld [vmem:[#allocation29_spill] sm:$0xff] }
 0x2aa   :  { %14761 = vmatpush1.bf16.msra.mxu0 %v21933_v51  ;;  %14953 = vmatpush1.bf16.msra.mxu1 %v21934_v32  ;;  %v21944_v51 = vld [vmem:[#allocation30_spill] sm:$0xff]  ;;  %v21945_v32 = vld [vmem:[#allocation33_spill] sm:$0xff] }
 0x2ab   :  { %14763 = vmatprep.subr.bf16.mxu0 %v21935_v49  ;;  %14955 = vmatprep.subr.bf16.mxu1 %v21936_v61  ;;  %v21946_v49 = vld [vmem:[#allocation34_spill] sm:$0xff]  ;;  %v21947_v61 = vld [vmem:[#allocation35_spill] sm:$0xff] }
 0x2ae   :  { %14765 = vmatpush1.bf16.msra.mxu0 %v21937_v63  ;;  %14957 = vmatpush1.bf16.msra.mxu1 %v21938_v16  ;;  %v21948_v63 = vld [vmem:[#allocation37_spill] sm:$0xff]  ;;  %v21949_v16 = vld [vmem:[#allocation39_spill] sm:$0xff] }
 0x2af   :  { %14767 = vmatprep.subr.bf16.mxu0 %v21939_v62  ;;  %14959 = vmatprep.subr.bf16.mxu1 %v21940_v37  ;;  %v21950_v62 = vld [vmem:[#allocation46_spill] sm:$0xff]  ;;  %v21951_v37 = vld [vmem:[#allocation95_spill] sm:$0xff] }
 0x2b2   :  { %14769 = vmatpush1.bf16.msra.mxu0 %v21941_v14  ;;  %14961 = vmatpush1.bf16.msra.mxu1 %v21942_v53  ;;  %v21952_v14 = vld [vmem:[#allocation49_spill] sm:$0xff]  ;;  %v21953_v53 = vld [vmem:[#allocation98_spill] sm:$0xff] }
 0x2b3   :  { %14771 = vmatprep.subr.bf16.mxu0 %v21943_v23  ;;  %14963 = vmatprep.subr.bf16.mxu1 %v21944_v51  ;;  %v21954_v23 = vld [vmem:[#allocation126_spill] sm:$0xff] }
 0x2b6   :  { %14773 = vmatpush1.bf16.msra.mxu0 %v21945_v32  ;;  %14965 = vmatpush1.bf16.msra.mxu1 %v21946_v49 }
 0x2b7   :  { %14775 = vmatprep.subr.bf16.mxu0 %v21947_v61  ;;  %14967 = vmatprep.subr.bf16.mxu1 %v21948_v63 }
 0x2ba   :  { %14777 = vmatpush1.bf16.msra.mxu0 %v21949_v16  ;;  %14969 = vmatpush1.bf16.msra.mxu1 %v21950_v62 }
 0x2bb   :  { %14779 = vmatprep.subr.bf16.mxu0 %v21951_v37  ;;  %14971 = vmatprep.subr.bf16.mxu1 %v21952_v14  ;;  %v1887_v14 = vld [vmem:[#allocation4 + $0x28] sm:$0xff] }
 0x2be   :  { %14781 = vmatpush1.bf16.msra.mxu0 %v21953_v53  ;;  %14973 = vmatpush1.bf16.msra.mxu1 %v21954_v23  ;;  %v21956_v23 = vld [vmem:[#allocation70_spill] sm:$0xff]  ;;  %v1886_v53 = vld [vmem:[#allocation4 + $0x20] sm:$0xff] }
 0x2bf   :  { %14783 = vmatprep.subr.bf16.mxu0 %v21787_v7  ;;  %14975 = vmatprep.subr.bf16.mxu1 %v21790_v54 }
 0x2c1   :  { %2635 = vmatmul.mubr.f32.vlgmr.msra.gmra.mrb[2].mxu0 %v19373_v9  ;;  %3490 = vmatmul.mubr.f32.vlgmr.msra.gmra.mrb[2].mxu1 %v19373_v9 }
 0x2c2   :  { %14785 = vmatpush1.bf16.msra.mxu0 %v21789_v28  ;;  %14977 = vmatpush1.bf16.msra.mxu1 %v21792_v48 }
 0x2c3   :  { %14787 = vmatprep.subr.bf16.mxu0 %v21791_v3  ;;  %14979 = vmatprep.subr.bf16.mxu1 %v21794_v20 }
 0x2c4   :  { %2737 = vmatprep.mubr.f32.mxu0 %v21539_v1  ;;  %3592 = vmatprep.mubr.f32.mxu1 %v21539_v1 }
 0x2c6   :  { %14789 = vmatpush1.bf16.msra.mxu0 %v21793_v38  ;;  %14981 = vmatpush1.bf16.msra.mxu1 %v21796_v29 }
 0x2c7   :  { %14791 = vmatprep.subr.bf16.mxu0 %v21795_v60  ;;  %14983 = vmatprep.subr.bf16.mxu1 %v21798_v50 }
 0x2ca   :  { %14793 = vmatpush1.bf16.msra.mxu0 %v21797_v24  ;;  %14985 = vmatpush1.bf16.msra.mxu1 %v21800_v55 }
 0x2cb   :  { %14795 = vmatprep.subr.bf16.mxu0 %v21799_v17  ;;  %14987 = vmatprep.subr.bf16.mxu1 %v21802_v22 }
 0x2ce   :  { %14797 = vmatpush1.bf16.msra.mxu0 %v21801_v40  ;;  %14989 = vmatpush1.bf16.msra.mxu1 %v21804_v43 }
 0x2cf   :  { %14799 = vmatprep.subr.bf16.mxu0 %v21803_v56  ;;  %14991 = vmatprep.subr.bf16.mxu1 %v21806_v35 }
 0x2d2   :  { %14801 = vmatpush1.bf16.msra.mxu0 %v21805_v30  ;;  %14993 = vmatpush1.bf16.msra.mxu1 %v21808_v59 }
 0x2d3   :  { %14803 = vmatprep.subr.bf16.mxu0 %v21807_v41  ;;  %14995 = vmatprep.subr.bf16.mxu1 %v21810_v10 }
 0x2d6   :  { %14805 = vmatpush1.bf16.msra.mxu0 %v21809_v27  ;;  %14997 = vmatpush1.bf16.msra.mxu1 %v21812_v42 }
 0x2d7   :  { %14807 = vmatprep.subr.bf16.mxu0 %v21811_v36  ;;  %14999 = vmatprep.subr.bf16.mxu1 %v21814_v11 }
 0x2da   :  { %14809 = vmatpush1.bf16.msra.mxu0 %v21813_v2  ;;  %15001 = vmatpush1.bf16.msra.mxu1 %v21819_v31 }
 0x2db   :  { %14811 = vmatprep.subr.bf16.mxu0 %v21815_v57  ;;  %15003 = vmatprep.subr.bf16.mxu1 %v21824_v5 }
 0x2de   :  { %14813 = vmatpush1.bf16.msra.mxu0 %v21820_v33  ;;  %15005 = vmatpush1.bf16.msra.mxu1 %v21832_v6 }
 0x2df   :  { %15007 = vmatprep.subr.bf16.mxu0 %v21787_v7  ;;  %15199 = vmatprep.subr.bf16.mxu1 %v21790_v54 }
 0x2e1   :  { %2739 = vmatmul.mubr.f32.vlgmr.msra.gmra.mrb[2].mxu0 %v19373_v9  ;;  %3594 = vmatmul.mubr.f32.vlgmr.msra.gmra.mrb[2].mxu1 %v19373_v9  ;;  %v21955_v9 = vld [vmem:[#allocation69_spill] sm:$0xff] }
 0x2e2   :  { %15009 = vmatpush1.bf16.msra.mxu0 %v21789_v28  ;;  %15201 = vmatpush1.bf16.msra.mxu1 %v21792_v48 }
 0x2e3   :  { %15011 = vmatprep.subr.bf16.mxu0 %v21791_v3  ;;  %15203 = vmatprep.subr.bf16.mxu1 %v21794_v20 }
 0x2e4   :  { %3744 = vmatprep.mubr.f32.mxu0 %v21539_v1  ;;  %4599 = vmatprep.mubr.f32.mxu1 %v21539_v1 }
 0x2e6   :  { %15013 = vmatpush1.bf16.msra.mxu0 %v21793_v38  ;;  %15205 = vmatpush1.bf16.msra.mxu1 %v21796_v29 }
 0x2e7   :  { %15015 = vmatprep.subr.bf16.mxu0 %v21795_v60  ;;  %15207 = vmatprep.subr.bf16.mxu1 %v21798_v50 }
 0x2ea   :  { %15017 = vmatpush1.bf16.msra.mxu0 %v21797_v24  ;;  %15209 = vmatpush1.bf16.msra.mxu1 %v21800_v55 }
 0x2eb   :  { %15019 = vmatprep.subr.bf16.mxu0 %v21799_v17  ;;  %15211 = vmatprep.subr.bf16.mxu1 %v21802_v22 }
 0x2ee   :  { %15021 = vmatpush1.bf16.msra.mxu0 %v21801_v40  ;;  %15213 = vmatpush1.bf16.msra.mxu1 %v21804_v43 }
 0x2ef   :  { %15023 = vmatprep.subr.bf16.mxu0 %v21803_v56  ;;  %15215 = vmatprep.subr.bf16.mxu1 %v21806_v35 }
 0x2f2   :  { %15025 = vmatpush1.bf16.msra.mxu0 %v21805_v30  ;;  %15217 = vmatpush1.bf16.msra.mxu1 %v21808_v59 }
 0x2f3   :  { %15027 = vmatprep.subr.bf16.mxu0 %v21807_v41  ;;  %15219 = vmatprep.subr.bf16.mxu1 %v21810_v10 }
 0x2f6   :  { %15029 = vmatpush1.bf16.msra.mxu0 %v21809_v27  ;;  %15221 = vmatpush1.bf16.msra.mxu1 %v21812_v42 }
 0x2f7   :  { %15031 = vmatprep.subr.bf16.mxu0 %v21811_v36  ;;  %15223 = vmatprep.subr.bf16.mxu1 %v21814_v11 }
 0x2fa   :  { %15033 = vmatpush1.bf16.msra.mxu0 %v21813_v2  ;;  %15225 = vmatpush1.bf16.msra.mxu1 %v21819_v31 }
 0x2fb   :  { %15035 = vmatprep.subr.bf16.mxu0 %v21815_v57  ;;  %15227 = vmatprep.subr.bf16.mxu1 %v21824_v5  ;;  %v1888_v5 = vld [vmem:[#allocation4 + $0x30] sm:$0xff]  ;;  %v1889_v57 = vld [vmem:[#allocation4 + $0x38] sm:$0xff] }
 0x2fe   :  { %15037 = vmatpush1.bf16.msra.mxu0 %v21820_v33  ;;  %15229 = vmatpush1.bf16.msra.mxu1 %v21832_v6 }
 0x2ff   :  { %15039 = vmatprep.subr.bf16.mxu0 %v21955_v9  ;;  %15231 = vmatprep.subr.bf16.mxu1 %v21956_v23 }
 0x3b4   :  { %v2740_v37 = vpop.f32.mrb[2].mxu0  ;;  %v3595_v62 = vpop.f32.mrb[2].mxu1 }
 0x3b5   :  { %v3600_v16 = vadd.f32 %v2740_v37, %v1886_v53  ;;  %v2742_v63 = vpop.f32.mrb[3].mxu0  ;;  %v3597_v61 = vpop.f32.mrb[3].mxu1  ;;  %v3602_v33 = vadd.f32 %v3595_v62, %v1888_v5 }
 0x3b6   :  { %v3601_v49 = vadd.f32 %v2742_v63, %v1887_v14  ;;  %v3603_v9 = vadd.f32 %v3597_v61, %v1889_v57  ;;  %v3631_v5 = vpop.permute.xlu0 %3630 }
 0x3b7   :  { %v14211_v32 = vmul.f32 -1.442695, %v3600_v16  ;;  %v14213_v6 = vmul.f32 -1.442695, %v3602_v33 }
 0x3b8   :  { %v14212_v51 = vmul.f32 -1.442695, %v3601_v49 }
 0x3b9   :  { %17497 = vpow2.f32 %v14211_v32 }
 0x3ba   :  { %17499 = vpow2.f32 %v14212_v51 }
 0x3bb   :  { %17501 = vpow2.f32 %v14213_v6 }
 0x3c3   :  { %v17498_v31 = vpop.eup %17497 }
 0x3c4   :  { %v3607_v2 = vadd.f32 1.0, %v17498_v31  ;;  %v17500_v23 = vpop.eup %17499 }
 0x3c5   :  { %v3613_v11 = vadd.f32 1.0, %v17500_v23  ;;  %v17502_v37 = vpop.eup %17501 }
 0x3c6   :  { %17503 = vrcp.f32 %v3607_v2  ;;  %v3619_v32 = vadd.f32 1.0, %v17502_v37  ;;  %v21958_v37 = vld [vmem:[#allocation82_spill] sm:$0xff] }
 0x3c7   :  { %17505 = vtanh.f32 %v3603_v9  ;;  %v21957_v9 = vld [vmem:[#allocation81_spill] sm:$0xff] }
 0x3c8   :  { %17507 = vrcp.f32 %v3613_v11 }
 0x3c9   :  { %17509 = vrcp.f32 %v3619_v32  ;;  %v21963_v32 = vld [vmem:[#allocation89_spill] sm:$0xff] }
 0x3d0   :  { %v17504_v53 = vpop.eup %17503 }
 0x3d1   :  { %v17506_v63 = vpop.eup %17505  ;;  %v3623_v16 = vmul.f32 %v17504_v53, %v19370_v47  ;;  %v21959_v53 = vld [vmem:[#allocation83_spill] sm:$0xff] }
 0x3d2   :  { %v17508_v49 = vpop.eup %17507 }
 0x3d3   :  { %v3624_v14 = vmul.f32 %v17508_v49, %v17506_v63  ;;  %v17510_v31 = vpop.eup %17509  ;;  %v21960_v63 = vld [vmem:[#allocation84_spill] sm:$0xff]  ;;  %v21962_v49 = vld [vmem:[#allocation87_spill] sm:$0xff] }
 0x3d5   :  { %v3625_v62 = vadd.f32 %v3624_v14, %v3623_v16  ;;  %v21961_v16 = vld [vmem:[#allocation85_spill] sm:$0xff]  ;;  %v21964_v14 = vld [vmem:[#allocation90_spill] sm:$0xff] }
 0x3d7   :  { %17511 = vtanh.f32 %v3625_v62  ;;  %v19598_v61 = vmul.f32 %v3631_v5, %v3625_v62  ;;  %v21965_v62 = vld [vmem:[#allocation91_spill] sm:$0xff] }
 0x3d9   :  { %3637 = vst [vmem:[#allocation9 + $0x18] sm:$0xff] %v19598_v61 }
 0x3e1   :  { %v17512_v23 = vpop.eup %17511 }
 0x3e2   :  { %v3627_v33 = vmul.f32 %v17512_v23, %v17510_v31  ;;  %v21967_v31 = vld [vmem:[#allocation93_spill] sm:$0xff]  ;;  %v21968_v23 = vld [vmem:[#allocation94_spill] sm:$0xff] }
 0x3e4   :  { %v3633_v2 = vmul.f32 %v3631_v5, %v3627_v33  ;;  %v21966_v5 = vld [vmem:[#allocation92_spill] sm:$0xff]  ;;  %v21969_v33 = vld [vmem:[#allocation38_spill] sm:$0xff] }
 0x3e6   :  { %3636 = vst [vmem:[#allocation9 + $0x10] sm:$0xff] %v3633_v2  ;;  %v19601_v11 = vand.u32 4294901760, %v3633_v2 }
 0x3e8   :  { %v19604_v57 = vsub.f32 %v3633_v2, %v19601_v11  ;;  %v21970_v2 = vld [vmem:[#allocation41_spill] sm:$0xff] }
 0x3ea   :  { %v19607_v6 = vand.u32 4294901760, %v19604_v57 }
 0x3ec   :  { %v3748_v47 = vsub.f32 %v19604_v57, %v19607_v6 }
 0x3ee   :  { %v3749_v51 = vand.u32 4294901760, %v3748_v47  ;;  %v21971_v47 = vld [vmem:[#allocation42_spill] sm:$0xff] }
 0x3f0   :  { %3750 = vmatmul.mubr.f32.vlgmr.msra.gmra.mrb[4].mxu0 %v3749_v51  ;;  %4605 = vmatmul.mubr.f32.vlgmr.msra.gmra.mrb[4].mxu1 %v3749_v51  ;;  %v21972_v51 = vld [vmem:[#allocation43_spill] sm:$0xff] }
 0x3f1   :  { %15041 = vmatpush1.bf16.msra.mxu0 %v21873_v26  ;;  %15233 = vmatpush1.bf16.msra.mxu1 %v21874_v34 }
 0x3f2   :  { %15043 = vmatprep.subr.bf16.mxu0 %v21875_v52  ;;  %15235 = vmatprep.subr.bf16.mxu1 %v21876_v44 }
 0x3f3   :  { %3980 = vmatprep.mubr.f32.mxu0 %v21539_v1  ;;  %4835 = vmatprep.mubr.f32.mxu1 %v21539_v1 }
 0x3f5   :  { %15045 = vmatpush1.bf16.msra.mxu0 %v21957_v9  ;;  %15237 = vmatpush1.bf16.msra.mxu1 %v21958_v37 }
 0x3f6   :  { %15047 = vmatprep.subr.bf16.mxu0 %v21959_v53  ;;  %15239 = vmatprep.subr.bf16.mxu1 %v21960_v63 }
 0x3f9   :  { %15049 = vmatpush1.bf16.msra.mxu0 %v21961_v16  ;;  %15241 = vmatpush1.bf16.msra.mxu1 %v21962_v49  ;;  %v21973_v49 = vld [vmem:[#allocation48_spill] sm:$0xff] }
 0x3fa   :  { %15051 = vmatprep.subr.bf16.mxu0 %v21963_v32  ;;  %15243 = vmatprep.subr.bf16.mxu1 %v21964_v14 }
 0x3fd   :  { %15053 = vmatpush1.bf16.msra.mxu0 %v21965_v62  ;;  %15245 = vmatpush1.bf16.msra.mxu1 %v21966_v5  ;;  %v21974_v62 = vld [vmem:[#allocation51_spill] sm:$0xff] }
 0x3fe   :  { %15055 = vmatprep.subr.bf16.mxu0 %v21967_v31  ;;  %15247 = vmatprep.subr.bf16.mxu1 %v21968_v23  ;;  %v21975_v5 = vld [vmem:[#allocation99_spill] sm:$0xff]  ;;  %v21977_v23 = vld [vmem:[#allocation100_spill] sm:$0xff] }
 0x3ff   :  { %v21976_v31 = vld [vmem:[#allocation55_spill] sm:$0xff] }
 0x401   :  { %15057 = vmatpush1.bf16.msra.mxu0 %v21969_v33  ;;  %15249 = vmatpush1.bf16.msra.mxu1 %v21970_v2  ;;  %v21978_v33 = vld [vmem:[#allocation101_spill] sm:$0xff]  ;;  %v21979_v2 = vld [vmem:[#allocation104_spill] sm:$0xff] }
 0x402   :  { %15059 = vmatprep.subr.bf16.mxu0 %v21971_v47  ;;  %15251 = vmatprep.subr.bf16.mxu1 %v21972_v51  ;;  %v21980_v47 = vld [vmem:[#allocation65_spill] sm:$0xff]  ;;  %v21981_v51 = vld [vmem:[#allocation102_spill] sm:$0xff] }
 0x405   :  { %15061 = vmatpush1.bf16.msra.mxu0 %v21973_v49  ;;  %15253 = vmatpush1.bf16.msra.mxu1 %v21894_v4  ;;  %v21982_v49 = vld [vmem:[#allocation63_spill] sm:$0xff] }
 0x406   :  { %15063 = vmatprep.subr.bf16.mxu0 %v21895_v12  ;;  %15255 = vmatprep.subr.bf16.mxu1 %v21974_v62 }
 0x409   :  { %15065 = vmatpush1.bf16.msra.mxu0 %v21975_v5  ;;  %15257 = vmatpush1.bf16.msra.mxu1 %v21976_v31  ;;  %v17609_v31 = vld [vmem:[%s20950_s1] sm:$0xff]  ;;  %s17688_s1 = smov [#allocation9]  }
 0x40a   :  { %15067 = vmatprep.subr.bf16.mxu0 %v21977_v23  ;;  %15259 = vmatprep.subr.bf16.mxu1 %v21978_v33  ;;  %vm3640_vm4 = vcmp.gt.s32.totalorder %v17609_v31, 2  ;;  %v21983_v33 = vld [vmem:[#allocation113_spill] sm:$0xff]  ;;  %vm5398_vm5 = vcmp.gt.s32.totalorder %v17609_v31, 3  ;;  %vm8914_vm6 = vcmp.gt.s32.totalorder %v17609_v31, 5  ;;  %vm12430_vm7 = vcmp.gt.s32.totalorder %v17609_v31, 7  ;;  %v21997_v31 = vld [vmem:[#allocation138_spill] sm:$0xff] }
 0x40b   :  { %s14193_s23 = sshll.u32 %s17688_s1, 4  ;;  %s14194_s23 = int_to_ptr.vmem [resolvable:$true] %s14193_s23 }
 0x40c   :  { %s17654_s24 = scalar_lea.vmem %s14194_s23, 2048  ;;  %p17659_p3 = scmp.lt.s32.totalorder %s14194_s23, %s14194_s23 }
 0x40d   :  { %15069 = vmatpush1.bf16.msra.mxu0 %v21979_v2  ;;  %15261 = vmatpush1.bf16.msra.mxu1 %v21980_v47  ;;  %v14214_v2 = vsel %vm3640_vm4, 1.0, %v21539_v1  ;;  %p17655_p2 = scmp.ne.s32.totalorder %s14194_s23, %s17654_s24  ;;  %p17660_p4 = scmp.lt.s32.totalorder %s17654_s24, %s17654_s24 }
 0x40e   :  { %15071 = vmatprep.subr.bf16.mxu0 %v21981_v51  ;;  %15263 = vmatprep.subr.bf16.mxu1 %v21982_v49  ;;  %v14226_v49 = vsel %vm8914_vm6, 1.0, %v21539_v1  ;;  %v21987_v51 = vld [vmem:[#allocation115_spill] sm:$0xff] }
 0x40f   :  { %5388 = vperm.xlu1 %17480, %v14214_v2   ;;  %v21988_v2 = vld [vmem:[#allocation116_spill] sm:$0xff]  ;;  %p17661_p5 = por %p17660_p4, %p17659_p3 }
 0x410   :  { %3982 = vmatmul.mubr.f32.vlgmr.msra.gmra.mrb[4].mxu0 %v19601_v11  ;;  %4837 = vmatmul.mubr.f32.vlgmr.msra.gmra.mrb[4].mxu1 %v19601_v11 }
 0x411   :  { %15073 = vmatpush1.bf16.msra.mxu0 %v21905_v45  ;;  %15265 = vmatpush1.bf16.msra.mxu1 %v21983_v33  ;;  %v14218_v45 = vsel %vm5398_vm5, 1.0, %v21539_v1  ;;  %v21984_v33 = vld [vmem:[#allocation109_spill] sm:$0xff]  ;;  %p17662_p6 = pnand %p17661_p5, %p17655_p2 }
 0x412   :  { %15075 = vmatprep.subr.bf16.mxu0 %v21907_v19  ;;  %15267 = vmatprep.subr.bf16.mxu1 %v21908_v13  ;;  %v21985_v19 = vld [vmem:[#allocation110_spill] sm:$0xff]  ;;  %v21986_v13 = vld [vmem:[#allocation112_spill] sm:$0xff] }
 0x413   :  { %4116 = vmatprep.mubr.f32.mxu0 %v21539_v1  ;;  %4971 = vmatprep.mubr.f32.mxu1 %v21539_v1 }
 0x414   :  { %7146 = vperm.xlu1 %17480, %v14218_v45   ;;  %v21992_v45 = vld [vmem:[#allocation129_spill] sm:$0xff] }
 0x415   :  { %15077 = vmatpush1.bf16.msra.mxu0 %v21909_v0  ;;  %15269 = vmatpush1.bf16.msra.mxu1 %v21910_v8  ;;  %v21989_v8 = vld [vmem:[#allocation117_spill] sm:$0xff]  ;;  %v21990_v0 = vld [vmem:[#allocation127_spill] sm:$0xff] }
 0x416   :  { %15079 = vmatprep.subr.bf16.mxu0 %v21911_v18  ;;  %15271 = vmatprep.subr.bf16.mxu1 %v21984_v33  ;;  %v14234_v33 = vsel %vm12430_vm7, 1.0, %v21539_v1  ;;  %v21991_v18 = vld [vmem:[#allocation118_spill] sm:$0xff] }
 0x418   :  { %10662 = vperm.xlu1 %17480, %v14226_v49   ;;  %v21996_v49 = vld [vmem:[#allocation139_spill] sm:$0xff] }
 0x419   :  { %15081 = vmatpush1.bf16.msra.mxu0 %v21985_v19  ;;  %15273 = vmatpush1.bf16.msra.mxu1 %v21986_v13  ;;  %v21993_v13 = vld [vmem:[#allocation128_spill] sm:$0xff]  ;;  %v21994_v19 = vld [vmem:[#allocation131_spill] sm:$0xff] }
 0x41a   :  { %15083 = vmatprep.subr.bf16.mxu0 %v21987_v51  ;;  %15275 = vmatprep.subr.bf16.mxu1 %v21988_v2  ;;  %v21995_v51 = vld [vmem:[#allocation130_spill] sm:$0xff] }
 0x41c   :  { %14178 = vperm.xlu1 %17480, %v14234_v33   ;;  %v21998_v33 = vld [vmem:[#allocation141_spill] sm:$0xff] }
 0x41d   :  { %15085 = vmatpush1.bf16.msra.mxu0 %v21989_v8  ;;  %15277 = vmatpush1.bf16.msra.mxu1 %v21990_v0  ;;  %v22023_v0 = vld [vmem:[#allocation86_spill] sm:$0xff]  ;;  %v22024_v8 = vld [vmem:[#allocation88_spill] sm:$0xff] }
 0x41e   :  { %15087 = vmatprep.subr.bf16.mxu0 %v21991_v18  ;;  %15279 = vmatprep.subr.bf16.mxu1 %v21992_v45  ;;  %v22014_v45 = vld [vmem:[#allocation16_spill] sm:$0xff] }
 0x41f   :  { %v22017_v18 = vld [vmem:[#allocation120_spill] sm:$0xff] }
 0x421   :  { %15089 = vmatpush1.bf16.msra.mxu0 %v21993_v13  ;;  %15281 = vmatpush1.bf16.msra.mxu1 %v21994_v19  ;;  %v21999_v19 = vld [vmem:[#allocation140_spill] sm:$0xff]  ;;  %v22013_v13 = vld [vmem:[#allocation19_spill] sm:$0xff] }
 0x422   :  { %15091 = vmatprep.subr.bf16.mxu0 %v21995_v51  ;;  %15283 = vmatprep.subr.bf16.mxu1 %v21916_v15  ;;  %v22000_v51 = vld [vmem:[#allocation114_spill] sm:$0xff] }
 0x423   :  { %v22012_v15 = vld [vmem:[#allocation14_spill] sm:$0xff] }
 0x425   :  { %15093 = vmatpush1.bf16.msra.mxu0 %v21917_v58  ;;  %15285 = vmatpush1.bf16.msra.mxu1 %v21918_v46  ;;  %v22010_v46 = vld [vmem:[#allocation67_spill] sm:$0xff]  ;;  %v22011_v58 = vld [vmem:[#allocation17_spill] sm:$0xff] }
 0x426   :  { %15095 = vmatprep.subr.bf16.mxu0 %v21919_v25  ;;  %15287 = vmatprep.subr.bf16.mxu1 %v21920_v39  ;;  %v22008_v39 = vld [vmem:[#allocation13_spill] sm:$0xff]  ;;  %v22009_v25 = vld [vmem:[#allocation15_spill] sm:$0xff] }
 0x429   :  { %15097 = vmatpush1.bf16.msra.mxu0 %v21921_v21  ;;  %15289 = vmatpush1.bf16.msra.mxu1 %v21996_v49  ;;  %v22006_v49 = vld [vmem:[#allocation62_spill] sm:$0xff]  ;;  %v22007_v21 = vld [vmem:[#allocation64_spill] sm:$0xff] }
 0x42a   :  { %15099 = vmatprep.subr.bf16.mxu0 %v21997_v31  ;;  %15291 = vmatprep.subr.bf16.mxu1 %v21998_v33  ;;  %v22004_v33 = vld [vmem:[#allocation60_spill] sm:$0xff]  ;;  %v22005_v31 = vld [vmem:[#allocation61_spill] sm:$0xff] }
 0x42d   :  { %15101 = vmatpush1.bf16.msra.mxu0 %v21999_v19  ;;  %15293 = vmatpush1.bf16.msra.mxu1 %v22000_v51  ;;  %v22002_v51 = vld [vmem:[#allocation58_spill] sm:$0xff]  ;;  %v22003_v19 = vld [vmem:[#allocation59_spill] sm:$0xff] }
 0x42e   :  { %15103 = vmatprep.subr.bf16.mxu0 %v21787_v7  ;;  %15295 = vmatprep.subr.bf16.mxu1 %v21790_v54 }
 0x430   :  { %4119 = vmatmul.mubr.f32.vlgmr.msra.gmra.mrb[4].mxu0 %v19604_v57  ;;  %4974 = vmatmul.mubr.f32.vlgmr.msra.gmra.mrb[4].mxu1 %v19604_v57  ;;  %v22001_v57 = vld [vmem:[#allocation57_spill] sm:$0xff] }
 0x431   :  { %15105 = vmatpush1.bf16.msra.mxu0 %v21789_v28  ;;  %15297 = vmatpush1.bf16.msra.mxu1 %v21792_v48 }
 0x432   :  { %15107 = vmatprep.subr.bf16.mxu0 %v21791_v3  ;;  %15299 = vmatprep.subr.bf16.mxu1 %v21794_v20 }
 0x433   :  { %4221 = vmatprep.mubr.f32.mxu0 %v21539_v1  ;;  %5076 = vmatprep.mubr.f32.mxu1 %v21539_v1 }
 0x435   :  { %15109 = vmatpush1.bf16.msra.mxu0 %v21793_v38  ;;  %15301 = vmatpush1.bf16.msra.mxu1 %v21796_v29 }
 0x436   :  { %15111 = vmatprep.subr.bf16.mxu0 %v21795_v60  ;;  %15303 = vmatprep.subr.bf16.mxu1 %v21798_v50 }
 0x439   :  { %15113 = vmatpush1.bf16.msra.mxu0 %v21797_v24  ;;  %15305 = vmatpush1.bf16.msra.mxu1 %v21800_v55 }
 0x43a   :  { %15115 = vmatprep.subr.bf16.mxu0 %v21799_v17  ;;  %15307 = vmatprep.subr.bf16.mxu1 %v21802_v22 }
 0x43d   :  { %15117 = vmatpush1.bf16.msra.mxu0 %v21801_v40  ;;  %15309 = vmatpush1.bf16.msra.mxu1 %v21804_v43 }
 0x43e   :  { %15119 = vmatprep.subr.bf16.mxu0 %v21803_v56  ;;  %15311 = vmatprep.subr.bf16.mxu1 %v21806_v35 }
 0x441   :  { %15121 = vmatpush1.bf16.msra.mxu0 %v21805_v30  ;;  %15313 = vmatpush1.bf16.msra.mxu1 %v21808_v59 }
 0x442   :  { %15123 = vmatprep.subr.bf16.mxu0 %v21807_v41  ;;  %15315 = vmatprep.subr.bf16.mxu1 %v21810_v10 }
 0x445   :  { %15125 = vmatpush1.bf16.msra.mxu0 %v21809_v27  ;;  %15317 = vmatpush1.bf16.msra.mxu1 %v21812_v42 }
 0x446   :  { %15127 = vmatprep.subr.bf16.mxu0 %v21811_v36  ;;  %15319 = vmatprep.subr.bf16.mxu1 %v22001_v57 }
 0x449   :  { %15129 = vmatpush1.bf16.msra.mxu0 %v22002_v51  ;;  %15321 = vmatpush1.bf16.msra.mxu1 %v22003_v19 }
 0x44a   :  { %15131 = vmatprep.subr.bf16.mxu0 %v22004_v33  ;;  %15323 = vmatprep.subr.bf16.mxu1 %v22005_v31 }
 0x44d   :  { %15133 = vmatpush1.bf16.msra.mxu0 %v22006_v49  ;;  %15325 = vmatpush1.bf16.msra.mxu1 %v22007_v21 }
 0x44e   :  { %15135 = vmatprep.subr.bf16.mxu0 %v22008_v39  ;;  %15327 = vmatprep.subr.bf16.mxu1 %v22009_v25  ;;  %v22015_v39 = vld [vmem:[#allocation18_spill] sm:$0xff]  ;;  %v22016_v25 = vld [vmem:[#allocation119_spill] sm:$0xff] }
 0x450   :  { %4225 = vmatmul.mubr.f32.vlgmr.msra.gmra.mrb[4].mxu0 %v19607_v6  ;;  %5080 = vmatmul.mubr.f32.vlgmr.msra.gmra.mrb[4].mxu1 %v19607_v6  ;;  %v22018_v6 = vld [vmem:[#allocation121_spill] sm:$0xff] }
 0x451   :  { %15137 = vmatpush1.bf16.msra.mxu0 %v22010_v46  ;;  %15329 = vmatpush1.bf16.msra.mxu1 %v22011_v58  ;;  %v22019_v46 = vld [vmem:[#allocation122_spill] sm:$0xff]  ;;  %v22020_v58 = vld [vmem:[#allocation123_spill] sm:$0xff] }
 0x452   :  { %15139 = vmatprep.subr.bf16.mxu0 %v22012_v15  ;;  %15331 = vmatprep.subr.bf16.mxu1 %v22013_v13  ;;  %v22021_v15 = vld [vmem:[#allocation124_spill] sm:$0xff]  ;;  %v22022_v13 = vld [vmem:[#allocation125_spill] sm:$0xff] }
 0x453   :  { %4391 = vmatprep.mubr.f32.mxu0 %v21539_v1  ;;  %5246 = vmatprep.mubr.f32.mxu1 %v21539_v1 }
 0x455   :  { %15141 = vmatpush1.bf16.msra.mxu0 %v22014_v45  ;;  %15333 = vmatpush1.bf16.msra.mxu1 %v22015_v39  ;;  %v22025_v45 = vld [vmem:[#allocation25_spill] sm:$0xff]  ;;  %v22026_v39 = vld [vmem:[#allocation26_spill] sm:$0xff] }
 0x456   :  { %15143 = vmatprep.subr.bf16.mxu0 %v22016_v25  ;;  %15335 = vmatprep.subr.bf16.mxu1 %v22017_v18  ;;  %v22027_v25 = vld [vmem:[#allocation28_spill] sm:$0xff]  ;;  %v22028_v18 = vld [vmem:[#allocation29_spill] sm:$0xff] }
 0x459   :  { %15145 = vmatpush1.bf16.msra.mxu0 %v22018_v6  ;;  %15337 = vmatpush1.bf16.msra.mxu1 %v22019_v46  ;;  %v22029_v6 = vld [vmem:[#allocation30_spill] sm:$0xff]  ;;  %v22030_v46 = vld [vmem:[#allocation33_spill] sm:$0xff] }
 0x45a   :  { %15147 = vmatprep.subr.bf16.mxu0 %v22020_v58  ;;  %15339 = vmatprep.subr.bf16.mxu1 %v22021_v15  ;;  %v22031_v58 = vld [vmem:[#allocation34_spill] sm:$0xff]  ;;  %v22032_v15 = vld [vmem:[#allocation35_spill] sm:$0xff] }
 0x45d   :  { %15149 = vmatpush1.bf16.msra.mxu0 %v22022_v13  ;;  %15341 = vmatpush1.bf16.msra.mxu1 %v22023_v0  ;;  %v22033_v13 = vld [vmem:[#allocation37_spill] sm:$0xff]  ;;  %v22034_v0 = vld [vmem:[#allocation39_spill] sm:$0xff] }
 0x45e   :  { %15151 = vmatprep.subr.bf16.mxu0 %v22024_v8  ;;  %15343 = vmatprep.subr.bf16.mxu1 %v22025_v45  ;;  %v22035_v8 = vld [vmem:[#allocation46_spill] sm:$0xff]  ;;  %v22036_v45 = vld [vmem:[#allocation95_spill] sm:$0xff] }
 0x461   :  { %15153 = vmatpush1.bf16.msra.mxu0 %v22026_v39  ;;  %15345 = vmatpush1.bf16.msra.mxu1 %v22027_v25  ;;  %v22037_v39 = vld [vmem:[#allocation49_spill] sm:$0xff]  ;;  %v22038_v25 = vld [vmem:[#allocation98_spill] sm:$0xff] }
 0x462   :  { %15155 = vmatprep.subr.bf16.mxu0 %v22028_v18  ;;  %15347 = vmatprep.subr.bf16.mxu1 %v22029_v6  ;;  %v22039_v18 = vld [vmem:[#allocation126_spill] sm:$0xff] }
 0x465   :  { %15157 = vmatpush1.bf16.msra.mxu0 %v22030_v46  ;;  %15349 = vmatpush1.bf16.msra.mxu1 %v22031_v58 }
 0x466   :  { %15159 = vmatprep.subr.bf16.mxu0 %v22032_v15  ;;  %15351 = vmatprep.subr.bf16.mxu1 %v22033_v13 }
 0x469   :  { %15161 = vmatpush1.bf16.msra.mxu0 %v22034_v0  ;;  %15353 = vmatpush1.bf16.msra.mxu1 %v22035_v8 }
 0x46a   :  { %15163 = vmatprep.subr.bf16.mxu0 %v22036_v45  ;;  %15355 = vmatprep.subr.bf16.mxu1 %v22037_v39  ;;  %v3645_v39 = vld [vmem:[#allocation4 + $0x48] sm:$0xff] }
 0x46d   :  { %15165 = vmatpush1.bf16.msra.mxu0 %v22038_v25  ;;  %15357 = vmatpush1.bf16.msra.mxu1 %v22039_v18  ;;  %v22041_v18 = vld [vmem:[#allocation70_spill] sm:$0xff]  ;;  %v3644_v25 = vld [vmem:[#allocation4 + $0x40] sm:$0xff] }
 0x46e   :  { %15167 = vmatprep.subr.bf16.mxu0 %v21787_v7  ;;  %15359 = vmatprep.subr.bf16.mxu1 %v21790_v54 }
 0x470   :  { %4393 = vmatmul.mubr.f32.vlgmr.msra.gmra.mrb[4].mxu0 %v19601_v11  ;;  %5248 = vmatmul.mubr.f32.vlgmr.msra.gmra.mrb[4].mxu1 %v19601_v11 }
 0x471   :  { %15169 = vmatpush1.bf16.msra.mxu0 %v21789_v28  ;;  %15361 = vmatpush1.bf16.msra.mxu1 %v21792_v48 }
 0x472   :  { %15171 = vmatprep.subr.bf16.mxu0 %v21791_v3  ;;  %15363 = vmatprep.subr.bf16.mxu1 %v21794_v20 }
 0x473   :  { %4495 = vmatprep.mubr.f32.mxu0 %v21539_v1  ;;  %5350 = vmatprep.mubr.f32.mxu1 %v21539_v1 }
 0x475   :  { %15173 = vmatpush1.bf16.msra.mxu0 %v21793_v38  ;;  %15365 = vmatpush1.bf16.msra.mxu1 %v21796_v29 }
 0x476   :  { %15175 = vmatprep.subr.bf16.mxu0 %v21795_v60  ;;  %15367 = vmatprep.subr.bf16.mxu1 %v21798_v50 }
 0x479   :  { %15177 = vmatpush1.bf16.msra.mxu0 %v21797_v24  ;;  %15369 = vmatpush1.bf16.msra.mxu1 %v21800_v55 }
 0x47a   :  { %15179 = vmatprep.subr.bf16.mxu0 %v21799_v17  ;;  %15371 = vmatprep.subr.bf16.mxu1 %v21802_v22 }
 0x47d   :  { %15181 = vmatpush1.bf16.msra.mxu0 %v21801_v40  ;;  %15373 = vmatpush1.bf16.msra.mxu1 %v21804_v43 }
 0x47e   :  { %15183 = vmatprep.subr.bf16.mxu0 %v21803_v56  ;;  %15375 = vmatprep.subr.bf16.mxu1 %v21806_v35 }
 0x481   :  { %15185 = vmatpush1.bf16.msra.mxu0 %v21805_v30  ;;  %15377 = vmatpush1.bf16.msra.mxu1 %v21808_v59 }
 0x482   :  { %15187 = vmatprep.subr.bf16.mxu0 %v21807_v41  ;;  %15379 = vmatprep.subr.bf16.mxu1 %v21810_v10 }
 0x485   :  { %15189 = vmatpush1.bf16.msra.mxu0 %v21809_v27  ;;  %15381 = vmatpush1.bf16.msra.mxu1 %v21812_v42 }
 0x486   :  { %15191 = vmatprep.subr.bf16.mxu0 %v21811_v36  ;;  %15383 = vmatprep.subr.bf16.mxu1 %v22001_v57 }
 0x489   :  { %15193 = vmatpush1.bf16.msra.mxu0 %v22002_v51  ;;  %15385 = vmatpush1.bf16.msra.mxu1 %v22003_v19 }
 0x48a   :  { %15195 = vmatprep.subr.bf16.mxu0 %v22004_v33  ;;  %15387 = vmatprep.subr.bf16.mxu1 %v22005_v31 }
 0x48d   :  { %15197 = vmatpush1.bf16.msra.mxu0 %v22006_v49  ;;  %15389 = vmatpush1.bf16.msra.mxu1 %v22007_v21 }
 0x48e   :  { %15391 = vmatprep.subr.bf16.mxu0 %v21787_v7  ;;  %15583 = vmatprep.subr.bf16.mxu1 %v21790_v54 }
 0x490   :  { %4497 = vmatmul.mubr.f32.vlgmr.msra.gmra.mrb[4].mxu0 %v19601_v11  ;;  %5352 = vmatmul.mubr.f32.vlgmr.msra.gmra.mrb[4].mxu1 %v19601_v11  ;;  %v22040_v11 = vld [vmem:[#allocation69_spill] sm:$0xff] }
 0x491   :  { %15393 = vmatpush1.bf16.msra.mxu0 %v21789_v28  ;;  %15585 = vmatpush1.bf16.msra.mxu1 %v21792_v48 }
 0x492   :  { %15395 = vmatprep.subr.bf16.mxu0 %v21791_v3  ;;  %15587 = vmatprep.subr.bf16.mxu1 %v21794_v20 }
 0x493   :  { %5502 = vmatprep.mubr.f32.mxu0 %v21539_v1  ;;  %6357 = vmatprep.mubr.f32.mxu1 %v21539_v1 }
 0x495   :  { %15397 = vmatpush1.bf16.msra.mxu0 %v21793_v38  ;;  %15589 = vmatpush1.bf16.msra.mxu1 %v21796_v29 }
 0x496   :  { %15399 = vmatprep.subr.bf16.mxu0 %v21795_v60  ;;  %15591 = vmatprep.subr.bf16.mxu1 %v21798_v50 }
 0x499   :  { %15401 = vmatpush1.bf16.msra.mxu0 %v21797_v24  ;;  %15593 = vmatpush1.bf16.msra.mxu1 %v21800_v55 }
 0x49a   :  { %15403 = vmatprep.subr.bf16.mxu0 %v21799_v17  ;;  %15595 = vmatprep.subr.bf16.mxu1 %v21802_v22 }
 0x49d   :  { %15405 = vmatpush1.bf16.msra.mxu0 %v21801_v40  ;;  %15597 = vmatpush1.bf16.msra.mxu1 %v21804_v43 }
 0x49e   :  { %15407 = vmatprep.subr.bf16.mxu0 %v21803_v56  ;;  %15599 = vmatprep.subr.bf16.mxu1 %v21806_v35 }
 0x4a1   :  { %15409 = vmatpush1.bf16.msra.mxu0 %v21805_v30  ;;  %15601 = vmatpush1.bf16.msra.mxu1 %v21808_v59 }
 0x4a2   :  { %15411 = vmatprep.subr.bf16.mxu0 %v21807_v41  ;;  %15603 = vmatprep.subr.bf16.mxu1 %v21810_v10 }
 0x4a5   :  { %15413 = vmatpush1.bf16.msra.mxu0 %v21809_v27  ;;  %15605 = vmatpush1.bf16.msra.mxu1 %v21812_v42 }
 0x4a6   :  { %15415 = vmatprep.subr.bf16.mxu0 %v21811_v36  ;;  %15607 = vmatprep.subr.bf16.mxu1 %v22001_v57 }
 0x4a9   :  { %15417 = vmatpush1.bf16.msra.mxu0 %v22002_v51  ;;  %15609 = vmatpush1.bf16.msra.mxu1 %v22003_v19 }
 0x4aa   :  { %15419 = vmatprep.subr.bf16.mxu0 %v22004_v33  ;;  %15611 = vmatprep.subr.bf16.mxu1 %v22005_v31  ;;  %v3646_v31 = vld [vmem:[#allocation4 + $0x50] sm:$0xff]  ;;  %v3647_v33 = vld [vmem:[#allocation4 + $0x58] sm:$0xff] }
 0x4ad   :  { %15421 = vmatpush1.bf16.msra.mxu0 %v22006_v49  ;;  %15613 = vmatpush1.bf16.msra.mxu1 %v22007_v21 }
 0x4ae   :  { %15423 = vmatprep.subr.bf16.mxu0 %v22040_v11  ;;  %15615 = vmatprep.subr.bf16.mxu1 %v22041_v18 }
 0x563   :  { %v4498_v45 = vpop.f32.mrb[4].mxu0  ;;  %v5353_v8 = vpop.f32.mrb[4].mxu1 }
 0x564   :  { %v5358_v0 = vadd.f32 %v4498_v45, %v3644_v25  ;;  %v4500_v13 = vpop.f32.mrb[5].mxu0  ;;  %v5355_v15 = vpop.f32.mrb[5].mxu1  ;;  %v5360_v49 = vadd.f32 %v5353_v8, %v3646_v31 }
 0x565   :  { %v5359_v58 = vadd.f32 %v4500_v13, %v3645_v39  ;;  %v5361_v11 = vadd.f32 %v5355_v15, %v3647_v33  ;;  %v5389_v8 = vpop.permute.xlu1 %5388 }
 0x566   :  { %v14215_v46 = vmul.f32 -1.442695, %v5358_v0  ;;  %v14217_v21 = vmul.f32 -1.442695, %v5360_v49 }
 0x567   :  { %v14216_v6 = vmul.f32 -1.442695, %v5359_v58 }
 0x568   :  { %17513 = vpow2.f32 %v14215_v46 }
 0x569   :  { %17515 = vpow2.f32 %v14216_v6 }
 0x56a   :  { %17517 = vpow2.f32 %v14217_v21 }
 0x572   :  { %v17514_v19 = vpop.eup %17513 }
 0x573   :  { %v5365_v51 = vadd.f32 1.0, %v17514_v19  ;;  %v17516_v18 = vpop.eup %17515 }
 0x574   :  { %v5371_v57 = vadd.f32 1.0, %v17516_v18  ;;  %v17518_v25 = vpop.eup %17517 }
 0x575   :  { %17519 = vrcp.f32 %v5365_v51  ;;  %v5377_v0 = vadd.f32 1.0, %v17518_v25  ;;  %v22043_v25 = vld [vmem:[#allocation91_spill] sm:$0xff] }
 0x576   :  { %17521 = vtanh.f32 %v5361_v11  ;;  %v22042_v11 = vld [vmem:[#allocation87_spill] sm:$0xff] }
 0x577   :  { %17523 = vrcp.f32 %v5371_v57 }
 0x578   :  { %17525 = vrcp.f32 %v5377_v0  ;;  %v22048_v0 = vld [vmem:[#allocation41_spill] sm:$0xff] }
 0x57f   :  { %v17520_v45 = vpop.eup %17519 }
 0x580   :  { %v17522_v39 = vpop.eup %17521  ;;  %v5381_v58 = vmul.f32 %v17520_v45, %v19598_v61  ;;  %v22044_v45 = vld [vmem:[#allocation92_spill] sm:$0xff] }
 0x581   :  { %v17524_v13 = vpop.eup %17523 }
 0x582   :  { %v5382_v46 = vmul.f32 %v17524_v13, %v17522_v39  ;;  %v17526_v21 = vpop.eup %17525  ;;  %v22045_v39 = vld [vmem:[#allocation93_spill] sm:$0xff]  ;;  %v22047_v13 = vld [vmem:[#allocation38_spill] sm:$0xff] }
 0x584   :  { %v5383_v31 = vadd.f32 %v5382_v46, %v5381_v58  ;;  %v22046_v58 = vld [vmem:[#allocation94_spill] sm:$0xff] }
 0x585   :  { %v22049_v46 = vld [vmem:[#allocation42_spill] sm:$0xff] }
 0x586   :  { %17527 = vtanh.f32 %v5383_v31  ;;  %v19833_v15 = vmul.f32 %v5389_v8, %v5383_v31  ;;  %v22051_v31 = vld [vmem:[#allocation48_spill] sm:$0xff] }
 0x588   :  { %5395 = vst [vmem:[#allocation9 + $0x28] sm:$0xff] %v19833_v15 }
 0x590   :  { %v17528_v18 = vpop.eup %17527 }
 0x591   :  { %v5385_v19 = vmul.f32 %v17528_v18, %v17526_v21  ;;  %v22052_v21 = vld [vmem:[#allocation55_spill] sm:$0xff]  ;;  %v22053_v18 = vld [vmem:[#allocation101_spill] sm:$0xff] }
 0x593   :  { %v5391_v51 = vmul.f32 %v5389_v8, %v5385_v19  ;;  %v22050_v8 = vld [vmem:[#allocation43_spill] sm:$0xff]  ;;  %v22054_v19 = vld [vmem:[#allocation104_spill] sm:$0xff] }
 0x595   :  { %5394 = vst [vmem:[#allocation9 + $0x20] sm:$0xff] %v5391_v51  ;;  %v19836_v49 = vand.u32 4294901760, %v5391_v51 }
 0x597   :  { %v19839_v61 = vsub.f32 %v5391_v51, %v19836_v49  ;;  %v22055_v51 = vld [vmem:[#allocation102_spill] sm:$0xff] }
 0x599   :  { %v19842_v33 = vand.u32 4294901760, %v19839_v61 }
 0x59b   :  { %v5506_v57 = vsub.f32 %v19839_v61, %v19842_v33 }
 0x59d   :  { %v5507_v6 = vand.u32 4294901760, %v5506_v57  ;;  %v22056_v57 = vld [vmem:[#allocation63_spill] sm:$0xff] }
 0x59f   :  { %5508 = vmatmul.mubr.f32.vlgmr.msra.gmra.mrb[6].mxu0 %v5507_v6  ;;  %6363 = vmatmul.mubr.f32.vlgmr.msra.gmra.mrb[6].mxu1 %v5507_v6  ;;  %v22057_v6 = vld [vmem:[#allocation111_spill] sm:$0xff] }
 0x5a0   :  { %15425 = vmatpush1.bf16.msra.mxu0 %v21873_v26  ;;  %15617 = vmatpush1.bf16.msra.mxu1 %v21874_v34 }
 0x5a1   :  { %15427 = vmatprep.subr.bf16.mxu0 %v21875_v52  ;;  %15619 = vmatprep.subr.bf16.mxu1 %v21876_v44 }
 0x5a2   :  { %5738 = vmatprep.mubr.f32.mxu0 %v21539_v1  ;;  %6593 = vmatprep.mubr.f32.mxu1 %v21539_v1 }
 0x5a4   :  { %15429 = vmatpush1.bf16.msra.mxu0 %v21957_v9  ;;  %15621 = vmatpush1.bf16.msra.mxu1 %v21958_v37 }
 0x5a5   :  { %15431 = vmatprep.subr.bf16.mxu0 %v21959_v53  ;;  %15623 = vmatprep.subr.bf16.mxu1 %v21960_v63 }
 0x5a8   :  { %15433 = vmatpush1.bf16.msra.mxu0 %v21961_v16  ;;  %15625 = vmatpush1.bf16.msra.mxu1 %v22042_v11 }
 0x5a9   :  { %15435 = vmatprep.subr.bf16.mxu0 %v21963_v32  ;;  %15627 = vmatprep.subr.bf16.mxu1 %v21964_v14 }
 0x5ac   :  { %15437 = vmatpush1.bf16.msra.mxu0 %v22043_v25  ;;  %15629 = vmatpush1.bf16.msra.mxu1 %v22044_v45 }
 0x5ad   :  { %15439 = vmatprep.subr.bf16.mxu0 %v22045_v39  ;;  %15631 = vmatprep.subr.bf16.mxu1 %v22046_v58 }
 0x5b0   :  { %15441 = vmatpush1.bf16.msra.mxu0 %v22047_v13  ;;  %15633 = vmatpush1.bf16.msra.mxu1 %v22048_v0 }
 0x5b1   :  { %15443 = vmatprep.subr.bf16.mxu0 %v22049_v46  ;;  %15635 = vmatprep.subr.bf16.mxu1 %v22050_v8  ;;  %v22108_v8 = vld [vmem:[#allocation86_spill] sm:$0xff]  ;;  %v22109_v46 = vld [vmem:[#allocation88_spill] sm:$0xff] }
 0x5b4   :  { %15445 = vmatpush1.bf16.msra.mxu0 %v22051_v31  ;;  %15637 = vmatpush1.bf16.msra.mxu1 %v21894_v4  ;;  %v22099_v4 = vld [vmem:[#allocation16_spill] sm:$0xff] }
 0x5b5   :  { %15447 = vmatprep.subr.bf16.mxu0 %v21895_v12  ;;  %15639 = vmatprep.subr.bf16.mxu1 %v21974_v62  ;;  %v22070_v62 = vld [vmem:[#allocation118_spill] sm:$0xff]  ;;  %v22098_v12 = vld [vmem:[#allocation19_spill] sm:$0xff]  ;;  %v22102_v31 = vld [vmem:[#allocation120_spill] sm:$0xff] }
 0x5b8   :  { %15449 = vmatpush1.bf16.msra.mxu0 %v21975_v5  ;;  %15641 = vmatpush1.bf16.msra.mxu1 %v22052_v21  ;;  %v22058_v5 = vld [vmem:[#allocation113_spill] sm:$0xff]  ;;  %v22059_v21 = vld [vmem:[#allocation103_spill] sm:$0xff] }
 0x5b9   :  { %15451 = vmatprep.subr.bf16.mxu0 %v21977_v23  ;;  %15643 = vmatprep.subr.bf16.mxu1 %v22053_v18  ;;  %v22060_v23 = vld [vmem:[#allocation105_spill] sm:$0xff]  ;;  %v22065_v18 = vld [vmem:[#allocation110_spill] sm:$0xff] }
 0x5bc   :  { %15453 = vmatpush1.bf16.msra.mxu0 %v22054_v19  ;;  %15645 = vmatpush1.bf16.msra.mxu1 %v21980_v47  ;;  %v22061_v47 = vld [vmem:[#allocation106_spill] sm:$0xff]  ;;  %v22064_v19 = vld [vmem:[#allocation109_spill] sm:$0xff] }
 0x5bd   :  { %15455 = vmatprep.subr.bf16.mxu0 %v22055_v51  ;;  %15647 = vmatprep.subr.bf16.mxu1 %v22056_v57  ;;  %v22062_v51 = vld [vmem:[#allocation107_spill] sm:$0xff]  ;;  %v22063_v57 = vld [vmem:[#allocation108_spill] sm:$0xff] }
 0x5bf   :  { %5740 = vmatmul.mubr.f32.vlgmr.msra.gmra.mrb[6].mxu0 %v19836_v49  ;;  %6595 = vmatmul.mubr.f32.vlgmr.msra.gmra.mrb[6].mxu1 %v19836_v49 }
 0x5c0   :  { %15457 = vmatpush1.bf16.msra.mxu0 %v22057_v6  ;;  %15649 = vmatpush1.bf16.msra.mxu1 %v22058_v5  ;;  %v22066_v6 = vld [vmem:[#allocation112_spill] sm:$0xff]  ;;  %v22067_v5 = vld [vmem:[#allocation115_spill] sm:$0xff] }
 0x5c1   :  { %15459 = vmatprep.subr.bf16.mxu0 %v22059_v21  ;;  %15651 = vmatprep.subr.bf16.mxu1 %v22060_v23  ;;  %v22068_v23 = vld [vmem:[#allocation117_spill] sm:$0xff]  ;;  %v22069_v21 = vld [vmem:[#allocation127_spill] sm:$0xff] }
 0x5c2   :  { %5874 = vmatprep.mubr.f32.mxu0 %v21539_v1  ;;  %6729 = vmatprep.mubr.f32.mxu1 %v21539_v1 }
 0x5c4   :  { %15461 = vmatpush1.bf16.msra.mxu0 %v22061_v47  ;;  %15653 = vmatpush1.bf16.msra.mxu1 %v22062_v51  ;;  %v22071_v47 = vld [vmem:[#allocation129_spill] sm:$0xff]  ;;  %v22072_v51 = vld [vmem:[#allocation128_spill] sm:$0xff] }
 0x5c5   :  { %15463 = vmatprep.subr.bf16.mxu0 %v22063_v57  ;;  %15655 = vmatprep.subr.bf16.mxu1 %v22064_v19  ;;  %v22073_v57 = vld [vmem:[#allocation131_spill] sm:$0xff]  ;;  %v22074_v19 = vld [vmem:[#allocation130_spill] sm:$0xff] }
 0x5c8   :  { %15465 = vmatpush1.bf16.msra.mxu0 %v22065_v18  ;;  %15657 = vmatpush1.bf16.msra.mxu1 %v22066_v6  ;;  %v22075_v18 = vld [vmem:[#allocation133_spill] sm:$0xff]  ;;  %v22076_v6 = vld [vmem:[#allocation132_spill] sm:$0xff] }
 0x5c9   :  { %15467 = vmatprep.subr.bf16.mxu0 %v22067_v5  ;;  %15659 = vmatprep.subr.bf16.mxu1 %v21988_v2  ;;  %v22077_v5 = vld [vmem:[#allocation135_spill] sm:$0xff]  ;;  %v22078_v2 = vld [vmem:[#allocation134_spill] sm:$0xff] }
 0x5cc   :  { %15469 = vmatpush1.bf16.msra.mxu0 %v22068_v23  ;;  %15661 = vmatpush1.bf16.msra.mxu1 %v22069_v21  ;;  %v22079_v23 = vld [vmem:[#allocation137_spill] sm:$0xff]  ;;  %v22080_v21 = vld [vmem:[#allocation136_spill] sm:$0xff] }
 0x5cd   :  { %15471 = vmatprep.subr.bf16.mxu0 %v22070_v62  ;;  %15663 = vmatprep.subr.bf16.mxu1 %v22071_v47  ;;  %v22081_v62 = vld [vmem:[#allocation139_spill] sm:$0xff]  ;;  %v22082_v47 = vld [vmem:[#allocation138_spill] sm:$0xff] }
 0x5d0   :  { %15473 = vmatpush1.bf16.msra.mxu0 %v22072_v51  ;;  %15665 = vmatpush1.bf16.msra.mxu1 %v22073_v57  ;;  %v22083_v51 = vld [vmem:[#allocation141_spill] sm:$0xff]  ;;  %v22084_v57 = vld [vmem:[#allocation140_spill] sm:$0xff] }
 0x5d1   :  { %15475 = vmatprep.subr.bf16.mxu0 %v22074_v19  ;;  %15667 = vmatprep.subr.bf16.mxu1 %v22075_v18  ;;  %v22085_v19 = vld [vmem:[#allocation114_spill] sm:$0xff] }
 0x5d2   :  { %v22097_v18 = vld [vmem:[#allocation14_spill] sm:$0xff] }
 0x5d4   :  { %15477 = vmatpush1.bf16.msra.mxu0 %v22076_v6  ;;  %15669 = vmatpush1.bf16.msra.mxu1 %v22077_v5  ;;  %v22095_v5 = vld [vmem:[#allocation67_spill] sm:$0xff]  ;;  %v22096_v6 = vld [vmem:[#allocation17_spill] sm:$0xff] }
 0x5d5   :  { %15479 = vmatprep.subr.bf16.mxu0 %v22078_v2  ;;  %15671 = vmatprep.subr.bf16.mxu1 %v22079_v23  ;;  %v22093_v23 = vld [vmem:[#allocation13_spill] sm:$0xff]  ;;  %v22094_v2 = vld [vmem:[#allocation15_spill] sm:$0xff] }
 0x5d8   :  { %15481 = vmatpush1.bf16.msra.mxu0 %v22080_v21  ;;  %15673 = vmatpush1.bf16.msra.mxu1 %v22081_v62  ;;  %v22091_v62 = vld [vmem:[#allocation62_spill] sm:$0xff]  ;;  %v22092_v21 = vld [vmem:[#allocation64_spill] sm:$0xff] }
 0x5d9   :  { %15483 = vmatprep.subr.bf16.mxu0 %v22082_v47  ;;  %15675 = vmatprep.subr.bf16.mxu1 %v22083_v51  ;;  %v22089_v51 = vld [vmem:[#allocation60_spill] sm:$0xff]  ;;  %v22090_v47 = vld [vmem:[#allocation61_spill] sm:$0xff] }
 0x5dc   :  { %15485 = vmatpush1.bf16.msra.mxu0 %v22084_v57  ;;  %15677 = vmatpush1.bf16.msra.mxu1 %v22085_v19  ;;  %v22087_v19 = vld [vmem:[#allocation58_spill] sm:$0xff]  ;;  %v22088_v57 = vld [vmem:[#allocation59_spill] sm:$0xff] }
 0x5dd   :  { %15487 = vmatprep.subr.bf16.mxu0 %v21787_v7  ;;  %15679 = vmatprep.subr.bf16.mxu1 %v21790_v54 }
 0x5df   :  { %5877 = vmatmul.mubr.f32.vlgmr.msra.gmra.mrb[6].mxu0 %v19839_v61  ;;  %6732 = vmatmul.mubr.f32.vlgmr.msra.gmra.mrb[6].mxu1 %v19839_v61  ;;  %v22086_v61 = vld [vmem:[#allocation57_spill] sm:$0xff] }
 0x5e0   :  { %15489 = vmatpush1.bf16.msra.mxu0 %v21789_v28  ;;  %15681 = vmatpush1.bf16.msra.mxu1 %v21792_v48 }
 0x5e1   :  { %15491 = vmatprep.subr.bf16.mxu0 %v21791_v3  ;;  %15683 = vmatprep.subr.bf16.mxu1 %v21794_v20 }
 0x5e2   :  { %5979 = vmatprep.mubr.f32.mxu0 %v21539_v1  ;;  %6834 = vmatprep.mubr.f32.mxu1 %v21539_v1 }
 0x5e4   :  { %15493 = vmatpush1.bf16.msra.mxu0 %v21793_v38  ;;  %15685 = vmatpush1.bf16.msra.mxu1 %v21796_v29 }
 0x5e5   :  { %15495 = vmatprep.subr.bf16.mxu0 %v21795_v60  ;;  %15687 = vmatprep.subr.bf16.mxu1 %v21798_v50 }
 0x5e8   :  { %15497 = vmatpush1.bf16.msra.mxu0 %v21797_v24  ;;  %15689 = vmatpush1.bf16.msra.mxu1 %v21800_v55 }
 0x5e9   :  { %15499 = vmatprep.subr.bf16.mxu0 %v21799_v17  ;;  %15691 = vmatprep.subr.bf16.mxu1 %v21802_v22 }
 0x5ec   :  { %15501 = vmatpush1.bf16.msra.mxu0 %v21801_v40  ;;  %15693 = vmatpush1.bf16.msra.mxu1 %v21804_v43 }
 0x5ed   :  { %15503 = vmatprep.subr.bf16.mxu0 %v21803_v56  ;;  %15695 = vmatprep.subr.bf16.mxu1 %v21806_v35 }
 0x5f0   :  { %15505 = vmatpush1.bf16.msra.mxu0 %v21805_v30  ;;  %15697 = vmatpush1.bf16.msra.mxu1 %v21808_v59 }
 0x5f1   :  { %15507 = vmatprep.subr.bf16.mxu0 %v21807_v41  ;;  %15699 = vmatprep.subr.bf16.mxu1 %v21810_v10 }
 0x5f4   :  { %15509 = vmatpush1.bf16.msra.mxu0 %v21809_v27  ;;  %15701 = vmatpush1.bf16.msra.mxu1 %v21812_v42 }
 0x5f5   :  { %15511 = vmatprep.subr.bf16.mxu0 %v21811_v36  ;;  %15703 = vmatprep.subr.bf16.mxu1 %v22086_v61 }
 0x5f8   :  { %15513 = vmatpush1.bf16.msra.mxu0 %v22087_v19  ;;  %15705 = vmatpush1.bf16.msra.mxu1 %v22088_v57 }
 0x5f9   :  { %15515 = vmatprep.subr.bf16.mxu0 %v22089_v51  ;;  %15707 = vmatprep.subr.bf16.mxu1 %v22090_v47 }
 0x5fc   :  { %15517 = vmatpush1.bf16.msra.mxu0 %v22091_v62  ;;  %15709 = vmatpush1.bf16.msra.mxu1 %v22092_v21 }
 0x5fd   :  { %15519 = vmatprep.subr.bf16.mxu0 %v22093_v23  ;;  %15711 = vmatprep.subr.bf16.mxu1 %v22094_v2  ;;  %v22100_v23 = vld [vmem:[#allocation18_spill] sm:$0xff]  ;;  %v22101_v2 = vld [vmem:[#allocation119_spill] sm:$0xff] }
 0x5ff   :  { %5983 = vmatmul.mubr.f32.vlgmr.msra.gmra.mrb[6].mxu0 %v19842_v33  ;;  %6838 = vmatmul.mubr.f32.vlgmr.msra.gmra.mrb[6].mxu1 %v19842_v33  ;;  %v22103_v33 = vld [vmem:[#allocation121_spill] sm:$0xff] }
 0x600   :  { %15521 = vmatpush1.bf16.msra.mxu0 %v22095_v5  ;;  %15713 = vmatpush1.bf16.msra.mxu1 %v22096_v6  ;;  %v22104_v5 = vld [vmem:[#allocation122_spill] sm:$0xff]  ;;  %v22105_v6 = vld [vmem:[#allocation123_spill] sm:$0xff] }
 0x601   :  { %15523 = vmatprep.subr.bf16.mxu0 %v22097_v18  ;;  %15715 = vmatprep.subr.bf16.mxu1 %v22098_v12  ;;  %v22106_v18 = vld [vmem:[#allocation124_spill] sm:$0xff]  ;;  %v22107_v12 = vld [vmem:[#allocation125_spill] sm:$0xff] }
 0x602   :  { %6149 = vmatprep.mubr.f32.mxu0 %v21539_v1  ;;  %7004 = vmatprep.mubr.f32.mxu1 %v21539_v1 }
 0x604   :  { %15525 = vmatpush1.bf16.msra.mxu0 %v22099_v4  ;;  %15717 = vmatpush1.bf16.msra.mxu1 %v22100_v23  ;;  %v22110_v4 = vld [vmem:[#allocation25_spill] sm:$0xff]  ;;  %v22111_v23 = vld [vmem:[#allocation26_spill] sm:$0xff] }
 0x605   :  { %15527 = vmatprep.subr.bf16.mxu0 %v22101_v2  ;;  %15719 = vmatprep.subr.bf16.mxu1 %v22102_v31  ;;  %v22112_v2 = vld [vmem:[#allocation28_spill] sm:$0xff]  ;;  %v22113_v31 = vld [vmem:[#allocation29_spill] sm:$0xff] }
 0x608   :  { %15529 = vmatpush1.bf16.msra.mxu0 %v22103_v33  ;;  %15721 = vmatpush1.bf16.msra.mxu1 %v22104_v5  ;;  %v22114_v33 = vld [vmem:[#allocation30_spill] sm:$0xff]  ;;  %v22115_v5 = vld [vmem:[#allocation33_spill] sm:$0xff] }
 0x609   :  { %15531 = vmatprep.subr.bf16.mxu0 %v22105_v6  ;;  %15723 = vmatprep.subr.bf16.mxu1 %v22106_v18  ;;  %v22116_v6 = vld [vmem:[#allocation34_spill] sm:$0xff]  ;;  %v22117_v18 = vld [vmem:[#allocation35_spill] sm:$0xff] }
 0x60c   :  { %15533 = vmatpush1.bf16.msra.mxu0 %v22107_v12  ;;  %15725 = vmatpush1.bf16.msra.mxu1 %v22108_v8  ;;  %v22118_v12 = vld [vmem:[#allocation37_spill] sm:$0xff]  ;;  %v22119_v8 = vld [vmem:[#allocation39_spill] sm:$0xff] }
 0x60d   :  { %15535 = vmatprep.subr.bf16.mxu0 %v22109_v46  ;;  %15727 = vmatprep.subr.bf16.mxu1 %v22110_v4  ;;  %v22120_v46 = vld [vmem:[#allocation46_spill] sm:$0xff]  ;;  %v22121_v4 = vld [vmem:[#allocation95_spill] sm:$0xff] }
 0x610   :  { %15537 = vmatpush1.bf16.msra.mxu0 %v22111_v23  ;;  %15729 = vmatpush1.bf16.msra.mxu1 %v22112_v2  ;;  %v22122_v23 = vld [vmem:[#allocation49_spill] sm:$0xff]  ;;  %v22123_v2 = vld [vmem:[#allocation98_spill] sm:$0xff] }
 0x611   :  { %15539 = vmatprep.subr.bf16.mxu0 %v22113_v31  ;;  %15731 = vmatprep.subr.bf16.mxu1 %v22114_v33  ;;  %v22124_v31 = vld [vmem:[#allocation126_spill] sm:$0xff] }
 0x614   :  { %15541 = vmatpush1.bf16.msra.mxu0 %v22115_v5  ;;  %15733 = vmatpush1.bf16.msra.mxu1 %v22116_v6 }
 0x615   :  { %15543 = vmatprep.subr.bf16.mxu0 %v22117_v18  ;;  %15735 = vmatprep.subr.bf16.mxu1 %v22118_v12 }
 0x618   :  { %15545 = vmatpush1.bf16.msra.mxu0 %v22119_v8  ;;  %15737 = vmatpush1.bf16.msra.mxu1 %v22120_v46 }
 0x619   :  { %15547 = vmatprep.subr.bf16.mxu0 %v22121_v4  ;;  %15739 = vmatprep.subr.bf16.mxu1 %v22122_v23  ;;  %v5403_v23 = vld [vmem:[#allocation4 + $0x68] sm:$0xff] }
 0x61c   :  { %15549 = vmatpush1.bf16.msra.mxu0 %v22123_v2  ;;  %15741 = vmatpush1.bf16.msra.mxu1 %v22124_v31  ;;  %v22126_v31 = vld [vmem:[#allocation70_spill] sm:$0xff]  ;;  %v5402_v2 = vld [vmem:[#allocation4 + $0x60] sm:$0xff] }
 0x61d   :  { %15551 = vmatprep.subr.bf16.mxu0 %v21787_v7  ;;  %15743 = vmatprep.subr.bf16.mxu1 %v21790_v54 }
 0x61f   :  { %6151 = vmatmul.mubr.f32.vlgmr.msra.gmra.mrb[6].mxu0 %v19836_v49  ;;  %7006 = vmatmul.mubr.f32.vlgmr.msra.gmra.mrb[6].mxu1 %v19836_v49 }
 0x620   :  { %15553 = vmatpush1.bf16.msra.mxu0 %v21789_v28  ;;  %15745 = vmatpush1.bf16.msra.mxu1 %v21792_v48 }
 0x621   :  { %15555 = vmatprep.subr.bf16.mxu0 %v21791_v3  ;;  %15747 = vmatprep.subr.bf16.mxu1 %v21794_v20 }
 0x622   :  { %6253 = vmatprep.mubr.f32.mxu0 %v21539_v1  ;;  %7108 = vmatprep.mubr.f32.mxu1 %v21539_v1 }
 0x624   :  { %15557 = vmatpush1.bf16.msra.mxu0 %v21793_v38  ;;  %15749 = vmatpush1.bf16.msra.mxu1 %v21796_v29 }
 0x625   :  { %15559 = vmatprep.subr.bf16.mxu0 %v21795_v60  ;;  %15751 = vmatprep.subr.bf16.mxu1 %v21798_v50 }
 0x628   :  { %15561 = vmatpush1.bf16.msra.mxu0 %v21797_v24  ;;  %15753 = vmatpush1.bf16.msra.mxu1 %v21800_v55 }
 0x629   :  { %15563 = vmatprep.subr.bf16.mxu0 %v21799_v17  ;;  %15755 = vmatprep.subr.bf16.mxu1 %v21802_v22 }
 0x62c   :  { %15565 = vmatpush1.bf16.msra.mxu0 %v21801_v40  ;;  %15757 = vmatpush1.bf16.msra.mxu1 %v21804_v43 }
 0x62d   :  { %15567 = vmatprep.subr.bf16.mxu0 %v21803_v56  ;;  %15759 = vmatprep.subr.bf16.mxu1 %v21806_v35 }
 0x630   :  { %15569 = vmatpush1.bf16.msra.mxu0 %v21805_v30  ;;  %15761 = vmatpush1.bf16.msra.mxu1 %v21808_v59 }
 0x631   :  { %15571 = vmatprep.subr.bf16.mxu0 %v21807_v41  ;;  %15763 = vmatprep.subr.bf16.mxu1 %v21810_v10 }
 0x634   :  { %15573 = vmatpush1.bf16.msra.mxu0 %v21809_v27  ;;  %15765 = vmatpush1.bf16.msra.mxu1 %v21812_v42 }
 0x635   :  { %15575 = vmatprep.subr.bf16.mxu0 %v21811_v36  ;;  %15767 = vmatprep.subr.bf16.mxu1 %v22086_v61 }
 0x638   :  { %15577 = vmatpush1.bf16.msra.mxu0 %v22087_v19  ;;  %15769 = vmatpush1.bf16.msra.mxu1 %v22088_v57 }
 0x639   :  { %15579 = vmatprep.subr.bf16.mxu0 %v22089_v51  ;;  %15771 = vmatprep.subr.bf16.mxu1 %v22090_v47 }
 0x63c   :  { %15581 = vmatpush1.bf16.msra.mxu0 %v22091_v62  ;;  %15773 = vmatpush1.bf16.msra.mxu1 %v22092_v21 }
 0x63d   :  { %15775 = vmatprep.subr.bf16.mxu0 %v21787_v7  ;;  %15967 = vmatprep.subr.bf16.mxu1 %v21790_v54 }
 0x63f   :  { %6255 = vmatmul.mubr.f32.vlgmr.msra.gmra.mrb[6].mxu0 %v19836_v49  ;;  %7110 = vmatmul.mubr.f32.vlgmr.msra.gmra.mrb[6].mxu1 %v19836_v49  ;;  %v22125_v49 = vld [vmem:[#allocation69_spill] sm:$0xff] }
 0x640   :  { %15777 = vmatpush1.bf16.msra.mxu0 %v21789_v28  ;;  %15969 = vmatpush1.bf16.msra.mxu1 %v21792_v48 }
 0x641   :  { %15779 = vmatprep.subr.bf16.mxu0 %v21791_v3  ;;  %15971 = vmatprep.subr.bf16.mxu1 %v21794_v20 }
 0x642   :  { %7260 = vmatprep.mubr.f32.mxu0 %v21539_v1  ;;  %8115 = vmatprep.mubr.f32.mxu1 %v21539_v1 }
 0x644   :  { %15781 = vmatpush1.bf16.msra.mxu0 %v21793_v38  ;;  %15973 = vmatpush1.bf16.msra.mxu1 %v21796_v29 }
 0x645   :  { %15783 = vmatprep.subr.bf16.mxu0 %v21795_v60  ;;  %15975 = vmatprep.subr.bf16.mxu1 %v21798_v50 }
 0x648   :  { %15785 = vmatpush1.bf16.msra.mxu0 %v21797_v24  ;;  %15977 = vmatpush1.bf16.msra.mxu1 %v21800_v55 }
 0x649   :  { %15787 = vmatprep.subr.bf16.mxu0 %v21799_v17  ;;  %15979 = vmatprep.subr.bf16.mxu1 %v21802_v22 }
 0x64c   :  { %15789 = vmatpush1.bf16.msra.mxu0 %v21801_v40  ;;  %15981 = vmatpush1.bf16.msra.mxu1 %v21804_v43 }
 0x64d   :  { %15791 = vmatprep.subr.bf16.mxu0 %v21803_v56  ;;  %15983 = vmatprep.subr.bf16.mxu1 %v21806_v35 }
 0x650   :  { %15793 = vmatpush1.bf16.msra.mxu0 %v21805_v30  ;;  %15985 = vmatpush1.bf16.msra.mxu1 %v21808_v59 }
 0x651   :  { %15795 = vmatprep.subr.bf16.mxu0 %v21807_v41  ;;  %15987 = vmatprep.subr.bf16.mxu1 %v21810_v10 }
 0x654   :  { %15797 = vmatpush1.bf16.msra.mxu0 %v21809_v27  ;;  %15989 = vmatpush1.bf16.msra.mxu1 %v21812_v42 }
 0x655   :  { %15799 = vmatprep.subr.bf16.mxu0 %v21811_v36  ;;  %15991 = vmatprep.subr.bf16.mxu1 %v22086_v61 }
 0x658   :  { %15801 = vmatpush1.bf16.msra.mxu0 %v22087_v19  ;;  %15993 = vmatpush1.bf16.msra.mxu1 %v22088_v57 }
 0x659   :  { %15803 = vmatprep.subr.bf16.mxu0 %v22089_v51  ;;  %15995 = vmatprep.subr.bf16.mxu1 %v22090_v47  ;;  %v5404_v47 = vld [vmem:[#allocation4 + $0x70] sm:$0xff]  ;;  %v5405_v51 = vld [vmem:[#allocation4 + $0x78] sm:$0xff] }
 0x65c   :  { %15805 = vmatpush1.bf16.msra.mxu0 %v22091_v62  ;;  %15997 = vmatpush1.bf16.msra.mxu1 %v22092_v21 }
 0x65d   :  { %15807 = vmatprep.subr.bf16.mxu0 %v22125_v49  ;;  %15999 = vmatprep.subr.bf16.mxu1 %v22126_v31 }
 0x712   :  { %v6256_v4 = vpop.f32.mrb[6].mxu0  ;;  %v7111_v46 = vpop.f32.mrb[6].mxu1 }
 0x713   :  { %v7116_v8 = vadd.f32 %v6256_v4, %v5402_v2  ;;  %v6258_v12 = vpop.f32.mrb[7].mxu0  ;;  %v7113_v18 = vpop.f32.mrb[7].mxu1  ;;  %v7118_v62 = vadd.f32 %v7111_v46, %v5404_v47 }
 0x714   :  { %v7117_v6 = vadd.f32 %v6258_v12, %v5403_v23  ;;  %v7119_v49 = vadd.f32 %v7113_v18, %v5405_v51  ;;  %v7147_v46 = vpop.permute.xlu1 %7146 }
 0x715   :  { %v14219_v5 = vmul.f32 -1.442695, %v7116_v8  ;;  %v14221_v21 = vmul.f32 -1.442695, %v7118_v62 }
 0x716   :  { %v14220_v33 = vmul.f32 -1.442695, %v7117_v6 }
 0x717   :  { %17529 = vpow2.f32 %v14219_v5 }
 0x718   :  { %17531 = vpow2.f32 %v14220_v33 }
 0x719   :  { %17533 = vpow2.f32 %v14221_v21 }
 0x721   :  { %v17530_v57 = vpop.eup %17529 }
 0x722   :  { %v7123_v19 = vadd.f32 1.0, %v17530_v57  ;;  %v17532_v31 = vpop.eup %17531 }
 0x723   :  { %v7129_v61 = vadd.f32 1.0, %v17532_v31  ;;  %v17534_v4 = vpop.eup %17533 }
 0x724   :  { %17535 = vrcp.f32 %v7123_v19  ;;  %v7135_v8 = vadd.f32 1.0, %v17534_v4  ;;  %v22128_v4 = vld [vmem:[#allocation43_spill] sm:$0xff] }
 0x725   :  { %17537 = vtanh.f32 %v7119_v49  ;;  %v22127_v49 = vld [vmem:[#allocation42_spill] sm:$0xff] }
 0x726   :  { %17539 = vrcp.f32 %v7129_v61 }
 0x727   :  { %17541 = vrcp.f32 %v7135_v8  ;;  %v22133_v8 = vld [vmem:[#allocation99_spill] sm:$0xff] }
 0x72e   :  { %v17536_v2 = vpop.eup %17535 }
 0x72f   :  { %v17538_v12 = vpop.eup %17537  ;;  %v7139_v23 = vmul.f32 %v17536_v2, %v19833_v15  ;;  %v22129_v2 = vld [vmem:[#allocation48_spill] sm:$0xff] }
 0x730   :  { %v17540_v5 = vpop.eup %17539 }
 0x731   :  { %v7140_v6 = vmul.f32 %v17540_v5, %v17538_v12  ;;  %v17542_v21 = vpop.eup %17541  ;;  %v22130_v12 = vld [vmem:[#allocation96_spill] sm:$0xff]  ;;  %v22132_v5 = vld [vmem:[#allocation51_spill] sm:$0xff] }
 0x733   :  { %v7141_v47 = vadd.f32 %v7140_v6, %v7139_v23  ;;  %v22131_v23 = vld [vmem:[#allocation97_spill] sm:$0xff]  ;;  %v22134_v6 = vld [vmem:[#allocation55_spill] sm:$0xff] }
 0x735   :  { %17543 = vtanh.f32 %v7141_v47  ;;  %v20061_v62 = vmul.f32 %v7147_v46, %v7141_v47  ;;  %v22135_v47 = vld [vmem:[#allocation100_spill] sm:$0xff] }
 0x737   :  { %7153 = vst [vmem:[#allocation9 + $0x38] sm:$0xff] %v20061_v62 }
 0x73f   :  { %v17544_v31 = vpop.eup %17543 }
 0x740   :  { %v7143_v18 = vmul.f32 %v17544_v31, %v17542_v21  ;;  %v22137_v21 = vld [vmem:[#allocation104_spill] sm:$0xff]  ;;  %v22138_v31 = vld [vmem:[#allocation65_spill] sm:$0xff] }
 0x742   :  { %v7149_v19 = vmul.f32 %v7147_v46, %v7143_v18  ;;  %v22136_v46 = vld [vmem:[#allocation101_spill] sm:$0xff]  ;;  %v22139_v18 = vld [vmem:[#allocation102_spill] sm:$0xff] }
 0x744   :  { %7152 = vst [vmem:[#allocation9 + $0x30] sm:$0xff] %v7149_v19  ;;  %v20064_v51 = vand.u32 4294901760, %v7149_v19 }
 0x746   :  { %v20067_v15 = vsub.f32 %v7149_v19, %v20064_v51  ;;  %v22140_v19 = vld [vmem:[#allocation63_spill] sm:$0xff] }
 0x748   :  { %v20070_v57 = vand.u32 4294901760, %v20067_v15 }
 0x74a   :  { %v7264_v61 = vsub.f32 %v20067_v15, %v20070_v57 }
 0x74c   :  { %v7265_v33 = vand.u32 4294901760, %v7264_v61  ;;  %v22141_v61 = vld [vmem:[#allocation111_spill] sm:$0xff] }
 0x74e   :  { %7266 = vmatmul.mubr.f32.vlgmr.msra.gmra.mrb[8].mxu0 %v7265_v33  ;;  %8121 = vmatmul.mubr.f32.vlgmr.msra.gmra.mrb[8].mxu1 %v7265_v33  ;;  %v22142_v33 = vld [vmem:[#allocation113_spill] sm:$0xff] }
 0x74f   :  { %15809 = vmatpush1.bf16.msra.mxu0 %v21873_v26  ;;  %16001 = vmatpush1.bf16.msra.mxu1 %v21874_v34 }
 0x750   :  { %15811 = vmatprep.subr.bf16.mxu0 %v21875_v52  ;;  %16003 = vmatprep.subr.bf16.mxu1 %v21876_v44 }
 0x751   :  { %7496 = vmatprep.mubr.f32.mxu0 %v21539_v1  ;;  %8351 = vmatprep.mubr.f32.mxu1 %v21539_v1 }
 0x753   :  { %15813 = vmatpush1.bf16.msra.mxu0 %v21957_v9  ;;  %16005 = vmatpush1.bf16.msra.mxu1 %v21958_v37 }
 0x754   :  { %15815 = vmatprep.subr.bf16.mxu0 %v21959_v53  ;;  %16007 = vmatprep.subr.bf16.mxu1 %v21960_v63 }
 0x757   :  { %15817 = vmatpush1.bf16.msra.mxu0 %v21961_v16  ;;  %16009 = vmatpush1.bf16.msra.mxu1 %v22042_v11 }
 0x758   :  { %15819 = vmatprep.subr.bf16.mxu0 %v21963_v32  ;;  %16011 = vmatprep.subr.bf16.mxu1 %v21964_v14 }
 0x75b   :  { %15821 = vmatpush1.bf16.msra.mxu0 %v22043_v25  ;;  %16013 = vmatpush1.bf16.msra.mxu1 %v22044_v45 }
 0x75c   :  { %15823 = vmatprep.subr.bf16.mxu0 %v22045_v39  ;;  %16015 = vmatprep.subr.bf16.mxu1 %v22046_v58 }
 0x75f   :  { %15825 = vmatpush1.bf16.msra.mxu0 %v22047_v13  ;;  %16017 = vmatpush1.bf16.msra.mxu1 %v22048_v0 }
 0x760   :  { %15827 = vmatprep.subr.bf16.mxu0 %v22127_v49  ;;  %16019 = vmatprep.subr.bf16.mxu1 %v22128_v4  ;;  %v22193_v4 = vld [vmem:[#allocation86_spill] sm:$0xff]  ;;  %v22194_v49 = vld [vmem:[#allocation88_spill] sm:$0xff] }
 0x763   :  { %15829 = vmatpush1.bf16.msra.mxu0 %v22129_v2  ;;  %16021 = vmatpush1.bf16.msra.mxu1 %v22130_v12  ;;  %v22184_v12 = vld [vmem:[#allocation16_spill] sm:$0xff] }
 0x764   :  { %15831 = vmatprep.subr.bf16.mxu0 %v22131_v23  ;;  %16023 = vmatprep.subr.bf16.mxu1 %v22132_v5  ;;  %v22155_v5 = vld [vmem:[#allocation118_spill] sm:$0xff]  ;;  %v22183_v23 = vld [vmem:[#allocation19_spill] sm:$0xff]  ;;  %v22187_v2 = vld [vmem:[#allocation120_spill] sm:$0xff] }
 0x767   :  { %15833 = vmatpush1.bf16.msra.mxu0 %v22133_v8  ;;  %16025 = vmatpush1.bf16.msra.mxu1 %v22134_v6  ;;  %v22143_v6 = vld [vmem:[#allocation103_spill] sm:$0xff] }
 0x768   :  { %15835 = vmatprep.subr.bf16.mxu0 %v22135_v47  ;;  %16027 = vmatprep.subr.bf16.mxu1 %v22136_v46  ;;  %v22144_v47 = vld [vmem:[#allocation105_spill] sm:$0xff]  ;;  %v22149_v46 = vld [vmem:[#allocation110_spill] sm:$0xff]  ;;  %v22154_v8 = vld [vmem:[#allocation127_spill] sm:$0xff] }
 0x76b   :  { %15837 = vmatpush1.bf16.msra.mxu0 %v22137_v21  ;;  %16029 = vmatpush1.bf16.msra.mxu1 %v22138_v31  ;;  %v22145_v31 = vld [vmem:[#allocation106_spill] sm:$0xff]  ;;  %v22148_v21 = vld [vmem:[#allocation109_spill] sm:$0xff] }
 0x76c   :  { %15839 = vmatprep.subr.bf16.mxu0 %v22139_v18  ;;  %16031 = vmatprep.subr.bf16.mxu1 %v22140_v19  ;;  %v22146_v18 = vld [vmem:[#allocation107_spill] sm:$0xff]  ;;  %v22147_v19 = vld [vmem:[#allocation108_spill] sm:$0xff] }
 0x76e   :  { %7498 = vmatmul.mubr.f32.vlgmr.msra.gmra.mrb[8].mxu0 %v20064_v51  ;;  %8353 = vmatmul.mubr.f32.vlgmr.msra.gmra.mrb[8].mxu1 %v20064_v51 }
 0x76f   :  { %15841 = vmatpush1.bf16.msra.mxu0 %v22141_v61  ;;  %16033 = vmatpush1.bf16.msra.mxu1 %v22142_v33  ;;  %v22150_v61 = vld [vmem:[#allocation112_spill] sm:$0xff]  ;;  %v22151_v33 = vld [vmem:[#allocation115_spill] sm:$0xff] }
 0x770   :  { %15843 = vmatprep.subr.bf16.mxu0 %v22143_v6  ;;  %16035 = vmatprep.subr.bf16.mxu1 %v22144_v47  ;;  %v22152_v6 = vld [vmem:[#allocation116_spill] sm:$0xff]  ;;  %v22153_v47 = vld [vmem:[#allocation117_spill] sm:$0xff] }
 0x771   :  { %7632 = vmatprep.mubr.f32.mxu0 %v21539_v1  ;;  %8487 = vmatprep.mubr.f32.mxu1 %v21539_v1 }
 0x773   :  { %15845 = vmatpush1.bf16.msra.mxu0 %v22145_v31  ;;  %16037 = vmatpush1.bf16.msra.mxu1 %v22146_v18  ;;  %v22156_v31 = vld [vmem:[#allocation129_spill] sm:$0xff]  ;;  %v22157_v18 = vld [vmem:[#allocation128_spill] sm:$0xff] }
 0x774   :  { %15847 = vmatprep.subr.bf16.mxu0 %v22147_v19  ;;  %16039 = vmatprep.subr.bf16.mxu1 %v22148_v21  ;;  %v22158_v19 = vld [vmem:[#allocation131_spill] sm:$0xff]  ;;  %v22159_v21 = vld [vmem:[#allocation130_spill] sm:$0xff] }
 0x777   :  { %15849 = vmatpush1.bf16.msra.mxu0 %v22149_v46  ;;  %16041 = vmatpush1.bf16.msra.mxu1 %v22150_v61  ;;  %v22160_v46 = vld [vmem:[#allocation133_spill] sm:$0xff]  ;;  %v22161_v61 = vld [vmem:[#allocation132_spill] sm:$0xff] }
 0x778   :  { %15851 = vmatprep.subr.bf16.mxu0 %v22151_v33  ;;  %16043 = vmatprep.subr.bf16.mxu1 %v22152_v6  ;;  %v22162_v33 = vld [vmem:[#allocation135_spill] sm:$0xff]  ;;  %v22163_v6 = vld [vmem:[#allocation134_spill] sm:$0xff] }
 0x77b   :  { %15853 = vmatpush1.bf16.msra.mxu0 %v22153_v47  ;;  %16045 = vmatpush1.bf16.msra.mxu1 %v22154_v8  ;;  %v22164_v47 = vld [vmem:[#allocation137_spill] sm:$0xff]  ;;  %v22165_v8 = vld [vmem:[#allocation136_spill] sm:$0xff] }
 0x77c   :  { %15855 = vmatprep.subr.bf16.mxu0 %v22155_v5  ;;  %16047 = vmatprep.subr.bf16.mxu1 %v22156_v31  ;;  %v22166_v5 = vld [vmem:[#allocation139_spill] sm:$0xff]  ;;  %v22167_v31 = vld [vmem:[#allocation138_spill] sm:$0xff] }
 0x77f   :  { %15857 = vmatpush1.bf16.msra.mxu0 %v22157_v18  ;;  %16049 = vmatpush1.bf16.msra.mxu1 %v22158_v19  ;;  %v22168_v18 = vld [vmem:[#allocation141_spill] sm:$0xff]  ;;  %v22169_v19 = vld [vmem:[#allocation140_spill] sm:$0xff] }
 0x780   :  { %15859 = vmatprep.subr.bf16.mxu0 %v22159_v21  ;;  %16051 = vmatprep.subr.bf16.mxu1 %v22160_v46  ;;  %v22170_v21 = vld [vmem:[#allocation114_spill] sm:$0xff] }
 0x781   :  { %v22182_v46 = vld [vmem:[#allocation14_spill] sm:$0xff] }
 0x783   :  { %15861 = vmatpush1.bf16.msra.mxu0 %v22161_v61  ;;  %16053 = vmatpush1.bf16.msra.mxu1 %v22162_v33  ;;  %v22180_v33 = vld [vmem:[#allocation67_spill] sm:$0xff]  ;;  %v22181_v61 = vld [vmem:[#allocation17_spill] sm:$0xff] }
 0x784   :  { %15863 = vmatprep.subr.bf16.mxu0 %v22163_v6  ;;  %16055 = vmatprep.subr.bf16.mxu1 %v22164_v47  ;;  %v22178_v47 = vld [vmem:[#allocation13_spill] sm:$0xff]  ;;  %v22179_v6 = vld [vmem:[#allocation15_spill] sm:$0xff] }
 0x787   :  { %15865 = vmatpush1.bf16.msra.mxu0 %v22165_v8  ;;  %16057 = vmatpush1.bf16.msra.mxu1 %v22166_v5  ;;  %v22176_v5 = vld [vmem:[#allocation62_spill] sm:$0xff]  ;;  %v22177_v8 = vld [vmem:[#allocation64_spill] sm:$0xff] }
 0x788   :  { %15867 = vmatprep.subr.bf16.mxu0 %v22167_v31  ;;  %16059 = vmatprep.subr.bf16.mxu1 %v22168_v18  ;;  %v22174_v18 = vld [vmem:[#allocation60_spill] sm:$0xff]  ;;  %v22175_v31 = vld [vmem:[#allocation61_spill] sm:$0xff] }
 0x78b   :  { %15869 = vmatpush1.bf16.msra.mxu0 %v22169_v19  ;;  %16061 = vmatpush1.bf16.msra.mxu1 %v22170_v21  ;;  %v22172_v21 = vld [vmem:[#allocation58_spill] sm:$0xff]  ;;  %v22173_v19 = vld [vmem:[#allocation59_spill] sm:$0xff] }
 0x78c   :  { %15871 = vmatprep.subr.bf16.mxu0 %v21787_v7  ;;  %16063 = vmatprep.subr.bf16.mxu1 %v21790_v54 }
 0x78e   :  { %7635 = vmatmul.mubr.f32.vlgmr.msra.gmra.mrb[8].mxu0 %v20067_v15  ;;  %8490 = vmatmul.mubr.f32.vlgmr.msra.gmra.mrb[8].mxu1 %v20067_v15  ;;  %v22171_v15 = vld [vmem:[#allocation57_spill] sm:$0xff] }
 0x78f   :  { %15873 = vmatpush1.bf16.msra.mxu0 %v21789_v28  ;;  %16065 = vmatpush1.bf16.msra.mxu1 %v21792_v48 }
 0x790   :  { %15875 = vmatprep.subr.bf16.mxu0 %v21791_v3  ;;  %16067 = vmatprep.subr.bf16.mxu1 %v21794_v20 }
 0x791   :  { %7737 = vmatprep.mubr.f32.mxu0 %v21539_v1  ;;  %8592 = vmatprep.mubr.f32.mxu1 %v21539_v1 }
 0x793   :  { %15877 = vmatpush1.bf16.msra.mxu0 %v21793_v38  ;;  %16069 = vmatpush1.bf16.msra.mxu1 %v21796_v29 }
 0x794   :  { %15879 = vmatprep.subr.bf16.mxu0 %v21795_v60  ;;  %16071 = vmatprep.subr.bf16.mxu1 %v21798_v50 }
 0x797   :  { %15881 = vmatpush1.bf16.msra.mxu0 %v21797_v24  ;;  %16073 = vmatpush1.bf16.msra.mxu1 %v21800_v55 }
 0x798   :  { %15883 = vmatprep.subr.bf16.mxu0 %v21799_v17  ;;  %16075 = vmatprep.subr.bf16.mxu1 %v21802_v22 }
 0x79b   :  { %15885 = vmatpush1.bf16.msra.mxu0 %v21801_v40  ;;  %16077 = vmatpush1.bf16.msra.mxu1 %v21804_v43 }
 0x79c   :  { %15887 = vmatprep.subr.bf16.mxu0 %v21803_v56  ;;  %16079 = vmatprep.subr.bf16.mxu1 %v21806_v35 }
 0x79f   :  { %15889 = vmatpush1.bf16.msra.mxu0 %v21805_v30  ;;  %16081 = vmatpush1.bf16.msra.mxu1 %v21808_v59 }
 0x7a0   :  { %15891 = vmatprep.subr.bf16.mxu0 %v21807_v41  ;;  %16083 = vmatprep.subr.bf16.mxu1 %v21810_v10 }
 0x7a3   :  { %15893 = vmatpush1.bf16.msra.mxu0 %v21809_v27  ;;  %16085 = vmatpush1.bf16.msra.mxu1 %v21812_v42 }
 0x7a4   :  { %15895 = vmatprep.subr.bf16.mxu0 %v21811_v36  ;;  %16087 = vmatprep.subr.bf16.mxu1 %v22171_v15 }
 0x7a7   :  { %15897 = vmatpush1.bf16.msra.mxu0 %v22172_v21  ;;  %16089 = vmatpush1.bf16.msra.mxu1 %v22173_v19 }
 0x7a8   :  { %15899 = vmatprep.subr.bf16.mxu0 %v22174_v18  ;;  %16091 = vmatprep.subr.bf16.mxu1 %v22175_v31 }
 0x7ab   :  { %15901 = vmatpush1.bf16.msra.mxu0 %v22176_v5  ;;  %16093 = vmatpush1.bf16.msra.mxu1 %v22177_v8 }
 0x7ac   :  { %15903 = vmatprep.subr.bf16.mxu0 %v22178_v47  ;;  %16095 = vmatprep.subr.bf16.mxu1 %v22179_v6  ;;  %v22185_v47 = vld [vmem:[#allocation18_spill] sm:$0xff]  ;;  %v22186_v6 = vld [vmem:[#allocation119_spill] sm:$0xff] }
 0x7ae   :  { %7741 = vmatmul.mubr.f32.vlgmr.msra.gmra.mrb[8].mxu0 %v20070_v57  ;;  %8596 = vmatmul.mubr.f32.vlgmr.msra.gmra.mrb[8].mxu1 %v20070_v57  ;;  %v22188_v57 = vld [vmem:[#allocation121_spill] sm:$0xff] }
 0x7af   :  { %15905 = vmatpush1.bf16.msra.mxu0 %v22180_v33  ;;  %16097 = vmatpush1.bf16.msra.mxu1 %v22181_v61  ;;  %v22189_v33 = vld [vmem:[#allocation122_spill] sm:$0xff]  ;;  %v22190_v61 = vld [vmem:[#allocation123_spill] sm:$0xff] }
 0x7b0   :  { %15907 = vmatprep.subr.bf16.mxu0 %v22182_v46  ;;  %16099 = vmatprep.subr.bf16.mxu1 %v22183_v23  ;;  %v22191_v46 = vld [vmem:[#allocation124_spill] sm:$0xff]  ;;  %v22192_v23 = vld [vmem:[#allocation125_spill] sm:$0xff] }
 0x7b1   :  { %7907 = vmatprep.mubr.f32.mxu0 %v21539_v1  ;;  %8762 = vmatprep.mubr.f32.mxu1 %v21539_v1 }
 0x7b3   :  { %15909 = vmatpush1.bf16.msra.mxu0 %v22184_v12  ;;  %16101 = vmatpush1.bf16.msra.mxu1 %v22185_v47  ;;  %v22195_v12 = vld [vmem:[#allocation25_spill] sm:$0xff]  ;;  %v22196_v47 = vld [vmem:[#allocation26_spill] sm:$0xff] }
 0x7b4   :  { %15911 = vmatprep.subr.bf16.mxu0 %v22186_v6  ;;  %16103 = vmatprep.subr.bf16.mxu1 %v22187_v2  ;;  %v22197_v6 = vld [vmem:[#allocation28_spill] sm:$0xff]  ;;  %v22198_v2 = vld [vmem:[#allocation29_spill] sm:$0xff] }
 0x7b7   :  { %15913 = vmatpush1.bf16.msra.mxu0 %v22188_v57  ;;  %16105 = vmatpush1.bf16.msra.mxu1 %v22189_v33  ;;  %v22199_v57 = vld [vmem:[#allocation30_spill] sm:$0xff]  ;;  %v22200_v33 = vld [vmem:[#allocation33_spill] sm:$0xff] }
 0x7b8   :  { %15915 = vmatprep.subr.bf16.mxu0 %v22190_v61  ;;  %16107 = vmatprep.subr.bf16.mxu1 %v22191_v46  ;;  %v22201_v61 = vld [vmem:[#allocation34_spill] sm:$0xff]  ;;  %v22202_v46 = vld [vmem:[#allocation35_spill] sm:$0xff] }
 0x7bb   :  { %15917 = vmatpush1.bf16.msra.mxu0 %v22192_v23  ;;  %16109 = vmatpush1.bf16.msra.mxu1 %v22193_v4  ;;  %v22203_v23 = vld [vmem:[#allocation37_spill] sm:$0xff]  ;;  %v22204_v4 = vld [vmem:[#allocation39_spill] sm:$0xff] }
 0x7bc   :  { %15919 = vmatprep.subr.bf16.mxu0 %v22194_v49  ;;  %16111 = vmatprep.subr.bf16.mxu1 %v22195_v12  ;;  %v22205_v49 = vld [vmem:[#allocation46_spill] sm:$0xff]  ;;  %v22206_v12 = vld [vmem:[#allocation95_spill] sm:$0xff] }
 0x7bf   :  { %15921 = vmatpush1.bf16.msra.mxu0 %v22196_v47  ;;  %16113 = vmatpush1.bf16.msra.mxu1 %v22197_v6  ;;  %v22207_v47 = vld [vmem:[#allocation49_spill] sm:$0xff]  ;;  %v22208_v6 = vld [vmem:[#allocation98_spill] sm:$0xff] }
 0x7c0   :  { %15923 = vmatprep.subr.bf16.mxu0 %v22198_v2  ;;  %16115 = vmatprep.subr.bf16.mxu1 %v22199_v57  ;;  %v22209_v2 = vld [vmem:[#allocation126_spill] sm:$0xff] }
 0x7c3   :  { %15925 = vmatpush1.bf16.msra.mxu0 %v22200_v33  ;;  %16117 = vmatpush1.bf16.msra.mxu1 %v22201_v61 }
 0x7c4   :  { %15927 = vmatprep.subr.bf16.mxu0 %v22202_v46  ;;  %16119 = vmatprep.subr.bf16.mxu1 %v22203_v23 }
 0x7c7   :  { %15929 = vmatpush1.bf16.msra.mxu0 %v22204_v4  ;;  %16121 = vmatpush1.bf16.msra.mxu1 %v22205_v49 }
 0x7c8   :  { %15931 = vmatprep.subr.bf16.mxu0 %v22206_v12  ;;  %16123 = vmatprep.subr.bf16.mxu1 %v22207_v47  ;;  %v7161_v47 = vld [vmem:[#allocation4 + $0x88] sm:$0xff] }
 0x7cb   :  { %15933 = vmatpush1.bf16.msra.mxu0 %v22208_v6  ;;  %16125 = vmatpush1.bf16.msra.mxu1 %v22209_v2  ;;  %v22211_v2 = vld [vmem:[#allocation70_spill] sm:$0xff]  ;;  %v7160_v6 = vld [vmem:[#allocation4 + $0x80] sm:$0xff] }
 0x7cc   :  { %15935 = vmatprep.subr.bf16.mxu0 %v21787_v7  ;;  %16127 = vmatprep.subr.bf16.mxu1 %v21790_v54 }
 0x7ce   :  { %7909 = vmatmul.mubr.f32.vlgmr.msra.gmra.mrb[8].mxu0 %v20064_v51  ;;  %8764 = vmatmul.mubr.f32.vlgmr.msra.gmra.mrb[8].mxu1 %v20064_v51 }
 0x7cf   :  { %15937 = vmatpush1.bf16.msra.mxu0 %v21789_v28  ;;  %16129 = vmatpush1.bf16.msra.mxu1 %v21792_v48 }
 0x7d0   :  { %15939 = vmatprep.subr.bf16.mxu0 %v21791_v3  ;;  %16131 = vmatprep.subr.bf16.mxu1 %v21794_v20 }
 0x7d1   :  { %8011 = vmatprep.mubr.f32.mxu0 %v21539_v1  ;;  %8866 = vmatprep.mubr.f32.mxu1 %v21539_v1 }
 0x7d3   :  { %15941 = vmatpush1.bf16.msra.mxu0 %v21793_v38  ;;  %16133 = vmatpush1.bf16.msra.mxu1 %v21796_v29 }
 0x7d4   :  { %15943 = vmatprep.subr.bf16.mxu0 %v21795_v60  ;;  %16135 = vmatprep.subr.bf16.mxu1 %v21798_v50 }
 0x7d7   :  { %15945 = vmatpush1.bf16.msra.mxu0 %v21797_v24  ;;  %16137 = vmatpush1.bf16.msra.mxu1 %v21800_v55 }
 0x7d8   :  { %15947 = vmatprep.subr.bf16.mxu0 %v21799_v17  ;;  %16139 = vmatprep.subr.bf16.mxu1 %v21802_v22 }
 0x7db   :  { %15949 = vmatpush1.bf16.msra.mxu0 %v21801_v40  ;;  %16141 = vmatpush1.bf16.msra.mxu1 %v21804_v43 }
 0x7dc   :  { %15951 = vmatprep.subr.bf16.mxu0 %v21803_v56  ;;  %16143 = vmatprep.subr.bf16.mxu1 %v21806_v35 }
 0x7df   :  { %15953 = vmatpush1.bf16.msra.mxu0 %v21805_v30  ;;  %16145 = vmatpush1.bf16.msra.mxu1 %v21808_v59 }
 0x7e0   :  { %15955 = vmatprep.subr.bf16.mxu0 %v21807_v41  ;;  %16147 = vmatprep.subr.bf16.mxu1 %v21810_v10 }
 0x7e3   :  { %15957 = vmatpush1.bf16.msra.mxu0 %v21809_v27  ;;  %16149 = vmatpush1.bf16.msra.mxu1 %v21812_v42 }
 0x7e4   :  { %15959 = vmatprep.subr.bf16.mxu0 %v21811_v36  ;;  %16151 = vmatprep.subr.bf16.mxu1 %v22171_v15 }
 0x7e7   :  { %15961 = vmatpush1.bf16.msra.mxu0 %v22172_v21  ;;  %16153 = vmatpush1.bf16.msra.mxu1 %v22173_v19 }
 0x7e8   :  { %15963 = vmatprep.subr.bf16.mxu0 %v22174_v18  ;;  %16155 = vmatprep.subr.bf16.mxu1 %v22175_v31 }
 0x7eb   :  { %15965 = vmatpush1.bf16.msra.mxu0 %v22176_v5  ;;  %16157 = vmatpush1.bf16.msra.mxu1 %v22177_v8 }
 0x7ec   :  { %16159 = vmatprep.subr.bf16.mxu0 %v21787_v7  ;;  %16351 = vmatprep.subr.bf16.mxu1 %v21790_v54 }
 0x7ee   :  { %8013 = vmatmul.mubr.f32.vlgmr.msra.gmra.mrb[8].mxu0 %v20064_v51  ;;  %8868 = vmatmul.mubr.f32.vlgmr.msra.gmra.mrb[8].mxu1 %v20064_v51  ;;  %v22210_v51 = vld [vmem:[#allocation69_spill] sm:$0xff] }
 0x7ef   :  { %16161 = vmatpush1.bf16.msra.mxu0 %v21789_v28  ;;  %16353 = vmatpush1.bf16.msra.mxu1 %v21792_v48 }
 0x7f0   :  { %16163 = vmatprep.subr.bf16.mxu0 %v21791_v3  ;;  %16355 = vmatprep.subr.bf16.mxu1 %v21794_v20 }
 0x7f1   :  { %9018 = vmatprep.mubr.f32.mxu0 %v21539_v1  ;;  %9873 = vmatprep.mubr.f32.mxu1 %v21539_v1 }
 0x7f3   :  { %16165 = vmatpush1.bf16.msra.mxu0 %v21793_v38  ;;  %16357 = vmatpush1.bf16.msra.mxu1 %v21796_v29 }
 0x7f4   :  { %16167 = vmatprep.subr.bf16.mxu0 %v21795_v60  ;;  %16359 = vmatprep.subr.bf16.mxu1 %v21798_v50 }
 0x7f7   :  { %16169 = vmatpush1.bf16.msra.mxu0 %v21797_v24  ;;  %16361 = vmatpush1.bf16.msra.mxu1 %v21800_v55 }
 0x7f8   :  { %16171 = vmatprep.subr.bf16.mxu0 %v21799_v17  ;;  %16363 = vmatprep.subr.bf16.mxu1 %v21802_v22 }
 0x7fb   :  { %16173 = vmatpush1.bf16.msra.mxu0 %v21801_v40  ;;  %16365 = vmatpush1.bf16.msra.mxu1 %v21804_v43 }
 0x7fc   :  { %16175 = vmatprep.subr.bf16.mxu0 %v21803_v56  ;;  %16367 = vmatprep.subr.bf16.mxu1 %v21806_v35 }
 0x7ff   :  { %16177 = vmatpush1.bf16.msra.mxu0 %v21805_v30  ;;  %16369 = vmatpush1.bf16.msra.mxu1 %v21808_v59 }
 0x800   :  { %16179 = vmatprep.subr.bf16.mxu0 %v21807_v41  ;;  %16371 = vmatprep.subr.bf16.mxu1 %v21810_v10 }
 0x803   :  { %16181 = vmatpush1.bf16.msra.mxu0 %v21809_v27  ;;  %16373 = vmatpush1.bf16.msra.mxu1 %v21812_v42 }
 0x804   :  { %16183 = vmatprep.subr.bf16.mxu0 %v21811_v36  ;;  %16375 = vmatprep.subr.bf16.mxu1 %v22171_v15 }
 0x807   :  { %16185 = vmatpush1.bf16.msra.mxu0 %v22172_v21  ;;  %16377 = vmatpush1.bf16.msra.mxu1 %v22173_v19 }
 0x808   :  { %16187 = vmatprep.subr.bf16.mxu0 %v22174_v18  ;;  %16379 = vmatprep.subr.bf16.mxu1 %v22175_v31  ;;  %v7162_v31 = vld [vmem:[#allocation4 + $0x90] sm:$0xff]  ;;  %v7163_v18 = vld [vmem:[#allocation4 + $0x98] sm:$0xff] }
 0x80b   :  { %16189 = vmatpush1.bf16.msra.mxu0 %v22176_v5  ;;  %16381 = vmatpush1.bf16.msra.mxu1 %v22177_v8 }
 0x80c   :  { %16191 = vmatprep.subr.bf16.mxu0 %v22210_v51  ;;  %16383 = vmatprep.subr.bf16.mxu1 %v22211_v2 }
 0x8c1   :  { %v8014_v12 = vpop.f32.mrb[8].mxu0  ;;  %v8869_v49 = vpop.f32.mrb[8].mxu1 }
 0x8c2   :  { %v8874_v4 = vadd.f32 %v8014_v12, %v7160_v6  ;;  %v8016_v23 = vpop.f32.mrb[9].mxu0  ;;  %v8871_v46 = vpop.f32.mrb[9].mxu1  ;;  %v8876_v5 = vadd.f32 %v8869_v49, %v7162_v31 }
 0x8c3   :  { %v8875_v61 = vadd.f32 %v8016_v23, %v7161_v47  ;;  %v8877_v51 = vadd.f32 %v8871_v46, %v7163_v18  ;;  %v8905_v31 = vpop.permute.xlu0 %8904 }
 0x8c4   :  { %v14223_v33 = vmul.f32 -1.442695, %v8874_v4  ;;  %v14225_v8 = vmul.f32 -1.442695, %v8876_v5 }
 0x8c5   :  { %v14224_v57 = vmul.f32 -1.442695, %v8875_v61 }
 0x8c6   :  { %17545 = vpow2.f32 %v14223_v33 }
 0x8c7   :  { %17547 = vpow2.f32 %v14224_v57 }
 0x8c8   :  { %17549 = vpow2.f32 %v14225_v8 }
 0x8d0   :  { %v17546_v19 = vpop.eup %17545 }
 0x8d1   :  { %v8881_v21 = vadd.f32 1.0, %v17546_v19  ;;  %v17548_v2 = vpop.eup %17547 }
 0x8d2   :  { %v8887_v15 = vadd.f32 1.0, %v17548_v2  ;;  %v17550_v12 = vpop.eup %17549 }
 0x8d3   :  { %17551 = vrcp.f32 %v8881_v21  ;;  %v8893_v61 = vadd.f32 1.0, %v17550_v12  ;;  %v22213_v12 = vld [vmem:[#allocation43_spill] sm:$0xff] }
 0x8d4   :  { %17553 = vtanh.f32 %v8877_v51  ;;  %v22212_v51 = vld [vmem:[#allocation42_spill] sm:$0xff] }
 0x8d5   :  { %17555 = vrcp.f32 %v8887_v15 }
 0x8d6   :  { %17557 = vrcp.f32 %v8893_v61  ;;  %v22218_v61 = vld [vmem:[#allocation99_spill] sm:$0xff] }
 0x8dd   :  { %v17552_v6 = vpop.eup %17551 }
 0x8de   :  { %v17554_v23 = vpop.eup %17553  ;;  %v8897_v4 = vmul.f32 %v17552_v6, %v20061_v62  ;;  %v22214_v6 = vld [vmem:[#allocation48_spill] sm:$0xff] }
 0x8df   :  { %v17556_v47 = vpop.eup %17555 }
 0x8e0   :  { %v8898_v33 = vmul.f32 %v17556_v47, %v17554_v23  ;;  %v17558_v8 = vpop.eup %17557  ;;  %v22215_v23 = vld [vmem:[#allocation96_spill] sm:$0xff]  ;;  %v22217_v47 = vld [vmem:[#allocation51_spill] sm:$0xff] }
 0x8e2   :  { %v8899_v49 = vadd.f32 %v8898_v33, %v8897_v4  ;;  %v22216_v4 = vld [vmem:[#allocation97_spill] sm:$0xff]  ;;  %v22219_v33 = vld [vmem:[#allocation55_spill] sm:$0xff] }
 0x8e4   :  { %17559 = vtanh.f32 %v8899_v49  ;;  %v20289_v5 = vmul.f32 %v8905_v31, %v8899_v49  ;;  %v22220_v49 = vld [vmem:[#allocation100_spill] sm:$0xff] }
 0x8e6   :  { %8911 = vst [vmem:[#allocation9 + $0x48] sm:$0xff] %v20289_v5 }
 0x8ee   :  { %v17560_v2 = vpop.eup %17559 }
 0x8ef   :  { %v8901_v46 = vmul.f32 %v17560_v2, %v17558_v8  ;;  %v22222_v8 = vld [vmem:[#allocation104_spill] sm:$0xff]  ;;  %v22223_v2 = vld [vmem:[#allocation65_spill] sm:$0xff] }
 0x8f1   :  { %v8907_v21 = vmul.f32 %v8905_v31, %v8901_v46  ;;  %v22221_v31 = vld [vmem:[#allocation101_spill] sm:$0xff]  ;;  %v22224_v46 = vld [vmem:[#allocation102_spill] sm:$0xff] }
 0x8f3   :  { %8910 = vst [vmem:[#allocation9 + $0x40] sm:$0xff] %v8907_v21  ;;  %v20292_v18 = vand.u32 4294901760, %v8907_v21 }
 0x8f5   :  { %v20295_v62 = vsub.f32 %v8907_v21, %v20292_v18  ;;  %v22225_v21 = vld [vmem:[#allocation63_spill] sm:$0xff] }
 0x8f7   :  { %v20298_v19 = vand.u32 4294901760, %v20295_v62 }
 0x8f9   :  { %v9022_v15 = vsub.f32 %v20295_v62, %v20298_v19 }
 0x8fb   :  { %v9023_v57 = vand.u32 4294901760, %v9022_v15  ;;  %v22226_v15 = vld [vmem:[#allocation111_spill] sm:$0xff] }
 0x8fd   :  { %9024 = vmatmul.mubr.f32.vlgmr.msra.gmra.mrb[10].mxu0 %v9023_v57  ;;  %9879 = vmatmul.mubr.f32.vlgmr.msra.gmra.mrb[10].mxu1 %v9023_v57  ;;  %v22227_v57 = vld [vmem:[#allocation113_spill] sm:$0xff] }
 0x8fe   :  { %16193 = vmatpush1.bf16.msra.mxu0 %v21873_v26  ;;  %16385 = vmatpush1.bf16.msra.mxu1 %v21874_v34 }
 0x8ff   :  { %16195 = vmatprep.subr.bf16.mxu0 %v21875_v52  ;;  %16387 = vmatprep.subr.bf16.mxu1 %v21876_v44 }
 0x900   :  { %9254 = vmatprep.mubr.f32.mxu0 %v21539_v1  ;;  %10109 = vmatprep.mubr.f32.mxu1 %v21539_v1 }
 0x902   :  { %16197 = vmatpush1.bf16.msra.mxu0 %v21957_v9  ;;  %16389 = vmatpush1.bf16.msra.mxu1 %v21958_v37 }
 0x903   :  { %16199 = vmatprep.subr.bf16.mxu0 %v21959_v53  ;;  %16391 = vmatprep.subr.bf16.mxu1 %v21960_v63 }
 0x906   :  { %16201 = vmatpush1.bf16.msra.mxu0 %v21961_v16  ;;  %16393 = vmatpush1.bf16.msra.mxu1 %v22042_v11 }
 0x907   :  { %16203 = vmatprep.subr.bf16.mxu0 %v21963_v32  ;;  %16395 = vmatprep.subr.bf16.mxu1 %v21964_v14 }
 0x90a   :  { %16205 = vmatpush1.bf16.msra.mxu0 %v22043_v25  ;;  %16397 = vmatpush1.bf16.msra.mxu1 %v22044_v45 }
 0x90b   :  { %16207 = vmatprep.subr.bf16.mxu0 %v22045_v39  ;;  %16399 = vmatprep.subr.bf16.mxu1 %v22046_v58 }
 0x90e   :  { %16209 = vmatpush1.bf16.msra.mxu0 %v22047_v13  ;;  %16401 = vmatpush1.bf16.msra.mxu1 %v22048_v0 }
 0x90f   :  { %16211 = vmatprep.subr.bf16.mxu0 %v22212_v51  ;;  %16403 = vmatprep.subr.bf16.mxu1 %v22213_v12  ;;  %v22278_v12 = vld [vmem:[#allocation86_spill] sm:$0xff]  ;;  %v22279_v51 = vld [vmem:[#allocation88_spill] sm:$0xff] }
 0x912   :  { %16213 = vmatpush1.bf16.msra.mxu0 %v22214_v6  ;;  %16405 = vmatpush1.bf16.msra.mxu1 %v22215_v23  ;;  %v22269_v23 = vld [vmem:[#allocation16_spill] sm:$0xff] }
 0x913   :  { %16215 = vmatprep.subr.bf16.mxu0 %v22216_v4  ;;  %16407 = vmatprep.subr.bf16.mxu1 %v22217_v47  ;;  %v22240_v47 = vld [vmem:[#allocation118_spill] sm:$0xff]  ;;  %v22268_v4 = vld [vmem:[#allocation19_spill] sm:$0xff]  ;;  %v22272_v6 = vld [vmem:[#allocation120_spill] sm:$0xff] }
 0x916   :  { %16217 = vmatpush1.bf16.msra.mxu0 %v22218_v61  ;;  %16409 = vmatpush1.bf16.msra.mxu1 %v22219_v33  ;;  %v22228_v33 = vld [vmem:[#allocation103_spill] sm:$0xff] }
 0x917   :  { %16219 = vmatprep.subr.bf16.mxu0 %v22220_v49  ;;  %16411 = vmatprep.subr.bf16.mxu1 %v22221_v31  ;;  %v22229_v49 = vld [vmem:[#allocation105_spill] sm:$0xff]  ;;  %v22234_v31 = vld [vmem:[#allocation110_spill] sm:$0xff]  ;;  %v22239_v61 = vld [vmem:[#allocation127_spill] sm:$0xff] }
 0x91a   :  { %16221 = vmatpush1.bf16.msra.mxu0 %v22222_v8  ;;  %16413 = vmatpush1.bf16.msra.mxu1 %v22223_v2  ;;  %v22230_v2 = vld [vmem:[#allocation106_spill] sm:$0xff]  ;;  %v22233_v8 = vld [vmem:[#allocation109_spill] sm:$0xff] }
 0x91b   :  { %16223 = vmatprep.subr.bf16.mxu0 %v22224_v46  ;;  %16415 = vmatprep.subr.bf16.mxu1 %v22225_v21  ;;  %v22231_v46 = vld [vmem:[#allocation107_spill] sm:$0xff]  ;;  %v22232_v21 = vld [vmem:[#allocation108_spill] sm:$0xff] }
 0x91d   :  { %9256 = vmatmul.mubr.f32.vlgmr.msra.gmra.mrb[10].mxu0 %v20292_v18  ;;  %10111 = vmatmul.mubr.f32.vlgmr.msra.gmra.mrb[10].mxu1 %v20292_v18 }
 0x91e   :  { %16225 = vmatpush1.bf16.msra.mxu0 %v22226_v15  ;;  %16417 = vmatpush1.bf16.msra.mxu1 %v22227_v57  ;;  %v22235_v15 = vld [vmem:[#allocation112_spill] sm:$0xff]  ;;  %v22236_v57 = vld [vmem:[#allocation115_spill] sm:$0xff] }
 0x91f   :  { %16227 = vmatprep.subr.bf16.mxu0 %v22228_v33  ;;  %16419 = vmatprep.subr.bf16.mxu1 %v22229_v49  ;;  %v22237_v33 = vld [vmem:[#allocation116_spill] sm:$0xff]  ;;  %v22238_v49 = vld [vmem:[#allocation117_spill] sm:$0xff] }
 0x920   :  { %9390 = vmatprep.mubr.f32.mxu0 %v21539_v1  ;;  %10245 = vmatprep.mubr.f32.mxu1 %v21539_v1 }
 0x922   :  { %16229 = vmatpush1.bf16.msra.mxu0 %v22230_v2  ;;  %16421 = vmatpush1.bf16.msra.mxu1 %v22231_v46  ;;  %v22241_v2 = vld [vmem:[#allocation129_spill] sm:$0xff]  ;;  %v22242_v46 = vld [vmem:[#allocation128_spill] sm:$0xff] }
 0x923   :  { %16231 = vmatprep.subr.bf16.mxu0 %v22232_v21  ;;  %16423 = vmatprep.subr.bf16.mxu1 %v22233_v8  ;;  %v22243_v21 = vld [vmem:[#allocation131_spill] sm:$0xff]  ;;  %v22244_v8 = vld [vmem:[#allocation130_spill] sm:$0xff] }
 0x926   :  { %16233 = vmatpush1.bf16.msra.mxu0 %v22234_v31  ;;  %16425 = vmatpush1.bf16.msra.mxu1 %v22235_v15  ;;  %v22245_v31 = vld [vmem:[#allocation133_spill] sm:$0xff]  ;;  %v22246_v15 = vld [vmem:[#allocation132_spill] sm:$0xff] }
 0x927   :  { %16235 = vmatprep.subr.bf16.mxu0 %v22236_v57  ;;  %16427 = vmatprep.subr.bf16.mxu1 %v22237_v33  ;;  %v22247_v57 = vld [vmem:[#allocation135_spill] sm:$0xff]  ;;  %v22248_v33 = vld [vmem:[#allocation134_spill] sm:$0xff] }
 0x92a   :  { %16237 = vmatpush1.bf16.msra.mxu0 %v22238_v49  ;;  %16429 = vmatpush1.bf16.msra.mxu1 %v22239_v61  ;;  %v22249_v49 = vld [vmem:[#allocation137_spill] sm:$0xff]  ;;  %v22250_v61 = vld [vmem:[#allocation136_spill] sm:$0xff] }
 0x92b   :  { %16239 = vmatprep.subr.bf16.mxu0 %v22240_v47  ;;  %16431 = vmatprep.subr.bf16.mxu1 %v22241_v2  ;;  %v22251_v47 = vld [vmem:[#allocation139_spill] sm:$0xff]  ;;  %v22252_v2 = vld [vmem:[#allocation138_spill] sm:$0xff] }
 0x92e   :  { %16241 = vmatpush1.bf16.msra.mxu0 %v22242_v46  ;;  %16433 = vmatpush1.bf16.msra.mxu1 %v22243_v21  ;;  %v22253_v46 = vld [vmem:[#allocation141_spill] sm:$0xff]  ;;  %v22254_v21 = vld [vmem:[#allocation140_spill] sm:$0xff] }
 0x92f   :  { %16243 = vmatprep.subr.bf16.mxu0 %v22244_v8  ;;  %16435 = vmatprep.subr.bf16.mxu1 %v22245_v31  ;;  %v22255_v8 = vld [vmem:[#allocation114_spill] sm:$0xff] }
 0x930   :  { %v22267_v31 = vld [vmem:[#allocation14_spill] sm:$0xff] }
 0x932   :  { %16245 = vmatpush1.bf16.msra.mxu0 %v22246_v15  ;;  %16437 = vmatpush1.bf16.msra.mxu1 %v22247_v57  ;;  %v22265_v57 = vld [vmem:[#allocation67_spill] sm:$0xff]  ;;  %v22266_v15 = vld [vmem:[#allocation17_spill] sm:$0xff] }
 0x933   :  { %16247 = vmatprep.subr.bf16.mxu0 %v22248_v33  ;;  %16439 = vmatprep.subr.bf16.mxu1 %v22249_v49  ;;  %v22263_v49 = vld [vmem:[#allocation13_spill] sm:$0xff]  ;;  %v22264_v33 = vld [vmem:[#allocation15_spill] sm:$0xff] }
 0x936   :  { %16249 = vmatpush1.bf16.msra.mxu0 %v22250_v61  ;;  %16441 = vmatpush1.bf16.msra.mxu1 %v22251_v47  ;;  %v22261_v47 = vld [vmem:[#allocation62_spill] sm:$0xff]  ;;  %v22262_v61 = vld [vmem:[#allocation64_spill] sm:$0xff] }
 0x937   :  { %16251 = vmatprep.subr.bf16.mxu0 %v22252_v2  ;;  %16443 = vmatprep.subr.bf16.mxu1 %v22253_v46  ;;  %v22259_v46 = vld [vmem:[#allocation60_spill] sm:$0xff]  ;;  %v22260_v2 = vld [vmem:[#allocation61_spill] sm:$0xff] }
 0x93a   :  { %16253 = vmatpush1.bf16.msra.mxu0 %v22254_v21  ;;  %16445 = vmatpush1.bf16.msra.mxu1 %v22255_v8  ;;  %v22257_v8 = vld [vmem:[#allocation58_spill] sm:$0xff]  ;;  %v22258_v21 = vld [vmem:[#allocation59_spill] sm:$0xff] }
 0x93b   :  { %16255 = vmatprep.subr.bf16.mxu0 %v21787_v7  ;;  %16447 = vmatprep.subr.bf16.mxu1 %v21790_v54 }
 0x93d   :  { %9393 = vmatmul.mubr.f32.vlgmr.msra.gmra.mrb[10].mxu0 %v20295_v62  ;;  %10248 = vmatmul.mubr.f32.vlgmr.msra.gmra.mrb[10].mxu1 %v20295_v62  ;;  %v22256_v62 = vld [vmem:[#allocation57_spill] sm:$0xff] }
 0x93e   :  { %16257 = vmatpush1.bf16.msra.mxu0 %v21789_v28  ;;  %16449 = vmatpush1.bf16.msra.mxu1 %v21792_v48 }
 0x93f   :  { %16259 = vmatprep.subr.bf16.mxu0 %v21791_v3  ;;  %16451 = vmatprep.subr.bf16.mxu1 %v21794_v20 }
 0x940   :  { %9495 = vmatprep.mubr.f32.mxu0 %v21539_v1  ;;  %10350 = vmatprep.mubr.f32.mxu1 %v21539_v1 }
 0x942   :  { %16261 = vmatpush1.bf16.msra.mxu0 %v21793_v38  ;;  %16453 = vmatpush1.bf16.msra.mxu1 %v21796_v29 }
 0x943   :  { %16263 = vmatprep.subr.bf16.mxu0 %v21795_v60  ;;  %16455 = vmatprep.subr.bf16.mxu1 %v21798_v50 }
 0x946   :  { %16265 = vmatpush1.bf16.msra.mxu0 %v21797_v24  ;;  %16457 = vmatpush1.bf16.msra.mxu1 %v21800_v55 }
 0x947   :  { %16267 = vmatprep.subr.bf16.mxu0 %v21799_v17  ;;  %16459 = vmatprep.subr.bf16.mxu1 %v21802_v22 }
 0x94a   :  { %16269 = vmatpush1.bf16.msra.mxu0 %v21801_v40  ;;  %16461 = vmatpush1.bf16.msra.mxu1 %v21804_v43 }
 0x94b   :  { %16271 = vmatprep.subr.bf16.mxu0 %v21803_v56  ;;  %16463 = vmatprep.subr.bf16.mxu1 %v21806_v35 }
 0x94e   :  { %16273 = vmatpush1.bf16.msra.mxu0 %v21805_v30  ;;  %16465 = vmatpush1.bf16.msra.mxu1 %v21808_v59 }
 0x94f   :  { %16275 = vmatprep.subr.bf16.mxu0 %v21807_v41  ;;  %16467 = vmatprep.subr.bf16.mxu1 %v21810_v10 }
 0x952   :  { %16277 = vmatpush1.bf16.msra.mxu0 %v21809_v27  ;;  %16469 = vmatpush1.bf16.msra.mxu1 %v21812_v42 }
 0x953   :  { %16279 = vmatprep.subr.bf16.mxu0 %v21811_v36  ;;  %16471 = vmatprep.subr.bf16.mxu1 %v22256_v62 }
 0x956   :  { %16281 = vmatpush1.bf16.msra.mxu0 %v22257_v8  ;;  %16473 = vmatpush1.bf16.msra.mxu1 %v22258_v21 }
 0x957   :  { %16283 = vmatprep.subr.bf16.mxu0 %v22259_v46  ;;  %16475 = vmatprep.subr.bf16.mxu1 %v22260_v2 }
 0x95a   :  { %16285 = vmatpush1.bf16.msra.mxu0 %v22261_v47  ;;  %16477 = vmatpush1.bf16.msra.mxu1 %v22262_v61 }
 0x95b   :  { %16287 = vmatprep.subr.bf16.mxu0 %v22263_v49  ;;  %16479 = vmatprep.subr.bf16.mxu1 %v22264_v33  ;;  %v22270_v49 = vld [vmem:[#allocation18_spill] sm:$0xff]  ;;  %v22271_v33 = vld [vmem:[#allocation119_spill] sm:$0xff] }
 0x95d   :  { %9499 = vmatmul.mubr.f32.vlgmr.msra.gmra.mrb[10].mxu0 %v20298_v19  ;;  %10354 = vmatmul.mubr.f32.vlgmr.msra.gmra.mrb[10].mxu1 %v20298_v19  ;;  %v22273_v19 = vld [vmem:[#allocation121_spill] sm:$0xff] }
 0x95e   :  { %16289 = vmatpush1.bf16.msra.mxu0 %v22265_v57  ;;  %16481 = vmatpush1.bf16.msra.mxu1 %v22266_v15  ;;  %v22274_v57 = vld [vmem:[#allocation122_spill] sm:$0xff]  ;;  %v22275_v15 = vld [vmem:[#allocation123_spill] sm:$0xff] }
 0x95f   :  { %16291 = vmatprep.subr.bf16.mxu0 %v22267_v31  ;;  %16483 = vmatprep.subr.bf16.mxu1 %v22268_v4  ;;  %v22276_v31 = vld [vmem:[#allocation124_spill] sm:$0xff]  ;;  %v22277_v4 = vld [vmem:[#allocation125_spill] sm:$0xff] }
 0x960   :  { %9665 = vmatprep.mubr.f32.mxu0 %v21539_v1  ;;  %10520 = vmatprep.mubr.f32.mxu1 %v21539_v1 }
 0x962   :  { %16293 = vmatpush1.bf16.msra.mxu0 %v22269_v23  ;;  %16485 = vmatpush1.bf16.msra.mxu1 %v22270_v49  ;;  %v22280_v23 = vld [vmem:[#allocation25_spill] sm:$0xff]  ;;  %v22281_v49 = vld [vmem:[#allocation26_spill] sm:$0xff] }
 0x963   :  { %16295 = vmatprep.subr.bf16.mxu0 %v22271_v33  ;;  %16487 = vmatprep.subr.bf16.mxu1 %v22272_v6  ;;  %v22282_v33 = vld [vmem:[#allocation28_spill] sm:$0xff]  ;;  %v22283_v6 = vld [vmem:[#allocation29_spill] sm:$0xff] }
 0x966   :  { %16297 = vmatpush1.bf16.msra.mxu0 %v22273_v19  ;;  %16489 = vmatpush1.bf16.msra.mxu1 %v22274_v57  ;;  %v22284_v19 = vld [vmem:[#allocation30_spill] sm:$0xff]  ;;  %v22285_v57 = vld [vmem:[#allocation33_spill] sm:$0xff] }
 0x967   :  { %16299 = vmatprep.subr.bf16.mxu0 %v22275_v15  ;;  %16491 = vmatprep.subr.bf16.mxu1 %v22276_v31  ;;  %v22286_v15 = vld [vmem:[#allocation34_spill] sm:$0xff]  ;;  %v22287_v31 = vld [vmem:[#allocation35_spill] sm:$0xff] }
 0x96a   :  { %16301 = vmatpush1.bf16.msra.mxu0 %v22277_v4  ;;  %16493 = vmatpush1.bf16.msra.mxu1 %v22278_v12  ;;  %v22288_v4 = vld [vmem:[#allocation37_spill] sm:$0xff]  ;;  %v22289_v12 = vld [vmem:[#allocation39_spill] sm:$0xff] }
 0x96b   :  { %16303 = vmatprep.subr.bf16.mxu0 %v22279_v51  ;;  %16495 = vmatprep.subr.bf16.mxu1 %v22280_v23  ;;  %v22290_v51 = vld [vmem:[#allocation46_spill] sm:$0xff]  ;;  %v22291_v23 = vld [vmem:[#allocation95_spill] sm:$0xff] }
 0x96e   :  { %16305 = vmatpush1.bf16.msra.mxu0 %v22281_v49  ;;  %16497 = vmatpush1.bf16.msra.mxu1 %v22282_v33  ;;  %v22292_v49 = vld [vmem:[#allocation49_spill] sm:$0xff]  ;;  %v22293_v33 = vld [vmem:[#allocation98_spill] sm:$0xff] }
 0x96f   :  { %16307 = vmatprep.subr.bf16.mxu0 %v22283_v6  ;;  %16499 = vmatprep.subr.bf16.mxu1 %v22284_v19  ;;  %v22294_v6 = vld [vmem:[#allocation126_spill] sm:$0xff] }
 0x972   :  { %16309 = vmatpush1.bf16.msra.mxu0 %v22285_v57  ;;  %16501 = vmatpush1.bf16.msra.mxu1 %v22286_v15 }
 0x973   :  { %16311 = vmatprep.subr.bf16.mxu0 %v22287_v31  ;;  %16503 = vmatprep.subr.bf16.mxu1 %v22288_v4 }
 0x976   :  { %16313 = vmatpush1.bf16.msra.mxu0 %v22289_v12  ;;  %16505 = vmatpush1.bf16.msra.mxu1 %v22290_v51 }
 0x977   :  { %16315 = vmatprep.subr.bf16.mxu0 %v22291_v23  ;;  %16507 = vmatprep.subr.bf16.mxu1 %v22292_v49  ;;  %v8919_v49 = vld [vmem:[#allocation4 + $0xa8] sm:$0xff] }
 0x97a   :  { %16317 = vmatpush1.bf16.msra.mxu0 %v22293_v33  ;;  %16509 = vmatpush1.bf16.msra.mxu1 %v22294_v6  ;;  %v22296_v6 = vld [vmem:[#allocation70_spill] sm:$0xff]  ;;  %v8918_v33 = vld [vmem:[#allocation4 + $0xa0] sm:$0xff] }
 0x97b   :  { %16319 = vmatprep.subr.bf16.mxu0 %v21787_v7  ;;  %16511 = vmatprep.subr.bf16.mxu1 %v21790_v54 }
 0x97d   :  { %9667 = vmatmul.mubr.f32.vlgmr.msra.gmra.mrb[10].mxu0 %v20292_v18  ;;  %10522 = vmatmul.mubr.f32.vlgmr.msra.gmra.mrb[10].mxu1 %v20292_v18 }
 0x97e   :  { %16321 = vmatpush1.bf16.msra.mxu0 %v21789_v28  ;;  %16513 = vmatpush1.bf16.msra.mxu1 %v21792_v48 }
 0x97f   :  { %16323 = vmatprep.subr.bf16.mxu0 %v21791_v3  ;;  %16515 = vmatprep.subr.bf16.mxu1 %v21794_v20 }
 0x980   :  { %9769 = vmatprep.mubr.f32.mxu0 %v21539_v1  ;;  %10624 = vmatprep.mubr.f32.mxu1 %v21539_v1 }
 0x982   :  { %16325 = vmatpush1.bf16.msra.mxu0 %v21793_v38  ;;  %16517 = vmatpush1.bf16.msra.mxu1 %v21796_v29 }
 0x983   :  { %16327 = vmatprep.subr.bf16.mxu0 %v21795_v60  ;;  %16519 = vmatprep.subr.bf16.mxu1 %v21798_v50 }
 0x986   :  { %16329 = vmatpush1.bf16.msra.mxu0 %v21797_v24  ;;  %16521 = vmatpush1.bf16.msra.mxu1 %v21800_v55 }
 0x987   :  { %16331 = vmatprep.subr.bf16.mxu0 %v21799_v17  ;;  %16523 = vmatprep.subr.bf16.mxu1 %v21802_v22 }
 0x98a   :  { %16333 = vmatpush1.bf16.msra.mxu0 %v21801_v40  ;;  %16525 = vmatpush1.bf16.msra.mxu1 %v21804_v43 }
 0x98b   :  { %16335 = vmatprep.subr.bf16.mxu0 %v21803_v56  ;;  %16527 = vmatprep.subr.bf16.mxu1 %v21806_v35 }
 0x98e   :  { %16337 = vmatpush1.bf16.msra.mxu0 %v21805_v30  ;;  %16529 = vmatpush1.bf16.msra.mxu1 %v21808_v59 }
 0x98f   :  { %16339 = vmatprep.subr.bf16.mxu0 %v21807_v41  ;;  %16531 = vmatprep.subr.bf16.mxu1 %v21810_v10 }
 0x992   :  { %16341 = vmatpush1.bf16.msra.mxu0 %v21809_v27  ;;  %16533 = vmatpush1.bf16.msra.mxu1 %v21812_v42 }
 0x993   :  { %16343 = vmatprep.subr.bf16.mxu0 %v21811_v36  ;;  %16535 = vmatprep.subr.bf16.mxu1 %v22256_v62 }
 0x996   :  { %16345 = vmatpush1.bf16.msra.mxu0 %v22257_v8  ;;  %16537 = vmatpush1.bf16.msra.mxu1 %v22258_v21 }
 0x997   :  { %16347 = vmatprep.subr.bf16.mxu0 %v22259_v46  ;;  %16539 = vmatprep.subr.bf16.mxu1 %v22260_v2 }
 0x99a   :  { %16349 = vmatpush1.bf16.msra.mxu0 %v22261_v47  ;;  %16541 = vmatpush1.bf16.msra.mxu1 %v22262_v61 }
 0x99b   :  { %16543 = vmatprep.subr.bf16.mxu0 %v21787_v7  ;;  %16735 = vmatprep.subr.bf16.mxu1 %v21790_v54 }
 0x99d   :  { %9771 = vmatmul.mubr.f32.vlgmr.msra.gmra.mrb[10].mxu0 %v20292_v18  ;;  %10626 = vmatmul.mubr.f32.vlgmr.msra.gmra.mrb[10].mxu1 %v20292_v18  ;;  %v22295_v18 = vld [vmem:[#allocation69_spill] sm:$0xff] }
 0x99e   :  { %16545 = vmatpush1.bf16.msra.mxu0 %v21789_v28  ;;  %16737 = vmatpush1.bf16.msra.mxu1 %v21792_v48 }
 0x99f   :  { %16547 = vmatprep.subr.bf16.mxu0 %v21791_v3  ;;  %16739 = vmatprep.subr.bf16.mxu1 %v21794_v20 }
 0x9a0   :  { %10776 = vmatprep.mubr.f32.mxu0 %v21539_v1  ;;  %11631 = vmatprep.mubr.f32.mxu1 %v21539_v1 }
 0x9a2   :  { %16549 = vmatpush1.bf16.msra.mxu0 %v21793_v38  ;;  %16741 = vmatpush1.bf16.msra.mxu1 %v21796_v29 }
 0x9a3   :  { %16551 = vmatprep.subr.bf16.mxu0 %v21795_v60  ;;  %16743 = vmatprep.subr.bf16.mxu1 %v21798_v50 }
 0x9a6   :  { %16553 = vmatpush1.bf16.msra.mxu0 %v21797_v24  ;;  %16745 = vmatpush1.bf16.msra.mxu1 %v21800_v55 }
 0x9a7   :  { %16555 = vmatprep.subr.bf16.mxu0 %v21799_v17  ;;  %16747 = vmatprep.subr.bf16.mxu1 %v21802_v22 }
 0x9aa   :  { %16557 = vmatpush1.bf16.msra.mxu0 %v21801_v40  ;;  %16749 = vmatpush1.bf16.msra.mxu1 %v21804_v43 }
 0x9ab   :  { %16559 = vmatprep.subr.bf16.mxu0 %v21803_v56  ;;  %16751 = vmatprep.subr.bf16.mxu1 %v21806_v35 }
 0x9ae   :  { %16561 = vmatpush1.bf16.msra.mxu0 %v21805_v30  ;;  %16753 = vmatpush1.bf16.msra.mxu1 %v21808_v59 }
 0x9af   :  { %16563 = vmatprep.subr.bf16.mxu0 %v21807_v41  ;;  %16755 = vmatprep.subr.bf16.mxu1 %v21810_v10 }
 0x9b2   :  { %16565 = vmatpush1.bf16.msra.mxu0 %v21809_v27  ;;  %16757 = vmatpush1.bf16.msra.mxu1 %v21812_v42 }
 0x9b3   :  { %16567 = vmatprep.subr.bf16.mxu0 %v21811_v36  ;;  %16759 = vmatprep.subr.bf16.mxu1 %v22256_v62 }
 0x9b6   :  { %16569 = vmatpush1.bf16.msra.mxu0 %v22257_v8  ;;  %16761 = vmatpush1.bf16.msra.mxu1 %v22258_v21 }
 0x9b7   :  { %16571 = vmatprep.subr.bf16.mxu0 %v22259_v46  ;;  %16763 = vmatprep.subr.bf16.mxu1 %v22260_v2  ;;  %v8920_v2 = vld [vmem:[#allocation4 + $0xb0] sm:$0xff]  ;;  %v8921_v46 = vld [vmem:[#allocation4 + $0xb8] sm:$0xff] }
 0x9ba   :  { %16573 = vmatpush1.bf16.msra.mxu0 %v22261_v47  ;;  %16765 = vmatpush1.bf16.msra.mxu1 %v22262_v61 }
 0x9bb   :  { %16575 = vmatprep.subr.bf16.mxu0 %v22295_v18  ;;  %16767 = vmatprep.subr.bf16.mxu1 %v22296_v6 }
 0xa70   :  { %v9772_v23 = vpop.f32.mrb[10].mxu0  ;;  %v10627_v51 = vpop.f32.mrb[10].mxu1 }
 0xa71   :  { %v10632_v12 = vadd.f32 %v9772_v23, %v8918_v33  ;;  %v9774_v4 = vpop.f32.mrb[11].mxu0  ;;  %v10629_v31 = vpop.f32.mrb[11].mxu1  ;;  %v10634_v47 = vadd.f32 %v10627_v51, %v8920_v2 }
 0xa72   :  { %v10633_v15 = vadd.f32 %v9774_v4, %v8919_v49  ;;  %v10635_v18 = vadd.f32 %v10629_v31, %v8921_v46  ;;  %v10663_v2 = vpop.permute.xlu1 %10662 }
 0xa73   :  { %v14227_v57 = vmul.f32 -1.442695, %v10632_v12  ;;  %v14229_v61 = vmul.f32 -1.442695, %v10634_v47 }
 0xa74   :  { %v14228_v19 = vmul.f32 -1.442695, %v10633_v15 }
 0xa75   :  { %17561 = vpow2.f32 %v14227_v57 }
 0xa76   :  { %17563 = vpow2.f32 %v14228_v19 }
 0xa77   :  { %17565 = vpow2.f32 %v14229_v61 }
 0xa7f   :  { %v17562_v21 = vpop.eup %17561 }
 0xa80   :  { %v10639_v8 = vadd.f32 1.0, %v17562_v21  ;;  %v17564_v6 = vpop.eup %17563 }
 0xa81   :  { %v10645_v62 = vadd.f32 1.0, %v17564_v6  ;;  %v17566_v23 = vpop.eup %17565 }
 0xa82   :  { %17567 = vrcp.f32 %v10639_v8  ;;  %v10651_v15 = vadd.f32 1.0, %v17566_v23  ;;  %v22298_v23 = vld [vmem:[#allocation43_spill] sm:$0xff] }
 0xa83   :  { %17569 = vtanh.f32 %v10635_v18  ;;  %v22297_v18 = vld [vmem:[#allocation42_spill] sm:$0xff] }
 0xa84   :  { %17571 = vrcp.f32 %v10645_v62 }
 0xa85   :  { %17573 = vrcp.f32 %v10651_v15  ;;  %v22303_v15 = vld [vmem:[#allocation99_spill] sm:$0xff] }
 0xa8c   :  { %v17568_v33 = vpop.eup %17567 }
 0xa8d   :  { %v17570_v4 = vpop.eup %17569  ;;  %v10655_v12 = vmul.f32 %v17568_v33, %v20289_v5  ;;  %v22299_v33 = vld [vmem:[#allocation48_spill] sm:$0xff] }
 0xa8e   :  { %v17572_v49 = vpop.eup %17571 }
 0xa8f   :  { %v10656_v57 = vmul.f32 %v17572_v49, %v17570_v4  ;;  %v17574_v61 = vpop.eup %17573  ;;  %v22300_v4 = vld [vmem:[#allocation96_spill] sm:$0xff]  ;;  %v22302_v49 = vld [vmem:[#allocation51_spill] sm:$0xff] }
 0xa91   :  { %v10657_v51 = vadd.f32 %v10656_v57, %v10655_v12  ;;  %v22301_v12 = vld [vmem:[#allocation97_spill] sm:$0xff]  ;;  %v22304_v57 = vld [vmem:[#allocation55_spill] sm:$0xff] }
 0xa93   :  { %17575 = vtanh.f32 %v10657_v51  ;;  %v20517_v47 = vmul.f32 %v10663_v2, %v10657_v51  ;;  %v22305_v51 = vld [vmem:[#allocation100_spill] sm:$0xff] }
 0xa95   :  { %10669 = vst [vmem:[#allocation9 + $0x58] sm:$0xff] %v20517_v47 }
 0xa9d   :  { %v17576_v6 = vpop.eup %17575 }
 0xa9e   :  { %v10659_v31 = vmul.f32 %v17576_v6, %v17574_v61  ;;  %v22307_v61 = vld [vmem:[#allocation104_spill] sm:$0xff]  ;;  %v22308_v6 = vld [vmem:[#allocation65_spill] sm:$0xff] }
 0xaa0   :  { %v10665_v8 = vmul.f32 %v10663_v2, %v10659_v31  ;;  %v22306_v2 = vld [vmem:[#allocation101_spill] sm:$0xff]  ;;  %v22309_v31 = vld [vmem:[#allocation102_spill] sm:$0xff] }
 0xaa2   :  { %10668 = vst [vmem:[#allocation9 + $0x50] sm:$0xff] %v10665_v8  ;;  %v20520_v46 = vand.u32 4294901760, %v10665_v8 }
 0xaa4   :  { %v20523_v5 = vsub.f32 %v10665_v8, %v20520_v46  ;;  %v22310_v8 = vld [vmem:[#allocation63_spill] sm:$0xff] }
 0xaa6   :  { %v20526_v21 = vand.u32 4294901760, %v20523_v5 }
 0xaa8   :  { %v10780_v62 = vsub.f32 %v20523_v5, %v20526_v21 }
 0xaaa   :  { %v10781_v19 = vand.u32 4294901760, %v10780_v62  ;;  %v22311_v62 = vld [vmem:[#allocation111_spill] sm:$0xff] }
 0xaac   :  { %10782 = vmatmul.mubr.f32.vlgmr.msra.gmra.mrb[12].mxu0 %v10781_v19  ;;  %11637 = vmatmul.mubr.f32.vlgmr.msra.gmra.mrb[12].mxu1 %v10781_v19  ;;  %v22312_v19 = vld [vmem:[#allocation113_spill] sm:$0xff] }
 0xaad   :  { %16577 = vmatpush1.bf16.msra.mxu0 %v21873_v26  ;;  %16769 = vmatpush1.bf16.msra.mxu1 %v21874_v34 }
 0xaae   :  { %16579 = vmatprep.subr.bf16.mxu0 %v21875_v52  ;;  %16771 = vmatprep.subr.bf16.mxu1 %v21876_v44 }
 0xaaf   :  { %11012 = vmatprep.mubr.f32.mxu0 %v21539_v1  ;;  %11867 = vmatprep.mubr.f32.mxu1 %v21539_v1 }
 0xab1   :  { %16581 = vmatpush1.bf16.msra.mxu0 %v21957_v9  ;;  %16773 = vmatpush1.bf16.msra.mxu1 %v21958_v37 }
 0xab2   :  { %16583 = vmatprep.subr.bf16.mxu0 %v21959_v53  ;;  %16775 = vmatprep.subr.bf16.mxu1 %v21960_v63 }
 0xab5   :  { %16585 = vmatpush1.bf16.msra.mxu0 %v21961_v16  ;;  %16777 = vmatpush1.bf16.msra.mxu1 %v22042_v11 }
 0xab6   :  { %16587 = vmatprep.subr.bf16.mxu0 %v21963_v32  ;;  %16779 = vmatprep.subr.bf16.mxu1 %v21964_v14 }
 0xab9   :  { %16589 = vmatpush1.bf16.msra.mxu0 %v22043_v25  ;;  %16781 = vmatpush1.bf16.msra.mxu1 %v22044_v45 }
 0xaba   :  { %16591 = vmatprep.subr.bf16.mxu0 %v22045_v39  ;;  %16783 = vmatprep.subr.bf16.mxu1 %v22046_v58 }
 0xabd   :  { %16593 = vmatpush1.bf16.msra.mxu0 %v22047_v13  ;;  %16785 = vmatpush1.bf16.msra.mxu1 %v22048_v0 }
 0xabe   :  { %16595 = vmatprep.subr.bf16.mxu0 %v22297_v18  ;;  %16787 = vmatprep.subr.bf16.mxu1 %v22298_v23  ;;  %v22363_v23 = vld [vmem:[#allocation86_spill] sm:$0xff]  ;;  %v22364_v18 = vld [vmem:[#allocation88_spill] sm:$0xff] }
 0xac1   :  { %16597 = vmatpush1.bf16.msra.mxu0 %v22299_v33  ;;  %16789 = vmatpush1.bf16.msra.mxu1 %v22300_v4  ;;  %v22354_v4 = vld [vmem:[#allocation16_spill] sm:$0xff] }
 0xac2   :  { %16599 = vmatprep.subr.bf16.mxu0 %v22301_v12  ;;  %16791 = vmatprep.subr.bf16.mxu1 %v22302_v49  ;;  %v22325_v49 = vld [vmem:[#allocation118_spill] sm:$0xff]  ;;  %v22353_v12 = vld [vmem:[#allocation19_spill] sm:$0xff]  ;;  %v22357_v33 = vld [vmem:[#allocation120_spill] sm:$0xff] }
 0xac5   :  { %16601 = vmatpush1.bf16.msra.mxu0 %v22303_v15  ;;  %16793 = vmatpush1.bf16.msra.mxu1 %v22304_v57  ;;  %v22313_v57 = vld [vmem:[#allocation103_spill] sm:$0xff] }
 0xac6   :  { %16603 = vmatprep.subr.bf16.mxu0 %v22305_v51  ;;  %16795 = vmatprep.subr.bf16.mxu1 %v22306_v2  ;;  %v22314_v51 = vld [vmem:[#allocation105_spill] sm:$0xff]  ;;  %v22319_v2 = vld [vmem:[#allocation110_spill] sm:$0xff]  ;;  %v22324_v15 = vld [vmem:[#allocation127_spill] sm:$0xff] }
 0xac9   :  { %16605 = vmatpush1.bf16.msra.mxu0 %v22307_v61  ;;  %16797 = vmatpush1.bf16.msra.mxu1 %v22308_v6  ;;  %v22315_v6 = vld [vmem:[#allocation106_spill] sm:$0xff]  ;;  %v22318_v61 = vld [vmem:[#allocation109_spill] sm:$0xff] }
 0xaca   :  { %16607 = vmatprep.subr.bf16.mxu0 %v22309_v31  ;;  %16799 = vmatprep.subr.bf16.mxu1 %v22310_v8  ;;  %v22316_v31 = vld [vmem:[#allocation107_spill] sm:$0xff]  ;;  %v22317_v8 = vld [vmem:[#allocation108_spill] sm:$0xff] }
 0xacc   :  { %11014 = vmatmul.mubr.f32.vlgmr.msra.gmra.mrb[12].mxu0 %v20520_v46  ;;  %11869 = vmatmul.mubr.f32.vlgmr.msra.gmra.mrb[12].mxu1 %v20520_v46 }
 0xacd   :  { %16609 = vmatpush1.bf16.msra.mxu0 %v22311_v62  ;;  %16801 = vmatpush1.bf16.msra.mxu1 %v22312_v19  ;;  %v22320_v62 = vld [vmem:[#allocation112_spill] sm:$0xff]  ;;  %v22321_v19 = vld [vmem:[#allocation115_spill] sm:$0xff] }
 0xace   :  { %16611 = vmatprep.subr.bf16.mxu0 %v22313_v57  ;;  %16803 = vmatprep.subr.bf16.mxu1 %v22314_v51  ;;  %v22322_v57 = vld [vmem:[#allocation116_spill] sm:$0xff]  ;;  %v22323_v51 = vld [vmem:[#allocation117_spill] sm:$0xff] }
 0xacf   :  { %11148 = vmatprep.mubr.f32.mxu0 %v21539_v1  ;;  %12003 = vmatprep.mubr.f32.mxu1 %v21539_v1 }
 0xad1   :  { %16613 = vmatpush1.bf16.msra.mxu0 %v22315_v6  ;;  %16805 = vmatpush1.bf16.msra.mxu1 %v22316_v31  ;;  %v22326_v6 = vld [vmem:[#allocation129_spill] sm:$0xff]  ;;  %v22327_v31 = vld [vmem:[#allocation128_spill] sm:$0xff] }
 0xad2   :  { %16615 = vmatprep.subr.bf16.mxu0 %v22317_v8  ;;  %16807 = vmatprep.subr.bf16.mxu1 %v22318_v61  ;;  %v22328_v8 = vld [vmem:[#allocation131_spill] sm:$0xff]  ;;  %v22329_v61 = vld [vmem:[#allocation130_spill] sm:$0xff] }
 0xad5   :  { %16617 = vmatpush1.bf16.msra.mxu0 %v22319_v2  ;;  %16809 = vmatpush1.bf16.msra.mxu1 %v22320_v62  ;;  %v22330_v2 = vld [vmem:[#allocation133_spill] sm:$0xff]  ;;  %v22331_v62 = vld [vmem:[#allocation132_spill] sm:$0xff] }
 0xad6   :  { %16619 = vmatprep.subr.bf16.mxu0 %v22321_v19  ;;  %16811 = vmatprep.subr.bf16.mxu1 %v22322_v57  ;;  %v22332_v19 = vld [vmem:[#allocation135_spill] sm:$0xff]  ;;  %v22333_v57 = vld [vmem:[#allocation134_spill] sm:$0xff] }
 0xad9   :  { %16621 = vmatpush1.bf16.msra.mxu0 %v22323_v51  ;;  %16813 = vmatpush1.bf16.msra.mxu1 %v22324_v15  ;;  %v22334_v51 = vld [vmem:[#allocation137_spill] sm:$0xff]  ;;  %v22335_v15 = vld [vmem:[#allocation136_spill] sm:$0xff] }
 0xada   :  { %16623 = vmatprep.subr.bf16.mxu0 %v22325_v49  ;;  %16815 = vmatprep.subr.bf16.mxu1 %v22326_v6  ;;  %v22336_v49 = vld [vmem:[#allocation139_spill] sm:$0xff]  ;;  %v22337_v6 = vld [vmem:[#allocation138_spill] sm:$0xff] }
 0xadd   :  { %16625 = vmatpush1.bf16.msra.mxu0 %v22327_v31  ;;  %16817 = vmatpush1.bf16.msra.mxu1 %v22328_v8  ;;  %v22338_v31 = vld [vmem:[#allocation141_spill] sm:$0xff]  ;;  %v22339_v8 = vld [vmem:[#allocation140_spill] sm:$0xff] }
 0xade   :  { %16627 = vmatprep.subr.bf16.mxu0 %v22329_v61  ;;  %16819 = vmatprep.subr.bf16.mxu1 %v22330_v2  ;;  %v22340_v61 = vld [vmem:[#allocation114_spill] sm:$0xff] }
 0xadf   :  { %v22352_v2 = vld [vmem:[#allocation14_spill] sm:$0xff] }
 0xae1   :  { %16629 = vmatpush1.bf16.msra.mxu0 %v22331_v62  ;;  %16821 = vmatpush1.bf16.msra.mxu1 %v22332_v19  ;;  %v22350_v19 = vld [vmem:[#allocation67_spill] sm:$0xff]  ;;  %v22351_v62 = vld [vmem:[#allocation17_spill] sm:$0xff] }
 0xae2   :  { %16631 = vmatprep.subr.bf16.mxu0 %v22333_v57  ;;  %16823 = vmatprep.subr.bf16.mxu1 %v22334_v51  ;;  %v22348_v51 = vld [vmem:[#allocation13_spill] sm:$0xff]  ;;  %v22349_v57 = vld [vmem:[#allocation15_spill] sm:$0xff] }
 0xae5   :  { %16633 = vmatpush1.bf16.msra.mxu0 %v22335_v15  ;;  %16825 = vmatpush1.bf16.msra.mxu1 %v22336_v49  ;;  %v22346_v49 = vld [vmem:[#allocation62_spill] sm:$0xff]  ;;  %v22347_v15 = vld [vmem:[#allocation64_spill] sm:$0xff] }
 0xae6   :  { %16635 = vmatprep.subr.bf16.mxu0 %v22337_v6  ;;  %16827 = vmatprep.subr.bf16.mxu1 %v22338_v31  ;;  %v22344_v31 = vld [vmem:[#allocation60_spill] sm:$0xff]  ;;  %v22345_v6 = vld [vmem:[#allocation61_spill] sm:$0xff] }
 0xae9   :  { %16637 = vmatpush1.bf16.msra.mxu0 %v22339_v8  ;;  %16829 = vmatpush1.bf16.msra.mxu1 %v22340_v61  ;;  %v22342_v61 = vld [vmem:[#allocation58_spill] sm:$0xff]  ;;  %v22343_v8 = vld [vmem:[#allocation59_spill] sm:$0xff] }
 0xaea   :  { %16639 = vmatprep.subr.bf16.mxu0 %v21787_v7  ;;  %16831 = vmatprep.subr.bf16.mxu1 %v21790_v54 }
 0xaec   :  { %11151 = vmatmul.mubr.f32.vlgmr.msra.gmra.mrb[12].mxu0 %v20523_v5  ;;  %12006 = vmatmul.mubr.f32.vlgmr.msra.gmra.mrb[12].mxu1 %v20523_v5  ;;  %v22341_v5 = vld [vmem:[#allocation57_spill] sm:$0xff] }
 0xaed   :  { %16641 = vmatpush1.bf16.msra.mxu0 %v21789_v28  ;;  %16833 = vmatpush1.bf16.msra.mxu1 %v21792_v48 }
 0xaee   :  { %16643 = vmatprep.subr.bf16.mxu0 %v21791_v3  ;;  %16835 = vmatprep.subr.bf16.mxu1 %v21794_v20 }
 0xaef   :  { %11253 = vmatprep.mubr.f32.mxu0 %v21539_v1  ;;  %12108 = vmatprep.mubr.f32.mxu1 %v21539_v1 }
 0xaf1   :  { %16645 = vmatpush1.bf16.msra.mxu0 %v21793_v38  ;;  %16837 = vmatpush1.bf16.msra.mxu1 %v21796_v29 }
 0xaf2   :  { %16647 = vmatprep.subr.bf16.mxu0 %v21795_v60  ;;  %16839 = vmatprep.subr.bf16.mxu1 %v21798_v50 }
 0xaf5   :  { %16649 = vmatpush1.bf16.msra.mxu0 %v21797_v24  ;;  %16841 = vmatpush1.bf16.msra.mxu1 %v21800_v55 }
 0xaf6   :  { %16651 = vmatprep.subr.bf16.mxu0 %v21799_v17  ;;  %16843 = vmatprep.subr.bf16.mxu1 %v21802_v22 }
 0xaf9   :  { %16653 = vmatpush1.bf16.msra.mxu0 %v21801_v40  ;;  %16845 = vmatpush1.bf16.msra.mxu1 %v21804_v43 }
 0xafa   :  { %16655 = vmatprep.subr.bf16.mxu0 %v21803_v56  ;;  %16847 = vmatprep.subr.bf16.mxu1 %v21806_v35 }
 0xafd   :  { %16657 = vmatpush1.bf16.msra.mxu0 %v21805_v30  ;;  %16849 = vmatpush1.bf16.msra.mxu1 %v21808_v59 }
 0xafe   :  { %16659 = vmatprep.subr.bf16.mxu0 %v21807_v41  ;;  %16851 = vmatprep.subr.bf16.mxu1 %v21810_v10 }
 0xb01   :  { %16661 = vmatpush1.bf16.msra.mxu0 %v21809_v27  ;;  %16853 = vmatpush1.bf16.msra.mxu1 %v21812_v42 }
 0xb02   :  { %16663 = vmatprep.subr.bf16.mxu0 %v21811_v36  ;;  %16855 = vmatprep.subr.bf16.mxu1 %v22341_v5 }
 0xb05   :  { %16665 = vmatpush1.bf16.msra.mxu0 %v22342_v61  ;;  %16857 = vmatpush1.bf16.msra.mxu1 %v22343_v8 }
 0xb06   :  { %16667 = vmatprep.subr.bf16.mxu0 %v22344_v31  ;;  %16859 = vmatprep.subr.bf16.mxu1 %v22345_v6 }
 0xb09   :  { %16669 = vmatpush1.bf16.msra.mxu0 %v22346_v49  ;;  %16861 = vmatpush1.bf16.msra.mxu1 %v22347_v15 }
 0xb0a   :  { %16671 = vmatprep.subr.bf16.mxu0 %v22348_v51  ;;  %16863 = vmatprep.subr.bf16.mxu1 %v22349_v57  ;;  %v22355_v51 = vld [vmem:[#allocation18_spill] sm:$0xff]  ;;  %v22356_v57 = vld [vmem:[#allocation119_spill] sm:$0xff] }
 0xb0c   :  { %11257 = vmatmul.mubr.f32.vlgmr.msra.gmra.mrb[12].mxu0 %v20526_v21  ;;  %12112 = vmatmul.mubr.f32.vlgmr.msra.gmra.mrb[12].mxu1 %v20526_v21  ;;  %v22358_v21 = vld [vmem:[#allocation121_spill] sm:$0xff] }
 0xb0d   :  { %16673 = vmatpush1.bf16.msra.mxu0 %v22350_v19  ;;  %16865 = vmatpush1.bf16.msra.mxu1 %v22351_v62  ;;  %v22359_v19 = vld [vmem:[#allocation122_spill] sm:$0xff]  ;;  %v22360_v62 = vld [vmem:[#allocation123_spill] sm:$0xff] }
 0xb0e   :  { %16675 = vmatprep.subr.bf16.mxu0 %v22352_v2  ;;  %16867 = vmatprep.subr.bf16.mxu1 %v22353_v12  ;;  %v22361_v2 = vld [vmem:[#allocation124_spill] sm:$0xff]  ;;  %v22362_v12 = vld [vmem:[#allocation125_spill] sm:$0xff] }
 0xb0f   :  { %11423 = vmatprep.mubr.f32.mxu0 %v21539_v1  ;;  %12278 = vmatprep.mubr.f32.mxu1 %v21539_v1 }
 0xb11   :  { %16677 = vmatpush1.bf16.msra.mxu0 %v22354_v4  ;;  %16869 = vmatpush1.bf16.msra.mxu1 %v22355_v51  ;;  %v22365_v4 = vld [vmem:[#allocation25_spill] sm:$0xff]  ;;  %v22366_v51 = vld [vmem:[#allocation26_spill] sm:$0xff] }
 0xb12   :  { %16679 = vmatprep.subr.bf16.mxu0 %v22356_v57  ;;  %16871 = vmatprep.subr.bf16.mxu1 %v22357_v33  ;;  %v22367_v57 = vld [vmem:[#allocation28_spill] sm:$0xff]  ;;  %v22368_v33 = vld [vmem:[#allocation29_spill] sm:$0xff] }
 0xb15   :  { %16681 = vmatpush1.bf16.msra.mxu0 %v22358_v21  ;;  %16873 = vmatpush1.bf16.msra.mxu1 %v22359_v19  ;;  %v22369_v21 = vld [vmem:[#allocation30_spill] sm:$0xff]  ;;  %v22370_v19 = vld [vmem:[#allocation33_spill] sm:$0xff] }
 0xb16   :  { %16683 = vmatprep.subr.bf16.mxu0 %v22360_v62  ;;  %16875 = vmatprep.subr.bf16.mxu1 %v22361_v2  ;;  %v22371_v62 = vld [vmem:[#allocation34_spill] sm:$0xff]  ;;  %v22372_v2 = vld [vmem:[#allocation35_spill] sm:$0xff] }
 0xb19   :  { %16685 = vmatpush1.bf16.msra.mxu0 %v22362_v12  ;;  %16877 = vmatpush1.bf16.msra.mxu1 %v22363_v23  ;;  %v22373_v12 = vld [vmem:[#allocation37_spill] sm:$0xff]  ;;  %v22374_v23 = vld [vmem:[#allocation39_spill] sm:$0xff] }
 0xb1a   :  { %16687 = vmatprep.subr.bf16.mxu0 %v22364_v18  ;;  %16879 = vmatprep.subr.bf16.mxu1 %v22365_v4  ;;  %v22375_v18 = vld [vmem:[#allocation46_spill] sm:$0xff]  ;;  %v22376_v4 = vld [vmem:[#allocation95_spill] sm:$0xff] }
 0xb1d   :  { %16689 = vmatpush1.bf16.msra.mxu0 %v22366_v51  ;;  %16881 = vmatpush1.bf16.msra.mxu1 %v22367_v57  ;;  %v22377_v51 = vld [vmem:[#allocation49_spill] sm:$0xff]  ;;  %v22378_v57 = vld [vmem:[#allocation98_spill] sm:$0xff] }
 0xb1e   :  { %16691 = vmatprep.subr.bf16.mxu0 %v22368_v33  ;;  %16883 = vmatprep.subr.bf16.mxu1 %v22369_v21  ;;  %v22379_v33 = vld [vmem:[#allocation126_spill] sm:$0xff] }
 0xb21   :  { %16693 = vmatpush1.bf16.msra.mxu0 %v22370_v19  ;;  %16885 = vmatpush1.bf16.msra.mxu1 %v22371_v62 }
 0xb22   :  { %16695 = vmatprep.subr.bf16.mxu0 %v22372_v2  ;;  %16887 = vmatprep.subr.bf16.mxu1 %v22373_v12 }
 0xb25   :  { %16697 = vmatpush1.bf16.msra.mxu0 %v22374_v23  ;;  %16889 = vmatpush1.bf16.msra.mxu1 %v22375_v18 }
 0xb26   :  { %16699 = vmatprep.subr.bf16.mxu0 %v22376_v4  ;;  %16891 = vmatprep.subr.bf16.mxu1 %v22377_v51  ;;  %v10677_v51 = vld [vmem:[#allocation4 + $0xc8] sm:$0xff] }
 0xb29   :  { %16701 = vmatpush1.bf16.msra.mxu0 %v22378_v57  ;;  %16893 = vmatpush1.bf16.msra.mxu1 %v22379_v33  ;;  %v22381_v33 = vld [vmem:[#allocation70_spill] sm:$0xff]  ;;  %v10676_v57 = vld [vmem:[#allocation4 + $0xc0] sm:$0xff] }
 0xb2a   :  { %16703 = vmatprep.subr.bf16.mxu0 %v21787_v7  ;;  %16895 = vmatprep.subr.bf16.mxu1 %v21790_v54 }
 0xb2c   :  { %11425 = vmatmul.mubr.f32.vlgmr.msra.gmra.mrb[12].mxu0 %v20520_v46  ;;  %12280 = vmatmul.mubr.f32.vlgmr.msra.gmra.mrb[12].mxu1 %v20520_v46 }
 0xb2d   :  { %16705 = vmatpush1.bf16.msra.mxu0 %v21789_v28  ;;  %16897 = vmatpush1.bf16.msra.mxu1 %v21792_v48 }
 0xb2e   :  { %16707 = vmatprep.subr.bf16.mxu0 %v21791_v3  ;;  %16899 = vmatprep.subr.bf16.mxu1 %v21794_v20 }
 0xb2f   :  { %11527 = vmatprep.mubr.f32.mxu0 %v21539_v1  ;;  %12382 = vmatprep.mubr.f32.mxu1 %v21539_v1 }
 0xb31   :  { %16709 = vmatpush1.bf16.msra.mxu0 %v21793_v38  ;;  %16901 = vmatpush1.bf16.msra.mxu1 %v21796_v29 }
 0xb32   :  { %16711 = vmatprep.subr.bf16.mxu0 %v21795_v60  ;;  %16903 = vmatprep.subr.bf16.mxu1 %v21798_v50 }
 0xb35   :  { %16713 = vmatpush1.bf16.msra.mxu0 %v21797_v24  ;;  %16905 = vmatpush1.bf16.msra.mxu1 %v21800_v55 }
 0xb36   :  { %16715 = vmatprep.subr.bf16.mxu0 %v21799_v17  ;;  %16907 = vmatprep.subr.bf16.mxu1 %v21802_v22 }
 0xb39   :  { %16717 = vmatpush1.bf16.msra.mxu0 %v21801_v40  ;;  %16909 = vmatpush1.bf16.msra.mxu1 %v21804_v43 }
 0xb3a   :  { %16719 = vmatprep.subr.bf16.mxu0 %v21803_v56  ;;  %16911 = vmatprep.subr.bf16.mxu1 %v21806_v35 }
 0xb3d   :  { %16721 = vmatpush1.bf16.msra.mxu0 %v21805_v30  ;;  %16913 = vmatpush1.bf16.msra.mxu1 %v21808_v59 }
 0xb3e   :  { %16723 = vmatprep.subr.bf16.mxu0 %v21807_v41  ;;  %16915 = vmatprep.subr.bf16.mxu1 %v21810_v10 }
 0xb41   :  { %16725 = vmatpush1.bf16.msra.mxu0 %v21809_v27  ;;  %16917 = vmatpush1.bf16.msra.mxu1 %v21812_v42 }
 0xb42   :  { %16727 = vmatprep.subr.bf16.mxu0 %v21811_v36  ;;  %16919 = vmatprep.subr.bf16.mxu1 %v22341_v5 }
 0xb45   :  { %16729 = vmatpush1.bf16.msra.mxu0 %v22342_v61  ;;  %16921 = vmatpush1.bf16.msra.mxu1 %v22343_v8 }
 0xb46   :  { %16731 = vmatprep.subr.bf16.mxu0 %v22344_v31  ;;  %16923 = vmatprep.subr.bf16.mxu1 %v22345_v6 }
 0xb49   :  { %16733 = vmatpush1.bf16.msra.mxu0 %v22346_v49  ;;  %16925 = vmatpush1.bf16.msra.mxu1 %v22347_v15 }
 0xb4a   :  { %16927 = vmatprep.subr.bf16.mxu0 %v21787_v7  ;;  %17119 = vmatprep.subr.bf16.mxu1 %v21790_v54 }
 0xb4c   :  { %11529 = vmatmul.mubr.f32.vlgmr.msra.gmra.mrb[12].mxu0 %v20520_v46  ;;  %12384 = vmatmul.mubr.f32.vlgmr.msra.gmra.mrb[12].mxu1 %v20520_v46  ;;  %v22380_v46 = vld [vmem:[#allocation69_spill] sm:$0xff] }
 0xb4d   :  { %16929 = vmatpush1.bf16.msra.mxu0 %v21789_v28  ;;  %17121 = vmatpush1.bf16.msra.mxu1 %v21792_v48 }
 0xb4e   :  { %16931 = vmatprep.subr.bf16.mxu0 %v21791_v3  ;;  %17123 = vmatprep.subr.bf16.mxu1 %v21794_v20 }
 0xb4f   :  { %12534 = vmatprep.mubr.f32.mxu0 %v21539_v1  ;;  %13389 = vmatprep.mubr.f32.mxu1 %v21539_v1 }
 0xb51   :  { %16933 = vmatpush1.bf16.msra.mxu0 %v21793_v38  ;;  %17125 = vmatpush1.bf16.msra.mxu1 %v21796_v29 }
 0xb52   :  { %16935 = vmatprep.subr.bf16.mxu0 %v21795_v60  ;;  %17127 = vmatprep.subr.bf16.mxu1 %v21798_v50 }
 0xb55   :  { %16937 = vmatpush1.bf16.msra.mxu0 %v21797_v24  ;;  %17129 = vmatpush1.bf16.msra.mxu1 %v21800_v55 }
 0xb56   :  { %16939 = vmatprep.subr.bf16.mxu0 %v21799_v17  ;;  %17131 = vmatprep.subr.bf16.mxu1 %v21802_v22 }
 0xb59   :  { %16941 = vmatpush1.bf16.msra.mxu0 %v21801_v40  ;;  %17133 = vmatpush1.bf16.msra.mxu1 %v21804_v43 }
 0xb5a   :  { %16943 = vmatprep.subr.bf16.mxu0 %v21803_v56  ;;  %17135 = vmatprep.subr.bf16.mxu1 %v21806_v35 }
 0xb5d   :  { %16945 = vmatpush1.bf16.msra.mxu0 %v21805_v30  ;;  %17137 = vmatpush1.bf16.msra.mxu1 %v21808_v59 }
 0xb5e   :  { %16947 = vmatprep.subr.bf16.mxu0 %v21807_v41  ;;  %17139 = vmatprep.subr.bf16.mxu1 %v21810_v10 }
 0xb61   :  { %16949 = vmatpush1.bf16.msra.mxu0 %v21809_v27  ;;  %17141 = vmatpush1.bf16.msra.mxu1 %v21812_v42 }
 0xb62   :  { %16951 = vmatprep.subr.bf16.mxu0 %v21811_v36  ;;  %17143 = vmatprep.subr.bf16.mxu1 %v22341_v5 }
 0xb65   :  { %16953 = vmatpush1.bf16.msra.mxu0 %v22342_v61  ;;  %17145 = vmatpush1.bf16.msra.mxu1 %v22343_v8 }
 0xb66   :  { %16955 = vmatprep.subr.bf16.mxu0 %v22344_v31  ;;  %17147 = vmatprep.subr.bf16.mxu1 %v22345_v6  ;;  %v10678_v6 = vld [vmem:[#allocation4 + $0xd0] sm:$0xff]  ;;  %v10679_v31 = vld [vmem:[#allocation4 + $0xd8] sm:$0xff] }
 0xb69   :  { %16957 = vmatpush1.bf16.msra.mxu0 %v22346_v49  ;;  %17149 = vmatpush1.bf16.msra.mxu1 %v22347_v15 }
 0xb6a   :  { %16959 = vmatprep.subr.bf16.mxu0 %v22380_v46  ;;  %17151 = vmatprep.subr.bf16.mxu1 %v22381_v33 }
 0xc1f   :  { %v11530_v4 = vpop.f32.mrb[12].mxu0  ;;  %v12385_v18 = vpop.f32.mrb[12].mxu1 }
 0xc20   :  { %v12390_v23 = vadd.f32 %v11530_v4, %v10676_v57  ;;  %v11532_v12 = vpop.f32.mrb[13].mxu0  ;;  %v12387_v2 = vpop.f32.mrb[13].mxu1  ;;  %v12392_v49 = vadd.f32 %v12385_v18, %v10678_v6 }
 0xc21   :  { %v12391_v62 = vadd.f32 %v11532_v12, %v10677_v51  ;;  %v12393_v46 = vadd.f32 %v12387_v2, %v10679_v31  ;;  %v12421_v6 = vpop.permute.xlu0 %12420 }
 0xc22   :  { %v14231_v19 = vmul.f32 -1.442695, %v12390_v23  ;;  %v14233_v15 = vmul.f32 -1.442695, %v12392_v49 }
 0xc23   :  { %v14232_v21 = vmul.f32 -1.442695, %v12391_v62 }
 0xc24   :  { %17577 = vpow2.f32 %v14231_v19 }
 0xc25   :  { %17579 = vpow2.f32 %v14232_v21 }
 0xc26   :  { %17581 = vpow2.f32 %v14233_v15 }
 0xc2e   :  { %v17578_v8 = vpop.eup %17577 }
 0xc2f   :  { %v12397_v61 = vadd.f32 1.0, %v17578_v8  ;;  %v17580_v33 = vpop.eup %17579 }
 0xc30   :  { %v12403_v5 = vadd.f32 1.0, %v17580_v33  ;;  %v17582_v4 = vpop.eup %17581  ;;  %v22400_v33 = vld [vmem:[#allocation106_spill] sm:$0xff] }
 0xc31   :  { %17583 = vrcp.f32 %v12397_v61  ;;  %v12409_v62 = vadd.f32 1.0, %v17582_v4  ;;  %v22401_v4 = vld [vmem:[#allocation107_spill] sm:$0xff] }
 0xc32   :  { %17585 = vtanh.f32 %v12393_v46 }
 0xc33   :  { %17587 = vrcp.f32 %v12403_v5 }
 0xc34   :  { %17589 = vrcp.f32 %v12409_v62  ;;  %v22406_v62 = vld [vmem:[#allocation115_spill] sm:$0xff] }
 0xc3b   :  { %v17584_v57 = vpop.eup %17583 }
 0xc3c   :  { %v17586_v12 = vpop.eup %17585  ;;  %v12413_v23 = vmul.f32 %v17584_v57, %v20517_v47  ;;  %v22402_v57 = vld [vmem:[#allocation108_spill] sm:$0xff] }
 0xc3d   :  { %v17588_v51 = vpop.eup %17587 }
 0xc3e   :  { %v12414_v19 = vmul.f32 %v17588_v51, %v17586_v12  ;;  %v17590_v15 = vpop.eup %17589  ;;  %v22403_v12 = vld [vmem:[#allocation109_spill] sm:$0xff]  ;;  %v22405_v51 = vld [vmem:[#allocation112_spill] sm:$0xff] }
 0xc40   :  { %v12415_v18 = vadd.f32 %v12414_v19, %v12413_v23  ;;  %v22404_v23 = vld [vmem:[#allocation110_spill] sm:$0xff]  ;;  %v22407_v19 = vld [vmem:[#allocation116_spill] sm:$0xff] }
 0xc42   :  { %17591 = vtanh.f32 %v12415_v18  ;;  %v20745_v49 = vmul.f32 %v12421_v6, %v12415_v18  ;;  %v22408_v18 = vld [vmem:[#allocation117_spill] sm:$0xff] }
 0xc44   :  { %12427 = vst [vmem:[#allocation9 + $0x68] sm:$0xff] %v20745_v49 }
 0xc4c   :  { %v17592_v2 = vpop.eup %17591 }
 0xc4d   :  { %v12417_v61 = vmul.f32 %v17592_v2, %v17590_v15  ;;  %v22410_v15 = vld [vmem:[#allocation118_spill] sm:$0xff]  ;;  %v22411_v2 = vld [vmem:[#allocation129_spill] sm:$0xff] }
 0xc4f   :  { %v12423_v31 = vmul.f32 %v12421_v6, %v12417_v61  ;;  %v22409_v6 = vld [vmem:[#allocation127_spill] sm:$0xff]  ;;  %v22412_v61 = vld [vmem:[#allocation128_spill] sm:$0xff] }
 0xc51   :  { %12426 = vst [vmem:[#allocation9 + $0x60] sm:$0xff] %v12423_v31  ;;  %v20748_v8 = vand.u32 4294901760, %v12423_v31 }
 0xc53   :  { %v20751_v47 = vsub.f32 %v12423_v31, %v20748_v8  ;;  %v22413_v31 = vld [vmem:[#allocation131_spill] sm:$0xff] }
 0xc55   :  { %v20754_v5 = vand.u32 4294901760, %v20751_v47 }
 0xc57   :  { %v12538_v21 = vsub.f32 %v20751_v47, %v20754_v5 }
 0xc59   :  { %v12539_v46 = vand.u32 4294901760, %v12538_v21  ;;  %v22414_v21 = vld [vmem:[#allocation130_spill] sm:$0xff] }
 0xc5b   :  { %12540 = vmatmul.mubr.f32.vlgmr.msra.gmra.mrb[14].mxu0 %v12539_v46  ;;  %13395 = vmatmul.mubr.f32.vlgmr.msra.gmra.mrb[14].mxu1 %v12539_v46  ;;  %v22415_v46 = vld [vmem:[#allocation133_spill] sm:$0xff] }
 0xc5c   :  { %16961 = vmatpush1.bf16.msra.mxu0 %v21873_v26  ;;  %17153 = vmatpush1.bf16.msra.mxu1 %v21874_v34  ;;  %v22382_v26 = vld [vmem:[#allocation42_spill] sm:$0xff]  ;;  %v22383_v34 = vld [vmem:[#allocation43_spill] sm:$0xff] }
 0xc5d   :  { %16963 = vmatprep.subr.bf16.mxu0 %v21875_v52  ;;  %17155 = vmatprep.subr.bf16.mxu1 %v21876_v44  ;;  %v22384_v52 = vld [vmem:[#allocation48_spill] sm:$0xff] }
 0xc5e   :  { %12770 = vmatprep.mubr.f32.mxu0 %v21539_v1  ;;  %13625 = vmatprep.mubr.f32.mxu1 %v21539_v1  ;;  %v22385_v44 = vld [vmem:[#allocation96_spill] sm:$0xff] }
 0xc60   :  { %16965 = vmatpush1.bf16.msra.mxu0 %v21957_v9  ;;  %17157 = vmatpush1.bf16.msra.mxu1 %v21958_v37  ;;  %v22386_v9 = vld [vmem:[#allocation97_spill] sm:$0xff]  ;;  %v22387_v37 = vld [vmem:[#allocation51_spill] sm:$0xff] }
 0xc61   :  { %16967 = vmatprep.subr.bf16.mxu0 %v21959_v53  ;;  %17159 = vmatprep.subr.bf16.mxu1 %v21960_v63  ;;  %v22388_v53 = vld [vmem:[#allocation99_spill] sm:$0xff] }
 0xc62   :  { %v22389_v63 = vld [vmem:[#allocation55_spill] sm:$0xff] }
 0xc64   :  { %16969 = vmatpush1.bf16.msra.mxu0 %v21961_v16  ;;  %17161 = vmatpush1.bf16.msra.mxu1 %v22042_v11  ;;  %v22390_v16 = vld [vmem:[#allocation100_spill] sm:$0xff]  ;;  %v22393_v11 = vld [vmem:[#allocation65_spill] sm:$0xff] }
 0xc65   :  { %16971 = vmatprep.subr.bf16.mxu0 %v21963_v32  ;;  %17163 = vmatprep.subr.bf16.mxu1 %v21964_v14  ;;  %v22391_v32 = vld [vmem:[#allocation101_spill] sm:$0xff]  ;;  %v22392_v14 = vld [vmem:[#allocation104_spill] sm:$0xff] }
 0xc68   :  { %16973 = vmatpush1.bf16.msra.mxu0 %v22043_v25  ;;  %17165 = vmatpush1.bf16.msra.mxu1 %v22044_v45  ;;  %v22394_v25 = vld [vmem:[#allocation102_spill] sm:$0xff]  ;;  %v22395_v45 = vld [vmem:[#allocation63_spill] sm:$0xff] }
 0xc69   :  { %16975 = vmatprep.subr.bf16.mxu0 %v22045_v39  ;;  %17167 = vmatprep.subr.bf16.mxu1 %v22046_v58  ;;  %v22396_v39 = vld [vmem:[#allocation111_spill] sm:$0xff]  ;;  %v22397_v58 = vld [vmem:[#allocation113_spill] sm:$0xff] }
 0xc6c   :  { %16977 = vmatpush1.bf16.msra.mxu0 %v22047_v13  ;;  %17169 = vmatpush1.bf16.msra.mxu1 %v22048_v0  ;;  %v22398_v13 = vld [vmem:[#allocation103_spill] sm:$0xff]  ;;  %v22399_v0 = vld [vmem:[#allocation105_spill] sm:$0xff] }
 0xc6d   :  { %16979 = vmatprep.subr.bf16.mxu0 %v22382_v26  ;;  %17171 = vmatprep.subr.bf16.mxu1 %v22383_v34  ;;  %v22416_v26 = vld [vmem:[#allocation132_spill] sm:$0xff]  ;;  %v22417_v34 = vld [vmem:[#allocation135_spill] sm:$0xff] }
 0xc70   :  { %16981 = vmatpush1.bf16.msra.mxu0 %v22384_v52  ;;  %17173 = vmatpush1.bf16.msra.mxu1 %v22385_v44  ;;  %v22418_v52 = vld [vmem:[#allocation134_spill] sm:$0xff]  ;;  %v22419_v44 = vld [vmem:[#allocation137_spill] sm:$0xff] }
 0xc71   :  { %16983 = vmatprep.subr.bf16.mxu0 %v22386_v9  ;;  %17175 = vmatprep.subr.bf16.mxu1 %v22387_v37  ;;  %v22420_v9 = vld [vmem:[#allocation136_spill] sm:$0xff]  ;;  %v22421_v37 = vld [vmem:[#allocation139_spill] sm:$0xff] }
 0xc74   :  { %16985 = vmatpush1.bf16.msra.mxu0 %v22388_v53  ;;  %17177 = vmatpush1.bf16.msra.mxu1 %v22389_v63  ;;  %v22422_v53 = vld [vmem:[#allocation138_spill] sm:$0xff]  ;;  %v22423_v63 = vld [vmem:[#allocation141_spill] sm:$0xff] }
 0xc75   :  { %16987 = vmatprep.subr.bf16.mxu0 %v22390_v16  ;;  %17179 = vmatprep.subr.bf16.mxu1 %v22391_v32  ;;  %v22424_v16 = vld [vmem:[#allocation140_spill] sm:$0xff]  ;;  %v22425_v32 = vld [vmem:[#allocation114_spill] sm:$0xff] }
 0xc78   :  { %16989 = vmatpush1.bf16.msra.mxu0 %v22392_v14  ;;  %17181 = vmatpush1.bf16.msra.mxu1 %v22393_v11  ;;  %v22427_v14 = vld [vmem:[#allocation58_spill] sm:$0xff]  ;;  %v22428_v11 = vld [vmem:[#allocation59_spill] sm:$0xff] }
 0xc79   :  { %16991 = vmatprep.subr.bf16.mxu0 %v22394_v25  ;;  %17183 = vmatprep.subr.bf16.mxu1 %v22395_v45  ;;  %v22429_v25 = vld [vmem:[#allocation60_spill] sm:$0xff]  ;;  %v22430_v45 = vld [vmem:[#allocation61_spill] sm:$0xff] }
 0xc7b   :  { %12772 = vmatmul.mubr.f32.vlgmr.msra.gmra.mrb[14].mxu0 %v20748_v8  ;;  %13627 = vmatmul.mubr.f32.vlgmr.msra.gmra.mrb[14].mxu1 %v20748_v8 }
 0xc7c   :  { %16993 = vmatpush1.bf16.msra.mxu0 %v22396_v39  ;;  %17185 = vmatpush1.bf16.msra.mxu1 %v22397_v58  ;;  %v22431_v39 = vld [vmem:[#allocation62_spill] sm:$0xff]  ;;  %v22432_v58 = vld [vmem:[#allocation64_spill] sm:$0xff] }
 0xc7d   :  { %16995 = vmatprep.subr.bf16.mxu0 %v22398_v13  ;;  %17187 = vmatprep.subr.bf16.mxu1 %v22399_v0  ;;  %v22433_v13 = vld [vmem:[#allocation13_spill] sm:$0xff]  ;;  %v22434_v0 = vld [vmem:[#allocation15_spill] sm:$0xff] }
 0xc7e   :  { %12906 = vmatprep.mubr.f32.mxu0 %v21539_v1  ;;  %13761 = vmatprep.mubr.f32.mxu1 %v21539_v1 }
 0xc80   :  { %16997 = vmatpush1.bf16.msra.mxu0 %v22400_v33  ;;  %17189 = vmatpush1.bf16.msra.mxu1 %v22401_v4  ;;  %v22435_v33 = vld [vmem:[#allocation67_spill] sm:$0xff]  ;;  %v22436_v4 = vld [vmem:[#allocation17_spill] sm:$0xff] }
 0xc81   :  { %16999 = vmatprep.subr.bf16.mxu0 %v22402_v57  ;;  %17191 = vmatprep.subr.bf16.mxu1 %v22403_v12  ;;  %v22437_v57 = vld [vmem:[#allocation14_spill] sm:$0xff]  ;;  %v22438_v12 = vld [vmem:[#allocation19_spill] sm:$0xff] }
 0xc84   :  { %17001 = vmatpush1.bf16.msra.mxu0 %v22404_v23  ;;  %17193 = vmatpush1.bf16.msra.mxu1 %v22405_v51  ;;  %v22439_v23 = vld [vmem:[#allocation16_spill] sm:$0xff]  ;;  %v22440_v51 = vld [vmem:[#allocation18_spill] sm:$0xff] }
 0xc85   :  { %17003 = vmatprep.subr.bf16.mxu0 %v22406_v62  ;;  %17195 = vmatprep.subr.bf16.mxu1 %v22407_v19  ;;  %v22441_v62 = vld [vmem:[#allocation119_spill] sm:$0xff]  ;;  %v22442_v19 = vld [vmem:[#allocation120_spill] sm:$0xff] }
 0xc88   :  { %17005 = vmatpush1.bf16.msra.mxu0 %v22408_v18  ;;  %17197 = vmatpush1.bf16.msra.mxu1 %v22409_v6  ;;  %v22444_v18 = vld [vmem:[#allocation122_spill] sm:$0xff]  ;;  %v22445_v6 = vld [vmem:[#allocation123_spill] sm:$0xff] }
 0xc89   :  { %17007 = vmatprep.subr.bf16.mxu0 %v22410_v15  ;;  %17199 = vmatprep.subr.bf16.mxu1 %v22411_v2  ;;  %v22446_v15 = vld [vmem:[#allocation124_spill] sm:$0xff]  ;;  %v22447_v2 = vld [vmem:[#allocation125_spill] sm:$0xff] }
 0xc8c   :  { %17009 = vmatpush1.bf16.msra.mxu0 %v22412_v61  ;;  %17201 = vmatpush1.bf16.msra.mxu1 %v22413_v31  ;;  %v22448_v61 = vld [vmem:[#allocation86_spill] sm:$0xff]  ;;  %v22449_v31 = vld [vmem:[#allocation88_spill] sm:$0xff] }
 0xc8d   :  { %17011 = vmatprep.subr.bf16.mxu0 %v22414_v21  ;;  %17203 = vmatprep.subr.bf16.mxu1 %v22415_v46  ;;  %v22450_v21 = vld [vmem:[#allocation25_spill] sm:$0xff]  ;;  %v22451_v46 = vld [vmem:[#allocation26_spill] sm:$0xff] }
 0xc90   :  { %17013 = vmatpush1.bf16.msra.mxu0 %v22416_v26  ;;  %17205 = vmatpush1.bf16.msra.mxu1 %v22417_v34  ;;  %v22452_v26 = vld [vmem:[#allocation28_spill] sm:$0xff]  ;;  %v22453_v34 = vld [vmem:[#allocation29_spill] sm:$0xff] }
 0xc91   :  { %17015 = vmatprep.subr.bf16.mxu0 %v22418_v52  ;;  %17207 = vmatprep.subr.bf16.mxu1 %v22419_v44  ;;  %v22454_v52 = vld [vmem:[#allocation30_spill] sm:$0xff]  ;;  %v22455_v44 = vld [vmem:[#allocation33_spill] sm:$0xff] }
 0xc94   :  { %17017 = vmatpush1.bf16.msra.mxu0 %v22420_v9  ;;  %17209 = vmatpush1.bf16.msra.mxu1 %v22421_v37  ;;  %v22456_v9 = vld [vmem:[#allocation34_spill] sm:$0xff]  ;;  %v22457_v37 = vld [vmem:[#allocation35_spill] sm:$0xff] }
 0xc95   :  { %17019 = vmatprep.subr.bf16.mxu0 %v22422_v53  ;;  %17211 = vmatprep.subr.bf16.mxu1 %v22423_v63  ;;  %v22458_v53 = vld [vmem:[#allocation37_spill] sm:$0xff]  ;;  %v22459_v63 = vld [vmem:[#allocation39_spill] sm:$0xff] }
 0xc98   :  { %17021 = vmatpush1.bf16.msra.mxu0 %v22424_v16  ;;  %17213 = vmatpush1.bf16.msra.mxu1 %v22425_v32  ;;  %v22460_v16 = vld [vmem:[#allocation46_spill] sm:$0xff]  ;;  %v22461_v32 = vld [vmem:[#allocation95_spill] sm:$0xff] }
 0xc99   :  { %17023 = vmatprep.subr.bf16.mxu0 %v21787_v7  ;;  %17215 = vmatprep.subr.bf16.mxu1 %v21790_v54 }
 0xc9b   :  { %12909 = vmatmul.mubr.f32.vlgmr.msra.gmra.mrb[14].mxu0 %v20751_v47  ;;  %13764 = vmatmul.mubr.f32.vlgmr.msra.gmra.mrb[14].mxu1 %v20751_v47  ;;  %v22426_v47 = vld [vmem:[#allocation57_spill] sm:$0xff] }
 0xc9c   :  { %17025 = vmatpush1.bf16.msra.mxu0 %v21789_v28  ;;  %17217 = vmatpush1.bf16.msra.mxu1 %v21792_v48 }
 0xc9d   :  { %17027 = vmatprep.subr.bf16.mxu0 %v21791_v3  ;;  %17219 = vmatprep.subr.bf16.mxu1 %v21794_v20 }
 0xc9e   :  { %13011 = vmatprep.mubr.f32.mxu0 %v21539_v1  ;;  %13866 = vmatprep.mubr.f32.mxu1 %v21539_v1 }
 0xca0   :  { %17029 = vmatpush1.bf16.msra.mxu0 %v21793_v38  ;;  %17221 = vmatpush1.bf16.msra.mxu1 %v21796_v29 }
 0xca1   :  { %17031 = vmatprep.subr.bf16.mxu0 %v21795_v60  ;;  %17223 = vmatprep.subr.bf16.mxu1 %v21798_v50 }
 0xca4   :  { %17033 = vmatpush1.bf16.msra.mxu0 %v21797_v24  ;;  %17225 = vmatpush1.bf16.msra.mxu1 %v21800_v55 }
 0xca5   :  { %17035 = vmatprep.subr.bf16.mxu0 %v21799_v17  ;;  %17227 = vmatprep.subr.bf16.mxu1 %v21802_v22 }
 0xca8   :  { %17037 = vmatpush1.bf16.msra.mxu0 %v21801_v40  ;;  %17229 = vmatpush1.bf16.msra.mxu1 %v21804_v43 }
 0xca9   :  { %17039 = vmatprep.subr.bf16.mxu0 %v21803_v56  ;;  %17231 = vmatprep.subr.bf16.mxu1 %v21806_v35 }
 0xcac   :  { %17041 = vmatpush1.bf16.msra.mxu0 %v21805_v30  ;;  %17233 = vmatpush1.bf16.msra.mxu1 %v21808_v59 }
 0xcad   :  { %17043 = vmatprep.subr.bf16.mxu0 %v21807_v41  ;;  %17235 = vmatprep.subr.bf16.mxu1 %v21810_v10 }
 0xcb0   :  { %17045 = vmatpush1.bf16.msra.mxu0 %v21809_v27  ;;  %17237 = vmatpush1.bf16.msra.mxu1 %v21812_v42 }
 0xcb1   :  { %17047 = vmatprep.subr.bf16.mxu0 %v21811_v36  ;;  %17239 = vmatprep.subr.bf16.mxu1 %v22426_v47 }
 0xcb4   :  { %17049 = vmatpush1.bf16.msra.mxu0 %v22427_v14  ;;  %17241 = vmatpush1.bf16.msra.mxu1 %v22428_v11 }
 0xcb5   :  { %17051 = vmatprep.subr.bf16.mxu0 %v22429_v25  ;;  %17243 = vmatprep.subr.bf16.mxu1 %v22430_v45 }
 0xcb8   :  { %17053 = vmatpush1.bf16.msra.mxu0 %v22431_v39  ;;  %17245 = vmatpush1.bf16.msra.mxu1 %v22432_v58 }
 0xcb9   :  { %17055 = vmatprep.subr.bf16.mxu0 %v22433_v13  ;;  %17247 = vmatprep.subr.bf16.mxu1 %v22434_v0  ;;  %v22462_v13 = vld [vmem:[#allocation49_spill] sm:$0xff]  ;;  %v22463_v0 = vld [vmem:[#allocation98_spill] sm:$0xff] }
 0xcbb   :  { %13015 = vmatmul.mubr.f32.vlgmr.msra.gmra.mrb[14].mxu0 %v20754_v5  ;;  %13870 = vmatmul.mubr.f32.vlgmr.msra.gmra.mrb[14].mxu1 %v20754_v5  ;;  %v22443_v5 = vld [vmem:[#allocation121_spill] sm:$0xff] }
 0xcbc   :  { %17057 = vmatpush1.bf16.msra.mxu0 %v22435_v33  ;;  %17249 = vmatpush1.bf16.msra.mxu1 %v22436_v4  ;;  %v22464_v33 = vld [vmem:[#allocation126_spill] sm:$0xff] }
 0xcbd   :  { %17059 = vmatprep.subr.bf16.mxu0 %v22437_v57  ;;  %17251 = vmatprep.subr.bf16.mxu1 %v22438_v12 }
 0xcbe   :  { %13181 = vmatprep.mubr.f32.mxu0 %v21539_v1  ;;  %14036 = vmatprep.mubr.f32.mxu1 %v21539_v1 }
 0xcc0   :  { %17061 = vmatpush1.bf16.msra.mxu0 %v22439_v23  ;;  %17253 = vmatpush1.bf16.msra.mxu1 %v22440_v51 }
 0xcc1   :  { %17063 = vmatprep.subr.bf16.mxu0 %v22441_v62  ;;  %17255 = vmatprep.subr.bf16.mxu1 %v22442_v19 }
 0xcc4   :  { %17065 = vmatpush1.bf16.msra.mxu0 %v22443_v5  ;;  %17257 = vmatpush1.bf16.msra.mxu1 %v22444_v18 }
 0xcc5   :  { %17067 = vmatprep.subr.bf16.mxu0 %v22445_v6  ;;  %17259 = vmatprep.subr.bf16.mxu1 %v22446_v15 }
 0xcc8   :  { %17069 = vmatpush1.bf16.msra.mxu0 %v22447_v2  ;;  %17261 = vmatpush1.bf16.msra.mxu1 %v22448_v61 }
 0xcc9   :  { %17071 = vmatprep.subr.bf16.mxu0 %v22449_v31  ;;  %17263 = vmatprep.subr.bf16.mxu1 %v22450_v21 }
 0xccc   :  { %17073 = vmatpush1.bf16.msra.mxu0 %v22451_v46  ;;  %17265 = vmatpush1.bf16.msra.mxu1 %v22452_v26 }
 0xccd   :  { %17075 = vmatprep.subr.bf16.mxu0 %v22453_v34  ;;  %17267 = vmatprep.subr.bf16.mxu1 %v22454_v52 }
 0xcd0   :  { %17077 = vmatpush1.bf16.msra.mxu0 %v22455_v44  ;;  %17269 = vmatpush1.bf16.msra.mxu1 %v22456_v9 }
 0xcd1   :  { %17079 = vmatprep.subr.bf16.mxu0 %v22457_v37  ;;  %17271 = vmatprep.subr.bf16.mxu1 %v22458_v53 }
 0xcd4   :  { %17081 = vmatpush1.bf16.msra.mxu0 %v22459_v63  ;;  %17273 = vmatpush1.bf16.msra.mxu1 %v22460_v16 }
 0xcd5   :  { %17083 = vmatprep.subr.bf16.mxu0 %v22461_v32  ;;  %17275 = vmatprep.subr.bf16.mxu1 %v22462_v13 }
 0xcd8   :  { %17085 = vmatpush1.bf16.msra.mxu0 %v22463_v0  ;;  %17277 = vmatpush1.bf16.msra.mxu1 %v22464_v33 }
 0xcd9   :  { %17087 = vmatprep.subr.bf16.mxu0 %v21787_v7  ;;  %17279 = vmatprep.subr.bf16.mxu1 %v21790_v54  ;;  %v12435_v7 = vld [vmem:[#allocation4 + $0xe8] sm:$0xff] }
 0xcdb   :  { %13183 = vmatmul.mubr.f32.vlgmr.msra.gmra.mrb[14].mxu0 %v20748_v8  ;;  %14038 = vmatmul.mubr.f32.vlgmr.msra.gmra.mrb[14].mxu1 %v20748_v8 }
 0xcdc   :  { %17089 = vmatpush1.bf16.msra.mxu0 %v21789_v28  ;;  %17281 = vmatpush1.bf16.msra.mxu1 %v21792_v48 }
 0xcdd   :  { %17091 = vmatprep.subr.bf16.mxu0 %v21791_v3  ;;  %17283 = vmatprep.subr.bf16.mxu1 %v21794_v20 }
 0xcde   :  { %13285 = vmatprep.mubr.f32.mxu0 %v21539_v1  ;;  %14140 = vmatprep.mubr.f32.mxu1 %v21539_v1  ;;  %v12434_v1 = vld [vmem:[#allocation4 + $0xe0] sm:$0xff] }
 0xce0   :  { %17093 = vmatpush1.bf16.msra.mxu0 %v21793_v38  ;;  %17285 = vmatpush1.bf16.msra.mxu1 %v21796_v29 }
 0xce1   :  { %17095 = vmatprep.subr.bf16.mxu0 %v21795_v60  ;;  %17287 = vmatprep.subr.bf16.mxu1 %v21798_v50 }
 0xce4   :  { %17097 = vmatpush1.bf16.msra.mxu0 %v21797_v24  ;;  %17289 = vmatpush1.bf16.msra.mxu1 %v21800_v55  ;;  %v12436_v24 = vld [vmem:[#allocation4 + $0xf0] sm:$0xff] }
 0xce5   :  { %17099 = vmatprep.subr.bf16.mxu0 %v21799_v17  ;;  %17291 = vmatprep.subr.bf16.mxu1 %v21802_v22  ;;  %v12437_v17 = vld [vmem:[#allocation4 + $0xf8] sm:$0xff] }
 0xce8   :  { %17101 = vmatpush1.bf16.msra.mxu0 %v21801_v40  ;;  %17293 = vmatpush1.bf16.msra.mxu1 %v21804_v43 }
 0xce9   :  { %17103 = vmatprep.subr.bf16.mxu0 %v21803_v56  ;;  %17295 = vmatprep.subr.bf16.mxu1 %v21806_v35 }
 0xcec   :  { %17105 = vmatpush1.bf16.msra.mxu0 %v21805_v30  ;;  %17297 = vmatpush1.bf16.msra.mxu1 %v21808_v59 }
 0xced   :  { %17107 = vmatprep.subr.bf16.mxu0 %v21807_v41  ;;  %17299 = vmatprep.subr.bf16.mxu1 %v21810_v10 }
 0xcf0   :  { %17109 = vmatpush1.bf16.msra.mxu0 %v21809_v27  ;;  %17301 = vmatpush1.bf16.msra.mxu1 %v21812_v42 }
 0xcf1   :  { %17111 = vmatprep.subr.bf16.mxu0 %v21811_v36  ;;  %17303 = vmatprep.subr.bf16.mxu1 %v22426_v47  ;;  %v14179_v47 = vpop.permute.xlu1 %14178 }
 0xcf4   :  { %17113 = vmatpush1.bf16.msra.mxu0 %v22427_v14  ;;  %17305 = vmatpush1.bf16.msra.mxu1 %v22428_v11 }
 0xcf5   :  { %17115 = vmatprep.subr.bf16.mxu0 %v22429_v25  ;;  %17307 = vmatprep.subr.bf16.mxu1 %v22430_v45 }
 0xcf8   :  { %17117 = vmatpush1.bf16.msra.mxu0 %v22431_v39  ;;  %17309 = vmatpush1.bf16.msra.mxu1 %v22432_v58 }
 0xcfb   :  { %13287 = vmatmul.mubr.f32.vlgmr.msra.gmra.mrb[14].mxu0 %v20748_v8  ;;  %14142 = vmatmul.mubr.f32.vlgmr.msra.gmra.mrb[14].mxu1 %v20748_v8 }
 0xdce   :  { %v13288_v28 = vpop.f32.mrb[14].mxu0  ;;  %v14143_v54 = vpop.f32.mrb[14].mxu1 }
 0xdcf   :  { %v14148_v3 = vadd.f32 %v13288_v28, %v12434_v1  ;;  %v13290_v48 = vpop.f32.mrb[15].mxu0  ;;  %v14145_v38 = vpop.f32.mrb[15].mxu1  ;;  %v14150_v50 = vadd.f32 %v14143_v54, %v12436_v24 }
 0xdd0   :  { %v14149_v20 = vadd.f32 %v13290_v48, %v12435_v7  ;;  %v14151_v22 = vadd.f32 %v14145_v38, %v12437_v17 }
 0xdd1   :  { %v14235_v60 = vmul.f32 -1.442695, %v14148_v3  ;;  %v14237_v55 = vmul.f32 -1.442695, %v14150_v50 }
 0xdd2   :  { %v14236_v29 = vmul.f32 -1.442695, %v14149_v20 }
 0xdd3   :  { %17593 = vpow2.f32 %v14235_v60 }
 0xdd4   :  { %17595 = vpow2.f32 %v14236_v29 }
 0xdd5   :  { %17597 = vpow2.f32 %v14237_v55 }
 0xddd   :  { %v17594_v40 = vpop.eup %17593 }
 0xdde   :  { %v14155_v56 = vadd.f32 1.0, %v17594_v40  ;;  %v17596_v43 = vpop.eup %17595 }
 0xddf   :  { %v14161_v30 = vadd.f32 1.0, %v17596_v43  ;;  %v17598_v35 = vpop.eup %17597 }
 0xde0   :  { %17599 = vrcp.f32 %v14155_v56  ;;  %v14167_v36 = vadd.f32 1.0, %v17598_v35 }
 0xde1   :  { %17601 = vtanh.f32 %v14151_v22 }
 0xde2   :  { %17603 = vrcp.f32 %v14161_v30 }
 0xde3   :  { %17605 = vrcp.f32 %v14167_v36 }
 0xdea   :  { %v17600_v41 = vpop.eup %17599 }
 0xdeb   :  { %v17602_v59 = vpop.eup %17601  ;;  %v14171_v27 = vmul.f32 %v17600_v41, %v20745_v49 }
 0xdec   :  { %v17604_v10 = vpop.eup %17603 }
 0xded   :  { %v14172_v42 = vmul.f32 %v17604_v10, %v17602_v59  ;;  %v17606_v11 = vpop.eup %17605 }
 0xdef   :  { %v14173_v8 = vadd.f32 %v14172_v42, %v14171_v27 }
 0xdf1   :  { %17607 = vtanh.f32 %v14173_v8  ;;  %v14182_v14 = vmul.f32 %v14179_v47, %v14173_v8 }
 0xdf3   :  { %14185 = vst [vmem:[#allocation9 + $0x78] sm:$0xff] %v14182_v14 }
 0xdfb   :  { %v17608_v25 = vpop.eup %17607 }
 0xdfc   :  { %v14175_v45 = vmul.f32 %v17608_v25, %v17606_v11 }
 0xdfe   :  { %v14181_v39 = vmul.f32 %v14179_v47, %v14175_v45 }
 0xe00   :  { %14184 = vst [vmem:[#allocation9 + $0x70] sm:$0xff] %v14181_v39 }
 0xe01   :  { %17665 = shalt.err (!%p17662_p6)
}
 0xe02   :  { %s17666_s27 = scalar_lea.hbm %s20954_s5, 2048 }
 0xe03   :  { %p17667_p7 = scmp.ne.s32.totalorder %s20954_s5, %s17666_s27  ;;  %p17670_p8 = scmp.lt.u32.totalorder %s17666_s27, %s20954_s5 }
 0xe05   :  { %p17672_p9 = pnand %p17670_p8, %p17667_p7 }
 0xe07   :  { %17675 = shalt.err (!%p17672_p9)
}
 0xe08   :  { %s17689_s7 = smov 256   ;;  %s17690_s8 = smov 16  }
 0xe09   :  { %14199 = dma.vmem_to_hbm [thread:$0]  %s14194_s23, 2048, %s20954_s5, [#allocation6], %s17689_s7, %s17689_s7, %s17690_s8  }
 0xe0a   :  { %17680 = dma.done.wait [#allocation6], 2048  }
 0xe0b   :  { %17681 = vsyncadd [#allocation6], 4294965248 }
 0xe0c   :  { %14203 = vsyncpa [#allocation5], 1 }
 0xe0d   :  { %14204 = vsyncpa [#allocation8], 1 }
 0xe0e   :  { %14205 = vsyncpa [#allocation6], 1 }

</bundles_post_ra>
